<compile_context>
chip_gen: v7x
topology: tpu7x:2x2x1
jax: 0.10.0
libtpu: 0.0.40
codegen_flags: <defaults>
</compile_context>

<pallas_src>
import jax
import jax.numpy as jnp
import numpy as np
from jax.experimental import pallas as pl
from jax.experimental.pallas import tpu as pltpu

CHANNELS = 1
IMG_SIZE = 28
IMG_SHAPE = (CHANNELS, IMG_SIZE, IMG_SIZE)
IMG_PIXELS = int(np.prod(IMG_SHAPE))          # 784
LATENT_DIM = 100
N_CLASSES = 10

NOISE_PAD = 128                               # 100 -> 128 (lane aligned)
N_CLASSES_PAD = 128                           # one-hot width (lane aligned)
OUT_DIM_PAD = 896                             # 784 -> 7 * 128

HIDDEN = (256, 512, 1024)
TM_MAX = 512                                  # batch tile (review: 256 -> 512)


def _round_up(x, m):
    return ((x + m - 1) // m) * m


def _leaky_relu_bf16(x_f32, slope=0.2):
    # bf16 leaky-ReLU: halves VALU/vreg traffic on v6e/v7x; on v5e (no bf16
    # VALU) this is emulated but the MXU/DMA dominate there anyway.
    x = x_f32.astype(jnp.bfloat16)
    return jnp.where(x > 0, x, x * jnp.array(slope, dtype=jnp.bfloat16))


# --------------------------------------------------------------------------
# Kernel: whole 4-layer MLP (embedding folded in) for one batch tile.
#   lbl_ref : (TM, 1)    int32   class ids
#   x_ref   : (TM, 128)  f32     zero-padded noise
#   wlb_ref : (128, 256) bf16    rows 0..9 = emb @ W1[:10] + b1, rest zero
#   w1n_ref : (128, 256) bf16    rows 0..99 = W1[10:110], rest zero
#   w2/w3/w4: bf16 weights ; b2/b3/b4: (1, out) f32 biases
#   o_ref   : (TM, 896)  bf16    padded tanh output
# --------------------------------------------------------------------------
def generator_mlp_kernel(lbl_ref, x_ref, wlb_ref, w1n_ref,
                         w2_ref, b2_ref, w3_ref, b3_ref, w4_ref, b4_ref,
                         o_ref):
    tm = x_ref.shape[0]

    # Layer 1, label path: one_hot(label) @ (emb @ W1[:10] + b1)
    # == label_emb(label) @ W1[:10] + b1   (bias folded; exactly one hot row).
    lbl = lbl_ref[...]                                              # (tm, 1)
    cls = jax.lax.broadcasted_iota(jnp.int32, (tm, N_CLASSES_PAD), 1)
    onehot = (lbl == cls).astype(jnp.bfloat16)                      # (tm, 128)
    h = jnp.dot(onehot, wlb_ref[...], preferred_element_type=jnp.float32)

    # Layer 1, noise path (padded cols 100..127 are zero in both operands).
    h = h + jnp.dot(x_ref[...].astype(jnp.bfloat16), w1n_ref[...],
                    preferred_element_type=jnp.float32)
    h = _leaky_relu_bf16(h)

    h = jnp.dot(h, w2_ref[...], preferred_element_type=jnp.float32) + b2_ref[...]
    h = _leaky_relu_bf16(h)

    h = jnp.dot(h, w3_ref[...], preferred_element_type=jnp.float32) + b3_ref[...]
    h = _leaky_relu_bf16(h)

    h = jnp.dot(h, w4_ref[...], preferred_element_type=jnp.float32) + b4_ref[...]
    # tanh in f32 (EUP), store bf16 -> halves output HBM writeback.
    o_ref[...] = jnp.tanh(h).astype(jnp.bfloat16)


# --------------------------------------------------------------------------
# Parameter init (PyTorch-default-like) and one-time kernel-param prep.
# --------------------------------------------------------------------------
def init_params(key):
    """f32, unpadded parameters matching the PyTorch module."""
    keys = jax.random.split(key, 9)
    params = {}
    # nn.Embedding default: N(0, 1)
    params["emb"] = jax.random.normal(keys[0], (N_CLASSES, N_CLASSES), jnp.float32)

    dims = [LATENT_DIM + N_CLASSES, *HIDDEN, IMG_PIXELS]   # [110,256,512,1024,784]
    for i in range(4):
        fan_in, fan_out = dims[i], dims[i + 1]
        bound = 1.0 / np.sqrt(fan_in)
        params[f"w{i + 1}"] = jax.random.uniform(
            keys[1 + 2 * i], (fan_in, fan_out), jnp.float32, -bound, bound)
        params[f"b{i + 1}"] = jax.random.uniform(
            keys[2 + 2 * i], (fan_out,), jnp.float32, -bound, bound)
    return params


def prepare_kernel_params(params):
    """Pad + cast + fold ONCE.  Zero padding keeps the math exact."""
    # TODO(synk): on v5e, int8-quantize w3/w4 (or pin weights in VMEM across
    # calls) to cut the exposed weight DMA; on v7x use fp8 instead (no int MXU).
    w1 = params["w1"]                                     # (110, 256)
    w1_emb, w1_noise = w1[:N_CLASSES], w1[N_CLASSES:]
    # Label path folded: one_hot(label) @ w_lb == label_emb(label) @ W1[:10] + b1
    w_lb = params["emb"] @ w1_emb + params["b1"][None, :]           # (10, 256)
    w_lb = jnp.pad(w_lb, ((0, N_CLASSES_PAD - N_CLASSES), (0, 0)))
    w1n = jnp.pad(w1_noise, ((0, NOISE_PAD - LATENT_DIM), (0, 0)))

    kp = {
        "w_lb": w_lb.astype(jnp.bfloat16),
        "w1n": w1n.astype(jnp.bfloat16),
        "w2": params["w2"].astype(jnp.bfloat16),
        "b2": params["b2"].reshape(1, -1),
        "w3": params["w3"].astype(jnp.bfloat16),
        "b3": params["b3"].reshape(1, -1),
        "w4": jnp.pad(params["w4"],
                      ((0, 0), (0, OUT_DIM_PAD - IMG_PIXELS))).astype(jnp.bfloat16),
        "b4": jnp.pad(params["b4"], (0, OUT_DIM_PAD - IMG_PIXELS)).reshape(1, -1),
    }
    return jax.tree_util.tree_map(jnp.asarray, kp)


# --------------------------------------------------------------------------
# Forward builder (single_buffer_weights toggles pl.Buffered(1) on residents).
# --------------------------------------------------------------------------
def _build_forward(single_buffer_weights=True):

    def const_spec(shape):
        if single_buffer_weights:
            # Constant block index -> DMA'd once; single buffer (no wasted VMEM).
            return pl.BlockSpec(shape, lambda i: (0, 0),
                                pipeline_mode=pl.Buffered(1))
        return pl.BlockSpec(shape, lambda i: (0, 0))

    @jax.jit
    def forward(kparams, noise, labels):
        """noise: (B, 100) f32, labels: (B,) int -> img (B, 1, 28, 28) f32."""
        B = noise.shape[0]
        if B >= 2 * TM_MAX:
            tm = TM_MAX
        elif B >= 16:
            # >= 2 tiles so the "parallel" batch axis feeds both v7x TensorCores.
            tm = min(TM_MAX, _round_up(-(-B // 2), 8))
        else:
            tm = _round_up(max(B, 1), 8)
        b_pad = _round_up(B, tm)
        n_tiles = b_pad // tm

        # Minimal glue: one fused pad per input (batch rows + lane columns).
        x = jnp.pad(noise, ((0, b_pad - B), (0, NOISE_PAD - LATENT_DIM)))
        lbl = jnp.pad(labels.astype(jnp.int32), (0, b_pad - B)).reshape(b_pad, 1)

        flops = 2 * b_pad * (N_CLASSES_PAD * HIDDEN[0] + NOISE_PAD * HIDDEN[0]
                             + HIDDEN[0] * HIDDEN[1] + HIDDEN[1] * HIDDEN[2]
                             + HIDDEN[2] * OUT_DIM_PAD)
        weight_bytes = 2 * (N_CLASSES_PAD * HIDDEN[0] + NOISE_PAD * HIDDEN[0]
                            + HIDDEN[0] * HIDDEN[1] + HIDDEN[1] * HIDDEN[2]
                            + HIDDEN[2] * OUT_DIM_PAD)
        bias_bytes = 4 * (HIDDEN[1] + HIDDEN[2] + OUT_DIM_PAD)
        bytes_accessed = (weight_bytes + bias_bytes
                          + b_pad * (NOISE_PAD * 4 + 4)     # f32 noise + i32 label
                          + b_pad * OUT_DIM_PAD * 2)        # bf16 output

        out_pad = pl.pallas_call(
            generator_mlp_kernel,
            out_shape=jax.ShapeDtypeStruct((b_pad, OUT_DIM_PAD), jnp.bfloat16),
            grid=(n_tiles,),
            in_specs=[
                pl.BlockSpec((tm, 1), lambda i: (i, 0)),            # labels
                pl.BlockSpec((tm, NOISE_PAD), lambda i: (i, 0)),    # noise
                const_spec((N_CLASSES_PAD, HIDDEN[0])),             # w_lb
                const_spec((NOISE_PAD, HIDDEN[0])),                 # w1 (noise)
                const_spec((HIDDEN[0], HIDDEN[1])), const_spec((1, HIDDEN[1])),
                const_spec((HIDDEN[1], HIDDEN[2])), const_spec((1, HIDDEN[2])),
                const_spec((HIDDEN[2], OUT_DIM_PAD)), const_spec((1, OUT_DIM_PAD)),
            ],
            out_specs=pl.BlockSpec((tm, OUT_DIM_PAD), lambda i: (i, 0)),
            compiler_params=pltpu.CompilerParams(
                dimension_semantics=("parallel",),
                vmem_limit_bytes=32 << 20,
            ),
            cost_estimate=pl.CostEstimate(
                flops=flops,
                transcendentals=b_pad * OUT_DIM_PAD,
                bytes_accessed=bytes_accessed,
            ),
        )(lbl, x,
          kparams["w_lb"], kparams["w1n"],
          kparams["w2"], kparams["b2"],
          kparams["w3"], kparams["b3"],
          kparams["w4"], kparams["b4"])

        img_flat = out_pad[:B, :IMG_PIXELS].astype(jnp.float32)     # (B, 784)
        return img_flat.reshape(B, *IMG_SHAPE)                      # (B,1,28,28)

    return forward


generator_forward = _build_forward(single_buffer_weights=True)


# --------------------------------------------------------------------------
# Pure-JAX f32 reference (matches the PyTorch module).
# --------------------------------------------------------------------------
def _leaky_relu_f32(x, slope=0.2):
    return jnp.where(x > 0, x, slope * x)


def _reference_forward(params, noise, labels):
    emb = params["emb"][labels]
    h = jnp.concatenate([emb, noise], axis=-1)
    h = _leaky_relu_f32(h @ params["w1"] + params["b1"])
    h = _leaky_relu_f32(h @ params["w2"] + params["b2"])
    h = _leaky_relu_f32(h @ params["w3"] + params["b3"])
    h = jnp.tanh(h @ params["w4"] + params["b4"])
    return h.reshape(h.shape[0], *IMG_SHAPE)


if __name__ == "__main__":
    key = jax.random.PRNGKey(0)
    k_param, k_noise, k_label = jax.random.split(key, 3)

    B = 4
    params = init_params(k_param)
    kparams = prepare_kernel_params(params)   # padded + folded + bf16, built once

    noise = jax.random.normal(k_noise, (B, LATENT_DIM), jnp.float32)
    labels = jax.random.randint(k_label, (B,), 0, N_CLASSES, jnp.int32)

    fwd = generator_forward
    try:
        img = jax.block_until_ready(fwd(kparams, noise, labels))
    except Exception:
        # pl.Buffered(1) not supported by this JAX/libtpu combo -> fall back to
        # default double-buffered resident weights (still DMA'd only once).
        fwd = _build_forward(single_buffer_weights=False)
        img = jax.block_until_ready(fwd(kparams, noise, labels))

    ref = jax.block_until_ready(_reference_forward(params, noise, labels))

    assert img.shape == (B, CHANNELS, IMG_SIZE, IMG_SIZE), img.shape
    # bf16 weights/activations/output vs f32 reference -> relaxed tolerance.
    np.testing.assert_allclose(np.asarray(img), np.asarray(ref),
                               rtol=3e-2, atol=3e-2)

    print("KERNEL_OK")
</pallas_src>

<mosaic_0001>
module attributes {stable_mosaic.version = 11 : i64} {
  func.func @generator_mlp_kernel(%arg0: i32, %arg1: memref<8x1xi32, #tpu.memory_space<vmem>>, %arg2: memref<8x128xf32, #tpu.memory_space<vmem>>, %arg3: memref<128x256xbf16, #tpu.memory_space<vmem>>, %arg4: memref<128x256xbf16, #tpu.memory_space<vmem>>, %arg5: memref<256x512xbf16, #tpu.memory_space<vmem>>, %arg6: memref<1x512xf32, #tpu.memory_space<vmem>>, %arg7: memref<512x1024xbf16, #tpu.memory_space<vmem>>, %arg8: memref<1x1024xf32, #tpu.memory_space<vmem>>, %arg9: memref<1024x896xbf16, #tpu.memory_space<vmem>>, %arg10: memref<1x896xf32, #tpu.memory_space<vmem>>, %arg11: memref<8x896xbf16, #tpu.memory_space<vmem>>) attributes {dimension_semantics = [#tpu.dimension_semantics<parallel>], iteration_bounds = array<i64: 1>, scalar_prefetch = 0 : i64, scratch_operands = 0 : i64, tpu.core_type = #tpu.core_type<tc>, window_params = [{transform_indices = @transform_0, window_bounds = array<i64: 8, 1>}, {transform_indices = @transform_1, window_bounds = array<i64: 8, 128>}, {pipeline_mode = #tpu.pipeline_mode<synchronous>, transform_indices = @transform_2, window_bounds = array<i64: 128, 256>}, {pipeline_mode = #tpu.pipeline_mode<synchronous>, transform_indices = @transform_3, window_bounds = array<i64: 128, 256>}, {pipeline_mode = #tpu.pipeline_mode<synchronous>, transform_indices = @transform_4, window_bounds = array<i64: 256, 512>}, {pipeline_mode = #tpu.pipeline_mode<synchronous>, transform_indices = @transform_5, window_bounds = array<i64: 1, 512>}, {pipeline_mode = #tpu.pipeline_mode<synchronous>, transform_indices = @transform_6, window_bounds = array<i64: 512, 1024>}, {pipeline_mode = #tpu.pipeline_mode<synchronous>, transform_indices = @transform_7, window_bounds = array<i64: 1, 1024>}, {pipeline_mode = #tpu.pipeline_mode<synchronous>, transform_indices = @transform_8, window_bounds = array<i64: 1024, 896>}, {pipeline_mode = #tpu.pipeline_mode<synchronous>, transform_indices = @transform_9, window_bounds = array<i64: 1, 896>}, {transform_indices = @transform_10, window_bounds = array<i64: 8, 896>}]} {
    %c0 = arith.constant 0 : index
    %c0_0 = arith.constant 0 : index
    %0 = vector.load %arg1[%c0, %c0_0] : memref<8x1xi32, #tpu.memory_space<vmem>>, vector<8x1xi32>
    %1 = tpu.iota {dimensions = array<i32: 1>} : vector<8x128xi32>
    %2 = vector.broadcast %0 : vector<8x1xi32> to vector<8x128xi32>
    %3 = arith.cmpi eq, %2, %1 : vector<8x128xi32>
    %4 = arith.extui %3 : vector<8x128xi1> to vector<8x128xi32>
    %5 = arith.sitofp %4 : vector<8x128xi32> to vector<8x128xf32>
    %6 = arith.truncf %5 : vector<8x128xf32> to vector<8x128xbf16>
    %c0_1 = arith.constant 0 : index
    %c0_2 = arith.constant 0 : index
    %7 = vector.load %arg3[%c0_1, %c0_2] : memref<128x256xbf16, #tpu.memory_space<vmem>>, vector<128x256xbf16>
    %cst = arith.constant dense<0.000000e+00> : vector<8x256xf32>
    %8 = tpu.matmul %6, %7, %cst {dimension_numbers = #tpu.dot_dimension_numbers<[1], [0], [0], [1], [0, 0, 1, 1], [], []>} : vector<8x128xbf16>, vector<128x256xbf16>, vector<8x256xf32> -> vector<8x256xf32>
    %c0_3 = arith.constant 0 : index
    %c0_4 = arith.constant 0 : index
    %9 = vector.load %arg2[%c0_3, %c0_4] : memref<8x128xf32, #tpu.memory_space<vmem>>, vector<8x128xf32>
    %10 = arith.truncf %9 : vector<8x128xf32> to vector<8x128xbf16>
    %c0_5 = arith.constant 0 : index
    %c0_6 = arith.constant 0 : index
    %11 = vector.load %arg4[%c0_5, %c0_6] : memref<128x256xbf16, #tpu.memory_space<vmem>>, vector<128x256xbf16>
    %cst_7 = arith.constant dense<0.000000e+00> : vector<8x256xf32>
    %12 = tpu.matmul %10, %11, %cst_7 {dimension_numbers = #tpu.dot_dimension_numbers<[1], [0], [0], [1], [0, 0, 1, 1], [], []>} : vector<8x128xbf16>, vector<128x256xbf16>, vector<8x256xf32> -> vector<8x256xf32>
    %13 = arith.addf %8, %12 : vector<8x256xf32>
    %14 = arith.truncf %13 : vector<8x256xf32> to vector<8x256xbf16>
    %cst_8 = arith.constant 0.000000e+00 : bf16
    %15 = vector.broadcast %cst_8 : bf16 to vector<8x256xbf16>
    %16 = arith.cmpf ogt, %14, %15 : vector<8x256xbf16>
    %cst_9 = arith.constant 2.001950e-01 : bf16
    %17 = vector.broadcast %cst_9 : bf16 to vector<8x256xbf16>
    %18 = arith.mulf %14, %17 : vector<8x256xbf16>
    %19 = arith.select %16, %14, %18 : vector<8x256xi1>, vector<8x256xbf16>
    %c0_10 = arith.constant 0 : index
    %c0_11 = arith.constant 0 : index
    %20 = vector.load %arg5[%c0_10, %c0_11] : memref<256x512xbf16, #tpu.memory_space<vmem>>, vector<256x512xbf16>
    %cst_12 = arith.constant dense<0.000000e+00> : vector<8x512xf32>
    %21 = tpu.matmul %19, %20, %cst_12 {dimension_numbers = #tpu.dot_dimension_numbers<[1], [0], [0], [1], [0, 0, 1, 1], [], []>} : vector<8x256xbf16>, vector<256x512xbf16>, vector<8x512xf32> -> vector<8x512xf32>
    %c0_13 = arith.constant 0 : index
    %c0_14 = arith.constant 0 : index
    %22 = vector.load %arg6[%c0_13, %c0_14] : memref<1x512xf32, #tpu.memory_space<vmem>>, vector<1x512xf32>
    %23 = vector.broadcast %22 : vector<1x512xf32> to vector<8x512xf32>
    %24 = arith.addf %21, %23 : vector<8x512xf32>
    %25 = arith.truncf %24 : vector<8x512xf32> to vector<8x512xbf16>
    %cst_15 = arith.constant 0.000000e+00 : bf16
    %26 = vector.broadcast %cst_15 : bf16 to vector<8x512xbf16>
    %27 = arith.cmpf ogt, %25, %26 : vector<8x512xbf16>
    %cst_16 = arith.constant 2.001950e-01 : bf16
    %28 = vector.broadcast %cst_16 : bf16 to vector<8x512xbf16>
    %29 = arith.mulf %25, %28 : vector<8x512xbf16>
    %30 = arith.select %27, %25, %29 : vector<8x512xi1>, vector<8x512xbf16>
    %c0_17 = arith.constant 0 : index
    %c0_18 = arith.constant 0 : index
    %31 = vector.load %arg7[%c0_17, %c0_18] : memref<512x1024xbf16, #tpu.memory_space<vmem>>, vector<512x1024xbf16>
    %cst_19 = arith.constant dense<0.000000e+00> : vector<8x1024xf32>
    %32 = tpu.matmul %30, %31, %cst_19 {dimension_numbers = #tpu.dot_dimension_numbers<[1], [0], [0], [1], [0, 0, 1, 1], [], []>} : vector<8x512xbf16>, vector<512x1024xbf16>, vector<8x1024xf32> -> vector<8x1024xf32>
    %c0_20 = arith.constant 0 : index
    %c0_21 = arith.constant 0 : index
    %33 = vector.load %arg8[%c0_20, %c0_21] : memref<1x1024xf32, #tpu.memory_space<vmem>>, vector<1x1024xf32>
    %34 = vector.broadcast %33 : vector<1x1024xf32> to vector<8x1024xf32>
    %35 = arith.addf %32, %34 : vector<8x1024xf32>
    %36 = arith.truncf %35 : vector<8x1024xf32> to vector<8x1024xbf16>
    %cst_22 = arith.constant 0.000000e+00 : bf16
    %37 = vector.broadcast %cst_22 : bf16 to vector<8x1024xbf16>
    %38 = arith.cmpf ogt, %36, %37 : vector<8x1024xbf16>
    %cst_23 = arith.constant 2.001950e-01 : bf16
    %39 = vector.broadcast %cst_23 : bf16 to vector<8x1024xbf16>
    %40 = arith.mulf %36, %39 : vector<8x1024xbf16>
    %41 = arith.select %38, %36, %40 : vector<8x1024xi1>, vector<8x1024xbf16>
    %c0_24 = arith.constant 0 : index
    %c0_25 = arith.constant 0 : index
    %42 = vector.load %arg9[%c0_24, %c0_25] : memref<1024x896xbf16, #tpu.memory_space<vmem>>, vector<1024x896xbf16>
    %cst_26 = arith.constant dense<0.000000e+00> : vector<8x896xf32>
    %43 = tpu.matmul %41, %42, %cst_26 {dimension_numbers = #tpu.dot_dimension_numbers<[1], [0], [0], [1], [0, 0, 1, 1], [], []>} : vector<8x1024xbf16>, vector<1024x896xbf16>, vector<8x896xf32> -> vector<8x896xf32>
    %c0_27 = arith.constant 0 : index
    %c0_28 = arith.constant 0 : index
    %44 = vector.load %arg10[%c0_27, %c0_28] : memref<1x896xf32, #tpu.memory_space<vmem>>, vector<1x896xf32>
    %45 = vector.broadcast %44 : vector<1x896xf32> to vector<8x896xf32>
    %46 = arith.addf %43, %45 : vector<8x896xf32>
    %47 = math.tanh %46 : vector<8x896xf32>
    %48 = arith.truncf %47 : vector<8x896xf32> to vector<8x896xbf16>
    %c0_29 = arith.constant 0 : index
    %c0_30 = arith.constant 0 : index
    %49 = vector.load %arg11[%c0_29, %c0_30] : memref<8x896xbf16, #tpu.memory_space<vmem>>, vector<8x896xbf16>
    tpu.vector_store %arg11[%c0_29, %c0_30], %48 {strides = array<i32>} : memref<8x896xbf16, #tpu.memory_space<vmem>>, vector<8x896xbf16>,
    return
  }
  func.func @transform_0(%arg0: i32) -> (i32, i32) {
    %c0_i32 = arith.constant 0 : i32
    %c0_i32_0 = arith.constant 0 : i32
    return %arg0, %c0_i32 : i32, i32
  }
  func.func @transform_1(%arg0: i32) -> (i32, i32) {
    %c0_i32 = arith.constant 0 : i32
    %c0_i32_0 = arith.constant 0 : i32
    return %arg0, %c0_i32 : i32, i32
  }
  func.func @transform_2(%arg0: i32) -> (i32, i32) {
    %c0_i32 = arith.constant 0 : i32
    %c0_i32_0 = arith.constant 0 : i32
    %c0_i32_1 = arith.constant 0 : i32
    return %c0_i32, %c0_i32_0 : i32, i32
  }
  func.func @transform_3(%arg0: i32) -> (i32, i32) {
    %c0_i32 = arith.constant 0 : i32
    %c0_i32_0 = arith.constant 0 : i32
    %c0_i32_1 = arith.constant 0 : i32
    return %c0_i32, %c0_i32_0 : i32, i32
  }
  func.func @transform_4(%arg0: i32) -> (i32, i32) {
    %c0_i32 = arith.constant 0 : i32
    %c0_i32_0 = arith.constant 0 : i32
    %c0_i32_1 = arith.constant 0 : i32
    return %c0_i32, %c0_i32_0 : i32, i32
  }
  func.func @transform_5(%arg0: i32) -> (i32, i32) {
    %c0_i32 = arith.constant 0 : i32
    %c0_i32_0 = arith.constant 0 : i32
    %c0_i32_1 = arith.constant 0 : i32
    return %c0_i32, %c0_i32_0 : i32, i32
  }
  func.func @transform_6(%arg0: i32) -> (i32, i32) {
    %c0_i32 = arith.constant 0 : i32
    %c0_i32_0 = arith.constant 0 : i32
    %c0_i32_1 = arith.constant 0 : i32
    return %c0_i32, %c0_i32_0 : i32, i32
  }
  func.func @transform_7(%arg0: i32) -> (i32, i32) {
    %c0_i32 = arith.constant 0 : i32
    %c0_i32_0 = arith.constant 0 : i32
    %c0_i32_1 = arith.constant 0 : i32
    return %c0_i32, %c0_i32_0 : i32, i32
  }
  func.func @transform_8(%arg0: i32) -> (i32, i32) {
    %c0_i32 = arith.constant 0 : i32
    %c0_i32_0 = arith.constant 0 : i32
    %c0_i32_1 = arith.constant 0 : i32
    return %c0_i32, %c0_i32_0 : i32, i32
  }
  func.func @transform_9(%arg0: i32) -> (i32, i32) {
    %c0_i32 = arith.constant 0 : i32
    %c0_i32_0 = arith.constant 0 : i32
    %c0_i32_1 = arith.constant 0 : i32
    return %c0_i32, %c0_i32_0 : i32, i32
  }
  func.func @transform_10(%arg0: i32) -> (i32, i32) {
    %c0_i32 = arith.constant 0 : i32
    %c0_i32_0 = arith.constant 0 : i32
    return %arg0, %c0_i32 : i32, i32
  }
}

module attributes {stable_mosaic.version = 11 : i64} {
  func.func @generator_mlp_kernel(%arg0: i32, %arg1: memref<8x1xi32, #tpu.memory_space<vmem>>, %arg2: memref<8x128xf32, #tpu.memory_space<vmem>>, %arg3: memref<128x256xbf16, #tpu.memory_space<vmem>>, %arg4: memref<128x256xbf16, #tpu.memory_space<vmem>>, %arg5: memref<256x512xbf16, #tpu.memory_space<vmem>>, %arg6: memref<1x512xf32, #tpu.memory_space<vmem>>, %arg7: memref<512x1024xbf16, #tpu.memory_space<vmem>>, %arg8: memref<1x1024xf32, #tpu.memory_space<vmem>>, %arg9: memref<1024x896xbf16, #tpu.memory_space<vmem>>, %arg10: memref<1x896xf32, #tpu.memory_space<vmem>>, %arg11: memref<8x896xbf16, #tpu.memory_space<vmem>>) attributes {dimension_semantics = [#tpu.dimension_semantics<parallel>], iteration_bounds = array<i64: 1>, scalar_prefetch = 0 : i64, scratch_operands = 0 : i64, tpu.core_type = #tpu.core_type<tc>, window_params = [{transform_indices = @transform_0, window_bounds = array<i64: 8, 1>}, {transform_indices = @transform_1, window_bounds = array<i64: 8, 128>}, {pipeline_mode = #tpu.pipeline_mode<synchronous>, transform_indices = @transform_2, window_bounds = array<i64: 128, 256>}, {pipeline_mode = #tpu.pipeline_mode<synchronous>, transform_indices = @transform_3, window_bounds = array<i64: 128, 256>}, {pipeline_mode = #tpu.pipeline_mode<synchronous>, transform_indices = @transform_4, window_bounds = array<i64: 256, 512>}, {pipeline_mode = #tpu.pipeline_mode<synchronous>, transform_indices = @transform_5, window_bounds = array<i64: 1, 512>}, {pipeline_mode = #tpu.pipeline_mode<synchronous>, transform_indices = @transform_6, window_bounds = array<i64: 512, 1024>}, {pipeline_mode = #tpu.pipeline_mode<synchronous>, transform_indices = @transform_7, window_bounds = array<i64: 1, 1024>}, {pipeline_mode = #tpu.pipeline_mode<synchronous>, transform_indices = @transform_8, window_bounds = array<i64: 1024, 896>}, {pipeline_mode = #tpu.pipeline_mode<synchronous>, transform_indices = @transform_9, window_bounds = array<i64: 1, 896>}, {transform_indices = @transform_10, window_bounds = array<i64: 8, 896>}]} {
    %c0 = arith.constant 0 : index
    %c0_0 = arith.constant 0 : index
    %0 = vector.load %arg1[%c0, %c0_0] : memref<8x1xi32, #tpu.memory_space<vmem>>, vector<8x1xi32>
    %1 = tpu.iota {dimensions = array<i32: 1>} : vector<8x128xi32>
    %2 = vector.broadcast %0 : vector<8x1xi32> to vector<8x128xi32>
    %3 = arith.cmpi eq, %2, %1 : vector<8x128xi32>
    %4 = arith.extui %3 : vector<8x128xi1> to vector<8x128xi32>
    %5 = arith.sitofp %4 : vector<8x128xi32> to vector<8x128xf32>
    %6 = arith.truncf %5 : vector<8x128xf32> to vector<8x128xbf16>
    %c0_1 = arith.constant 0 : index
    %c0_2 = arith.constant 0 : index
    %7 = vector.load %arg3[%c0_1, %c0_2] : memref<128x256xbf16, #tpu.memory_space<vmem>>, vector<128x256xbf16>
    %cst = arith.constant dense<0.000000e+00> : vector<8x256xf32>
    %8 = tpu.matmul %6, %7, %cst {dimension_numbers = #tpu.dot_dimension_numbers<[1], [0], [0], [1], [0, 0, 1, 1], [], []>} : vector<8x128xbf16>, vector<128x256xbf16>, vector<8x256xf32> -> vector<8x256xf32>
    %c0_3 = arith.constant 0 : index
    %c0_4 = arith.constant 0 : index
    %9 = vector.load %arg2[%c0_3, %c0_4] : memref<8x128xf32, #tpu.memory_space<vmem>>, vector<8x128xf32>
    %10 = arith.truncf %9 : vector<8x128xf32> to vector<8x128xbf16>
    %c0_5 = arith.constant 0 : index
    %c0_6 = arith.constant 0 : index
    %11 = vector.load %arg4[%c0_5, %c0_6] : memref<128x256xbf16, #tpu.memory_space<vmem>>, vector<128x256xbf16>
    %cst_7 = arith.constant dense<0.000000e+00> : vector<8x256xf32>
    %12 = tpu.matmul %10, %11, %cst_7 {dimension_numbers = #tpu.dot_dimension_numbers<[1], [0], [0], [1], [0, 0, 1, 1], [], []>} : vector<8x128xbf16>, vector<128x256xbf16>, vector<8x256xf32> -> vector<8x256xf32>
    %13 = arith.addf %8, %12 : vector<8x256xf32>
    %14 = arith.truncf %13 : vector<8x256xf32> to vector<8x256xbf16>
    %cst_8 = arith.constant 0.000000e+00 : bf16
    %15 = vector.broadcast %cst_8 : bf16 to vector<8x256xbf16>
    %16 = arith.cmpf ogt, %14, %15 : vector<8x256xbf16>
    %cst_9 = arith.constant 2.001950e-01 : bf16
    %17 = vector.broadcast %cst_9 : bf16 to vector<8x256xbf16>
    %18 = arith.mulf %14, %17 : vector<8x256xbf16>
    %19 = arith.select %16, %14, %18 : vector<8x256xi1>, vector<8x256xbf16>
    %c0_10 = arith.constant 0 : index
    %c0_11 = arith.constant 0 : index
    %20 = vector.load %arg5[%c0_10, %c0_11] : memref<256x512xbf16, #tpu.memory_space<vmem>>, vector<256x512xbf16>
    %cst_12 = arith.constant dense<0.000000e+00> : vector<8x512xf32>
    %21 = tpu.matmul %19, %20, %cst_12 {dimension_numbers = #tpu.dot_dimension_numbers<[1], [0], [0], [1], [0, 0, 1, 1], [], []>} : vector<8x256xbf16>, vector<256x512xbf16>, vector<8x512xf32> -> vector<8x512xf32>
    %c0_13 = arith.constant 0 : index
    %c0_14 = arith.constant 0 : index
    %22 = vector.load %arg6[%c0_13, %c0_14] : memref<1x512xf32, #tpu.memory_space<vmem>>, vector<1x512xf32>
    %23 = vector.broadcast %22 : vector<1x512xf32> to vector<8x512xf32>
    %24 = arith.addf %21, %23 : vector<8x512xf32>
    %25 = arith.truncf %24 : vector<8x512xf32> to vector<8x512xbf16>
    %cst_15 = arith.constant 0.000000e+00 : bf16
    %26 = vector.broadcast %cst_15 : bf16 to vector<8x512xbf16>
    %27 = arith.cmpf ogt, %25, %26 : vector<8x512xbf16>
    %cst_16 = arith.constant 2.001950e-01 : bf16
    %28 = vector.broadcast %cst_16 : bf16 to vector<8x512xbf16>
    %29 = arith.mulf %25, %28 : vector<8x512xbf16>
    %30 = arith.select %27, %25, %29 : vector<8x512xi1>, vector<8x512xbf16>
    %c0_17 = arith.constant 0 : index
    %c0_18 = arith.constant 0 : index
    %31 = vector.load %arg7[%c0_17, %c0_18] : memref<512x1024xbf16, #tpu.memory_space<vmem>>, vector<512x1024xbf16>
    %cst_19 = arith.constant dense<0.000000e+00> : vector<8x1024xf32>
    %32 = tpu.matmul %30, %31, %cst_19 {dimension_numbers = #tpu.dot_dimension_numbers<[1], [0], [0], [1], [0, 0, 1, 1], [], []>} : vector<8x512xbf16>, vector<512x1024xbf16>, vector<8x1024xf32> -> vector<8x1024xf32>
    %c0_20 = arith.constant 0 : index
    %c0_21 = arith.constant 0 : index
    %33 = vector.load %arg8[%c0_20, %c0_21] : memref<1x1024xf32, #tpu.memory_space<vmem>>, vector<1x1024xf32>
    %34 = vector.broadcast %33 : vector<1x1024xf32> to vector<8x1024xf32>
    %35 = arith.addf %32, %34 : vector<8x1024xf32>
    %36 = arith.truncf %35 : vector<8x1024xf32> to vector<8x1024xbf16>
    %cst_22 = arith.constant 0.000000e+00 : bf16
    %37 = vector.broadcast %cst_22 : bf16 to vector<8x1024xbf16>
    %38 = arith.cmpf ogt, %36, %37 : vector<8x1024xbf16>
    %cst_23 = arith.constant 2.001950e-01 : bf16
    %39 = vector.broadcast %cst_23 : bf16 to vector<8x1024xbf16>
    %40 = arith.mulf %36, %39 : vector<8x1024xbf16>
    %41 = arith.select %38, %36, %40 : vector<8x1024xi1>, vector<8x1024xbf16>
    %c0_24 = arith.constant 0 : index
    %c0_25 = arith.constant 0 : index
    %42 = vector.load %arg9[%c0_24, %c0_25] : memref<1024x896xbf16, #tpu.memory_space<vmem>>, vector<1024x896xbf16>
    %cst_26 = arith.constant dense<0.000000e+00> : vector<8x896xf32>
    %43 = tpu.matmul %41, %42, %cst_26 {dimension_numbers = #tpu.dot_dimension_numbers<[1], [0], [0], [1], [0, 0, 1, 1], [], []>} : vector<8x1024xbf16>, vector<1024x896xbf16>, vector<8x896xf32> -> vector<8x896xf32>
    %c0_27 = arith.constant 0 : index
    %c0_28 = arith.constant 0 : index
    %44 = vector.load %arg10[%c0_27, %c0_28] : memref<1x896xf32, #tpu.memory_space<vmem>>, vector<1x896xf32>
    %45 = vector.broadcast %44 : vector<1x896xf32> to vector<8x896xf32>
    %46 = arith.addf %43, %45 : vector<8x896xf32>
    %47 = math.tanh %46 : vector<8x896xf32>
    %48 = arith.truncf %47 : vector<8x896xf32> to vector<8x896xbf16>
    %c0_29 = arith.constant 0 : index
    %c0_30 = arith.constant 0 : index
    %49 = vector.load %arg11[%c0_29, %c0_30] : memref<8x896xbf16, #tpu.memory_space<vmem>>, vector<8x896xbf16>
    tpu.vector_store %arg11[%c0_29, %c0_30], %48 {strides = array<i32>} : memref<8x896xbf16, #tpu.memory_space<vmem>>, vector<8x896xbf16>,
    return
  }
  func.func @transform_0(%arg0: i32) -> (i32, i32) {
    %c0_i32 = arith.constant 0 : i32
    %c0_i32_0 = arith.constant 0 : i32
    return %arg0, %c0_i32 : i32, i32
  }
  func.func @transform_1(%arg0: i32) -> (i32, i32) {
    %c0_i32 = arith.constant 0 : i32
    %c0_i32_0 = arith.constant 0 : i32
    return %arg0, %c0_i32 : i32, i32
  }
  func.func @transform_2(%arg0: i32) -> (i32, i32) {
    %c0_i32 = arith.constant 0 : i32
    %c0_i32_0 = arith.constant 0 : i32
    %c0_i32_1 = arith.constant 0 : i32
    return %c0_i32, %c0_i32_0 : i32, i32
  }
  func.func @transform_3(%arg0: i32) -> (i32, i32) {
    %c0_i32 = arith.constant 0 : i32
    %c0_i32_0 = arith.constant 0 : i32
    %c0_i32_1 = arith.constant 0 : i32
    return %c0_i32, %c0_i32_0 : i32, i32
  }
  func.func @transform_4(%arg0: i32) -> (i32, i32) {
    %c0_i32 = arith.constant 0 : i32
    %c0_i32_0 = arith.constant 0 : i32
    %c0_i32_1 = arith.constant 0 : i32
    return %c0_i32, %c0_i32_0 : i32, i32
  }
  func.func @transform_5(%arg0: i32) -> (i32, i32) {
    %c0_i32 = arith.constant 0 : i32
    %c0_i32_0 = arith.constant 0 : i32
    %c0_i32_1 = arith.constant 0 : i32
    return %c0_i32, %c0_i32_0 : i32, i32
  }
  func.func @transform_6(%arg0: i32) -> (i32, i32) {
    %c0_i32 = arith.constant 0 : i32
    %c0_i32_0 = arith.constant 0 : i32
    %c0_i32_1 = arith.constant 0 : i32
    return %c0_i32, %c0_i32_0 : i32, i32
  }
  func.func @transform_7(%arg0: i32) -> (i32, i32) {
    %c0_i32 = arith.constant 0 : i32
    %c0_i32_0 = arith.constant 0 : i32
    %c0_i32_1 = arith.constant 0 : i32
    return %c0_i32, %c0_i32_0 : i32, i32
  }
  func.func @transform_8(%arg0: i32) -> (i32, i32) {
    %c0_i32 = arith.constant 0 : i32
    %c0_i32_0 = arith.constant 0 : i32
    %c0_i32_1 = arith.constant 0 : i32
    return %c0_i32, %c0_i32_0 : i32, i32
  }
  func.func @transform_9(%arg0: i32) -> (i32, i32) {
    %c0_i32 = arith.constant 0 : i32
    %c0_i32_0 = arith.constant 0 : i32
    %c0_i32_1 = arith.constant 0 : i32
    return %c0_i32, %c0_i32_0 : i32, i32
  }
  func.func @transform_10(%arg0: i32) -> (i32, i32) {
    %c0_i32 = arith.constant 0 : i32
    %c0_i32_0 = arith.constant 0 : i32
    return %arg0, %c0_i32 : i32, i32
  }
}

</mosaic_0001>

<bundles_post_ra>
// kernel: forward.1
= control target key start
LH: loop header
LB: loop body
LE: loop exit
PB: predicated region body
PF: predicated region fallthrough
CT: control target
= control target key end

     0   :  { %15 = vsyncpa [#allocation3], 0  ;;  %s8752_s0 = inlined_call_operand.vmem [shape: s32[8,1], index: 0, kind: input, shape index: {}]   ;;  %s8753_s1 = inlined_call_operand.vmem [shape: f32[8,128], index: 1, kind: input, shape index: {}]   ;;  %s8754_s2 = inlined_call_operand.hbm [shape: bf16[128,256], index: 2, kind: input, shape index: {}]   ;;  %s8755_s3 = inlined_call_operand.hbm [shape: bf16[128,256], index: 3, kind: input, shape index: {}]   ;;  %s8756_s4 = inlined_call_operand.hbm [shape: bf16[256,512], index: 4, kind: input, shape index: {}]   ;;  %s8757_s5 = inlined_call_operand.hbm [shape: f32[1,512], index: 5, kind: input, shape index: {}]   ;;  %s8758_s6 = inlined_call_operand.hbm [shape: bf16[512,1024], index: 6, kind: input, shape index: {}]   ;;  %s8759_s7 = inlined_call_operand.hbm [shape: f32[1,1024], index: 7, kind: input, shape index: {}]   ;;  %s8760_s8 = inlined_call_operand.hbm [shape: bf16[1024,896], index: 8, kind: input, shape index: {}]   ;;  %s8761_s9 = inlined_call_operand.hbm [shape: f32[1,896], index: 9, kind: input, shape index: {}]   ;;  %s8762_s10 = inlined_call_operand.vmem [shape: bf16[8,896], index: 10, kind: output, shape index: {}]  }
   0x1   :  { %16 = vsyncpa [#allocation5], 0 }
   0x2   :  { %17 = vsyncpa [#allocation8], 0 }
   0x3   :  { %18 = vsyncpa [#allocation11], 0 }
   0x4   :  { %19 = vsyncpa [#allocation14], 0  ;;  %s8402_s13 = smov [#allocation4]   ;;  %s8403_s15 = smov [#allocation7]  }
   0x5   :  { %s41_s14 = sshll.u32 %s8402_s13, 4  ;;  %s66_s16 = sshll.u32 %s8403_s15, 4  ;;  %s42_s14 = int_to_ptr.vmem [resolvable:$true] %s41_s14  ;;  %s67_s16 = int_to_ptr.vmem [resolvable:$true] %s66_s16 }
   0x6   :  { %s8216_s19 = scalar_lea.hbm %s8755_s3, 2048 }
   0x7   :  { %p8217_p0 = scmp.ne.s32.totalorder %s8755_s3, %s8216_s19  ;;  %p8220_p1 = scmp.lt.u32.totalorder %s8216_s19, %s8755_s3 }
   0x9   :  { %p8222_p2 = pnand %p8220_p1, %p8217_p0 }
   0xb   :  { %8225 = shalt.err (!%p8222_p2)
}
   0xc   :  { %s8226_s24 = scalar_lea.vmem %s42_s14, 2048  ;;  %p8231_p4 = scmp.lt.s32.totalorder %s42_s14, %s42_s14 }
   0xd   :  { %p8227_p3 = scmp.ne.s32.totalorder %s42_s14, %s8226_s24  ;;  %p8232_p5 = scmp.lt.s32.totalorder %s8226_s24, %s8226_s24 }
   0xf   :  { %p8233_p6 = por %p8232_p5, %p8231_p4 }
  0x11   :  { %p8234_p7 = pnand %p8233_p6, %p8227_p3 }
  0x13   :  { %8237 = shalt.err (!%p8234_p7)
}
  0x14   :  { %s8404_s25 = smov 128   ;;  %s8405_s26 = smov 8  }
  0x15   :  { %47 = dma.hbm_to_vmem [thread:$0]  %s8755_s3, 2048, %s42_s14, [#allocation5], %s8404_s25, %s8404_s25, %s8405_s26  }
  0x16   :  { %s8238_s11 = scalar_lea.hbm %s8757_s5, 64 }
  0x17   :  { %p8239_p8 = scmp.ne.s32.totalorder %s8757_s5, %s8238_s11  ;;  %p8242_p9 = scmp.lt.u32.totalorder %s8238_s11, %s8757_s5 }
  0x19   :  { %p8244_p10 = pnand %p8242_p9, %p8239_p8 }
  0x1b   :  { %8247 = shalt.err (!%p8244_p10)
}
  0x1c   :  { %s8248_s18 = scalar_lea.vmem %s67_s16, 64  ;;  %p8253_p12 = scmp.lt.s32.totalorder %s67_s16, %s67_s16 }
  0x1d   :  { %p8249_p11 = scmp.ne.s32.totalorder %s67_s16, %s8248_s18  ;;  %p8254_p13 = scmp.lt.s32.totalorder %s8248_s18, %s8248_s18 }
  0x1f   :  { %p8255_p0 = por %p8254_p13, %p8253_p12 }
  0x21   :  { %p8256_p1 = pnand %p8255_p0, %p8249_p11 }
  0x23   :  { %8259 = shalt.err (!%p8256_p1)
}
  0x24   :  { %69 = dma.hbm_to_vmem [thread:$0]  %s8757_s5, 64, %s67_s16, [#allocation8]  }
  0x25   :  { %s8406_s19 = smov [#allocation10]   ;;  %s8407_s21 = smov [#allocation2]  }
  0x26   :  { %s88_s20 = sshll.u32 %s8406_s19, 4  ;;  %s29_s22 = sshll.u32 %s8407_s21, 4  ;;  %s89_s20 = int_to_ptr.vmem [resolvable:$true] %s88_s20  ;;  %s8502_s22 = int_to_ptr.vmem [resolvable:$true] %s29_s22 }
  0x27   :  { %s8260_s27 = scalar_lea.hbm %s8759_s7, 128 }
  0x28   :  { %p8261_p2 = scmp.ne.s32.totalorder %s8759_s7, %s8260_s27  ;;  %p8264_p3 = scmp.lt.u32.totalorder %s8260_s27, %s8759_s7 }
  0x2a   :  { %p8266_p4 = pnand %p8264_p3, %p8261_p2 }
  0x2c   :  { %8269 = shalt.err (!%p8266_p4)
}
  0x2d   :  { %s8270_s5 = scalar_lea.vmem %s89_s20, 128  ;;  %p8275_p6 = scmp.lt.s32.totalorder %s89_s20, %s89_s20 }
  0x2e   :  { %p8271_p5 = scmp.ne.s32.totalorder %s89_s20, %s8270_s5  ;;  %p8276_p7 = scmp.lt.s32.totalorder %s8270_s5, %s8270_s5 }
  0x30   :  { %p8277_p8 = por %p8276_p7, %p8275_p6 }
  0x32   :  { %p8278_p9 = pnand %p8277_p8, %p8271_p5 }
  0x34   :  { %8281 = shalt.err (!%p8278_p9)
}
  0x35   :  { %91 = dma.hbm_to_vmem [thread:$0]  %s8759_s7, 128, %s89_s20, [#allocation11]  }
  0x36   :  { %s8282_s17 = scalar_lea.hbm %s8754_s2, 2048 }
  0x37   :  { %p8283_p10 = scmp.ne.s32.totalorder %s8754_s2, %s8282_s17  ;;  %p8286_p11 = scmp.lt.u32.totalorder %s8282_s17, %s8754_s2 }
  0x39   :  { %p8288_p12 = pnand %p8286_p11, %p8283_p10 }
  0x3b   :  { %8291 = shalt.err (!%p8288_p12)
}
  0x3c   :  { %s8292_s21 = scalar_lea.vmem %s8502_s22, 2048  ;;  %p8297_p0 = scmp.lt.s32.totalorder %s8502_s22, %s8502_s22 }
  0x3d   :  { %p8293_p13 = scmp.ne.s32.totalorder %s8502_s22, %s8292_s21  ;;  %p8298_p1 = scmp.lt.s32.totalorder %s8292_s21, %s8292_s21 }
  0x3f   :  { %p8299_p2 = por %p8298_p1, %p8297_p0 }
  0x41   :  { %p8300_p3 = pnand %p8299_p2, %p8293_p13 }
  0x43   :  { %8303 = shalt.err (!%p8300_p3)
}
  0x44   :  { %35 = dma.hbm_to_vmem [thread:$0]  %s8754_s2, 2048, %s8502_s22, [#allocation3], %s8404_s25, %s8404_s25, %s8405_s26  }
  0x45   :  { %s8408_s23 = smov [#allocation6]   ;;  %s8304_s29 = scalar_lea.hbm %s8756_s4, 8192 }
  0x46   :  { %s53_s24 = sshll.u32 %s8408_s23, 4  ;;  %p8305_p4 = scmp.ne.s32.totalorder %s8756_s4, %s8304_s29  ;;  %s54_s24 = int_to_ptr.vmem [resolvable:$true] %s53_s24 }
  0x47   :  { %p8308_p5 = scmp.lt.u32.totalorder %s8304_s29, %s8756_s4 }
  0x49   :  { %p8310_p6 = pnand %p8308_p5, %p8305_p4 }
  0x4b   :  { %8313 = shalt.err (!%p8310_p6)
}
  0x4c   :  { %s8314_s12 = scalar_lea.vmem %s54_s24, 8192  ;;  %p8319_p8 = scmp.lt.s32.totalorder %s54_s24, %s54_s24 }
  0x4d   :  { %p8315_p7 = scmp.ne.s32.totalorder %s54_s24, %s8314_s12  ;;  %p8320_p9 = scmp.lt.s32.totalorder %s8314_s12, %s8314_s12 }
  0x4f   :  { %p8321_p10 = por %p8320_p9, %p8319_p8 }
  0x51   :  { %p8322_p11 = pnand %p8321_p10, %p8315_p7 }
  0x53   :  { %8325 = shalt.err (!%p8322_p11)
}
  0x54   :  { %s8409_s2 = smov 256   ;;  %s8410_s25 = smov 16  }
  0x55   :  { %59 = dma.hbm_to_vmem [thread:$0]  %s8756_s4, 8192, %s54_s24, [#allocation5], %s8409_s2, %s8409_s2, %s8410_s25  }
  0x56   :  { %s8411_s13 = smov [#allocation9]   ;;  %s8326_s3 = scalar_lea.hbm %s8758_s6, 32768 }
  0x57   :  { %s75_s15 = sshll.u32 %s8411_s13, 4  ;;  %p8327_p12 = scmp.ne.s32.totalorder %s8758_s6, %s8326_s3  ;;  %s76_s15 = int_to_ptr.vmem [resolvable:$true] %s75_s15 }
  0x58   :  { %p8330_p13 = scmp.lt.u32.totalorder %s8326_s3, %s8758_s6 }
  0x5a   :  { %p8332_p0 = pnand %p8330_p13, %p8327_p12 }
  0x5c   :  { %8335 = shalt.err (!%p8332_p0)
}
  0x5d   :  { %s8336_s20 = scalar_lea.vmem %s76_s15, 32768  ;;  %p8341_p2 = scmp.lt.s32.totalorder %s76_s15, %s76_s15 }
  0x5e   :  { %p8337_p1 = scmp.ne.s32.totalorder %s76_s15, %s8336_s20  ;;  %p8342_p3 = scmp.lt.s32.totalorder %s8336_s20, %s8336_s20 }
  0x60   :  { %p8343_p4 = por %p8342_p3, %p8341_p2 }
  0x62   :  { %p8344_p5 = pnand %p8343_p4, %p8337_p1 }
  0x64   :  { %8347 = shalt.err (!%p8344_p5)
}
  0x65   :  { %s8412_s4 = smov 512   ;;  %s8413_s23 = smov 32  }
  0x66   :  { %81 = dma.hbm_to_vmem [thread:$0]  %s8758_s6, 32768, %s76_s15, [#allocation8], %s8412_s4, %s8412_s4, %s8413_s23  }
  0x67   :  { %s8414_s28 = smov [#allocation12]   ;;  %s8348_s5 = scalar_lea.hbm %s8760_s8, 57344 }
  0x68   :  { %s97_s29 = sshll.u32 %s8414_s28, 4  ;;  %p8349_p6 = scmp.ne.s32.totalorder %s8760_s8, %s8348_s5  ;;  %s98_s29 = int_to_ptr.vmem [resolvable:$true] %s97_s29 }
  0x69   :  { %p8352_p7 = scmp.lt.u32.totalorder %s8348_s5, %s8760_s8 }
  0x6b   :  { %p8354_p8 = pnand %p8352_p7, %p8349_p6 }
  0x6d   :  { %8357 = shalt.err (!%p8354_p8)
}
  0x6e   :  { %s8358_s26 = scalar_lea.vmem %s98_s29, 57344  ;;  %p8363_p10 = scmp.lt.s32.totalorder %s98_s29, %s98_s29 }
  0x6f   :  { %p8359_p9 = scmp.ne.s32.totalorder %s98_s29, %s8358_s26  ;;  %p8364_p11 = scmp.lt.s32.totalorder %s8358_s26, %s8358_s26 }
  0x71   :  { %p8365_p12 = por %p8364_p11, %p8363_p10 }
  0x73   :  { %p8366_p13 = pnand %p8365_p12, %p8359_p9 }
  0x75   :  { %8369 = shalt.err (!%p8366_p13)
}
  0x76   :  { %s8415_s6 = smov 448   ;;  %s8416_s22 = smov 28  }
  0x77   :  { %103 = dma.hbm_to_vmem [thread:$0]  %s8760_s8, 57344, %s98_s29, [#allocation11], %s8415_s6, %s8415_s6, %s8416_s22  }
  0x78   :  { %s8417_s17 = smov [#allocation13]   ;;  %s8370_s19 = scalar_lea.hbm %s8761_s9, 112 }
  0x79   :  { %s110_s18 = sshll.u32 %s8417_s17, 4  ;;  %p8371_p0 = scmp.ne.s32.totalorder %s8761_s9, %s8370_s19  ;;  %s111_s18 = int_to_ptr.vmem [resolvable:$true] %s110_s18 }
  0x7a   :  { %p8374_p1 = scmp.lt.u32.totalorder %s8370_s19, %s8761_s9 }
  0x7c   :  { %p8376_p2 = pnand %p8374_p1, %p8371_p0 }
  0x7e   :  { %8379 = shalt.err (!%p8376_p2)
}
  0x7f   :  { %s8380_s23 = scalar_lea.vmem %s111_s18, 112  ;;  %s8384_s8 = scalar_lea.vmem %s111_s18, 128 }
  0x80   :  { %p8381_p3 = scmp.ne.s32.totalorder %s111_s18, %s8380_s23  ;;  %p8385_p4 = scmp.lt.s32.totalorder %s111_s18, %s111_s18 }
  0x81   :  { %p8386_p5 = scmp.lt.s32.totalorder %s8384_s8, %s8380_s23 }
  0x83   :  { %p8387_p6 = por %p8386_p5, %p8385_p4 }
  0x85   :  { %p8388_p7 = pnand %p8387_p6, %p8381_p3 }
  0x87   :  { %8391 = shalt.err (!%p8388_p7)
}
  0x88   :  { %113 = dma.hbm_to_vmem [thread:$0]  %s8761_s9, 112, %s111_s18, [#allocation14]  }
  0x89   :  { %8392 = dma.done.wait [#allocation3], 2048  }
  0x8a   :  { %8393 = vsyncadd [#allocation3], 4294965248 }
  0x8b   :  { %8394 = dma.done.wait [#allocation5], 10240  }
  0x8c   :  { %8395 = vsyncadd [#allocation5], 4294957056 }
  0x8d   :  { %8396 = dma.done.wait [#allocation8], 32832  }
  0x8e   :  { %8397 = vsyncadd [#allocation8], 4294934464 }
  0x8f   :  { %8398 = dma.done.wait [#allocation11], 57472  }
  0x90   :  { %8399 = vsyncadd [#allocation11], 4294909824 }
  0x91   :  { %8400 = dma.done.wait [#allocation14], 112  }
  0x92   :  { %8401 = vsyncadd [#allocation14], 4294967184  ;;  %v8418_v0 = vmov 0   ;;  %v140_v1 = vld [vmem:[%s8752_s0] sm:$0xff]  ;;  %v7421_v4 = vld [vmem:[#allocation4 + $0x14] ss:$8 sps:$4 sm:$0xff]  }
  0x93   :  { %7417 = vset.pattern.permute.xlu0 %v8418_v0  ;;  %296 = vmatprep.mubr.bf16.mxu0 %v8418_v0  ;;  %v7418_v2 = vld [vmem:[#allocation4 + $0x4] ss:$8 sps:$4 sm:$0xff]   ;;  %v7420_v3 = vld [vmem:[#allocation4] ss:$8 sps:$4 sm:$0xff]   ;;  %v7423_v5 = vld [vmem:[#allocation4 + $0x10] ss:$8 sps:$4 sm:$0xff]  }
  0x94   :  { %144 = vperm.xlu0 %7417, %v140_v1   ;;  %264 = vmatprep.subr.bf16.mxu0 %v7418_v2  ;;  %v7424_v6 = vld [vmem:[#allocation4 + $0x24] ss:$8 sps:$4 sm:$0xff]   ;;  %v7426_v7 = vld [vmem:[#allocation4 + $0x20] ss:$8 sps:$4 sm:$0xff]   ;;  %v7427_v8 = vld [vmem:[#allocation4 + $0x34] ss:$8 sps:$4 sm:$0xff]   ;;  %v141_v1 = vlaneseq }
  0x95   :  { %265 = vmatpush1.bf16.msra.mxu0 %v7420_v3  ;;  %v7429_v9 = vld [vmem:[#allocation4 + $0x30] ss:$8 sps:$4 sm:$0xff]   ;;  %v7430_v10 = vld [vmem:[#allocation4 + $0x44] ss:$8 sps:$4 sm:$0xff]   ;;  %v7432_v11 = vld [vmem:[#allocation4 + $0x40] ss:$8 sps:$4 sm:$0xff]  }
  0x96   :  { %266 = vmatprep.subr.bf16.mxu0 %v7421_v4  ;;  %v7433_v12 = vld [vmem:[#allocation4 + $0x54] ss:$8 sps:$4 sm:$0xff]   ;;  %v7435_v13 = vld [vmem:[#allocation4 + $0x50] ss:$8 sps:$4 sm:$0xff]   ;;  %v7436_v14 = vld [vmem:[#allocation4 + $0x64] ss:$8 sps:$4 sm:$0xff]  }
  0x97   :  { %v7466_v15 = vld [vmem:[#allocation6 + $0x4] ss:$16 sps:$4 sm:$0xff]   ;;  %v7438_v16 = vld [vmem:[#allocation4 + $0x60] ss:$8 sps:$4 sm:$0xff]   ;;  %v7441_v20 = vld [vmem:[#allocation4 + $0x70] ss:$8 sps:$4 sm:$0xff]  }
  0x98   :  { %v7439_v17 = vld [vmem:[#allocation4 + $0x74] ss:$8 sps:$4 sm:$0xff]   ;;  %840 = vmatprep.subr.bf16.mxu1 %v7466_v15  ;;  %v7471_v18 = vld [vmem:[#allocation6] ss:$16 sps:$4 sm:$0xff]   ;;  %v7444_v24 = vld [vmem:[#allocation2 + $0x4] ss:$8 sps:$4 sm:$0xff]  }
  0x99   :  { %267 = vmatpush1.bf16.msra.mxu0 %v7423_v5  ;;  %v7472_v19 = vld [vmem:[#allocation6 + $0x24] ss:$16 sps:$4 sm:$0xff]   ;;  %841 = vmatpush1.bf16.msra.mxu1 %v7471_v18  ;;  %v7477_v22 = vld [vmem:[#allocation6 + $0x20] ss:$16 sps:$4 sm:$0xff]   ;;  %v7470_v56 = vld [vmem:[#allocation6 + $0xc] ss:$16 sps:$4 sm:$0xff]  }
  0x9a   :  { %268 = vmatprep.subr.bf16.mxu0 %v7424_v6  ;;  %v166_v21 = vld [vmem:[%s8753_s1] sm:$0xff]  ;;  %842 = vmatprep.subr.bf16.mxu1 %v7472_v19  ;;  %v7447_v29 = vld [vmem:[#allocation2 + $0x14] ss:$8 sps:$4 sm:$0xff]   ;;  %v7445_v32 = vld [vmem:[#allocation2 + $0x10] ss:$8 sps:$4 sm:$0xff]   ;;  %v142_v2 = vand.u32 127, %v141_v1 }
  0x9b   :  { %v7478_v23 = vld [vmem:[#allocation6 + $0x44] ss:$16 sps:$4 sm:$0xff]   ;;  %v7483_v25 = vld [vmem:[#allocation6 + $0x40] ss:$16 sps:$4 sm:$0xff]   ;;  %v167_v26 = vpack.c.bf16 %v166_v21, %v166_v21  ;;  %v7468_v3 = vld [vmem:[#allocation6 + $0x8] ss:$16 sps:$4 sm:$0xff]  }
  0x9c   :  { %v7484_v27 = vld [vmem:[#allocation6 + $0x64] ss:$16 sps:$4 sm:$0xff]   ;;  %v7442_v28 = vld [vmem:[#allocation2] ss:$8 sps:$4 sm:$0xff]   ;;  %v7451_v40 = vld [vmem:[#allocation2 + $0x30] ss:$8 sps:$4 sm:$0xff]  }
  0x9d   :  { %269 = vmatpush1.bf16.msra.mxu0 %v7426_v7  ;;  %843 = vmatpush1.bf16.msra.mxu1 %v7477_v22  ;;  %v7489_v30 = vld [vmem:[#allocation6 + $0x60] ss:$16 sps:$4 sm:$0xff]   ;;  %v7490_v31 = vld [vmem:[#allocation6 + $0x84] ss:$16 sps:$4 sm:$0xff]   ;;  %v7476_v4 = vld [vmem:[#allocation6 + $0x2c] ss:$16 sps:$4 sm:$0xff]  }
  0x9e   :  { %270 = vmatprep.subr.bf16.mxu0 %v7427_v8  ;;  %844 = vmatprep.subr.bf16.mxu1 %v7478_v23  ;;  %v7450_v33 = vld [vmem:[#allocation2 + $0x24] ss:$8 sps:$4 sm:$0xff]   ;;  %v7495_v34 = vld [vmem:[#allocation6 + $0x80] ss:$16 sps:$4 sm:$0xff]   ;;  %v7453_v37 = vld [vmem:[#allocation2 + $0x34] ss:$8 sps:$4 sm:$0xff]  }
  0x9f   :  { %v7496_v35 = vld [vmem:[#allocation6 + $0xa4] ss:$16 sps:$4 sm:$0xff]   ;;  %v7448_v36 = vld [vmem:[#allocation2 + $0x20] ss:$8 sps:$4 sm:$0xff]   ;;  %v7457_v48 = vld [vmem:[#allocation2 + $0x50] ss:$8 sps:$4 sm:$0xff]  }
  0xa0   :  { %v7501_v38 = vld [vmem:[#allocation6 + $0xa0] ss:$16 sps:$4 sm:$0xff]   ;;  %v7502_v39 = vld [vmem:[#allocation6 + $0xc4] ss:$16 sps:$4 sm:$0xff]   ;;  %v7474_v6 = vld [vmem:[#allocation6 + $0x28] ss:$16 sps:$4 sm:$0xff]  }
  0xa1   :  { %271 = vmatpush1.bf16.msra.mxu0 %v7429_v9  ;;  %845 = vmatpush1.bf16.msra.mxu1 %v7483_v25  ;;  %v7456_v41 = vld [vmem:[#allocation2 + $0x44] ss:$8 sps:$4 sm:$0xff]   ;;  %v7507_v42 = vld [vmem:[#allocation6 + $0xc0] ss:$16 sps:$4 sm:$0xff]   ;;  %v7459_v45 = vld [vmem:[#allocation2 + $0x54] ss:$8 sps:$4 sm:$0xff]  }
  0xa2   :  { %272 = vmatprep.subr.bf16.mxu0 %v7430_v10  ;;  %846 = vmatprep.subr.bf16.mxu1 %v7484_v27  ;;  %v7508_v43 = vld [vmem:[#allocation6 + $0xe4] ss:$16 sps:$4 sm:$0xff]   ;;  %v7454_v44 = vld [vmem:[#allocation2 + $0x40] ss:$8 sps:$4 sm:$0xff]   ;;  %v7463_v54 = vld [vmem:[#allocation2 + $0x70] ss:$8 sps:$4 sm:$0xff]  }
  0xa3   :  { %v7513_v46 = vld [vmem:[#allocation6 + $0xe0] ss:$16 sps:$4 sm:$0xff]   ;;  %v7514_v47 = vld [vmem:[#allocation6 + $0x104] ss:$16 sps:$4 sm:$0xff]   ;;  %v8419_v7 = vmov 1.0|1.0  }
  0xa4   :  { %v7462_v49 = vld [vmem:[#allocation2 + $0x64] ss:$8 sps:$4 sm:$0xff]   ;;  %v7519_v50 = vld [vmem:[#allocation6 + $0x100] ss:$16 sps:$4 sm:$0xff]   ;;  %v7465_v53 = vld [vmem:[#allocation2 + $0x74] ss:$8 sps:$4 sm:$0xff]  }
  0xa5   :  { %273 = vmatpush1.bf16.msra.mxu0 %v7432_v11  ;;  %847 = vmatpush1.bf16.msra.mxu1 %v7489_v30  ;;  %v7520_v51 = vld [vmem:[#allocation6 + $0x124] ss:$16 sps:$4 sm:$0xff]   ;;  %v7460_v52 = vld [vmem:[#allocation2 + $0x60] ss:$8 sps:$4 sm:$0xff]   ;;  %v7482_v8 = vld [vmem:[#allocation6 + $0x4c] ss:$16 sps:$4 sm:$0xff]  }
  0xa6   :  { %274 = vmatprep.subr.bf16.mxu0 %v7433_v12  ;;  %848 = vmatprep.subr.bf16.mxu1 %v7490_v31  ;;  %v7525_v55 = vld [vmem:[#allocation6 + $0x120] ss:$16 sps:$4 sm:$0xff]   ;;  %v7526_v57 = vld [vmem:[#allocation6 + $0x144] ss:$16 sps:$4 sm:$0xff]   ;;  %v7480_v9 = vld [vmem:[#allocation6 + $0x48] ss:$16 sps:$4 sm:$0xff]  }
  0xa7   :  { %v7531_v58 = vld [vmem:[#allocation6 + $0x140] ss:$16 sps:$4 sm:$0xff]   ;;  %v7532_v59 = vld [vmem:[#allocation6 + $0x164] ss:$16 sps:$4 sm:$0xff]   ;;  %v7488_v10 = vld [vmem:[#allocation6 + $0x6c] ss:$16 sps:$4 sm:$0xff]  }
  0xa8   :  { %v7537_v60 = vld [vmem:[#allocation6 + $0x160] ss:$16 sps:$4 sm:$0xff]   ;;  %v7538_v61 = vld [vmem:[#allocation6 + $0x184] ss:$16 sps:$4 sm:$0xff]   ;;  %v7486_v11 = vld [vmem:[#allocation6 + $0x68] ss:$16 sps:$4 sm:$0xff]  }
  0xa9   :  { %275 = vmatpush1.bf16.msra.mxu0 %v7435_v13  ;;  %849 = vmatpush1.bf16.msra.mxu1 %v7495_v34  ;;  %v7543_v62 = vld [vmem:[#allocation6 + $0x180] ss:$16 sps:$4 sm:$0xff]   ;;  %v7544_v63 = vld [vmem:[#allocation6 + $0x1a4] ss:$16 sps:$4 sm:$0xff]   ;;  %v7494_v12 = vld [vmem:[#allocation6 + $0x8c] ss:$16 sps:$4 sm:$0xff]  }
  0xaa   :  { %276 = vmatprep.subr.bf16.mxu0 %v7436_v14  ;;  %850 = vmatprep.subr.bf16.mxu1 %v7496_v35  ;;  %v7492_v13 = vld [vmem:[#allocation6 + $0x88] ss:$16 sps:$4 sm:$0xff]   ;;  %v7500_v14 = vld [vmem:[#allocation6 + $0xac] ss:$16 sps:$4 sm:$0xff]   ;;  %v7555_v35 = vld [vmem:[#allocation6 + $0x1c0] ss:$16 sps:$4 sm:$0xff]  }
  0xab   :  { %v7498_v15 = vld [vmem:[#allocation6 + $0xa8] ss:$16 sps:$4 sm:$0xff]   ;;  %v7512_v18 = vld [vmem:[#allocation6 + $0xec] ss:$16 sps:$4 sm:$0xff]  }
  0xac   :  { %v7510_v19 = vld [vmem:[#allocation6 + $0xe8] ss:$16 sps:$4 sm:$0xff]   ;;  %v7524_v22 = vld [vmem:[#allocation6 + $0x12c] ss:$16 sps:$4 sm:$0xff]  }
  0xad   :  { %277 = vmatpush1.bf16.msra.mxu0 %v7438_v16  ;;  %851 = vmatpush1.bf16.msra.mxu1 %v7501_v38  ;;  %v7506_v16 = vld [vmem:[#allocation6 + $0xcc] ss:$16 sps:$4 sm:$0xff]   ;;  %v7516_v21 = vld [vmem:[#allocation6 + $0x108] ss:$16 sps:$4 sm:$0xff]  }
  0xae   :  { %278 = vmatprep.subr.bf16.mxu0 %v7439_v17  ;;  %852 = vmatprep.subr.bf16.mxu1 %v7502_v39  ;;  %v7504_v17 = vld [vmem:[#allocation6 + $0xc8] ss:$16 sps:$4 sm:$0xff]   ;;  %v7548_v30 = vld [vmem:[#allocation6 + $0x1ac] ss:$16 sps:$4 sm:$0xff]   ;;  %v7561_v39 = vld [vmem:[#allocation6 + $0x1e0] ss:$16 sps:$4 sm:$0xff]  }
  0xaf   :  { %v7522_v23 = vld [vmem:[#allocation6 + $0x128] ss:$16 sps:$4 sm:$0xff]  }
  0xb0   :  { %v7528_v25 = vld [vmem:[#allocation6 + $0x148] ss:$16 sps:$4 sm:$0xff]  }
  0xb1   :  { %279 = vmatpush1.bf16.msra.mxu0 %v7441_v20  ;;  %853 = vmatpush1.bf16.msra.mxu1 %v7507_v42  ;;  %v7518_v20 = vld [vmem:[#allocation6 + $0x10c] ss:$16 sps:$4 sm:$0xff]   ;;  %v7534_v27 = vld [vmem:[#allocation6 + $0x168] ss:$16 sps:$4 sm:$0xff]  }
  0xb2   :  { %385 = vmatprep.subr.bf16.mxu0 %v7444_v24  ;;  %854 = vmatprep.subr.bf16.mxu1 %v7508_v43  ;;  %v7530_v24 = vld [vmem:[#allocation6 + $0x14c] ss:$16 sps:$4 sm:$0xff]   ;;  %v7546_v31 = vld [vmem:[#allocation6 + $0x1a8] ss:$16 sps:$4 sm:$0xff]  }
  0xb3   :  { %v7552_v34 = vld [vmem:[#allocation6 + $0x1c8] ss:$16 sps:$4 sm:$0xff]   ;;  %v939_v42 = vld [vmem:[#allocation9 + $0x8] sm:$0xff] }
  0xb4   :  { %297 = vmatmul.mubr.bf16.vlgmr.msra.gmra.mrb[0].mxu0 %v167_v26  ;;  %v7536_v26 = vld [vmem:[#allocation6 + $0x16c] ss:$16 sps:$4 sm:$0xff]   ;;  %v7558_v38 = vld [vmem:[#allocation6 + $0x1e8] ss:$16 sps:$4 sm:$0xff]  }
  0xb5   :  { %386 = vmatpush1.bf16.msra.mxu0 %v7442_v28  ;;  %417 = vmatprep.mubr.bf16.mxu0 %v8418_v0  ;;  %v7549_v0 = vld [vmem:[#allocation6 + $0x1a0] ss:$16 sps:$4 sm:$0xff]   ;;  %v7542_v28 = vld [vmem:[#allocation6 + $0x18c] ss:$16 sps:$4 sm:$0xff]  }
  0xb6   :  { %387 = vmatprep.subr.bf16.mxu0 %v7447_v29  ;;  %855 = vmatpush1.bf16.msra.mxu1 %v7513_v46  ;;  %v7540_v29 = vld [vmem:[#allocation6 + $0x188] ss:$16 sps:$4 sm:$0xff]  }
  0xb7   :  { %856 = vmatprep.subr.bf16.mxu1 %v7514_v47 }
  0xb9   :  { %388 = vmatpush1.bf16.msra.mxu0 %v7445_v32  ;;  %v7550_v32 = vld [vmem:[#allocation6 + $0x1c4] ss:$16 sps:$4 sm:$0xff]  }
  0xba   :  { %389 = vmatprep.subr.bf16.mxu0 %v7450_v33  ;;  %857 = vmatpush1.bf16.msra.mxu1 %v7519_v50  ;;  %v7554_v33 = vld [vmem:[#allocation6 + $0x1cc] ss:$16 sps:$4 sm:$0xff]  }
  0xbb   :  { %858 = vmatprep.subr.bf16.mxu1 %v7520_v51 }
  0xbd   :  { %390 = vmatpush1.bf16.msra.mxu0 %v7448_v36  ;;  %v7556_v36 = vld [vmem:[#allocation6 + $0x1e4] ss:$16 sps:$4 sm:$0xff]  }
  0xbe   :  { %391 = vmatprep.subr.bf16.mxu0 %v7453_v37  ;;  %859 = vmatpush1.bf16.msra.mxu1 %v7525_v55  ;;  %v7560_v37 = vld [vmem:[#allocation6 + $0x1ec] ss:$16 sps:$4 sm:$0xff]  }
  0xbf   :  { %860 = vmatprep.subr.bf16.mxu1 %v7526_v57  ;;  %v947_v57 = vld [vmem:[#allocation9 + $0x48] sm:$0xff] }
  0xc1   :  { %392 = vmatpush1.bf16.msra.mxu0 %v7451_v40  ;;  %v938_v40 = vld [vmem:[#allocation9] sm:$0xff] }
  0xc2   :  { %393 = vmatprep.subr.bf16.mxu0 %v7456_v41  ;;  %861 = vmatpush1.bf16.msra.mxu1 %v7531_v58  ;;  %v942_v41 = vld [vmem:[#allocation9 + $0x20] sm:$0xff]  ;;  %v951_v58 = vld [vmem:[#allocation9 + $0x68] sm:$0xff] }
  0xc3   :  { %862 = vmatprep.subr.bf16.mxu1 %v7532_v59  ;;  %v6529_v43 = vcombine.low %v938_v40, %v942_v41 }
  0xc5   :  { %394 = vmatpush1.bf16.msra.mxu0 %v7454_v44  ;;  %v6530_v44 = vcombine.high %v938_v40, %v942_v41  ;;  %v994_v41 = vld [vmem:[#allocation9 + $0x1c0] sm:$0xff] }
  0xc6   :  { %395 = vmatprep.subr.bf16.mxu0 %v7459_v45  ;;  %863 = vmatpush1.bf16.msra.mxu1 %v7537_v60  ;;  %v943_v45 = vld [vmem:[#allocation9 + $0x28] sm:$0xff] }
  0xc7   :  { %864 = vmatprep.subr.bf16.mxu1 %v7538_v61  ;;  %v6531_v46 = vcombine.low %v939_v42, %v943_v45  ;;  %v6532_v47 = vcombine.high %v939_v42, %v943_v45  ;;  %v998_v42 = vld [vmem:[#allocation9 + $0x1e0] sm:$0xff] }
  0xc9   :  { %396 = vmatpush1.bf16.msra.mxu0 %v7457_v48 }
  0xca   :  { %397 = vmatprep.subr.bf16.mxu0 %v7462_v49  ;;  %865 = vmatpush1.bf16.msra.mxu1 %v7543_v62  ;;  %v6540_v62 = vcombine.high %v947_v57, %v951_v58 }
  0xcb   :  { %866 = vmatprep.subr.bf16.mxu1 %v7544_v63  ;;  %v954_v63 = vld [vmem:[#allocation9 + $0x80] sm:$0xff] }
  0xcd   :  { %398 = vmatpush1.bf16.msra.mxu0 %v7460_v52 }
  0xce   :  { %399 = vmatprep.subr.bf16.mxu0 %v7465_v53  ;;  %867 = vmatpush1.bf16.msra.mxu1 %v7549_v0  ;;  %v946_v53 = vld [vmem:[#allocation9 + $0x40] sm:$0xff] }
  0xcf   :  { %868 = vmatprep.subr.bf16.mxu1 %v7550_v32 }
  0xd1   :  { %400 = vmatpush1.bf16.msra.mxu0 %v7463_v54 }
  0xd2   :  { %881 = vmatprep.subr.bf16.mxu0 %v7470_v56  ;;  %869 = vmatpush1.bf16.msra.mxu1 %v7555_v35  ;;  %v950_v56 = vld [vmem:[#allocation9 + $0x60] sm:$0xff]  ;;  %v987_v35 = vld [vmem:[#allocation9 + $0x188] sm:$0xff] }
  0xd3   :  { %870 = vmatprep.subr.bf16.mxu1 %v7556_v36  ;;  %v6538_v61 = vcombine.high %v946_v53, %v950_v56  ;;  %v991_v36 = vld [vmem:[#allocation9 + $0x1a8] sm:$0xff] }
  0xd4   :  { %v6580_v40 = vcombine.high %v987_v35, %v991_v36 }
  0xd6   :  { %871 = vmatpush1.bf16.msra.mxu1 %v7561_v39 }
  0xd7   :  { %2516 = vmatprep.subr.bf16.mxu1 %v6530_v44  ;;  %v999_v44 = vld [vmem:[#allocation9 + $0x1e8] sm:$0xff] }
 0x113   :  { %v145_v5 = vpop.permute.xlu0 %144 }
 0x114   :  { %vm146_vm0 = vcmp.eq.s32.totalorder %v145_v5, %v142_v2  ;;  %v958_v2 = vld [vmem:[#allocation9 + $0xa0] sm:$0xff]  ;;  %v6537_v5 = vcombine.low %v946_v53, %v950_v56  ;;  %v6585_v53 = vcombine.low %v994_v41, %v998_v42 }
 0x115   :  { %vm6463_vm1 = vmpackc.low %vm146_vm0, %vm146_vm0 }
 0x116   :  { %6464 = vmatmul.mubr.msk.bf16.vlgmr.msra.gmra.mrb[0].mxu0 %vm6463_vm1, %v8419_v7  ;;  %v6546_v7 = vcombine.high %v954_v63, %v958_v2 }
 0x117   :  { %882 = vmatpush1.bf16.msra.mxu0 %v7468_v3  ;;  %v955_v3 = vld [vmem:[#allocation9 + $0x88] sm:$0xff] }
 0x118   :  { %883 = vmatprep.subr.bf16.mxu0 %v7476_v4  ;;  %v959_v4 = vld [vmem:[#allocation9 + $0xa8] sm:$0xff] }
 0x11b   :  { %884 = vmatpush1.bf16.msra.mxu0 %v7474_v6  ;;  %v6539_v6 = vcombine.low %v947_v57, %v951_v58  ;;  %v1010_v57 = vld [vmem:[#allocation9 + $0x240] sm:$0xff] }
 0x11c   :  { %885 = vmatprep.subr.bf16.mxu0 %v7482_v8  ;;  %v6548_v8 = vcombine.high %v955_v3, %v959_v4  ;;  %v1014_v58 = vld [vmem:[#allocation9 + $0x260] sm:$0xff] }
 0x11f   :  { %886 = vmatpush1.bf16.msra.mxu0 %v7480_v9  ;;  %v962_v9 = vld [vmem:[#allocation9 + $0xc0] sm:$0xff] }
 0x120   :  { %887 = vmatprep.subr.bf16.mxu0 %v7488_v10  ;;  %v966_v10 = vld [vmem:[#allocation9 + $0xe0] sm:$0xff] }
 0x123   :  { %888 = vmatpush1.bf16.msra.mxu0 %v7486_v11  ;;  %v963_v11 = vld [vmem:[#allocation9 + $0xc8] sm:$0xff] }
 0x124   :  { %889 = vmatprep.subr.bf16.mxu0 %v7494_v12  ;;  %v967_v12 = vld [vmem:[#allocation9 + $0xe8] sm:$0xff] }
 0x127   :  { %890 = vmatpush1.bf16.msra.mxu0 %v7492_v13  ;;  %v6545_v13 = vcombine.low %v954_v63, %v958_v2  ;;  %v6602_v63 = vcombine.high %v1010_v57, %v1014_v58  ;;  %v1018_v2 = vld [vmem:[#allocation9 + $0x280] sm:$0xff] }
 0x128   :  { %891 = vmatprep.subr.bf16.mxu0 %v7500_v14  ;;  %v6547_v14 = vcombine.low %v955_v3, %v959_v4  ;;  %v1022_v3 = vld [vmem:[#allocation9 + $0x2a0] sm:$0xff]  ;;  %v1019_v4 = vld [vmem:[#allocation9 + $0x288] sm:$0xff] }
 0x12b   :  { %892 = vmatpush1.bf16.msra.mxu0 %v7498_v15  ;;  %v6554_v15 = vcombine.high %v962_v9, %v966_v10 }
 0x12c   :  { %893 = vmatprep.subr.bf16.mxu0 %v7506_v16  ;;  %v6556_v16 = vcombine.high %v963_v11, %v967_v12 }
 0x12f   :  { %894 = vmatpush1.bf16.msra.mxu0 %v7504_v17  ;;  %v970_v17 = vld [vmem:[#allocation9 + $0x100] sm:$0xff] }
 0x130   :  { %895 = vmatprep.subr.bf16.mxu0 %v7512_v18  ;;  %v974_v18 = vld [vmem:[#allocation9 + $0x120] sm:$0xff] }
 0x133   :  { %896 = vmatpush1.bf16.msra.mxu0 %v7510_v19  ;;  %v971_v19 = vld [vmem:[#allocation9 + $0x108] sm:$0xff] }
 0x134   :  { %897 = vmatprep.subr.bf16.mxu0 %v7518_v20  ;;  %v975_v20 = vld [vmem:[#allocation9 + $0x128] sm:$0xff] }
 0x137   :  { %898 = vmatpush1.bf16.msra.mxu0 %v7516_v21  ;;  %v6553_v21 = vcombine.low %v962_v9, %v966_v10  ;;  %v1026_v10 = vld [vmem:[#allocation9 + $0x2c0] sm:$0xff] }
 0x138   :  { %899 = vmatprep.subr.bf16.mxu0 %v7524_v22  ;;  %v6555_v22 = vcombine.low %v963_v11, %v967_v12  ;;  %v1030_v11 = vld [vmem:[#allocation9 + $0x2e0] sm:$0xff]  ;;  %v1027_v12 = vld [vmem:[#allocation9 + $0x2c8] sm:$0xff] }
 0x13b   :  { %900 = vmatpush1.bf16.msra.mxu0 %v7522_v23  ;;  %v6562_v23 = vcombine.high %v970_v17, %v974_v18 }
 0x13c   :  { %901 = vmatprep.subr.bf16.mxu0 %v7530_v24  ;;  %v6564_v24 = vcombine.high %v971_v19, %v975_v20 }
 0x13f   :  { %902 = vmatpush1.bf16.msra.mxu0 %v7528_v25  ;;  %v978_v25 = vld [vmem:[#allocation9 + $0x140] sm:$0xff] }
 0x140   :  { %903 = vmatprep.subr.bf16.mxu0 %v7536_v26  ;;  %v982_v26 = vld [vmem:[#allocation9 + $0x160] sm:$0xff] }
 0x143   :  { %904 = vmatpush1.bf16.msra.mxu0 %v7534_v27  ;;  %v979_v27 = vld [vmem:[#allocation9 + $0x148] sm:$0xff] }
 0x144   :  { %905 = vmatprep.subr.bf16.mxu0 %v7542_v28  ;;  %v983_v28 = vld [vmem:[#allocation9 + $0x168] sm:$0xff] }
 0x145   :  { %v6572_v32 = vcombine.high %v979_v27, %v983_v28 }
 0x147   :  { %906 = vmatpush1.bf16.msra.mxu0 %v7540_v29  ;;  %v6561_v29 = vcombine.low %v970_v17, %v974_v18  ;;  %v1034_v18 = vld [vmem:[#allocation9 + $0x300] sm:$0xff] }
 0x148   :  { %907 = vmatprep.subr.bf16.mxu0 %v7548_v30  ;;  %v6563_v30 = vcombine.low %v971_v19, %v975_v20  ;;  %v1038_v19 = vld [vmem:[#allocation9 + $0x320] sm:$0xff]  ;;  %v1035_v20 = vld [vmem:[#allocation9 + $0x308] sm:$0xff] }
 0x14b   :  { %908 = vmatpush1.bf16.msra.mxu0 %v7546_v31  ;;  %v6570_v31 = vcombine.high %v978_v25, %v982_v26 }
 0x14c   :  { %909 = vmatprep.subr.bf16.mxu0 %v7554_v33  ;;  %v986_v33 = vld [vmem:[#allocation9 + $0x180] sm:$0xff] }
 0x14f   :  { %910 = vmatpush1.bf16.msra.mxu0 %v7552_v34  ;;  %v990_v34 = vld [vmem:[#allocation9 + $0x1a0] sm:$0xff] }
 0x150   :  { %911 = vmatprep.subr.bf16.mxu0 %v7560_v37  ;;  %v6569_v37 = vcombine.low %v978_v25, %v982_v26  ;;  %v6578_v39 = vcombine.high %v986_v33, %v990_v34  ;;  %v6577_v45 = vcombine.low %v986_v33, %v990_v34  ;;  %v1042_v26 = vld [vmem:[#allocation9 + $0x340] sm:$0xff] }
 0x153   :  { %912 = vmatpush1.bf16.msra.mxu0 %v7558_v38  ;;  %v6571_v38 = vcombine.low %v979_v27, %v983_v28  ;;  %v1046_v27 = vld [vmem:[#allocation9 + $0x360] sm:$0xff]  ;;  %v1043_v28 = vld [vmem:[#allocation9 + $0x348] sm:$0xff] }
 0x154   :  { %2598 = vmatprep.subr.bf16.mxu0 %v6532_v47  ;;  %v6586_v47 = vcombine.high %v994_v41, %v998_v42  ;;  %v6633_v34 = vcombine.low %v1042_v26, %v1046_v27 }
 0x1e9   :  { %v419_v48 = vpop.f32.mrb[0].mxu0 }
 0x1ea   :  { %v426_v49 = vpack.c.bf16 %v419_v48, %v419_v48  ;;  %v421_v50 = vpop.f32.mrb[1].mxu0 }
 0x1eb   :  { %v427_v51 = vpack.c.bf16 %v421_v50, %v421_v50  ;;  %v423_v52 = vpop.f32.mrb[2].mxu0  ;;  %v1006_v50 = vld [vmem:[#allocation9 + $0x220] sm:$0xff] }
 0x1ec   :  { %v430_v54 = vmul.bf16 1045249613, %v426_v49  ;;  %v424_v55 = vpop.f32.mrb[3].mxu0  ;;  %vm428_vm3 = vcmp.gt.bf16.partialorder %v426_v49, 0  ;;  %v1007_v52 = vld [vmem:[#allocation9 + $0x228] sm:$0xff] }
 0x1ed   :  { %vm429_vm2 = vcmp.gt.bf16.partialorder %v427_v51, 0  ;;  %v431_v59 = vmul.bf16 1045249613, %v427_v51 }
 0x1ee   :  { %v432_v0 = vsel %vm428_vm3, %v426_v49, %v430_v54  ;;  %v1002_v49 = vld [vmem:[#allocation9 + $0x200] sm:$0xff] }
 0x1ef   :  { %v433_v60 = vsel %vm429_vm2, %v427_v51, %v431_v59  ;;  %v1003_v51 = vld [vmem:[#allocation9 + $0x208] sm:$0xff]  ;;  %v6594_v55 = vcombine.high %v1002_v49, %v1006_v50 }
 0x1f0   :  { %872 = vmatprep.mubr.bf16.mxu1 %v433_v60  ;;  %913 = vmatprep.mubr.bf16.mxu0 %v433_v60  ;;  %v6596_v56 = vcombine.high %v1003_v51, %v1007_v52  ;;  %v1011_v59 = vld [vmem:[#allocation9 + $0x248] sm:$0xff] }
 0x1f1   :  { %873 = vmatmul.mubr.bf16.vlgmr.msra.gmra.mrb[0].mxu1 %v432_v0  ;;  %914 = vmatmul.mubr.bf16.vlgmr.msra.gmra.mrb[4].mxu0 %v432_v0  ;;  %v1015_v60 = vld [vmem:[#allocation9 + $0x268] sm:$0xff] }
 0x1f2   :  { %2517 = vmatpush1.bf16.msra.mxu1 %v6529_v43  ;;  %2599 = vmatpush1.bf16.msra.mxu0 %v6531_v46  ;;  %v995_v43 = vld [vmem:[#allocation9 + $0x1c8] sm:$0xff]  ;;  %v6579_v46 = vcombine.low %v987_v35, %v991_v36  ;;  %v6604_v0 = vcombine.high %v1011_v59, %v1015_v60  ;;  %v1050_v36 = vld [vmem:[#allocation9 + $0x380] sm:$0xff] }
 0x1f3   :  { %2518 = vmatprep.subr.bf16.mxu1 %v6538_v61  ;;  %2600 = vmatprep.subr.bf16.mxu0 %v6540_v62  ;;  %v6588_v48 = vcombine.high %v995_v43, %v999_v44  ;;  %v6587_v54 = vcombine.low %v995_v43, %v999_v44  ;;  %v6593_v61 = vcombine.low %v1002_v49, %v1006_v50  ;;  %v1058_v44 = vld [vmem:[#allocation9 + $0x3c0] sm:$0xff] }
 0x1f4   :  { %v6595_v62 = vcombine.low %v1003_v51, %v1007_v52  ;;  %v1066_v52 = vld [vmem:[#allocation9 + $0x400] sm:$0xff] }
 0x1f6   :  { %2519 = vmatpush1.bf16.msra.mxu1 %v6537_v5  ;;  %2601 = vmatpush1.bf16.msra.mxu0 %v6539_v6  ;;  %v1023_v5 = vld [vmem:[#allocation9 + $0x2a8] sm:$0xff]  ;;  %v6601_v6 = vcombine.low %v1010_v57, %v1014_v58 }
 0x1f7   :  { %2520 = vmatprep.subr.bf16.mxu1 %v6546_v7  ;;  %2602 = vmatprep.subr.bf16.mxu0 %v6548_v8  ;;  %v6603_v7 = vcombine.low %v1011_v59, %v1015_v60  ;;  %v6610_v8 = vcombine.high %v1018_v2, %v1022_v3  ;;  %v6612_v9 = vcombine.high %v1019_v4, %v1023_v5  ;;  %v8592_v60 = vshrl.u32 %v141_v1, 7 }
 0x1fa   :  { %2521 = vmatpush1.bf16.msra.mxu1 %v6545_v13  ;;  %2603 = vmatpush1.bf16.msra.mxu0 %v6547_v14  ;;  %v1031_v13 = vld [vmem:[#allocation9 + $0x2e8] sm:$0xff]  ;;  %v6609_v14 = vcombine.low %v1018_v2, %v1022_v3 }
 0x1fb   :  { %2522 = vmatprep.subr.bf16.mxu1 %v6554_v15  ;;  %2604 = vmatprep.subr.bf16.mxu0 %v6556_v16  ;;  %v6611_v15 = vcombine.low %v1019_v4, %v1023_v5  ;;  %v6618_v16 = vcombine.high %v1026_v10, %v1030_v11  ;;  %v6620_v17 = vcombine.high %v1027_v12, %v1031_v13 }
 0x1fe   :  { %2523 = vmatpush1.bf16.msra.mxu1 %v6553_v21  ;;  %2605 = vmatpush1.bf16.msra.mxu0 %v6555_v22  ;;  %v1039_v21 = vld [vmem:[#allocation9 + $0x328] sm:$0xff]  ;;  %v6617_v22 = vcombine.low %v1026_v10, %v1030_v11 }
 0x1ff   :  { %2524 = vmatprep.subr.bf16.mxu1 %v6562_v23  ;;  %2606 = vmatprep.subr.bf16.mxu0 %v6564_v24  ;;  %v6619_v23 = vcombine.low %v1027_v12, %v1031_v13  ;;  %v6626_v24 = vcombine.high %v1034_v18, %v1038_v19  ;;  %v6628_v25 = vcombine.high %v1035_v20, %v1039_v21 }
 0x202   :  { %2525 = vmatpush1.bf16.msra.mxu1 %v6561_v29  ;;  %2607 = vmatpush1.bf16.msra.mxu0 %v6563_v30  ;;  %v1047_v29 = vld [vmem:[#allocation9 + $0x368] sm:$0xff]  ;;  %v6625_v30 = vcombine.low %v1034_v18, %v1038_v19  ;;  %v1074_v19 = vld [vmem:[#allocation9 + $0x440] sm:$0xff] }
 0x203   :  { %2526 = vmatprep.subr.bf16.mxu1 %v6570_v31  ;;  %2608 = vmatprep.subr.bf16.mxu0 %v6572_v32  ;;  %v6627_v31 = vcombine.low %v1035_v20, %v1039_v21  ;;  %v6634_v32 = vcombine.high %v1042_v26, %v1046_v27  ;;  %v6636_v33 = vcombine.high %v1043_v28, %v1047_v29  ;;  %v1078_v20 = vld [vmem:[#allocation9 + $0x460] sm:$0xff] }
 0x204   :  { %v6635_v35 = vcombine.low %v1043_v28, %v1047_v29  ;;  %v1082_v26 = vld [vmem:[#allocation9 + $0x480] sm:$0xff]  ;;  %v6666_v28 = vcombine.high %v1074_v19, %v1078_v20 }
 0x206   :  { %2527 = vmatpush1.bf16.msra.mxu1 %v6569_v37  ;;  %2609 = vmatpush1.bf16.msra.mxu0 %v6571_v38  ;;  %v1054_v37 = vld [vmem:[#allocation9 + $0x3a0] sm:$0xff]  ;;  %v1051_v38 = vld [vmem:[#allocation9 + $0x388] sm:$0xff] }
 0x207   :  { %2528 = vmatprep.subr.bf16.mxu1 %v6578_v39  ;;  %2610 = vmatprep.subr.bf16.mxu0 %v6580_v40  ;;  %v6642_v39 = vcombine.high %v1050_v36, %v1054_v37  ;;  %v1055_v40 = vld [vmem:[#allocation9 + $0x3a8] sm:$0xff]  ;;  %v6641_v41 = vcombine.low %v1050_v36, %v1054_v37 }
 0x208   :  { %v6643_v42 = vcombine.low %v1051_v38, %v1055_v40  ;;  %v6644_v43 = vcombine.high %v1051_v38, %v1055_v40  ;;  %v1090_v38 = vld [vmem:[#allocation9 + $0x4c0] sm:$0xff]  ;;  %v1091_v40 = vld [vmem:[#allocation9 + $0x4c8] sm:$0xff] }
 0x20a   :  { %2529 = vmatpush1.bf16.msra.mxu1 %v6577_v45  ;;  %2611 = vmatpush1.bf16.msra.mxu0 %v6579_v46  ;;  %v1062_v45 = vld [vmem:[#allocation9 + $0x3e0] sm:$0xff]  ;;  %v1059_v46 = vld [vmem:[#allocation9 + $0x3c8] sm:$0xff] }
 0x20b   :  { %2530 = vmatprep.subr.bf16.mxu1 %v6586_v47  ;;  %2612 = vmatprep.subr.bf16.mxu0 %v6588_v48  ;;  %v6650_v47 = vcombine.high %v1058_v44, %v1062_v45  ;;  %v1063_v48 = vld [vmem:[#allocation9 + $0x3e8] sm:$0xff]  ;;  %v6649_v49 = vcombine.low %v1058_v44, %v1062_v45 }
 0x20c   :  { %v6651_v50 = vcombine.low %v1059_v46, %v1063_v48  ;;  %v6652_v51 = vcombine.high %v1059_v46, %v1063_v48  ;;  %v1098_v46 = vld [vmem:[#allocation9 + $0x500] sm:$0xff]  ;;  %v1099_v48 = vld [vmem:[#allocation9 + $0x508] sm:$0xff] }
 0x20e   :  { %2531 = vmatpush1.bf16.msra.mxu1 %v6585_v53  ;;  %2613 = vmatpush1.bf16.msra.mxu0 %v6587_v54  ;;  %v1070_v53 = vld [vmem:[#allocation9 + $0x420] sm:$0xff]  ;;  %v1067_v54 = vld [vmem:[#allocation9 + $0x408] sm:$0xff] }
 0x20f   :  { %2532 = vmatprep.subr.bf16.mxu1 %v6594_v55  ;;  %2614 = vmatprep.subr.bf16.mxu0 %v6596_v56  ;;  %v6658_v55 = vcombine.high %v1066_v52, %v1070_v53  ;;  %v1071_v56 = vld [vmem:[#allocation9 + $0x428] sm:$0xff]  ;;  %v6657_v57 = vcombine.low %v1066_v52, %v1070_v53 }
 0x210   :  { %v6659_v58 = vcombine.low %v1067_v54, %v1071_v56  ;;  %v6660_v59 = vcombine.high %v1067_v54, %v1071_v56  ;;  %v1106_v54 = vld [vmem:[#allocation9 + $0x540] sm:$0xff]  ;;  %v1107_v56 = vld [vmem:[#allocation9 + $0x548] sm:$0xff] }
 0x212   :  { %2533 = vmatpush1.bf16.msra.mxu1 %v6593_v61  ;;  %2615 = vmatpush1.bf16.msra.mxu0 %v6595_v62  ;;  %v8595_v61 = vsub.s32 0, %v8592_v60  ;;  %v8597_v62 = vld [vmem:[#allocation7] sm:$0xf] }
 0x213   :  { %2534 = vmatprep.subr.bf16.mxu1 %v6602_v63  ;;  %2616 = vmatprep.subr.bf16.mxu0 %v6604_v0  ;;  %v8600_v63 = vsub.s32 1, %v8592_v60  ;;  %v8603_v0 = vsub.s32 3, %v8592_v60 }
 0x214   :  { %v503_v2 = vrot.slane %v8597_v62, %v8595_v61 }
 0x215   :  { %v507_v3 = vrot.slane %v8597_v62, %v8600_v63  ;;  %v515_v1 = vrot.slane %v8597_v62, %v8603_v0 }
 0x216   :  { %2535 = vmatpush1.bf16.msra.mxu1 %v6601_v6  ;;  %2617 = vmatpush1.bf16.msra.mxu0 %v6603_v7 }
 0x217   :  { %2536 = vmatprep.subr.bf16.mxu1 %v6610_v8  ;;  %2618 = vmatprep.subr.bf16.mxu0 %v6612_v9 }
 0x21a   :  { %2537 = vmatpush1.bf16.msra.mxu1 %v6609_v14  ;;  %2619 = vmatpush1.bf16.msra.mxu0 %v6611_v15 }
 0x21b   :  { %2538 = vmatprep.subr.bf16.mxu1 %v6618_v16  ;;  %2620 = vmatprep.subr.bf16.mxu0 %v6620_v17 }
 0x21e   :  { %2539 = vmatpush1.bf16.msra.mxu1 %v6617_v22  ;;  %2621 = vmatpush1.bf16.msra.mxu0 %v6619_v23  ;;  %v1075_v22 = vld [vmem:[#allocation9 + $0x448] sm:$0xff] }
 0x21f   :  { %2540 = vmatprep.subr.bf16.mxu1 %v6626_v24  ;;  %2622 = vmatprep.subr.bf16.mxu0 %v6628_v25  ;;  %v1079_v23 = vld [vmem:[#allocation9 + $0x468] sm:$0xff] }
 0x220   :  { %v6668_v29 = vcombine.high %v1075_v22, %v1079_v23 }
 0x222   :  { %2541 = vmatpush1.bf16.msra.mxu1 %v6625_v30  ;;  %2623 = vmatpush1.bf16.msra.mxu0 %v6627_v31  ;;  %v1086_v30 = vld [vmem:[#allocation9 + $0x4a0] sm:$0xff]  ;;  %v1083_v31 = vld [vmem:[#allocation9 + $0x488] sm:$0xff] }
 0x223   :  { %2542 = vmatprep.subr.bf16.mxu1 %v6634_v32  ;;  %2624 = vmatprep.subr.bf16.mxu0 %v6636_v33  ;;  %v1087_v32 = vld [vmem:[#allocation9 + $0x4a8] sm:$0xff]  ;;  %v6674_v36 = vcombine.high %v1082_v26, %v1086_v30 }
 0x224   :  { %v6676_v37 = vcombine.high %v1083_v31, %v1087_v32 }
 0x226   :  { %2543 = vmatpush1.bf16.msra.mxu1 %v6633_v34  ;;  %2625 = vmatpush1.bf16.msra.mxu0 %v6635_v35  ;;  %v6665_v34 = vcombine.low %v1074_v19, %v1078_v20  ;;  %v6667_v35 = vcombine.low %v1075_v22, %v1079_v23  ;;  %v1130_v20 = vld [vmem:[#allocation9 + $0x600] sm:$0xff]  ;;  %v1131_v22 = vld [vmem:[#allocation9 + $0x608] sm:$0xff] }
 0x227   :  { %2544 = vmatprep.subr.bf16.mxu1 %v6642_v39  ;;  %2626 = vmatprep.subr.bf16.mxu0 %v6644_v43  ;;  %v1094_v39 = vld [vmem:[#allocation9 + $0x4e0] sm:$0xff]  ;;  %v6675_v43 = vcombine.low %v1083_v31, %v1087_v32  ;;  %v1135_v23 = vld [vmem:[#allocation9 + $0x628] sm:$0xff] }
 0x228   :  { %v6682_v44 = vcombine.high %v1090_v38, %v1094_v39  ;;  %v1142_v31 = vld [vmem:[#allocation9 + $0x660] sm:$0xff]  ;;  %v1139_v32 = vld [vmem:[#allocation9 + $0x648] sm:$0xff] }
 0x22a   :  { %2545 = vmatpush1.bf16.msra.mxu1 %v6641_v41  ;;  %2627 = vmatpush1.bf16.msra.mxu0 %v6643_v42  ;;  %v1095_v41 = vld [vmem:[#allocation9 + $0x4e8] sm:$0xff]  ;;  %v6673_v42 = vcombine.low %v1082_v26, %v1086_v30  ;;  %v1138_v30 = vld [vmem:[#allocation9 + $0x640] sm:$0xff] }
 0x22b   :  { %2546 = vmatprep.subr.bf16.mxu1 %v6650_v47  ;;  %2628 = vmatprep.subr.bf16.mxu0 %v6652_v51  ;;  %v6684_v45 = vcombine.high %v1091_v40, %v1095_v41  ;;  %v1102_v47 = vld [vmem:[#allocation9 + $0x520] sm:$0xff]  ;;  %v6683_v51 = vcombine.low %v1091_v40, %v1095_v41  ;;  %v1147_v41 = vld [vmem:[#allocation9 + $0x688] sm:$0xff] }
 0x22c   :  { %v6690_v52 = vcombine.high %v1098_v46, %v1102_v47  ;;  %v1150_v40 = vld [vmem:[#allocation9 + $0x6a0] sm:$0xff] }
 0x22e   :  { %2547 = vmatpush1.bf16.msra.mxu1 %v6649_v49  ;;  %2629 = vmatpush1.bf16.msra.mxu0 %v6651_v50  ;;  %v1103_v49 = vld [vmem:[#allocation9 + $0x528] sm:$0xff]  ;;  %v6681_v50 = vcombine.low %v1090_v38, %v1094_v39  ;;  %v1146_v39 = vld [vmem:[#allocation9 + $0x680] sm:$0xff] }
 0x22f   :  { %2557 = vmatprep.subr.bf16.mxu1 %v6658_v55  ;;  %2639 = vmatprep.subr.bf16.mxu0 %v6660_v59  ;;  %v6692_v53 = vcombine.high %v1099_v48, %v1103_v49  ;;  %v1110_v55 = vld [vmem:[#allocation9 + $0x560] sm:$0xff]  ;;  %v6691_v59 = vcombine.low %v1099_v48, %v1103_v49  ;;  %v1155_v49 = vld [vmem:[#allocation9 + $0x6c8] sm:$0xff] }
 0x230   :  { %v1158_v48 = vld [vmem:[#allocation9 + $0x6e0] sm:$0xff] }
 0x2c4   :  { %v874_v4 = vpop.f32.mrb[0].mxu1  ;;  %v8611_v5 = vpop.f32.mrb[4].mxu0 }
 0x2c5   :  { %v875_v6 = vadd.f32 %v874_v4, %v503_v2  ;;  %v876_v7 = vpop.f32.mrb[1].mxu1  ;;  %v917_v8 = vpop.f32.mrb[5].mxu0  ;;  %v6698_v2 = vcombine.high %v1106_v54, %v1110_v55  ;;  %v1118_v4 = vld [vmem:[#allocation9 + $0x5a0] sm:$0xff] }
 0x2c6   :  { %v877_v9 = vadd.f32 %v876_v7, %v507_v3  ;;  %v918_v10 = vadd.f32 %v917_v8, %v515_v1  ;;  %v878_v11 = vpop.f32.mrb[2].mxu1  ;;  %v919_v12 = vpop.f32.mrb[6].mxu0  ;;  %v1114_v1 = vld [vmem:[#allocation9 + $0x580] sm:$0xff]  ;;  %v1119_v7 = vld [vmem:[#allocation9 + $0x5a8] sm:$0xff]  ;;  %v6697_v8 = vcombine.low %v1106_v54, %v1110_v55 }
 0x2c7   :  { %v922_v13 = vpack.c.bf16 %v875_v6, %v875_v6  ;;  %v879_v14 = vpop.f32.mrb[3].mxu1  ;;  %v920_v15 = vpop.f32.mrb[7].mxu0  ;;  %v1115_v6 = vld [vmem:[#allocation9 + $0x588] sm:$0xff]  ;;  %v1122_v12 = vld [vmem:[#allocation9 + $0x5c0] sm:$0xff] }
 0x2c8   :  { %v923_v16 = vpack.c.bf16 %v877_v9, %v877_v9  ;;  %v925_v17 = vpack.c.bf16 %v918_v10, %v918_v10  ;;  %v6706_v10 = vcombine.high %v1114_v1, %v1118_v4  ;;  %v6708_v11 = vcombine.high %v1115_v6, %v1119_v7  ;;  %v1123_v14 = vld [vmem:[#allocation9 + $0x5c8] sm:$0xff]  ;;  %v1162_v55 = vld [vmem:[#allocation9 + $0x700] sm:$0xff] }
 0x2c9   :  { %v930_v18 = vmul.bf16 1045249613, %v922_v13  ;;  %vm926_vm4 = vcmp.gt.bf16.partialorder %v922_v13, 0  ;;  %v1127_v15 = vld [vmem:[#allocation9 + $0x5e8] sm:$0xff] }
 0x2ca   :  { %vm927_vm5 = vcmp.gt.bf16.partialorder %v923_v16, 0  ;;  %v931_v21 = vmul.bf16 1045249613, %v923_v16  ;;  %v933_v24 = vmul.bf16 1045249613, %v925_v17  ;;  %vm929_vm6 = vcmp.gt.bf16.partialorder %v925_v17, 0 }
 0x2cb   :  { %v8617_v27 = vsel %vm926_vm4, %v922_v13, %v930_v18  ;;  %v1126_v13 = vld [vmem:[#allocation9 + $0x5e0] sm:$0xff]  ;;  %v6716_v19 = vcombine.high %v1123_v14, %v1127_v15  ;;  %v6715_v26 = vcombine.low %v1123_v14, %v1127_v15 }
 0x2cc   :  { %v8613_v25 = vsel %vm927_vm5, %v923_v16, %v931_v21  ;;  %v8621_v33 = vsel %vm929_vm6, %v925_v17, %v933_v24  ;;  %v6705_v16 = vcombine.low %v1114_v1, %v1118_v4  ;;  %v6707_v17 = vcombine.low %v1115_v6, %v1119_v7  ;;  %v1134_v21 = vld [vmem:[#allocation9 + $0x620] sm:$0xff] }
 0x2cd   :  { %2548 = vmatprep.mubr.bf16.mxu1 %v8613_v25  ;;  %2630 = vmatprep.mubr.bf16.mxu0 %v8613_v25  ;;  %v6714_v18 = vcombine.high %v1122_v12, %v1126_v13  ;;  %v6713_v24 = vcombine.low %v1122_v12, %v1126_v13  ;;  %v1170_v4 = vld [vmem:[#allocation9 + $0x740] sm:$0xff]  ;;  %v8626_v6 = vsub.s32 2, %v8592_v60 }
 0x2ce   :  { %2549 = vmatmul.mubr.bf16.vlgmr.msra.gmra.mrb[4].mxu1 %v8617_v27  ;;  %2631 = vmatmul.mubr.bf16.vlgmr.msra.gmra.mrb[8].mxu0 %v8617_v27  ;;  %v1174_v7 = vld [vmem:[#allocation9 + $0x760] sm:$0xff] }
 0x2cf   :  { %2558 = vmatpush1.bf16.msra.mxu1 %v6657_v57  ;;  %2640 = vmatpush1.bf16.msra.mxu0 %v6659_v58  ;;  %v1111_v57 = vld [vmem:[#allocation9 + $0x568] sm:$0xff]  ;;  %v6689_v58 = vcombine.low %v1098_v46, %v1102_v47  ;;  %v1154_v47 = vld [vmem:[#allocation9 + $0x6c0] sm:$0xff]  ;;  %v6762_v12 = vcombine.high %v1170_v4, %v1174_v7  ;;  %v511_v15 = vrot.slane %v8597_v62, %v8626_v6 }
 0x2d0   :  { %2589 = vmatprep.mubr.bf16.mxu1 %v8621_v33  ;;  %2671 = vmatprep.mubr.bf16.mxu0 %v8621_v33  ;;  %v6700_v3 = vcombine.high %v1107_v56, %v1111_v57  ;;  %v6699_v9 = vcombine.low %v1107_v56, %v1111_v57  ;;  %v1166_v56 = vld [vmem:[#allocation9 + $0x720] sm:$0xff]  ;;  %v1163_v57 = vld [vmem:[#allocation9 + $0x708] sm:$0xff] }
 0x2d1   :  { %2559 = vmatprep.subr.bf16.mxu1 %v6666_v28  ;;  %2641 = vmatprep.subr.bf16.mxu0 %v6668_v29  ;;  %v6722_v28 = vcombine.high %v1130_v20, %v1134_v21  ;;  %v6724_v29 = vcombine.high %v1131_v22, %v1135_v23  ;;  %v1178_v14 = vld [vmem:[#allocation9 + $0x780] sm:$0xff] }
 0x2d3   :  { %2560 = vmatpush1.bf16.msra.mxu1 %v6665_v34  ;;  %2642 = vmatpush1.bf16.msra.mxu0 %v6667_v35  ;;  %v1143_v34 = vld [vmem:[#allocation9 + $0x668] sm:$0xff]  ;;  %v6721_v35 = vcombine.low %v1130_v20, %v1134_v21 }
 0x2d4   :  { %2561 = vmatprep.subr.bf16.mxu1 %v6674_v36  ;;  %2643 = vmatprep.subr.bf16.mxu0 %v6676_v37  ;;  %v6723_v36 = vcombine.low %v1131_v22, %v1135_v23  ;;  %v6730_v37 = vcombine.high %v1138_v30, %v1142_v31  ;;  %v6732_v38 = vcombine.high %v1139_v32, %v1143_v34  ;;  %v1186_v23 = vld [vmem:[#allocation9 + $0x7c0] sm:$0xff] }
 0x2d7   :  { %2562 = vmatpush1.bf16.msra.mxu1 %v6673_v42  ;;  %2644 = vmatpush1.bf16.msra.mxu0 %v6675_v43  ;;  %v1151_v42 = vld [vmem:[#allocation9 + $0x6a8] sm:$0xff]  ;;  %v6729_v43 = vcombine.low %v1138_v30, %v1142_v31 }
 0x2d8   :  { %2563 = vmatprep.subr.bf16.mxu1 %v6682_v44  ;;  %2645 = vmatprep.subr.bf16.mxu0 %v6684_v45  ;;  %v6731_v44 = vcombine.low %v1139_v32, %v1143_v34  ;;  %v6738_v45 = vcombine.high %v1146_v39, %v1150_v40  ;;  %v6740_v46 = vcombine.high %v1147_v41, %v1151_v42  ;;  %v940_v34 = vld [vmem:[#allocation9 + $0x10] sm:$0xff] }
 0x2db   :  { %2564 = vmatpush1.bf16.msra.mxu1 %v6681_v50  ;;  %2646 = vmatpush1.bf16.msra.mxu0 %v6683_v51  ;;  %v1159_v50 = vld [vmem:[#allocation9 + $0x6e8] sm:$0xff]  ;;  %v6737_v51 = vcombine.low %v1146_v39, %v1150_v40 }
 0x2dc   :  { %2565 = vmatprep.subr.bf16.mxu1 %v6690_v52  ;;  %2647 = vmatprep.subr.bf16.mxu0 %v6692_v53  ;;  %v6739_v52 = vcombine.low %v1147_v41, %v1151_v42  ;;  %v6746_v53 = vcombine.high %v1154_v47, %v1158_v48  ;;  %v6748_v54 = vcombine.high %v1155_v49, %v1159_v50 }
 0x2df   :  { %2566 = vmatpush1.bf16.msra.mxu1 %v6689_v58  ;;  %2648 = vmatpush1.bf16.msra.mxu0 %v6691_v59  ;;  %v1167_v58 = vld [vmem:[#allocation9 + $0x728] sm:$0xff]  ;;  %v6745_v59 = vcombine.low %v1154_v47, %v1158_v48 }
 0x2e0   :  { %2567 = vmatprep.subr.bf16.mxu1 %v6698_v2  ;;  %2649 = vmatprep.subr.bf16.mxu0 %v6700_v3  ;;  %v6747_v2 = vcombine.low %v1155_v49, %v1159_v50  ;;  %v6754_v3 = vcombine.high %v1162_v55, %v1166_v56  ;;  %v6756_v1 = vcombine.high %v1163_v57, %v1167_v58 }
 0x2e3   :  { %2568 = vmatpush1.bf16.msra.mxu1 %v6697_v8  ;;  %2650 = vmatpush1.bf16.msra.mxu0 %v6699_v9  ;;  %v1171_v8 = vld [vmem:[#allocation9 + $0x748] sm:$0xff] }
 0x2e4   :  { %2569 = vmatprep.subr.bf16.mxu1 %v6706_v10  ;;  %2651 = vmatprep.subr.bf16.mxu0 %v6708_v11  ;;  %v1175_v9 = vld [vmem:[#allocation9 + $0x768] sm:$0xff]  ;;  %v6753_v10 = vcombine.low %v1162_v55, %v1166_v56  ;;  %v6755_v11 = vcombine.low %v1163_v57, %v1167_v58  ;;  %v961_v55 = vld [vmem:[#allocation9 + $0xb8] sm:$0xff] }
 0x2e5   :  { %v6764_v13 = vcombine.high %v1171_v8, %v1175_v9  ;;  %v6763_v20 = vcombine.low %v1171_v8, %v1175_v9 }
 0x2e7   :  { %2570 = vmatpush1.bf16.msra.mxu1 %v6705_v16  ;;  %2652 = vmatpush1.bf16.msra.mxu0 %v6707_v17  ;;  %v1182_v16 = vld [vmem:[#allocation9 + $0x7a0] sm:$0xff]  ;;  %v1179_v17 = vld [vmem:[#allocation9 + $0x788] sm:$0xff] }
 0x2e8   :  { %2571 = vmatprep.subr.bf16.mxu1 %v6714_v18  ;;  %2653 = vmatprep.subr.bf16.mxu0 %v6716_v19  ;;  %v1183_v18 = vld [vmem:[#allocation9 + $0x7a8] sm:$0xff]  ;;  %v6761_v19 = vcombine.low %v1170_v4, %v1174_v7  ;;  %v6770_v21 = vcombine.high %v1178_v14, %v1182_v16  ;;  %v6769_v62 = vcombine.low %v1178_v14, %v1182_v16  ;;  %v969_v4 = vld [vmem:[#allocation9 + $0xf8] sm:$0xff] }
 0x2e9   :  { %v6772_v22 = vcombine.high %v1179_v17, %v1183_v18  ;;  %v6771_v30 = vcombine.low %v1179_v17, %v1183_v18  ;;  %v980_v18 = vld [vmem:[#allocation9 + $0x150] sm:$0xff] }
 0x2eb   :  { %2572 = vmatpush1.bf16.msra.mxu1 %v6713_v24  ;;  %2654 = vmatpush1.bf16.msra.mxu0 %v6715_v26  ;;  %v916_v24 = vadd.f32 %v8611_v5, %v511_v15  ;;  %v1190_v26 = vld [vmem:[#allocation9 + $0x7e0] sm:$0xff] }
 0x2ec   :  { %2573 = vmatprep.subr.bf16.mxu1 %v6722_v28  ;;  %2655 = vmatprep.subr.bf16.mxu0 %v6724_v29  ;;  %v1187_v28 = vld [vmem:[#allocation9 + $0x7c8] sm:$0xff]  ;;  %v6778_v31 = vcombine.high %v1186_v23, %v1190_v26  ;;  %v6777_v39 = vcombine.low %v1186_v23, %v1190_v26 }
 0x2ed   :  { %v1191_v29 = vld [vmem:[#allocation9 + $0x7e8] sm:$0xff] }
 0x2ee   :  { %v6780_v32 = vcombine.high %v1187_v28, %v1191_v29  ;;  %v6779_v5 = vcombine.low %v1187_v28, %v1191_v29  ;;  %v988_v28 = vld [vmem:[#allocation9 + $0x190] sm:$0xff] }
 0x2ef   :  { %2574 = vmatpush1.bf16.msra.mxu1 %v6721_v35  ;;  %2656 = vmatpush1.bf16.msra.mxu0 %v6723_v36  ;;  %v924_v35 = vpack.c.bf16 %v916_v24, %v916_v24  ;;  %v944_v36 = vld [vmem:[#allocation9 + $0x30] sm:$0xff] }
 0x2f0   :  { %2575 = vmatprep.subr.bf16.mxu1 %v6730_v37  ;;  %2657 = vmatprep.subr.bf16.mxu0 %v6732_v38  ;;  %v941_v37 = vld [vmem:[#allocation9 + $0x18] sm:$0xff]  ;;  %v6534_v40 = vcombine.high %v940_v34, %v944_v36  ;;  %v6533_v47 = vcombine.low %v940_v34, %v944_v36  ;;  %v992_v29 = vld [vmem:[#allocation9 + $0x1b0] sm:$0xff] }
 0x2f1   :  { %v945_v38 = vld [vmem:[#allocation9 + $0x38] sm:$0xff]  ;;  %v932_v42 = vmul.bf16 1045249613, %v924_v35  ;;  %vm928_vm7 = vcmp.gt.bf16.partialorder %v924_v35, 0  ;;  %v6582_v34 = vcombine.high %v988_v28, %v992_v29  ;;  %v996_v36 = vld [vmem:[#allocation9 + $0x1d0] sm:$0xff] }
 0x2f2   :  { %v6536_v41 = vcombine.high %v941_v37, %v945_v38  ;;  %v6535_v48 = vcombine.low %v941_v37, %v945_v38  ;;  %v1000_v37 = vld [vmem:[#allocation9 + $0x1f0] sm:$0xff]  ;;  %v997_v38 = vld [vmem:[#allocation9 + $0x1d8] sm:$0xff] }
 0x2f3   :  { %2576 = vmatpush1.bf16.msra.mxu1 %v6729_v43  ;;  %2658 = vmatpush1.bf16.msra.mxu0 %v6731_v44  ;;  %v948_v43 = vld [vmem:[#allocation9 + $0x50] sm:$0xff]  ;;  %v8631_v49 = vsel %vm928_vm7, %v924_v35, %v932_v42 }
 0x2f4   :  { %2577 = vmatprep.subr.bf16.mxu1 %v6738_v45  ;;  %2659 = vmatprep.subr.bf16.mxu0 %v6740_v46  ;;  %v952_v44 = vld [vmem:[#allocation9 + $0x70] sm:$0xff]  ;;  %v949_v45 = vld [vmem:[#allocation9 + $0x58] sm:$0xff] }
 0x2f5   :  { %v953_v46 = vld [vmem:[#allocation9 + $0x78] sm:$0xff]  ;;  %v6542_v50 = vcombine.high %v948_v43, %v952_v44  ;;  %v6541_v56 = vcombine.low %v948_v43, %v952_v44  ;;  %v1004_v43 = vld [vmem:[#allocation9 + $0x210] sm:$0xff] }
 0x2f6   :  { %v6543_v57 = vcombine.low %v949_v45, %v953_v46  ;;  %v1008_v44 = vld [vmem:[#allocation9 + $0x230] sm:$0xff] }
 0x2f7   :  { %2578 = vmatpush1.bf16.msra.mxu1 %v6737_v51  ;;  %2660 = vmatpush1.bf16.msra.mxu0 %v6739_v52  ;;  %v6544_v51 = vcombine.high %v949_v45, %v953_v46  ;;  %v956_v52 = vld [vmem:[#allocation9 + $0x90] sm:$0xff]  ;;  %v1005_v45 = vld [vmem:[#allocation9 + $0x218] sm:$0xff] }
 0x2f8   :  { %2579 = vmatprep.subr.bf16.mxu1 %v6746_v53  ;;  %2661 = vmatprep.subr.bf16.mxu0 %v6748_v54  ;;  %v960_v53 = vld [vmem:[#allocation9 + $0xb0] sm:$0xff]  ;;  %v957_v54 = vld [vmem:[#allocation9 + $0x98] sm:$0xff] }
 0x2f9   :  { %v6550_v58 = vcombine.high %v956_v52, %v960_v53  ;;  %v6549_v7 = vcombine.low %v956_v52, %v960_v53  ;;  %v6551_v8 = vcombine.low %v957_v54, %v961_v55  ;;  %v1009_v46 = vld [vmem:[#allocation9 + $0x238] sm:$0xff]  ;;  %v1012_v52 = vld [vmem:[#allocation9 + $0x250] sm:$0xff] }
 0x2fa   :  { %v1016_v53 = vld [vmem:[#allocation9 + $0x270] sm:$0xff] }
 0x2fb   :  { %2580 = vmatpush1.bf16.msra.mxu1 %v6745_v59  ;;  %2662 = vmatpush1.bf16.msra.mxu0 %v6747_v2  ;;  %v6552_v59 = vcombine.high %v957_v54, %v961_v55  ;;  %v964_v2 = vld [vmem:[#allocation9 + $0xd0] sm:$0xff]  ;;  %v1013_v54 = vld [vmem:[#allocation9 + $0x258] sm:$0xff] }
 0x2fc   :  { %2581 = vmatprep.subr.bf16.mxu1 %v6754_v3  ;;  %2663 = vmatprep.subr.bf16.mxu0 %v6756_v1  ;;  %v968_v3 = vld [vmem:[#allocation9 + $0xf0] sm:$0xff]  ;;  %v965_v1 = vld [vmem:[#allocation9 + $0xd8] sm:$0xff] }
 0x2fd   :  { %v6558_v9 = vcombine.high %v964_v2, %v968_v3  ;;  %v6557_v14 = vcombine.low %v964_v2, %v968_v3  ;;  %v6559_v15 = vcombine.low %v965_v1, %v969_v4  ;;  %v1017_v55 = vld [vmem:[#allocation9 + $0x278] sm:$0xff]  ;;  %v1020_v2 = vld [vmem:[#allocation9 + $0x290] sm:$0xff] }
 0x2fe   :  { %v1024_v3 = vld [vmem:[#allocation9 + $0x2b0] sm:$0xff] }
 0x2ff   :  { %2582 = vmatpush1.bf16.msra.mxu1 %v6753_v10  ;;  %2664 = vmatpush1.bf16.msra.mxu0 %v6755_v11  ;;  %v6560_v10 = vcombine.high %v965_v1, %v969_v4  ;;  %v972_v11 = vld [vmem:[#allocation9 + $0x110] sm:$0xff]  ;;  %v1021_v1 = vld [vmem:[#allocation9 + $0x298] sm:$0xff] }
 0x300   :  { %2583 = vmatprep.subr.bf16.mxu1 %v6762_v12  ;;  %2665 = vmatprep.subr.bf16.mxu0 %v6764_v13  ;;  %v976_v12 = vld [vmem:[#allocation9 + $0x130] sm:$0xff]  ;;  %v977_v13 = vld [vmem:[#allocation9 + $0x138] sm:$0xff] }
 0x301   :  { %v6566_v16 = vcombine.high %v972_v11, %v976_v12  ;;  %v1025_v4 = vld [vmem:[#allocation9 + $0x2b8] sm:$0xff] }
 0x303   :  { %2584 = vmatpush1.bf16.msra.mxu1 %v6761_v19  ;;  %2666 = vmatpush1.bf16.msra.mxu0 %v6763_v20  ;;  %v984_v19 = vld [vmem:[#allocation9 + $0x170] sm:$0xff]  ;;  %v981_v20 = vld [vmem:[#allocation9 + $0x158] sm:$0xff] }
 0x304   :  { %2585 = vmatprep.subr.bf16.mxu1 %v6770_v21  ;;  %2667 = vmatprep.subr.bf16.mxu0 %v6772_v22  ;;  %v985_v21 = vld [vmem:[#allocation9 + $0x178] sm:$0xff]  ;;  %v6565_v22 = vcombine.low %v972_v11, %v976_v12  ;;  %v6574_v24 = vcombine.high %v980_v18, %v984_v19  ;;  %v1028_v11 = vld [vmem:[#allocation9 + $0x2d0] sm:$0xff] }
 0x305   :  { %v6576_v26 = vcombine.high %v981_v20, %v985_v21  ;;  %v1032_v12 = vld [vmem:[#allocation9 + $0x2f0] sm:$0xff] }
 0x307   :  { %2586 = vmatpush1.bf16.msra.mxu1 %v6769_v62  ;;  %2668 = vmatpush1.bf16.msra.mxu0 %v6771_v30  ;;  %v989_v62 = vld [vmem:[#allocation9 + $0x198] sm:$0xff] }
 0x308   :  { %2587 = vmatprep.subr.bf16.mxu1 %v6778_v31  ;;  %2669 = vmatprep.subr.bf16.mxu0 %v6780_v32  ;;  %v993_v30 = vld [vmem:[#allocation9 + $0x1b8] sm:$0xff]  ;;  %v6573_v31 = vcombine.low %v980_v18, %v984_v19  ;;  %v6575_v32 = vcombine.low %v981_v20, %v985_v21  ;;  %v1036_v18 = vld [vmem:[#allocation9 + $0x310] sm:$0xff] }
 0x309   :  { %v6584_v35 = vcombine.high %v989_v62, %v993_v30  ;;  %v1040_v19 = vld [vmem:[#allocation9 + $0x330] sm:$0xff]  ;;  %v1037_v20 = vld [vmem:[#allocation9 + $0x318] sm:$0xff] }
 0x30a   :  { %v1041_v21 = vld [vmem:[#allocation9 + $0x338] sm:$0xff] }
 0x30b   :  { %2588 = vmatpush1.bf16.msra.mxu1 %v6777_v39  ;;  %2670 = vmatpush1.bf16.msra.mxu0 %v6779_v5  ;;  %v1001_v39 = vld [vmem:[#allocation9 + $0x1f8] sm:$0xff]  ;;  %v6581_v5 = vcombine.low %v988_v28, %v992_v29  ;;  %v1044_v28 = vld [vmem:[#allocation9 + $0x350] sm:$0xff] }
 0x30c   :  { %2680 = vmatprep.subr.bf16.mxu1 %v6534_v40  ;;  %2762 = vmatprep.subr.bf16.mxu0 %v6536_v41  ;;  %v6583_v40 = vcombine.low %v989_v62, %v993_v30  ;;  %v6590_v41 = vcombine.high %v996_v36, %v1000_v37  ;;  %v6592_v42 = vcombine.high %v997_v38, %v1001_v39  ;;  %v1048_v29 = vld [vmem:[#allocation9 + $0x370] sm:$0xff]  ;;  %v1045_v62 = vld [vmem:[#allocation9 + $0x358] sm:$0xff] }
 0x30d   :  { %v1049_v30 = vld [vmem:[#allocation9 + $0x378] sm:$0xff] }
 0x30e   :  { %2590 = vmatmul.mubr.bf16.vlgmr.msra.gmra.mrb[4].mxu1 %v8631_v49  ;;  %2672 = vmatmul.mubr.bf16.vlgmr.msra.gmra.mrb[8].mxu0 %v8631_v49 }
 0x30f   :  { %2681 = vmatpush1.bf16.msra.mxu1 %v6533_v47  ;;  %2712 = vmatprep.mubr.bf16.mxu1 %v8613_v25  ;;  %v6589_v47 = vcombine.low %v996_v36, %v1000_v37  ;;  %v1052_v36 = vld [vmem:[#allocation9 + $0x390] sm:$0xff] }
 0x310   :  { %2763 = vmatpush1.bf16.msra.mxu0 %v6535_v48  ;;  %2794 = vmatprep.mubr.bf16.mxu0 %v8613_v25  ;;  %v973_v25 = vld [vmem:[#allocation9 + $0x118] sm:$0xff]  ;;  %v6591_v48 = vcombine.low %v997_v38, %v1001_v39  ;;  %v1056_v37 = vld [vmem:[#allocation9 + $0x3b0] sm:$0xff] }
 0x311   :  { %2682 = vmatprep.subr.bf16.mxu1 %v6542_v50  ;;  %2764 = vmatprep.subr.bf16.mxu0 %v6544_v51  ;;  %v6568_v17 = vcombine.high %v973_v25, %v977_v13  ;;  %v6567_v23 = vcombine.low %v973_v25, %v977_v13  ;;  %v6598_v50 = vcombine.high %v1004_v43, %v1008_v44  ;;  %v1029_v25 = vld [vmem:[#allocation9 + $0x2d8] sm:$0xff] }
 0x312   :  { %v6600_v51 = vcombine.high %v1005_v45, %v1009_v46  ;;  %v1033_v13 = vld [vmem:[#allocation9 + $0x2f8] sm:$0xff] }
 0x313   :  { %2683 = vmatpush1.bf16.msra.mxu1 %v6541_v56  ;;  %v6597_v56 = vcombine.low %v1004_v43, %v1008_v44  ;;  %v1053_v38 = vld [vmem:[#allocation9 + $0x398] sm:$0xff]  ;;  %v1060_v43 = vld [vmem:[#allocation9 + $0x3d0] sm:$0xff] }
 0x314   :  { %2765 = vmatpush1.bf16.msra.mxu0 %v6543_v57  ;;  %2684 = vmatprep.subr.bf16.mxu1 %v6550_v58  ;;  %v6599_v57 = vcombine.low %v1005_v45, %v1009_v46  ;;  %v6606_v58 = vcombine.high %v1012_v52, %v1016_v53  ;;  %v1057_v39 = vld [vmem:[#allocation9 + $0x3b8] sm:$0xff]  ;;  %v1064_v44 = vld [vmem:[#allocation9 + $0x3f0] sm:$0xff] }
 0x315   :  { %2766 = vmatprep.subr.bf16.mxu0 %v6552_v59  ;;  %v6608_v59 = vcombine.high %v1013_v54, %v1017_v55  ;;  %v1061_v45 = vld [vmem:[#allocation9 + $0x3d8] sm:$0xff] }
 0x316   :  { %v1065_v46 = vld [vmem:[#allocation9 + $0x3f8] sm:$0xff] }
 0x317   :  { %2685 = vmatpush1.bf16.msra.mxu1 %v6549_v7  ;;  %v6605_v7 = vcombine.low %v1012_v52, %v1016_v53  ;;  %v1068_v52 = vld [vmem:[#allocation9 + $0x410] sm:$0xff] }
 0x318   :  { %2767 = vmatpush1.bf16.msra.mxu0 %v6551_v8  ;;  %2686 = vmatprep.subr.bf16.mxu1 %v6558_v9  ;;  %v6607_v8 = vcombine.low %v1013_v54, %v1017_v55  ;;  %v6614_v9 = vcombine.high %v1020_v2, %v1024_v3  ;;  %v1072_v53 = vld [vmem:[#allocation9 + $0x430] sm:$0xff]  ;;  %v1069_v54 = vld [vmem:[#allocation9 + $0x418] sm:$0xff] }
 0x319   :  { %2768 = vmatprep.subr.bf16.mxu0 %v6560_v10  ;;  %v6616_v10 = vcombine.high %v1021_v1, %v1025_v4  ;;  %v1073_v55 = vld [vmem:[#allocation9 + $0x438] sm:$0xff] }
 0x31b   :  { %2687 = vmatpush1.bf16.msra.mxu1 %v6557_v14  ;;  %v6613_v14 = vcombine.low %v1020_v2, %v1024_v3  ;;  %v1076_v2 = vld [vmem:[#allocation9 + $0x450] sm:$0xff] }
 0x31c   :  { %2769 = vmatpush1.bf16.msra.mxu0 %v6559_v15  ;;  %2688 = vmatprep.subr.bf16.mxu1 %v6566_v16  ;;  %v6615_v15 = vcombine.low %v1021_v1, %v1025_v4  ;;  %v6622_v16 = vcombine.high %v1028_v11, %v1032_v12  ;;  %v1080_v3 = vld [vmem:[#allocation9 + $0x470] sm:$0xff]  ;;  %v6661_v1 = vcombine.low %v1068_v52, %v1072_v53  ;;  %v1077_v4 = vld [vmem:[#allocation9 + $0x458] sm:$0xff] }
 0x31d   :  { %2770 = vmatprep.subr.bf16.mxu0 %v6568_v17  ;;  %v6624_v17 = vcombine.high %v1029_v25, %v1033_v13 }
 0x31f   :  { %2689 = vmatpush1.bf16.msra.mxu1 %v6565_v22  ;;  %v6621_v22 = vcombine.low %v1028_v11, %v1032_v12  ;;  %v1088_v11 = vld [vmem:[#allocation9 + $0x4b0] sm:$0xff] }
 0x320   :  { %2771 = vmatpush1.bf16.msra.mxu0 %v6567_v23  ;;  %2690 = vmatprep.subr.bf16.mxu1 %v6574_v24  ;;  %v6623_v23 = vcombine.low %v1029_v25, %v1033_v13  ;;  %v6630_v24 = vcombine.high %v1036_v18, %v1040_v19  ;;  %v1085_v25 = vld [vmem:[#allocation9 + $0x498] sm:$0xff] }
 0x321   :  { %2772 = vmatprep.subr.bf16.mxu0 %v6576_v26  ;;  %v6632_v26 = vcombine.high %v1037_v20, %v1041_v21  ;;  %v1089_v13 = vld [vmem:[#allocation9 + $0x4b8] sm:$0xff] }
 0x323   :  { %2691 = vmatpush1.bf16.msra.mxu1 %v6573_v31  ;;  %v6629_v31 = vcombine.low %v1036_v18, %v1040_v19  ;;  %v1092_v18 = vld [vmem:[#allocation9 + $0x4d0] sm:$0xff] }
 0x324   :  { %2773 = vmatpush1.bf16.msra.mxu0 %v6575_v32  ;;  %2692 = vmatprep.subr.bf16.mxu1 %v6582_v34  ;;  %v6631_v32 = vcombine.low %v1037_v20, %v1041_v21  ;;  %v6638_v34 = vcombine.high %v1044_v28, %v1048_v29  ;;  %v1096_v19 = vld [vmem:[#allocation9 + $0x4f0] sm:$0xff]  ;;  %v1093_v20 = vld [vmem:[#allocation9 + $0x4d8] sm:$0xff] }
 0x325   :  { %2774 = vmatprep.subr.bf16.mxu0 %v6584_v35  ;;  %v6640_v35 = vcombine.high %v1045_v62, %v1049_v30  ;;  %v1097_v21 = vld [vmem:[#allocation9 + $0x4f8] sm:$0xff] }
 0x327   :  { %2693 = vmatpush1.bf16.msra.mxu1 %v6581_v5  ;;  %v6637_v5 = vcombine.low %v1044_v28, %v1048_v29  ;;  %v1104_v28 = vld [vmem:[#allocation9 + $0x530] sm:$0xff]  ;;  %v1101_v29 = vld [vmem:[#allocation9 + $0x518] sm:$0xff] }
 0x328   :  { %2775 = vmatpush1.bf16.msra.mxu0 %v6583_v40  ;;  %2694 = vmatprep.subr.bf16.mxu1 %v6590_v41  ;;  %v6639_v40 = vcombine.low %v1045_v62, %v1049_v30  ;;  %v6646_v41 = vcombine.high %v1052_v36, %v1056_v37  ;;  %v1105_v62 = vld [vmem:[#allocation9 + $0x538] sm:$0xff]  ;;  %v6687_v30 = vcombine.low %v1093_v20, %v1097_v21 }
 0x329   :  { %2776 = vmatprep.subr.bf16.mxu0 %v6592_v42  ;;  %v6648_v42 = vcombine.high %v1053_v38, %v1057_v39 }
 0x32b   :  { %2695 = vmatpush1.bf16.msra.mxu1 %v6589_v47  ;;  %v6645_v47 = vcombine.low %v1052_v36, %v1056_v37  ;;  %v1109_v36 = vld [vmem:[#allocation9 + $0x558] sm:$0xff] }
 0x32c   :  { %2777 = vmatpush1.bf16.msra.mxu0 %v6591_v48  ;;  %2696 = vmatprep.subr.bf16.mxu1 %v6598_v50  ;;  %v6647_v48 = vcombine.low %v1053_v38, %v1057_v39  ;;  %v6654_v50 = vcombine.high %v1060_v43, %v1064_v44  ;;  %v1113_v37 = vld [vmem:[#allocation9 + $0x578] sm:$0xff]  ;;  %v6695_v39 = vcombine.low %v1101_v29, %v1105_v62 }
 0x32d   :  { %2778 = vmatprep.subr.bf16.mxu0 %v6600_v51  ;;  %v6656_v51 = vcombine.high %v1061_v45, %v1065_v46 }
 0x32f   :  { %2697 = vmatpush1.bf16.msra.mxu1 %v6597_v56  ;;  %v6653_v56 = vcombine.low %v1060_v43, %v1064_v44  ;;  %v1117_v43 = vld [vmem:[#allocation9 + $0x598] sm:$0xff] }
 0x330   :  { %2779 = vmatpush1.bf16.msra.mxu0 %v6599_v57  ;;  %2698 = vmatprep.subr.bf16.mxu1 %v6606_v58  ;;  %v6655_v57 = vcombine.low %v1061_v45, %v1065_v46  ;;  %v6662_v58 = vcombine.high %v1068_v52, %v1072_v53  ;;  %v1121_v44 = vld [vmem:[#allocation9 + $0x5b8] sm:$0xff]  ;;  %v6703_v46 = vcombine.low %v1109_v36, %v1113_v37 }
 0x331   :  { %2780 = vmatprep.subr.bf16.mxu0 %v6608_v59  ;;  %v6664_v59 = vcombine.high %v1069_v54, %v1073_v55  ;;  %v1125_v52 = vld [vmem:[#allocation9 + $0x5d8] sm:$0xff] }
 0x332   :  { %v1129_v53 = vld [vmem:[#allocation9 + $0x5f8] sm:$0xff] }
 0x333   :  { %2699 = vmatpush1.bf16.msra.mxu1 %v6605_v7  ;;  %v1081_v7 = vld [vmem:[#allocation9 + $0x478] sm:$0xff] }
 0x334   :  { %2781 = vmatpush1.bf16.msra.mxu0 %v6607_v8  ;;  %2700 = vmatprep.subr.bf16.mxu1 %v6614_v9  ;;  %v6663_v8 = vcombine.low %v1069_v54, %v1073_v55  ;;  %v6670_v9 = vcombine.high %v1076_v2, %v1080_v3  ;;  %v6672_v12 = vcombine.high %v1077_v4, %v1081_v7 }
 0x335   :  { %2782 = vmatprep.subr.bf16.mxu0 %v6616_v10  ;;  %v1084_v10 = vld [vmem:[#allocation9 + $0x490] sm:$0xff]  ;;  %v6711_v55 = vcombine.low %v1117_v43, %v1121_v44 }
 0x337   :  { %2701 = vmatpush1.bf16.msra.mxu1 %v6613_v14  ;;  %v6669_v14 = vcombine.low %v1076_v2, %v1080_v3  ;;  %v1133_v2 = vld [vmem:[#allocation9 + $0x618] sm:$0xff] }
 0x338   :  { %2783 = vmatpush1.bf16.msra.mxu0 %v6615_v15  ;;  %2702 = vmatprep.subr.bf16.mxu1 %v6622_v16  ;;  %v6671_v15 = vcombine.low %v1077_v4, %v1081_v7  ;;  %v6678_v16 = vcombine.high %v1084_v10, %v1088_v11  ;;  %v1137_v3 = vld [vmem:[#allocation9 + $0x638] sm:$0xff]  ;;  %v6719_v4 = vcombine.low %v1125_v52, %v1129_v53 }
 0x339   :  { %2784 = vmatprep.subr.bf16.mxu0 %v6624_v17  ;;  %v6680_v17 = vcombine.high %v1085_v25, %v1089_v13 }
 0x33b   :  { %2703 = vmatpush1.bf16.msra.mxu1 %v6621_v22  ;;  %v6677_v22 = vcombine.low %v1084_v10, %v1088_v11  ;;  %v1144_v10 = vld [vmem:[#allocation9 + $0x670] sm:$0xff]  ;;  %v1141_v11 = vld [vmem:[#allocation9 + $0x658] sm:$0xff] }
 0x33c   :  { %2785 = vmatpush1.bf16.msra.mxu0 %v6623_v23  ;;  %2704 = vmatprep.subr.bf16.mxu1 %v6630_v24  ;;  %v6686_v23 = vcombine.high %v1092_v18, %v1096_v19  ;;  %v6688_v24 = vcombine.high %v1093_v20, %v1097_v21 }
 0x33d   :  { %2786 = vmatprep.subr.bf16.mxu0 %v6632_v26  ;;  %v1100_v26 = vld [vmem:[#allocation9 + $0x510] sm:$0xff] }
 0x33e   :  { %v6693_v38 = vcombine.low %v1100_v26, %v1104_v28 }
 0x33f   :  { %2705 = vmatpush1.bf16.msra.mxu1 %v6629_v31  ;;  %v6694_v31 = vcombine.high %v1100_v26, %v1104_v28  ;;  %v1157_v26 = vld [vmem:[#allocation9 + $0x6d8] sm:$0xff] }
 0x340   :  { %2787 = vmatpush1.bf16.msra.mxu0 %v6631_v32  ;;  %2706 = vmatprep.subr.bf16.mxu1 %v6638_v34  ;;  %v6696_v32 = vcombine.high %v1101_v29, %v1105_v62  ;;  %v1108_v34 = vld [vmem:[#allocation9 + $0x550] sm:$0xff]  ;;  %v1161_v28 = vld [vmem:[#allocation9 + $0x6f8] sm:$0xff] }
 0x341   :  { %2788 = vmatprep.subr.bf16.mxu0 %v6640_v35  ;;  %v1112_v35 = vld [vmem:[#allocation9 + $0x570] sm:$0xff] }
 0x342   :  { %v6701_v45 = vcombine.low %v1108_v34, %v1112_v35 }
 0x343   :  { %2707 = vmatpush1.bf16.msra.mxu1 %v6637_v5  ;;  %v6702_v5 = vcombine.high %v1108_v34, %v1112_v35  ;;  %v1165_v34 = vld [vmem:[#allocation9 + $0x718] sm:$0xff] }
 0x344   :  { %2789 = vmatpush1.bf16.msra.mxu0 %v6639_v40  ;;  %2708 = vmatprep.subr.bf16.mxu1 %v6646_v41  ;;  %v6704_v40 = vcombine.high %v1109_v36, %v1113_v37  ;;  %v1116_v41 = vld [vmem:[#allocation9 + $0x590] sm:$0xff]  ;;  %v1169_v35 = vld [vmem:[#allocation9 + $0x738] sm:$0xff]  ;;  %v6751_v37 = vcombine.low %v1157_v26, %v1161_v28 }
 0x345   :  { %2790 = vmatprep.subr.bf16.mxu0 %v6648_v42  ;;  %v1120_v42 = vld [vmem:[#allocation9 + $0x5b0] sm:$0xff] }
 0x346   :  { %v6709_v54 = vcombine.low %v1116_v41, %v1120_v42 }
 0x347   :  { %2709 = vmatpush1.bf16.msra.mxu1 %v6645_v47  ;;  %v6710_v47 = vcombine.high %v1116_v41, %v1120_v42  ;;  %v1173_v41 = vld [vmem:[#allocation9 + $0x758] sm:$0xff] }
 0x348   :  { %2791 = vmatpush1.bf16.msra.mxu0 %v6647_v48  ;;  %2710 = vmatprep.subr.bf16.mxu1 %v6654_v50  ;;  %v6712_v48 = vcombine.high %v1117_v43, %v1121_v44  ;;  %v1124_v50 = vld [vmem:[#allocation9 + $0x5d0] sm:$0xff]  ;;  %v1177_v42 = vld [vmem:[#allocation9 + $0x778] sm:$0xff]  ;;  %v6759_v44 = vcombine.low %v1165_v34, %v1169_v35 }
 0x349   :  { %2792 = vmatprep.subr.bf16.mxu0 %v6656_v51  ;;  %v1128_v51 = vld [vmem:[#allocation9 + $0x5f0] sm:$0xff] }
 0x34b   :  { %2711 = vmatpush1.bf16.msra.mxu1 %v6653_v56  ;;  %v6718_v56 = vcombine.high %v1124_v50, %v1128_v51 }
 0x34c   :  { %2793 = vmatpush1.bf16.msra.mxu0 %v6655_v57  ;;  %2721 = vmatprep.subr.bf16.mxu1 %v6662_v58  ;;  %v6720_v57 = vcombine.high %v1125_v52, %v1129_v53  ;;  %v1132_v58 = vld [vmem:[#allocation9 + $0x610] sm:$0xff]  ;;  %v6767_v53 = vcombine.low %v1173_v41, %v1177_v42 }
 0x34d   :  { %2803 = vmatprep.subr.bf16.mxu0 %v6664_v59  ;;  %v1136_v59 = vld [vmem:[#allocation9 + $0x630] sm:$0xff] }
 0x34e   :  { %2713 = vmatmul.mubr.bf16.vlgmr.msra.gmra.mrb[8].mxu1 %v8617_v27  ;;  %v6726_v7 = vcombine.high %v1132_v58, %v1136_v59 }
 0x34f   :  { %2795 = vmatmul.mubr.bf16.vlgmr.msra.gmra.mrb[12].mxu0 %v8617_v27  ;;  %2722 = vmatpush1.bf16.msra.mxu1 %v6661_v1  ;;  %v6679_v27 = vcombine.low %v1085_v25, %v1089_v13  ;;  %v6717_v1 = vcombine.low %v1124_v50, %v1128_v51  ;;  %v6725_v25 = vcombine.low %v1132_v58, %v1136_v59  ;;  %v1181_v50 = vld [vmem:[#allocation9 + $0x798] sm:$0xff] }
 0x350   :  { %2753 = vmatprep.mubr.bf16.mxu1 %v8621_v33  ;;  %2804 = vmatpush1.bf16.msra.mxu0 %v6663_v8  ;;  %v6728_v8 = vcombine.high %v1133_v2, %v1137_v3  ;;  %v6727_v13 = vcombine.low %v1133_v2, %v1137_v3  ;;  %v1185_v51 = vld [vmem:[#allocation9 + $0x7b8] sm:$0xff] }
 0x351   :  { %2835 = vmatprep.mubr.bf16.mxu0 %v8621_v33  ;;  %2723 = vmatprep.subr.bf16.mxu1 %v6670_v9  ;;  %v6685_v33 = vcombine.low %v1092_v18, %v1096_v19  ;;  %v1140_v9 = vld [vmem:[#allocation9 + $0x650] sm:$0xff]  ;;  %v1149_v18 = vld [vmem:[#allocation9 + $0x698] sm:$0xff]  ;;  %v6775_v3 = vcombine.low %v1181_v50, %v1185_v51 }
 0x352   :  { %2805 = vmatprep.subr.bf16.mxu0 %v6672_v12  ;;  %v1145_v12 = vld [vmem:[#allocation9 + $0x678] sm:$0xff]  ;;  %v6733_v20 = vcombine.low %v1140_v9, %v1144_v10 }
 0x353   :  { %2724 = vmatpush1.bf16.msra.mxu1 %v6669_v14  ;;  %v6734_v14 = vcombine.high %v1140_v9, %v1144_v10  ;;  %v1153_v19 = vld [vmem:[#allocation9 + $0x6b8] sm:$0xff]  ;;  %v6735_v21 = vcombine.low %v1141_v11, %v1145_v12  ;;  %v7564_v9 = vld [vmem:[#allocation12 + $0x4] ss:$28 sps:$4 sm:$0xff]   ;;  %v7567_v10 = vld [vmem:[#allocation12 + $0xc] ss:$28 sps:$4 sm:$0xff]  }
 0x354   :  { %2806 = vmatpush1.bf16.msra.mxu0 %v6671_v15  ;;  %2725 = vmatprep.subr.bf16.mxu1 %v6678_v16  ;;  %v6736_v15 = vcombine.high %v1141_v11, %v1145_v12  ;;  %v1148_v16 = vld [vmem:[#allocation9 + $0x690] sm:$0xff]  ;;  %v6743_v62 = vcombine.low %v1149_v18, %v1153_v19  ;;  %v1189_v58 = vld [vmem:[#allocation9 + $0x7d8] sm:$0xff]  ;;  %v7562_v11 = vld [vmem:[#allocation12] ss:$28 sps:$4 sm:$0xff]  }
 0x355   :  { %2807 = vmatprep.subr.bf16.mxu0 %v6680_v17  ;;  %v1152_v17 = vld [vmem:[#allocation9 + $0x6b0] sm:$0xff]  ;;  %v1193_v59 = vld [vmem:[#allocation9 + $0x7f8] sm:$0xff] }
 0x356   :  { %v6741_v29 = vcombine.low %v1148_v16, %v1152_v17  ;;  %v7565_v12 = vld [vmem:[#allocation12 + $0x8] ss:$28 sps:$4 sm:$0xff]  }
 0x357   :  { %2726 = vmatpush1.bf16.msra.mxu1 %v6677_v22  ;;  %v6742_v22 = vcombine.high %v1148_v16, %v1152_v17  ;;  %v7576_v16 = vld [vmem:[#allocation12 + $0x74] ss:$28 sps:$4 sm:$0xff]   ;;  %v7579_v17 = vld [vmem:[#allocation12 + $0x7c] ss:$28 sps:$4 sm:$0xff]  }
 0x358   :  { %2808 = vmatpush1.bf16.msra.mxu0 %v6679_v27  ;;  %2727 = vmatprep.subr.bf16.mxu1 %v6686_v23  ;;  %v6744_v27 = vcombine.high %v1149_v18, %v1153_v19  ;;  %v1156_v23 = vld [vmem:[#allocation9 + $0x6d0] sm:$0xff]  ;;  %v7577_v19 = vld [vmem:[#allocation12 + $0x78] ss:$28 sps:$4 sm:$0xff]  }
 0x359   :  { %2809 = vmatprep.subr.bf16.mxu0 %v6688_v24  ;;  %v1160_v24 = vld [vmem:[#allocation9 + $0x6f0] sm:$0xff] }
 0x35a   :  { %v6749_v36 = vcombine.low %v1156_v23, %v1160_v24  ;;  %v7574_v18 = vld [vmem:[#allocation12 + $0x70] ss:$28 sps:$4 sm:$0xff]  }
 0x35b   :  { %2728 = vmatpush1.bf16.msra.mxu1 %v6685_v33  ;;  %v6750_v33 = vcombine.high %v1156_v23, %v1160_v24  ;;  %v7591_v23 = vld [vmem:[#allocation12 + $0xec] ss:$28 sps:$4 sm:$0xff]   ;;  %v7586_v24 = vld [vmem:[#allocation12 + $0xe0] ss:$28 sps:$4 sm:$0xff]  }
 0x35c   :  { %2810 = vmatpush1.bf16.msra.mxu0 %v6687_v30  ;;  %2729 = vmatprep.subr.bf16.mxu1 %v6694_v31  ;;  %v6752_v30 = vcombine.high %v1157_v26, %v1161_v28  ;;  %v1164_v31 = vld [vmem:[#allocation9 + $0x710] sm:$0xff]  ;;  %v7594_v28 = vld [vmem:[#allocation12 + $0x11c] ss:$28 sps:$4 sm:$0xff]  }
 0x35d   :  { %2811 = vmatprep.subr.bf16.mxu0 %v6696_v32  ;;  %v1168_v32 = vld [vmem:[#allocation9 + $0x730] sm:$0xff] }
 0x35e   :  { %v6757_v43 = vcombine.low %v1164_v31, %v1168_v32  ;;  %v7589_v26 = vld [vmem:[#allocation12 + $0xe8] ss:$28 sps:$4 sm:$0xff]  }
 0x35f   :  { %2730 = vmatpush1.bf16.msra.mxu1 %v6693_v38  ;;  %v6758_v38 = vcombine.high %v1164_v31, %v1168_v32  ;;  %v7603_v31 = vld [vmem:[#allocation12 + $0x15c] ss:$28 sps:$4 sm:$0xff]   ;;  %v7598_v32 = vld [vmem:[#allocation12 + $0x150] ss:$28 sps:$4 sm:$0xff]  }
 0x360   :  { %2812 = vmatpush1.bf16.msra.mxu0 %v6695_v39  ;;  %2731 = vmatprep.subr.bf16.mxu1 %v6702_v5  ;;  %v6760_v39 = vcombine.high %v1165_v34, %v1169_v35  ;;  %v1172_v5 = vld [vmem:[#allocation9 + $0x750] sm:$0xff]  ;;  %v7601_v34 = vld [vmem:[#allocation12 + $0x158] ss:$28 sps:$4 sm:$0xff]  }
 0x361   :  { %2813 = vmatprep.subr.bf16.mxu0 %v6704_v40  ;;  %v1176_v40 = vld [vmem:[#allocation9 + $0x770] sm:$0xff] }
 0x362   :  { %v6765_v52 = vcombine.low %v1172_v5, %v1176_v40  ;;  %v7606_v35 = vld [vmem:[#allocation12 + $0x18c] ss:$28 sps:$4 sm:$0xff]  }
 0x363   :  { %2732 = vmatpush1.bf16.msra.mxu1 %v6701_v45  ;;  %v6766_v45 = vcombine.high %v1172_v5, %v1176_v40  ;;  %v7615_v5 = vld [vmem:[#allocation12 + $0x1cc] ss:$28 sps:$4 sm:$0xff]   ;;  %v7610_v40 = vld [vmem:[#allocation12 + $0x1c0] ss:$28 sps:$4 sm:$0xff]  }
 0x364   :  { %2814 = vmatpush1.bf16.msra.mxu0 %v6703_v46  ;;  %2733 = vmatprep.subr.bf16.mxu1 %v6710_v47  ;;  %v6768_v46 = vcombine.high %v1173_v41, %v1177_v42  ;;  %v1180_v47 = vld [vmem:[#allocation9 + $0x790] sm:$0xff]  ;;  %v7618_v42 = vld [vmem:[#allocation12 + $0x1fc] ss:$28 sps:$4 sm:$0xff]  }
 0x365   :  { %2815 = vmatprep.subr.bf16.mxu0 %v6712_v48  ;;  %v1184_v48 = vld [vmem:[#allocation9 + $0x7b0] sm:$0xff] }
 0x366   :  { %v6773_v2 = vcombine.low %v1180_v47, %v1184_v48  ;;  %v7613_v41 = vld [vmem:[#allocation12 + $0x1c8] ss:$28 sps:$4 sm:$0xff]  }
 0x367   :  { %2734 = vmatpush1.bf16.msra.mxu1 %v6709_v54  ;;  %v6774_v54 = vcombine.high %v1180_v47, %v1184_v48  ;;  %v7627_v47 = vld [vmem:[#allocation12 + $0x23c] ss:$28 sps:$4 sm:$0xff]   ;;  %v7622_v48 = vld [vmem:[#allocation12 + $0x230] ss:$28 sps:$4 sm:$0xff]  }
 0x368   :  { %2816 = vmatpush1.bf16.msra.mxu0 %v6711_v55  ;;  %2735 = vmatprep.subr.bf16.mxu1 %v6718_v56  ;;  %v6776_v55 = vcombine.high %v1181_v50, %v1185_v51  ;;  %v1188_v56 = vld [vmem:[#allocation9 + $0x7d0] sm:$0xff]  ;;  %v7625_v50 = vld [vmem:[#allocation12 + $0x238] ss:$28 sps:$4 sm:$0xff]  }
 0x369   :  { %2817 = vmatprep.subr.bf16.mxu0 %v6720_v57  ;;  %v1192_v57 = vld [vmem:[#allocation9 + $0x7f0] sm:$0xff] }
 0x36a   :  { %v7630_v51 = vld [vmem:[#allocation12 + $0x26c] ss:$28 sps:$4 sm:$0xff]  }
 0x36b   :  { %2736 = vmatpush1.bf16.msra.mxu1 %v6717_v1  ;;  %v6782_v1 = vcombine.high %v1188_v56, %v1192_v57 }
 0x36c   :  { %2818 = vmatpush1.bf16.msra.mxu0 %v6719_v4  ;;  %2737 = vmatprep.subr.bf16.mxu1 %v6726_v7  ;;  %v6784_v4 = vcombine.high %v1189_v58, %v1193_v59  ;;  %v6781_v7 = vcombine.low %v1188_v56, %v1192_v57  ;;  %v7639_v56 = vld [vmem:[#allocation12 + $0x2ac] ss:$28 sps:$4 sm:$0xff]   ;;  %v7634_v57 = vld [vmem:[#allocation12 + $0x2a0] ss:$28 sps:$4 sm:$0xff]  }
 0x36d   :  { %2819 = vmatprep.subr.bf16.mxu0 %v6728_v8  ;;  %v6783_v8 = vcombine.low %v1189_v58, %v1193_v59  ;;  %v7637_v58 = vld [vmem:[#allocation12 + $0x2a8] ss:$28 sps:$4 sm:$0xff]   ;;  %v7642_v59 = vld [vmem:[#allocation12 + $0x2dc] ss:$28 sps:$4 sm:$0xff]  }
 0x36f   :  { %2738 = vmatpush1.bf16.msra.mxu1 %v6725_v25  ;;  %v7570_v25 = vld [vmem:[#allocation12 + $0x3c] ss:$28 sps:$4 sm:$0xff]  }
 0x370   :  { %2820 = vmatpush1.bf16.msra.mxu0 %v6727_v13  ;;  %2739 = vmatprep.subr.bf16.mxu1 %v6734_v14  ;;  %v7573_v13 = vld [vmem:[#allocation12 + $0x44] ss:$28 sps:$4 sm:$0xff]   ;;  %v7568_v14 = vld [vmem:[#allocation12 + $0x38] ss:$28 sps:$4 sm:$0xff]  }
 0x371   :  { %2821 = vmatprep.subr.bf16.mxu0 %v6736_v15  ;;  %v7571_v15 = vld [vmem:[#allocation12 + $0x40] ss:$28 sps:$4 sm:$0xff]  }
 0x373   :  { %2740 = vmatpush1.bf16.msra.mxu1 %v6733_v20  ;;  %v7582_v20 = vld [vmem:[#allocation12 + $0xac] ss:$28 sps:$4 sm:$0xff]  }
 0x374   :  { %2822 = vmatpush1.bf16.msra.mxu0 %v6735_v21  ;;  %2741 = vmatprep.subr.bf16.mxu1 %v6742_v22  ;;  %v7585_v21 = vld [vmem:[#allocation12 + $0xb4] ss:$28 sps:$4 sm:$0xff]   ;;  %v7580_v22 = vld [vmem:[#allocation12 + $0xa8] ss:$28 sps:$4 sm:$0xff]  }
 0x375   :  { %2823 = vmatprep.subr.bf16.mxu0 %v6744_v27  ;;  %v7588_v27 = vld [vmem:[#allocation12 + $0xe4] ss:$28 sps:$4 sm:$0xff]  }
 0x377   :  { %2742 = vmatpush1.bf16.msra.mxu1 %v6741_v29  ;;  %v7597_v29 = vld [vmem:[#allocation12 + $0x124] ss:$28 sps:$4 sm:$0xff]  }
 0x378   :  { %2824 = vmatpush1.bf16.msra.mxu0 %v6743_v62  ;;  %2743 = vmatprep.subr.bf16.mxu1 %v6750_v33  ;;  %v7592_v62 = vld [vmem:[#allocation12 + $0x118] ss:$28 sps:$4 sm:$0xff]   ;;  %v7595_v33 = vld [vmem:[#allocation12 + $0x120] ss:$28 sps:$4 sm:$0xff]  }
 0x379   :  { %2825 = vmatprep.subr.bf16.mxu0 %v6752_v30  ;;  %v7600_v30 = vld [vmem:[#allocation12 + $0x154] ss:$28 sps:$4 sm:$0xff]  }
 0x37b   :  { %2744 = vmatpush1.bf16.msra.mxu1 %v6749_v36  ;;  %v7609_v36 = vld [vmem:[#allocation12 + $0x194] ss:$28 sps:$4 sm:$0xff]  }
 0x37c   :  { %2826 = vmatpush1.bf16.msra.mxu0 %v6751_v37  ;;  %2745 = vmatprep.subr.bf16.mxu1 %v6758_v38  ;;  %v7604_v37 = vld [vmem:[#allocation12 + $0x188] ss:$28 sps:$4 sm:$0xff]   ;;  %v7607_v38 = vld [vmem:[#allocation12 + $0x190] ss:$28 sps:$4 sm:$0xff]  }
 0x37d   :  { %2827 = vmatprep.subr.bf16.mxu0 %v6760_v39  ;;  %v7612_v39 = vld [vmem:[#allocation12 + $0x1c4] ss:$28 sps:$4 sm:$0xff]  }
 0x37f   :  { %2746 = vmatpush1.bf16.msra.mxu1 %v6757_v43  ;;  %v7621_v43 = vld [vmem:[#allocation12 + $0x204] ss:$28 sps:$4 sm:$0xff]  }
 0x380   :  { %2828 = vmatpush1.bf16.msra.mxu0 %v6759_v44  ;;  %2747 = vmatprep.subr.bf16.mxu1 %v6766_v45  ;;  %v7616_v44 = vld [vmem:[#allocation12 + $0x1f8] ss:$28 sps:$4 sm:$0xff]   ;;  %v7619_v45 = vld [vmem:[#allocation12 + $0x200] ss:$28 sps:$4 sm:$0xff]  }
 0x381   :  { %2829 = vmatprep.subr.bf16.mxu0 %v6768_v46  ;;  %v7624_v46 = vld [vmem:[#allocation12 + $0x234] ss:$28 sps:$4 sm:$0xff]  }
 0x383   :  { %2748 = vmatpush1.bf16.msra.mxu1 %v6765_v52  ;;  %v7633_v52 = vld [vmem:[#allocation12 + $0x274] ss:$28 sps:$4 sm:$0xff]  }
 0x384   :  { %2830 = vmatpush1.bf16.msra.mxu0 %v6767_v53  ;;  %2749 = vmatprep.subr.bf16.mxu1 %v6774_v54  ;;  %v7628_v53 = vld [vmem:[#allocation12 + $0x268] ss:$28 sps:$4 sm:$0xff]   ;;  %v7631_v54 = vld [vmem:[#allocation12 + $0x270] ss:$28 sps:$4 sm:$0xff]  }
 0x385   :  { %2831 = vmatprep.subr.bf16.mxu0 %v6776_v55  ;;  %v7636_v55 = vld [vmem:[#allocation12 + $0x2a4] ss:$28 sps:$4 sm:$0xff]  }
 0x387   :  { %2750 = vmatpush1.bf16.msra.mxu1 %v6773_v2  ;;  %v7645_v2 = vld [vmem:[#allocation12 + $0x2e4] ss:$28 sps:$4 sm:$0xff]  }
 0x388   :  { %2832 = vmatpush1.bf16.msra.mxu0 %v6775_v3  ;;  %2751 = vmatprep.subr.bf16.mxu1 %v6782_v1  ;;  %v7640_v3 = vld [vmem:[#allocation12 + $0x2d8] ss:$28 sps:$4 sm:$0xff]   ;;  %v7643_v1 = vld [vmem:[#allocation12 + $0x2e0] ss:$28 sps:$4 sm:$0xff]  }
 0x389   :  { %2833 = vmatprep.subr.bf16.mxu0 %v6784_v4  ;;  %v7648_v4 = vld [vmem:[#allocation12 + $0x314] ss:$28 sps:$4 sm:$0xff]  }
 0x38b   :  { %2752 = vmatpush1.bf16.msra.mxu1 %v6781_v7  ;;  %v7651_v7 = vld [vmem:[#allocation12 + $0x31c] ss:$28 sps:$4 sm:$0xff]  }
 0x38c   :  { %2834 = vmatpush1.bf16.msra.mxu0 %v6783_v8  ;;  %5729 = vmatprep.subr.bf16.mxu1 %v7564_v9  ;;  %v7646_v8 = vld [vmem:[#allocation12 + $0x310] ss:$28 sps:$4 sm:$0xff]   ;;  %v7649_v9 = vld [vmem:[#allocation12 + $0x318] ss:$28 sps:$4 sm:$0xff]  }
 0x38d   :  { %5893 = vmatprep.subr.bf16.mxu0 %v7567_v10  ;;  %v7654_v10 = vld [vmem:[#allocation12 + $0x34c] ss:$28 sps:$4 sm:$0xff]  }
 0x38e   :  { %2754 = vmatmul.mubr.bf16.vlgmr.msra.gmra.mrb[8].mxu1 %v8631_v49 }
 0x38f   :  { %2836 = vmatmul.mubr.bf16.vlgmr.msra.gmra.mrb[12].mxu0 %v8631_v49  ;;  %5730 = vmatpush1.bf16.msra.mxu1 %v7562_v11  ;;  %v7583_v49 = vld [vmem:[#allocation12 + $0xb0] ss:$28 sps:$4 sm:$0xff]  }
 0x390   :  { %5894 = vmatpush1.bf16.msra.mxu0 %v7565_v12  ;;  %5731 = vmatprep.subr.bf16.mxu1 %v7570_v25  ;;  %v7657_v11 = vld [vmem:[#allocation12 + $0x354] ss:$28 sps:$4 sm:$0xff]   ;;  %v7652_v12 = vld [vmem:[#allocation12 + $0x348] ss:$28 sps:$4 sm:$0xff]  }
 0x391   :  { %5895 = vmatprep.subr.bf16.mxu0 %v7573_v13  ;;  %v7655_v25 = vld [vmem:[#allocation12 + $0x350] ss:$28 sps:$4 sm:$0xff]   ;;  %v7660_v13 = vld [vmem:[#allocation12 + $0x384] ss:$28 sps:$4 sm:$0xff]  }
 0x393   :  { %5732 = vmatpush1.bf16.msra.mxu1 %v7568_v14  ;;  %v7663_v14 = vld [vmem:[#allocation12 + $0x38c] ss:$28 sps:$4 sm:$0xff]  }
 0x394   :  { %5896 = vmatpush1.bf16.msra.mxu0 %v7571_v15  ;;  %5733 = vmatprep.subr.bf16.mxu1 %v7576_v16  ;;  %v8643_v15 = vld [vmem:[#allocation10] sm:$0xff] }
 0x395   :  { %5897 = vmatprep.subr.bf16.mxu0 %v7579_v17  ;;  %v1199_v16 = vrot.slane %v8643_v15, %v8595_v61  ;;  %v1203_v17 = vrot.slane %v8643_v15, %v8600_v63 }
 0x397   :  { %5734 = vmatpush1.bf16.msra.mxu1 %v7574_v18  ;;  %v1211_v18 = vrot.slane %v8643_v15, %v8603_v0 }
 0x398   :  { %5898 = vmatpush1.bf16.msra.mxu0 %v7577_v19  ;;  %5735 = vmatprep.subr.bf16.mxu1 %v7582_v20 }
 0x399   :  { %5899 = vmatprep.subr.bf16.mxu0 %v7585_v21 }
 0x39b   :  { %5736 = vmatpush1.bf16.msra.mxu1 %v7580_v22 }
 0x39c   :  { %5900 = vmatpush1.bf16.msra.mxu0 %v7583_v49  ;;  %5737 = vmatprep.subr.bf16.mxu1 %v7588_v27 }
 0x39d   :  { %5901 = vmatprep.subr.bf16.mxu0 %v7591_v23 }
 0x39f   :  { %5738 = vmatpush1.bf16.msra.mxu1 %v7586_v24 }
 0x3a0   :  { %5902 = vmatpush1.bf16.msra.mxu0 %v7589_v26  ;;  %5739 = vmatprep.subr.bf16.mxu1 %v7594_v28 }
 0x3a1   :  { %5903 = vmatprep.subr.bf16.mxu0 %v7597_v29 }
 0x3a3   :  { %5740 = vmatpush1.bf16.msra.mxu1 %v7592_v62 }
 0x3a4   :  { %5904 = vmatpush1.bf16.msra.mxu0 %v7595_v33  ;;  %5741 = vmatprep.subr.bf16.mxu1 %v7600_v30 }
 0x3a5   :  { %5905 = vmatprep.subr.bf16.mxu0 %v7603_v31 }
 0x3a7   :  { %5742 = vmatpush1.bf16.msra.mxu1 %v7598_v32 }
 0x3a8   :  { %5906 = vmatpush1.bf16.msra.mxu0 %v7601_v34  ;;  %5743 = vmatprep.subr.bf16.mxu1 %v7606_v35  ;;  %v7658_v35 = vld [vmem:[#allocation12 + $0x380] ss:$28 sps:$4 sm:$0xff]  }
 0x3a9   :  { %5907 = vmatprep.subr.bf16.mxu0 %v7609_v36  ;;  %v7661_v36 = vld [vmem:[#allocation12 + $0x388] ss:$28 sps:$4 sm:$0xff]  }
 0x3ab   :  { %5744 = vmatpush1.bf16.msra.mxu1 %v7604_v37 }
 0x3ac   :  { %5908 = vmatpush1.bf16.msra.mxu0 %v7607_v38  ;;  %5745 = vmatprep.subr.bf16.mxu1 %v7612_v39  ;;  %v7666_v39 = vld [vmem:[#allocation12 + $0x3bc] ss:$28 sps:$4 sm:$0xff]  }
 0x3ad   :  { %5909 = vmatprep.subr.bf16.mxu0 %v7615_v5  ;;  %v7669_v5 = vld [vmem:[#allocation12 + $0x3c4] ss:$28 sps:$4 sm:$0xff]  }
 0x3af   :  { %5746 = vmatpush1.bf16.msra.mxu1 %v7610_v40 }
 0x3b0   :  { %5910 = vmatpush1.bf16.msra.mxu0 %v7613_v41  ;;  %5747 = vmatprep.subr.bf16.mxu1 %v7618_v42  ;;  %v7664_v41 = vld [vmem:[#allocation12 + $0x3b8] ss:$28 sps:$4 sm:$0xff]   ;;  %v7667_v42 = vld [vmem:[#allocation12 + $0x3c0] ss:$28 sps:$4 sm:$0xff]  }
 0x3b1   :  { %5911 = vmatprep.subr.bf16.mxu0 %v7621_v43  ;;  %v7672_v43 = vld [vmem:[#allocation12 + $0x3f4] ss:$28 sps:$4 sm:$0xff]  }
 0x3b3   :  { %5748 = vmatpush1.bf16.msra.mxu1 %v7616_v44  ;;  %v7675_v44 = vld [vmem:[#allocation12 + $0x3fc] ss:$28 sps:$4 sm:$0xff]  }
 0x3b4   :  { %5912 = vmatpush1.bf16.msra.mxu0 %v7619_v45  ;;  %5749 = vmatprep.subr.bf16.mxu1 %v7624_v46  ;;  %v7670_v45 = vld [vmem:[#allocation12 + $0x3f0] ss:$28 sps:$4 sm:$0xff]   ;;  %v7673_v46 = vld [vmem:[#allocation12 + $0x3f8] ss:$28 sps:$4 sm:$0xff]  }
 0x3b5   :  { %5913 = vmatprep.subr.bf16.mxu0 %v7627_v47  ;;  %v7678_v47 = vld [vmem:[#allocation12 + $0x42c] ss:$28 sps:$4 sm:$0xff]  }
 0x3b7   :  { %5750 = vmatpush1.bf16.msra.mxu1 %v7622_v48  ;;  %v7681_v48 = vld [vmem:[#allocation12 + $0x434] ss:$28 sps:$4 sm:$0xff]  }
 0x3b8   :  { %5914 = vmatpush1.bf16.msra.mxu0 %v7625_v50  ;;  %5751 = vmatprep.subr.bf16.mxu1 %v7630_v51  ;;  %v7676_v50 = vld [vmem:[#allocation12 + $0x428] ss:$28 sps:$4 sm:$0xff]   ;;  %v7679_v51 = vld [vmem:[#allocation12 + $0x430] ss:$28 sps:$4 sm:$0xff]  }
 0x3b9   :  { %5915 = vmatprep.subr.bf16.mxu0 %v7633_v52  ;;  %v7684_v52 = vld [vmem:[#allocation12 + $0x464] ss:$28 sps:$4 sm:$0xff]  }
 0x3bb   :  { %5752 = vmatpush1.bf16.msra.mxu1 %v7628_v53  ;;  %v7687_v53 = vld [vmem:[#allocation12 + $0x46c] ss:$28 sps:$4 sm:$0xff]  }
 0x3bc   :  { %5916 = vmatpush1.bf16.msra.mxu0 %v7631_v54  ;;  %5753 = vmatprep.subr.bf16.mxu1 %v7636_v55  ;;  %v7682_v54 = vld [vmem:[#allocation12 + $0x460] ss:$28 sps:$4 sm:$0xff]   ;;  %v7685_v55 = vld [vmem:[#allocation12 + $0x468] ss:$28 sps:$4 sm:$0xff]  }
 0x3bd   :  { %5917 = vmatprep.subr.bf16.mxu0 %v7639_v56  ;;  %v7690_v56 = vld [vmem:[#allocation12 + $0x49c] ss:$28 sps:$4 sm:$0xff]  }
 0x3bf   :  { %5754 = vmatpush1.bf16.msra.mxu1 %v7634_v57  ;;  %v7693_v57 = vld [vmem:[#allocation12 + $0x4a4] ss:$28 sps:$4 sm:$0xff]  }
 0x3c0   :  { %5918 = vmatpush1.bf16.msra.mxu0 %v7637_v58  ;;  %5755 = vmatprep.subr.bf16.mxu1 %v7642_v59  ;;  %v7688_v58 = vld [vmem:[#allocation12 + $0x498] ss:$28 sps:$4 sm:$0xff]   ;;  %v7691_v59 = vld [vmem:[#allocation12 + $0x4a0] ss:$28 sps:$4 sm:$0xff]  }
 0x3c1   :  { %5919 = vmatprep.subr.bf16.mxu0 %v7645_v2  ;;  %v7696_v2 = vld [vmem:[#allocation12 + $0x4d4] ss:$28 sps:$4 sm:$0xff]  }
 0x3c3   :  { %5756 = vmatpush1.bf16.msra.mxu1 %v7640_v3  ;;  %v7699_v3 = vld [vmem:[#allocation12 + $0x4dc] ss:$28 sps:$4 sm:$0xff]  }
 0x3c4   :  { %5920 = vmatpush1.bf16.msra.mxu0 %v7643_v1  ;;  %5757 = vmatprep.subr.bf16.mxu1 %v7648_v4  ;;  %v7694_v1 = vld [vmem:[#allocation12 + $0x4d0] ss:$28 sps:$4 sm:$0xff]   ;;  %v7697_v4 = vld [vmem:[#allocation12 + $0x4d8] ss:$28 sps:$4 sm:$0xff]  }
 0x3c5   :  { %5921 = vmatprep.subr.bf16.mxu0 %v7651_v7  ;;  %v7702_v7 = vld [vmem:[#allocation12 + $0x50c] ss:$28 sps:$4 sm:$0xff]  }
 0x3c7   :  { %5758 = vmatpush1.bf16.msra.mxu1 %v7646_v8  ;;  %v7705_v8 = vld [vmem:[#allocation12 + $0x514] ss:$28 sps:$4 sm:$0xff]  }
 0x3c8   :  { %5922 = vmatpush1.bf16.msra.mxu0 %v7649_v9  ;;  %5759 = vmatprep.subr.bf16.mxu1 %v7654_v10  ;;  %v7700_v9 = vld [vmem:[#allocation12 + $0x508] ss:$28 sps:$4 sm:$0xff]   ;;  %v7703_v10 = vld [vmem:[#allocation12 + $0x510] ss:$28 sps:$4 sm:$0xff]  }
 0x3c9   :  { %5923 = vmatprep.subr.bf16.mxu0 %v7657_v11  ;;  %v7708_v11 = vld [vmem:[#allocation12 + $0x544] ss:$28 sps:$4 sm:$0xff]  }
 0x3cb   :  { %5760 = vmatpush1.bf16.msra.mxu1 %v7652_v12  ;;  %v7711_v12 = vld [vmem:[#allocation12 + $0x54c] ss:$28 sps:$4 sm:$0xff]  }
 0x3cc   :  { %5924 = vmatpush1.bf16.msra.mxu0 %v7655_v25  ;;  %5770 = vmatprep.subr.bf16.mxu1 %v7660_v13  ;;  %v7706_v25 = vld [vmem:[#allocation12 + $0x540] ss:$28 sps:$4 sm:$0xff]   ;;  %v7709_v13 = vld [vmem:[#allocation12 + $0x548] ss:$28 sps:$4 sm:$0xff]  }
 0x3cd   :  { %5934 = vmatprep.subr.bf16.mxu0 %v7663_v14  ;;  %v7714_v14 = vld [vmem:[#allocation12 + $0x57c] ss:$28 sps:$4 sm:$0xff]  }
 0x3e1   :  { %v2591_v19 = vpop.f32.mrb[4].mxu1  ;;  %v8651_v20 = vpop.f32.mrb[8].mxu0 }
 0x3e2   :  { %v7329_v21 = vadd.f32 %v2591_v19, %v1199_v16  ;;  %v2593_v22 = vpop.f32.mrb[5].mxu1  ;;  %v2675_v49 = vpop.f32.mrb[9].mxu0  ;;  %v7717_v16 = vld [vmem:[#allocation12 + $0x584] ss:$28 sps:$4 sm:$0xff]   ;;  %v7720_v19 = vld [vmem:[#allocation12 + $0x5b4] ss:$28 sps:$4 sm:$0xff]  }
 0x3e3   :  { %v7330_v27 = vadd.f32 %v2593_v22, %v1203_v17  ;;  %v7332_v23 = vadd.f32 %v2675_v49, %v1211_v18  ;;  %v2595_v24 = vpop.f32.mrb[6].mxu1  ;;  %v2677_v26 = vpop.f32.mrb[10].mxu0  ;;  %v7712_v17 = vld [vmem:[#allocation12 + $0x578] ss:$28 sps:$4 sm:$0xff]   ;;  %v7715_v18 = vld [vmem:[#allocation12 + $0x580] ss:$28 sps:$4 sm:$0xff]  }
 0x3e4   :  { %v2844_v28 = vpack.c.bf16 %v7329_v21, %v7329_v21  ;;  %v2596_v29 = vpop.f32.mrb[7].mxu1  ;;  %v2678_v62 = vpop.f32.mrb[11].mxu0  ;;  %v7723_v21 = vld [vmem:[#allocation12 + $0x5bc] ss:$28 sps:$4 sm:$0xff]   ;;  %v7718_v22 = vld [vmem:[#allocation12 + $0x5b0] ss:$28 sps:$4 sm:$0xff]  }
 0x3e5   :  { %v2845_v33 = vpack.c.bf16 %v7330_v27, %v7330_v27  ;;  %v2847_v30 = vpack.c.bf16 %v7332_v23, %v7332_v23  ;;  %v7721_v49 = vld [vmem:[#allocation12 + $0x5b8] ss:$28 sps:$4 sm:$0xff]   ;;  %v7726_v27 = vld [vmem:[#allocation12 + $0x5ec] ss:$28 sps:$4 sm:$0xff]   ;;  %v7730_v62 = vld [vmem:[#allocation12 + $0x620] ss:$28 sps:$4 sm:$0xff]  }
 0x3e6   :  { %v2860_v31 = vmul.bf16 1045249613, %v2844_v28  ;;  %vm2852_vm8 = vcmp.gt.bf16.partialorder %v2844_v28, 0  ;;  %v7729_v23 = vld [vmem:[#allocation12 + $0x5f4] ss:$28 sps:$4 sm:$0xff]  }
 0x3e7   :  { %vm2853_vm9 = vcmp.gt.bf16.partialorder %v2845_v33, 0  ;;  %v2861_v32 = vmul.bf16 1045249613, %v2845_v33  ;;  %v2863_v34 = vmul.bf16 1045249613, %v2847_v30  ;;  %vm2855_vm10 = vcmp.gt.bf16.partialorder %v2847_v30, 0 }
 0x3e8   :  { %v8657_v38 = vsel %vm2852_vm8, %v2844_v28, %v2860_v31  ;;  %v7724_v24 = vld [vmem:[#allocation12 + $0x5e8] ss:$28 sps:$4 sm:$0xff]   ;;  %v7727_v26 = vld [vmem:[#allocation12 + $0x5f0] ss:$28 sps:$4 sm:$0xff]  }
 0x3e9   :  { %v8653_v37 = vsel %vm2853_vm9, %v2845_v33, %v2861_v32  ;;  %v8661_v40 = vsel %vm2855_vm10, %v2847_v30, %v2863_v34  ;;  %v7732_v28 = vld [vmem:[#allocation12 + $0x624] ss:$28 sps:$4 sm:$0xff]   ;;  %v7735_v29 = vld [vmem:[#allocation12 + $0x62c] ss:$28 sps:$4 sm:$0xff]   ;;  %v7738_v30 = vld [vmem:[#allocation12 + $0x65c] ss:$28 sps:$4 sm:$0xff]   ;;  %v1207_v32 = vrot.slane %v8643_v15, %v8626_v6 }
 0x3ea   :  { %5761 = vmatprep.mubr.bf16.mxu1 %v8653_v37  ;;  %5925 = vmatprep.mubr.bf16.mxu0 %v8653_v37  ;;  %v7733_v33 = vld [vmem:[#allocation12 + $0x628] ss:$28 sps:$4 sm:$0xff]   ;;  %v7736_v34 = vld [vmem:[#allocation12 + $0x658] ss:$28 sps:$4 sm:$0xff]  }
 0x3eb   :  { %5762 = vmatmul.mubr.bf16.vlgmr.msra.gmra.mrb[12].mxu1 %v8657_v38  ;;  %5926 = vmatmul.mubr.bf16.vlgmr.msra.gmra.mrb[16].mxu0 %v8657_v38  ;;  %v7741_v31 = vld [vmem:[#allocation12 + $0x664] ss:$28 sps:$4 sm:$0xff]  }
 0x3ec   :  { %5771 = vmatpush1.bf16.msra.mxu1 %v7658_v35  ;;  %5935 = vmatpush1.bf16.msra.mxu0 %v7661_v36  ;;  %v7739_v35 = vld [vmem:[#allocation12 + $0x660] ss:$28 sps:$4 sm:$0xff]   ;;  %v7744_v36 = vld [vmem:[#allocation12 + $0x694] ss:$28 sps:$4 sm:$0xff]  }
 0x3ed   :  { %5802 = vmatprep.mubr.bf16.mxu1 %v8661_v40  ;;  %5966 = vmatprep.mubr.bf16.mxu0 %v8661_v40 }
 0x3ee   :  { %5772 = vmatprep.subr.bf16.mxu1 %v7666_v39  ;;  %5936 = vmatprep.subr.bf16.mxu0 %v7669_v5  ;;  %v7747_v39 = vld [vmem:[#allocation12 + $0x69c] ss:$28 sps:$4 sm:$0xff]   ;;  %v7331_v5 = vadd.f32 %v8651_v20, %v1207_v32  ;;  %v7816_v32 = vld [vmem:[#allocation12 + $0x934] ss:$28 sps:$4 sm:$0xff]  }
 0x3ef   :  { %v7754_v20 = vld [vmem:[#allocation12 + $0x700] ss:$28 sps:$4 sm:$0xff]  }
 0x3f0   :  { %5773 = vmatpush1.bf16.msra.mxu1 %v7664_v41  ;;  %5937 = vmatpush1.bf16.msra.mxu0 %v7667_v42  ;;  %v7742_v41 = vld [vmem:[#allocation12 + $0x690] ss:$28 sps:$4 sm:$0xff]   ;;  %v7745_v42 = vld [vmem:[#allocation12 + $0x698] ss:$28 sps:$4 sm:$0xff]  }
 0x3f1   :  { %5774 = vmatprep.subr.bf16.mxu1 %v7672_v43  ;;  %5938 = vmatprep.subr.bf16.mxu0 %v7675_v44  ;;  %v7750_v43 = vld [vmem:[#allocation12 + $0x6cc] ss:$28 sps:$4 sm:$0xff]   ;;  %v7753_v44 = vld [vmem:[#allocation12 + $0x6d4] ss:$28 sps:$4 sm:$0xff]  }
 0x3f4   :  { %5775 = vmatpush1.bf16.msra.mxu1 %v7670_v45  ;;  %5939 = vmatpush1.bf16.msra.mxu0 %v7673_v46  ;;  %v2846_v45 = vpack.c.bf16 %v7331_v5, %v7331_v5  ;;  %v7748_v46 = vld [vmem:[#allocation12 + $0x6c8] ss:$28 sps:$4 sm:$0xff]   ;;  %v7825_v5 = vld [vmem:[#allocation12 + $0x974] ss:$28 sps:$4 sm:$0xff]  }
 0x3f5   :  { %5776 = vmatprep.subr.bf16.mxu1 %v7678_v47  ;;  %5940 = vmatprep.subr.bf16.mxu0 %v7681_v48  ;;  %v7751_v47 = vld [vmem:[#allocation12 + $0x6d0] ss:$28 sps:$4 sm:$0xff]   ;;  %v7756_v48 = vld [vmem:[#allocation12 + $0x704] ss:$28 sps:$4 sm:$0xff]  }
 0x3f6   :  { %vm2854_vm11 = vcmp.gt.bf16.partialorder %v2846_v45, 0 }
 0x3f8   :  { %5777 = vmatpush1.bf16.msra.mxu1 %v7676_v50  ;;  %5941 = vmatpush1.bf16.msra.mxu0 %v7679_v51  ;;  %v7759_v50 = vld [vmem:[#allocation12 + $0x70c] ss:$28 sps:$4 sm:$0xff]   ;;  %v2862_v51 = vmul.bf16 1045249613, %v2846_v45 }
 0x3f9   :  { %5778 = vmatprep.subr.bf16.mxu1 %v7684_v52  ;;  %5942 = vmatprep.subr.bf16.mxu0 %v7687_v53  ;;  %v7757_v52 = vld [vmem:[#allocation12 + $0x708] ss:$28 sps:$4 sm:$0xff]   ;;  %v7762_v53 = vld [vmem:[#allocation12 + $0x73c] ss:$28 sps:$4 sm:$0xff]  }
 0x3fc   :  { %5779 = vmatpush1.bf16.msra.mxu1 %v7682_v54  ;;  %5943 = vmatpush1.bf16.msra.mxu0 %v7685_v55  ;;  %v7765_v54 = vld [vmem:[#allocation12 + $0x744] ss:$28 sps:$4 sm:$0xff]   ;;  %v8668_v55 = vsel %vm2854_vm11, %v2846_v45, %v2862_v51  ;;  %v1218_v51 = vsub.s32 5, %v8592_v60 }
 0x3fd   :  { %5780 = vmatprep.subr.bf16.mxu1 %v7690_v56  ;;  %5944 = vmatprep.subr.bf16.mxu0 %v7693_v57  ;;  %v7760_v56 = vld [vmem:[#allocation12 + $0x738] ss:$28 sps:$4 sm:$0xff]   ;;  %v7763_v57 = vld [vmem:[#allocation12 + $0x740] ss:$28 sps:$4 sm:$0xff]  }
 0x3fe   :  { %v7826_v45 = vld [vmem:[#allocation12 + $0x9a0] ss:$28 sps:$4 sm:$0xff]  }
 0x400   :  { %5781 = vmatpush1.bf16.msra.mxu1 %v7688_v58  ;;  %5945 = vmatpush1.bf16.msra.mxu0 %v7691_v59  ;;  %v7768_v58 = vld [vmem:[#allocation12 + $0x774] ss:$28 sps:$4 sm:$0xff]   ;;  %v7771_v59 = vld [vmem:[#allocation12 + $0x77c] ss:$28 sps:$4 sm:$0xff]  }
 0x401   :  { %5782 = vmatprep.subr.bf16.mxu1 %v7696_v2  ;;  %5946 = vmatprep.subr.bf16.mxu0 %v7699_v3  ;;  %v7766_v2 = vld [vmem:[#allocation12 + $0x770] ss:$28 sps:$4 sm:$0xff]   ;;  %v7769_v3 = vld [vmem:[#allocation12 + $0x778] ss:$28 sps:$4 sm:$0xff]  }
 0x404   :  { %5783 = vmatpush1.bf16.msra.mxu1 %v7694_v1  ;;  %5947 = vmatpush1.bf16.msra.mxu0 %v7697_v4  ;;  %v7774_v1 = vld [vmem:[#allocation12 + $0x7ac] ss:$28 sps:$4 sm:$0xff]   ;;  %v7777_v4 = vld [vmem:[#allocation12 + $0x7b4] ss:$28 sps:$4 sm:$0xff]  }
 0x405   :  { %5784 = vmatprep.subr.bf16.mxu1 %v7702_v7  ;;  %5948 = vmatprep.subr.bf16.mxu0 %v7705_v8  ;;  %v7772_v7 = vld [vmem:[#allocation12 + $0x7a8] ss:$28 sps:$4 sm:$0xff]   ;;  %v7775_v8 = vld [vmem:[#allocation12 + $0x7b0] ss:$28 sps:$4 sm:$0xff]  }
 0x408   :  { %5785 = vmatpush1.bf16.msra.mxu1 %v7700_v9  ;;  %5949 = vmatpush1.bf16.msra.mxu0 %v7703_v10  ;;  %v7780_v9 = vld [vmem:[#allocation12 + $0x7e4] ss:$28 sps:$4 sm:$0xff]   ;;  %v7783_v10 = vld [vmem:[#allocation12 + $0x7ec] ss:$28 sps:$4 sm:$0xff]  }
 0x409   :  { %5786 = vmatprep.subr.bf16.mxu1 %v7708_v11  ;;  %5950 = vmatprep.subr.bf16.mxu0 %v7711_v12  ;;  %v7778_v11 = vld [vmem:[#allocation12 + $0x7e0] ss:$28 sps:$4 sm:$0xff]   ;;  %v7781_v12 = vld [vmem:[#allocation12 + $0x7e8] ss:$28 sps:$4 sm:$0xff]  }
 0x40c   :  { %5787 = vmatpush1.bf16.msra.mxu1 %v7706_v25  ;;  %5951 = vmatpush1.bf16.msra.mxu0 %v7709_v13  ;;  %v7786_v25 = vld [vmem:[#allocation12 + $0x81c] ss:$28 sps:$4 sm:$0xff]   ;;  %v7789_v13 = vld [vmem:[#allocation12 + $0x824] ss:$28 sps:$4 sm:$0xff]  }
 0x40d   :  { %5788 = vmatprep.subr.bf16.mxu1 %v7714_v14  ;;  %5952 = vmatprep.subr.bf16.mxu0 %v7717_v16  ;;  %v7784_v14 = vld [vmem:[#allocation12 + $0x818] ss:$28 sps:$4 sm:$0xff]   ;;  %v7787_v16 = vld [vmem:[#allocation12 + $0x820] ss:$28 sps:$4 sm:$0xff]  }
 0x410   :  { %5789 = vmatpush1.bf16.msra.mxu1 %v7712_v17  ;;  %5953 = vmatpush1.bf16.msra.mxu0 %v7715_v18  ;;  %v7792_v17 = vld [vmem:[#allocation12 + $0x854] ss:$28 sps:$4 sm:$0xff]   ;;  %v7795_v18 = vld [vmem:[#allocation12 + $0x85c] ss:$28 sps:$4 sm:$0xff]  }
 0x411   :  { %5790 = vmatprep.subr.bf16.mxu1 %v7720_v19  ;;  %5954 = vmatprep.subr.bf16.mxu0 %v7723_v21  ;;  %v7790_v19 = vld [vmem:[#allocation12 + $0x850] ss:$28 sps:$4 sm:$0xff]   ;;  %v7793_v21 = vld [vmem:[#allocation12 + $0x858] ss:$28 sps:$4 sm:$0xff]  }
 0x414   :  { %5791 = vmatpush1.bf16.msra.mxu1 %v7718_v22  ;;  %5955 = vmatpush1.bf16.msra.mxu0 %v7721_v49  ;;  %v7798_v22 = vld [vmem:[#allocation12 + $0x88c] ss:$28 sps:$4 sm:$0xff]   ;;  %v7801_v49 = vld [vmem:[#allocation12 + $0x894] ss:$28 sps:$4 sm:$0xff]  }
 0x415   :  { %5792 = vmatprep.subr.bf16.mxu1 %v7726_v27  ;;  %5956 = vmatprep.subr.bf16.mxu0 %v7729_v23  ;;  %v7796_v27 = vld [vmem:[#allocation12 + $0x888] ss:$28 sps:$4 sm:$0xff]   ;;  %v7799_v23 = vld [vmem:[#allocation12 + $0x890] ss:$28 sps:$4 sm:$0xff]  }
 0x418   :  { %5793 = vmatpush1.bf16.msra.mxu1 %v7724_v24  ;;  %5957 = vmatpush1.bf16.msra.mxu0 %v7727_v26  ;;  %v7804_v24 = vld [vmem:[#allocation12 + $0x8c4] ss:$28 sps:$4 sm:$0xff]   ;;  %v7807_v26 = vld [vmem:[#allocation12 + $0x8cc] ss:$28 sps:$4 sm:$0xff]  }
 0x419   :  { %5794 = vmatprep.subr.bf16.mxu1 %v7732_v28  ;;  %5958 = vmatprep.subr.bf16.mxu0 %v7735_v29  ;;  %v7802_v28 = vld [vmem:[#allocation12 + $0x8c0] ss:$28 sps:$4 sm:$0xff]   ;;  %v7805_v29 = vld [vmem:[#allocation12 + $0x8c8] ss:$28 sps:$4 sm:$0xff]  }
 0x41c   :  { %5795 = vmatpush1.bf16.msra.mxu1 %v7730_v62  ;;  %5959 = vmatpush1.bf16.msra.mxu0 %v7733_v33  ;;  %v7810_v62 = vld [vmem:[#allocation12 + $0x8fc] ss:$28 sps:$4 sm:$0xff]   ;;  %v7813_v33 = vld [vmem:[#allocation12 + $0x904] ss:$28 sps:$4 sm:$0xff]  }
 0x41d   :  { %5796 = vmatprep.subr.bf16.mxu1 %v7738_v30  ;;  %5960 = vmatprep.subr.bf16.mxu0 %v7741_v31  ;;  %v7808_v30 = vld [vmem:[#allocation12 + $0x8f8] ss:$28 sps:$4 sm:$0xff]   ;;  %v7811_v31 = vld [vmem:[#allocation12 + $0x900] ss:$28 sps:$4 sm:$0xff]  }
 0x420   :  { %5797 = vmatpush1.bf16.msra.mxu1 %v7736_v34  ;;  %5961 = vmatpush1.bf16.msra.mxu0 %v7739_v35  ;;  %v7819_v34 = vld [vmem:[#allocation12 + $0x93c] ss:$28 sps:$4 sm:$0xff]   ;;  %v7814_v35 = vld [vmem:[#allocation12 + $0x930] ss:$28 sps:$4 sm:$0xff]  }
 0x421   :  { %5798 = vmatprep.subr.bf16.mxu1 %v7744_v36  ;;  %5962 = vmatprep.subr.bf16.mxu0 %v7747_v39  ;;  %v7817_v36 = vld [vmem:[#allocation12 + $0x938] ss:$28 sps:$4 sm:$0xff]   ;;  %v7822_v39 = vld [vmem:[#allocation12 + $0x96c] ss:$28 sps:$4 sm:$0xff]  }
 0x424   :  { %5799 = vmatpush1.bf16.msra.mxu1 %v7742_v41  ;;  %5963 = vmatpush1.bf16.msra.mxu0 %v7745_v42  ;;  %v7820_v41 = vld [vmem:[#allocation12 + $0x968] ss:$28 sps:$4 sm:$0xff]   ;;  %v7823_v42 = vld [vmem:[#allocation12 + $0x970] ss:$28 sps:$4 sm:$0xff]  }
 0x425   :  { %5800 = vmatprep.subr.bf16.mxu1 %v7750_v43  ;;  %5964 = vmatprep.subr.bf16.mxu0 %v7753_v44  ;;  %v7828_v43 = vld [vmem:[#allocation12 + $0x9a4] ss:$28 sps:$4 sm:$0xff]   ;;  %v7831_v44 = vld [vmem:[#allocation12 + $0x9ac] ss:$28 sps:$4 sm:$0xff]  }
 0x428   :  { %5801 = vmatpush1.bf16.msra.mxu1 %v7748_v46  ;;  %5965 = vmatpush1.bf16.msra.mxu0 %v7751_v47  ;;  %v7829_v46 = vld [vmem:[#allocation12 + $0x9a8] ss:$28 sps:$4 sm:$0xff]   ;;  %v7834_v47 = vld [vmem:[#allocation12 + $0x9dc] ss:$28 sps:$4 sm:$0xff]  }
 0x429   :  { %5811 = vmatprep.subr.bf16.mxu1 %v7756_v48  ;;  %5975 = vmatprep.subr.bf16.mxu0 %v7759_v50  ;;  %v7837_v48 = vld [vmem:[#allocation12 + $0x9e4] ss:$28 sps:$4 sm:$0xff]   ;;  %v1214_v50 = vsub.s32 4, %v8592_v60 }
 0x42b   :  { %5803 = vmatmul.mubr.bf16.vlgmr.msra.gmra.mrb[12].mxu1 %v8668_v55  ;;  %5967 = vmatmul.mubr.bf16.vlgmr.msra.gmra.mrb[16].mxu0 %v8668_v55 }
 0x42c   :  { %5812 = vmatpush1.bf16.msra.mxu1 %v7754_v20  ;;  %5976 = vmatpush1.bf16.msra.mxu0 %v7757_v52  ;;  %v7832_v20 = vld [vmem:[#allocation12 + $0x9d8] ss:$28 sps:$4 sm:$0xff]   ;;  %v7835_v52 = vld [vmem:[#allocation12 + $0x9e0] ss:$28 sps:$4 sm:$0xff]  }
 0x42d   :  { %5813 = vmatprep.subr.bf16.mxu1 %v7762_v53  ;;  %5977 = vmatprep.subr.bf16.mxu0 %v7765_v54  ;;  %v1226_v53 = vsub.s32 7, %v8592_v60  ;;  %v7840_v54 = vld [vmem:[#allocation12 + $0xa14] ss:$28 sps:$4 sm:$0xff]  }
 0x430   :  { %5814 = vmatpush1.bf16.msra.mxu1 %v7760_v56  ;;  %5978 = vmatpush1.bf16.msra.mxu0 %v7763_v57  ;;  %v7843_v56 = vld [vmem:[#allocation12 + $0xa1c] ss:$28 sps:$4 sm:$0xff]   ;;  %v1215_v57 = vrot.slane %v8643_v15, %v1214_v50 }
 0x431   :  { %5815 = vmatprep.subr.bf16.mxu1 %v7768_v58  ;;  %5979 = vmatprep.subr.bf16.mxu0 %v7771_v59  ;;  %v1219_v58 = vrot.slane %v8643_v15, %v1218_v51  ;;  %v1227_v59 = vrot.slane %v8643_v15, %v1226_v53  ;;  %v7882_v53 = vld [vmem:[#allocation12 + $0xb9c] ss:$28 sps:$4 sm:$0xff]  }
 0x434   :  { %5816 = vmatpush1.bf16.msra.mxu1 %v7766_v2  ;;  %5980 = vmatpush1.bf16.msra.mxu0 %v7769_v3  ;;  %v7838_v2 = vld [vmem:[#allocation12 + $0xa10] ss:$28 sps:$4 sm:$0xff]   ;;  %v7841_v3 = vld [vmem:[#allocation12 + $0xa18] ss:$28 sps:$4 sm:$0xff]  }
 0x435   :  { %5817 = vmatprep.subr.bf16.mxu1 %v7774_v1  ;;  %5981 = vmatprep.subr.bf16.mxu0 %v7777_v4  ;;  %v7846_v4 = vld [vmem:[#allocation12 + $0xa4c] ss:$28 sps:$4 sm:$0xff]  }
 0x438   :  { %5818 = vmatpush1.bf16.msra.mxu1 %v7772_v7  ;;  %5982 = vmatpush1.bf16.msra.mxu0 %v7775_v8  ;;  %v7849_v7 = vld [vmem:[#allocation12 + $0xa54] ss:$28 sps:$4 sm:$0xff]  }
 0x439   :  { %5819 = vmatprep.subr.bf16.mxu1 %v7780_v9  ;;  %5983 = vmatprep.subr.bf16.mxu0 %v7783_v10 }
 0x43c   :  { %5820 = vmatpush1.bf16.msra.mxu1 %v7778_v11  ;;  %5984 = vmatpush1.bf16.msra.mxu0 %v7781_v12 }
 0x43d   :  { %5821 = vmatprep.subr.bf16.mxu1 %v7786_v25  ;;  %5985 = vmatprep.subr.bf16.mxu0 %v7789_v13 }
 0x440   :  { %5822 = vmatpush1.bf16.msra.mxu1 %v7784_v14  ;;  %5986 = vmatpush1.bf16.msra.mxu0 %v7787_v16 }
 0x441   :  { %5823 = vmatprep.subr.bf16.mxu1 %v7792_v17  ;;  %5987 = vmatprep.subr.bf16.mxu0 %v7795_v18  ;;  %v7844_v18 = vld [vmem:[#allocation12 + $0xa48] ss:$28 sps:$4 sm:$0xff]  }
 0x444   :  { %5824 = vmatpush1.bf16.msra.mxu1 %v7790_v19  ;;  %5988 = vmatpush1.bf16.msra.mxu0 %v7793_v21  ;;  %v7847_v19 = vld [vmem:[#allocation12 + $0xa50] ss:$28 sps:$4 sm:$0xff]  }
 0x445   :  { %5825 = vmatprep.subr.bf16.mxu1 %v7798_v22  ;;  %5989 = vmatprep.subr.bf16.mxu0 %v7801_v49  ;;  %v7852_v49 = vld [vmem:[#allocation12 + $0xa84] ss:$28 sps:$4 sm:$0xff]  }
 0x448   :  { %5826 = vmatpush1.bf16.msra.mxu1 %v7796_v27  ;;  %5990 = vmatpush1.bf16.msra.mxu0 %v7799_v23  ;;  %v7855_v27 = vld [vmem:[#allocation12 + $0xa8c] ss:$28 sps:$4 sm:$0xff]  }
 0x449   :  { %5827 = vmatprep.subr.bf16.mxu1 %v7804_v24  ;;  %5991 = vmatprep.subr.bf16.mxu0 %v7807_v26 }
 0x44c   :  { %5828 = vmatpush1.bf16.msra.mxu1 %v7802_v28  ;;  %5992 = vmatpush1.bf16.msra.mxu0 %v7805_v29  ;;  %v7850_v29 = vld [vmem:[#allocation12 + $0xa80] ss:$28 sps:$4 sm:$0xff]  }
 0x44d   :  { %5829 = vmatprep.subr.bf16.mxu1 %v7810_v62  ;;  %5993 = vmatprep.subr.bf16.mxu0 %v7813_v33  ;;  %v7853_v62 = vld [vmem:[#allocation12 + $0xa88] ss:$28 sps:$4 sm:$0xff]  }
 0x450   :  { %5830 = vmatpush1.bf16.msra.mxu1 %v7808_v30  ;;  %5994 = vmatpush1.bf16.msra.mxu0 %v7811_v31  ;;  %v7858_v31 = vld [vmem:[#allocation12 + $0xabc] ss:$28 sps:$4 sm:$0xff]  }
 0x451   :  { %5831 = vmatprep.subr.bf16.mxu1 %v7816_v32  ;;  %5995 = vmatprep.subr.bf16.mxu0 %v7819_v34  ;;  %v7861_v32 = vld [vmem:[#allocation12 + $0xac4] ss:$28 sps:$4 sm:$0xff]  }
 0x454   :  { %5832 = vmatpush1.bf16.msra.mxu1 %v7814_v35  ;;  %5996 = vmatpush1.bf16.msra.mxu0 %v7817_v36  ;;  %v7856_v35 = vld [vmem:[#allocation12 + $0xab8] ss:$28 sps:$4 sm:$0xff]   ;;  %v7859_v36 = vld [vmem:[#allocation12 + $0xac0] ss:$28 sps:$4 sm:$0xff]  }
 0x455   :  { %5833 = vmatprep.subr.bf16.mxu1 %v7822_v39  ;;  %5997 = vmatprep.subr.bf16.mxu0 %v7825_v5  ;;  %v7864_v39 = vld [vmem:[#allocation12 + $0xaf4] ss:$28 sps:$4 sm:$0xff]   ;;  %v7867_v5 = vld [vmem:[#allocation12 + $0xafc] ss:$28 sps:$4 sm:$0xff]  }
 0x458   :  { %5834 = vmatpush1.bf16.msra.mxu1 %v7820_v41  ;;  %5998 = vmatpush1.bf16.msra.mxu0 %v7823_v42  ;;  %v7862_v41 = vld [vmem:[#allocation12 + $0xaf0] ss:$28 sps:$4 sm:$0xff]   ;;  %v7865_v42 = vld [vmem:[#allocation12 + $0xaf8] ss:$28 sps:$4 sm:$0xff]  }
 0x459   :  { %5835 = vmatprep.subr.bf16.mxu1 %v7828_v43  ;;  %5999 = vmatprep.subr.bf16.mxu0 %v7831_v44  ;;  %v7870_v43 = vld [vmem:[#allocation12 + $0xb2c] ss:$28 sps:$4 sm:$0xff]   ;;  %v7873_v44 = vld [vmem:[#allocation12 + $0xb34] ss:$28 sps:$4 sm:$0xff]  }
 0x45c   :  { %5836 = vmatpush1.bf16.msra.mxu1 %v7826_v45  ;;  %6000 = vmatpush1.bf16.msra.mxu0 %v7829_v46  ;;  %v7868_v45 = vld [vmem:[#allocation12 + $0xb28] ss:$28 sps:$4 sm:$0xff]   ;;  %v7871_v46 = vld [vmem:[#allocation12 + $0xb30] ss:$28 sps:$4 sm:$0xff]  }
 0x45d   :  { %5837 = vmatprep.subr.bf16.mxu1 %v7834_v47  ;;  %6001 = vmatprep.subr.bf16.mxu0 %v7837_v48  ;;  %v7876_v47 = vld [vmem:[#allocation12 + $0xb64] ss:$28 sps:$4 sm:$0xff]   ;;  %v7879_v48 = vld [vmem:[#allocation12 + $0xb6c] ss:$28 sps:$4 sm:$0xff]  }
 0x460   :  { %5838 = vmatpush1.bf16.msra.mxu1 %v7832_v20  ;;  %6002 = vmatpush1.bf16.msra.mxu0 %v7835_v52  ;;  %v7874_v20 = vld [vmem:[#allocation12 + $0xb60] ss:$28 sps:$4 sm:$0xff]   ;;  %v7877_v52 = vld [vmem:[#allocation12 + $0xb68] ss:$28 sps:$4 sm:$0xff]  }
 0x461   :  { %v2755_v1 = vpop.f32.mrb[8].mxu1  ;;  %5839 = vmatprep.subr.bf16.mxu1 %v7840_v54  ;;  %6003 = vmatprep.subr.bf16.mxu0 %v7843_v56  ;;  %v7885_v54 = vld [vmem:[#allocation12 + $0xba4] ss:$28 sps:$4 sm:$0xff]   ;;  %v7880_v56 = vld [vmem:[#allocation12 + $0xb98] ss:$28 sps:$4 sm:$0xff]  }
 0x462   :  { %v7333_v8 = vadd.f32 %v2755_v1, %v1215_v57  ;;  %v8682_v9 = vpop.f32.mrb[12].mxu0  ;;  %v2757_v10 = vpop.f32.mrb[9].mxu1  ;;  %v7883_v57 = vld [vmem:[#allocation12 + $0xba0] ss:$28 sps:$4 sm:$0xff]   ;;  %v7894_v1 = vld [vmem:[#allocation12 + $0xc0c] ss:$28 sps:$4 sm:$0xff]  }
 0x463   :  { %v7334_v11 = vadd.f32 %v2757_v10, %v1219_v58  ;;  %v2839_v12 = vpop.f32.mrb[13].mxu0  ;;  %v2759_v25 = vpop.f32.mrb[10].mxu1  ;;  %v7888_v58 = vld [vmem:[#allocation12 + $0xbd4] ss:$28 sps:$4 sm:$0xff]   ;;  %v7900_v10 = vld [vmem:[#allocation12 + $0xc44] ss:$28 sps:$4 sm:$0xff]  }
 0x464   :  { %v2848_v13 = vpack.c.bf16 %v7333_v8, %v7333_v8  ;;  %v7336_v14 = vadd.f32 %v2839_v12, %v1227_v59  ;;  %v2841_v16 = vpop.f32.mrb[14].mxu0  ;;  %5840 = vmatpush1.bf16.msra.mxu1 %v7838_v2  ;;  %6004 = vmatpush1.bf16.msra.mxu0 %v7841_v3  ;;  %v2760_v17 = vpop.f32.mrb[11].mxu1  ;;  %v7891_v59 = vld [vmem:[#allocation12 + $0xbdc] ss:$28 sps:$4 sm:$0xff]   ;;  %v7886_v2 = vld [vmem:[#allocation12 + $0xbd0] ss:$28 sps:$4 sm:$0xff]  }
 0x465   :  { %v2849_v21 = vpack.c.bf16 %v7334_v11, %v7334_v11  ;;  %v2842_v22 = vpop.f32.mrb[15].mxu0  ;;  %5841 = vmatprep.subr.bf16.mxu1 %v7846_v4  ;;  %6005 = vmatprep.subr.bf16.mxu0 %v7849_v7  ;;  %v7889_v3 = vld [vmem:[#allocation12 + $0xbd8] ss:$28 sps:$4 sm:$0xff]   ;;  %v7892_v7 = vld [vmem:[#allocation12 + $0xc08] ss:$28 sps:$4 sm:$0xff]  }
 0x466   :  { %v2864_v23 = vmul.bf16 1045249613, %v2848_v13  ;;  %v2851_v24 = vpack.c.bf16 %v7336_v14, %v7336_v14  ;;  %vm2856_vm12 = vcmp.gt.bf16.partialorder %v2848_v13, 0  ;;  %v7897_v4 = vld [vmem:[#allocation12 + $0xc14] ss:$28 sps:$4 sm:$0xff]  }
 0x467   :  { %vm2857_vm13 = vcmp.gt.bf16.partialorder %v2849_v21, 0  ;;  %v2865_v26 = vmul.bf16 1045249613, %v2849_v21  ;;  %v7895_v8 = vld [vmem:[#allocation12 + $0xc10] ss:$28 sps:$4 sm:$0xff]  }
 0x468   :  { %v2867_v28 = vmul.bf16 1045249613, %v2851_v24  ;;  %5842 = vmatpush1.bf16.msra.mxu1 %v7844_v18  ;;  %6006 = vmatpush1.bf16.msra.mxu0 %v7847_v19  ;;  %vm2859_vm14 = vcmp.gt.bf16.partialorder %v2851_v24, 0  ;;  %v8688_v30 = vsel %vm2856_vm12, %v2848_v13, %v2864_v23  ;;  %v7903_v11 = vld [vmem:[#allocation12 + $0xc4c] ss:$28 sps:$4 sm:$0xff]  }
 0x469   :  { %v8684_v33 = vsel %vm2857_vm13, %v2849_v21, %v2865_v26  ;;  %5852 = vmatprep.subr.bf16.mxu1 %v7852_v49  ;;  %6016 = vmatprep.subr.bf16.mxu0 %v7855_v27  ;;  %v7898_v12 = vld [vmem:[#allocation12 + $0xc40] ss:$28 sps:$4 sm:$0xff]   ;;  %v7901_v25 = vld [vmem:[#allocation12 + $0xc48] ss:$28 sps:$4 sm:$0xff]   ;;  %v7904_v16 = vld [vmem:[#allocation12 + $0xc78] ss:$28 sps:$4 sm:$0xff]  }
 0x46a   :  { %5843 = vmatprep.mubr.bf16.mxu1 %v8684_v33  ;;  %6007 = vmatprep.mubr.bf16.mxu0 %v8684_v33  ;;  %v8692_v34 = vsel %vm2859_vm14, %v2851_v24, %v2867_v28  ;;  %v7906_v13 = vld [vmem:[#allocation12 + $0xc7c] ss:$28 sps:$4 sm:$0xff]   ;;  %v7909_v14 = vld [vmem:[#allocation12 + $0xc84] ss:$28 sps:$4 sm:$0xff]   ;;  %v7912_v18 = vld [vmem:[#allocation12 + $0xcb4] ss:$28 sps:$4 sm:$0xff]  }
 0x46b   :  { %5844 = vmatmul.mubr.bf16.vlgmr.msra.gmra.mrb[12].mxu1 %v8688_v30  ;;  %6008 = vmatmul.mubr.bf16.vlgmr.msra.gmra.mrb[16].mxu0 %v8688_v30  ;;  %v7907_v17 = vld [vmem:[#allocation12 + $0xc80] ss:$28 sps:$4 sm:$0xff]   ;;  %v7910_v21 = vld [vmem:[#allocation12 + $0xcb0] ss:$28 sps:$4 sm:$0xff]   ;;  %v7913_v22 = vld [vmem:[#allocation12 + $0xcb8] ss:$28 sps:$4 sm:$0xff]  }
 0x46c   :  { %5853 = vmatpush1.bf16.msra.mxu1 %v7850_v29  ;;  %6017 = vmatpush1.bf16.msra.mxu0 %v7853_v62  ;;  %v7915_v19 = vld [vmem:[#allocation12 + $0xcbc] ss:$28 sps:$4 sm:$0xff]   ;;  %v7918_v49 = vld [vmem:[#allocation12 + $0xcec] ss:$28 sps:$4 sm:$0xff]   ;;  %v7921_v27 = vld [vmem:[#allocation12 + $0xcf4] ss:$28 sps:$4 sm:$0xff]  }
 0x46d   :  { %5884 = vmatprep.mubr.bf16.mxu1 %v8692_v34  ;;  %6048 = vmatprep.mubr.bf16.mxu0 %v8692_v34  ;;  %v7916_v23 = vld [vmem:[#allocation12 + $0xce8] ss:$28 sps:$4 sm:$0xff]   ;;  %v7919_v24 = vld [vmem:[#allocation12 + $0xcf0] ss:$28 sps:$4 sm:$0xff]   ;;  %v1222_v29 = vsub.s32 6, %v8592_v60 }
 0x46e   :  { %5854 = vmatprep.subr.bf16.mxu1 %v7858_v31  ;;  %6018 = vmatprep.subr.bf16.mxu0 %v7861_v32  ;;  %v7924_v26 = vld [vmem:[#allocation12 + $0xd24] ss:$28 sps:$4 sm:$0xff]   ;;  %v7927_v28 = vld [vmem:[#allocation12 + $0xd2c] ss:$28 sps:$4 sm:$0xff]   ;;  %v7930_v32 = vld [vmem:[#allocation12 + $0xd5c] ss:$28 sps:$4 sm:$0xff]  }
 0x46f   :  { %v7922_v62 = vld [vmem:[#allocation12 + $0xd20] ss:$28 sps:$4 sm:$0xff]   ;;  %v7925_v31 = vld [vmem:[#allocation12 + $0xd28] ss:$28 sps:$4 sm:$0xff]  }
 0x470   :  { %5855 = vmatpush1.bf16.msra.mxu1 %v7856_v35  ;;  %6019 = vmatpush1.bf16.msra.mxu0 %v7859_v36  ;;  %v7933_v35 = vld [vmem:[#allocation12 + $0xd64] ss:$28 sps:$4 sm:$0xff]   ;;  %v1223_v36 = vrot.slane %v8643_v15, %v1222_v29 }
 0x471   :  { %5856 = vmatprep.subr.bf16.mxu1 %v7864_v39  ;;  %6020 = vmatprep.subr.bf16.mxu0 %v7867_v5  ;;  %v7928_v39 = vld [vmem:[#allocation12 + $0xd58] ss:$28 sps:$4 sm:$0xff]   ;;  %v7931_v5 = vld [vmem:[#allocation12 + $0xd60] ss:$28 sps:$4 sm:$0xff]   ;;  %v7940_v15 = vld [vmem:[#allocation12 + $0xdc8] ss:$28 sps:$4 sm:$0xff]  }
 0x474   :  { %5857 = vmatpush1.bf16.msra.mxu1 %v7862_v41  ;;  %6021 = vmatpush1.bf16.msra.mxu0 %v7865_v42  ;;  %v7936_v41 = vld [vmem:[#allocation12 + $0xd94] ss:$28 sps:$4 sm:$0xff]   ;;  %v7939_v42 = vld [vmem:[#allocation12 + $0xd9c] ss:$28 sps:$4 sm:$0xff]  }
 0x475   :  { %5858 = vmatprep.subr.bf16.mxu1 %v7870_v43  ;;  %6022 = vmatprep.subr.bf16.mxu0 %v7873_v44  ;;  %v7335_v43 = vadd.f32 %v8682_v9, %v1223_v36  ;;  %v7934_v44 = vld [vmem:[#allocation12 + $0xd90] ss:$28 sps:$4 sm:$0xff]   ;;  %v7990_v36 = vld [vmem:[#allocation12 + $0x398] ss:$28 sps:$4 sm:$0xff]  }
 0x476   :  { %v7946_v9 = vld [vmem:[#allocation12 + $0x10] ss:$28 sps:$4 sm:$0xff]  }
 0x478   :  { %5859 = vmatpush1.bf16.msra.mxu1 %v7868_v45  ;;  %6023 = vmatpush1.bf16.msra.mxu0 %v7871_v46  ;;  %v7937_v45 = vld [vmem:[#allocation12 + $0xd98] ss:$28 sps:$4 sm:$0xff]   ;;  %v7942_v46 = vld [vmem:[#allocation12 + $0xdcc] ss:$28 sps:$4 sm:$0xff]  }
 0x479   :  { %5860 = vmatprep.subr.bf16.mxu1 %v7876_v47  ;;  %6024 = vmatprep.subr.bf16.mxu0 %v7879_v48  ;;  %v7945_v47 = vld [vmem:[#allocation12 + $0xdd4] ss:$28 sps:$4 sm:$0xff]   ;;  %v2850_v48 = vpack.c.bf16 %v7335_v43, %v7335_v43  ;;  %v7998_v43 = vld [vmem:[#allocation12 + $0x244] ss:$28 sps:$4 sm:$0xff]  }
 0x47b   :  { %vm2858_vm15 = vcmp.gt.bf16.partialorder %v2850_v48, 0 }
 0x47c   :  { %5861 = vmatpush1.bf16.msra.mxu1 %v7874_v20  ;;  %6025 = vmatpush1.bf16.msra.mxu0 %v7877_v52  ;;  %v7943_v20 = vld [vmem:[#allocation12 + $0xdd0] ss:$28 sps:$4 sm:$0xff]  }
 0x47d   :  { %5862 = vmatprep.subr.bf16.mxu1 %v7882_v53  ;;  %6026 = vmatprep.subr.bf16.mxu0 %v7885_v54  ;;  %v7948_v52 = vld [vmem:[#allocation12 + $0x14] ss:$28 sps:$4 sm:$0xff]   ;;  %v2866_v54 = vmul.bf16 1045249613, %v2850_v48 }
 0x47e   :  { %v7949_v53 = vld [vmem:[#allocation12 + $0x1d8] ss:$28 sps:$4 sm:$0xff]  }
 0x480   :  { %5863 = vmatpush1.bf16.msra.mxu1 %v7880_v56  ;;  %6027 = vmatpush1.bf16.msra.mxu0 %v7883_v57  ;;  %v7950_v56 = vld [vmem:[#allocation12 + $0x18] ss:$28 sps:$4 sm:$0xff]   ;;  %v8701_v57 = vsel %vm2858_vm15, %v2850_v48, %v2866_v54  ;;  %v8004_v48 = vld [vmem:[#allocation12 + $0x600] ss:$28 sps:$4 sm:$0xff]   ;;  %v8006_v54 = vld [vmem:[#allocation12 + $0x2b0] ss:$28 sps:$4 sm:$0xff]  }
 0x481   :  { %5864 = vmatprep.subr.bf16.mxu1 %v7888_v58  ;;  %6028 = vmatprep.subr.bf16.mxu0 %v7891_v59  ;;  %v7953_v58 = vld [vmem:[#allocation12 + $0x4c] ss:$28 sps:$4 sm:$0xff]  }
 0x482   :  { %v7954_v59 = vld [vmem:[#allocation12 + $0x210] ss:$28 sps:$4 sm:$0xff]  }
 0x484   :  { %5865 = vmatpush1.bf16.msra.mxu1 %v7886_v2  ;;  %6029 = vmatpush1.bf16.msra.mxu0 %v7889_v3  ;;  %v7951_v2 = vld [vmem:[#allocation12 + $0x48] ss:$28 sps:$4 sm:$0xff]   ;;  %v7955_v3 = vld [vmem:[#allocation12 + $0x50] ss:$28 sps:$4 sm:$0xff]  }
 0x485   :  { %5866 = vmatprep.subr.bf16.mxu1 %v7894_v1  ;;  %6030 = vmatprep.subr.bf16.mxu0 %v7897_v4  ;;  %v7958_v1 = vld [vmem:[#allocation12 + $0x84] ss:$28 sps:$4 sm:$0xff]  }
 0x486   :  { %v7959_v4 = vld [vmem:[#allocation12 + $0x248] ss:$28 sps:$4 sm:$0xff]  }
 0x488   :  { %5867 = vmatpush1.bf16.msra.mxu1 %v7892_v7  ;;  %6031 = vmatpush1.bf16.msra.mxu0 %v7895_v8  ;;  %v7956_v7 = vld [vmem:[#allocation12 + $0x80] ss:$28 sps:$4 sm:$0xff]   ;;  %v7960_v8 = vld [vmem:[#allocation12 + $0x88] ss:$28 sps:$4 sm:$0xff]  }
 0x489   :  { %5868 = vmatprep.subr.bf16.mxu1 %v7900_v10  ;;  %6032 = vmatprep.subr.bf16.mxu0 %v7903_v11  ;;  %v7963_v10 = vld [vmem:[#allocation12 + $0xbc] ss:$28 sps:$4 sm:$0xff]  }
 0x48a   :  { %v7964_v11 = vld [vmem:[#allocation12 + $0x280] ss:$28 sps:$4 sm:$0xff]  }
 0x48c   :  { %5869 = vmatpush1.bf16.msra.mxu1 %v7898_v12  ;;  %6033 = vmatpush1.bf16.msra.mxu0 %v7901_v25  ;;  %v7961_v12 = vld [vmem:[#allocation12 + $0xb8] ss:$28 sps:$4 sm:$0xff]   ;;  %v7965_v25 = vld [vmem:[#allocation12 + $0xc0] ss:$28 sps:$4 sm:$0xff]  }
 0x48d   :  { %5870 = vmatprep.subr.bf16.mxu1 %v7906_v13  ;;  %6034 = vmatprep.subr.bf16.mxu0 %v7909_v14  ;;  %v7968_v13 = vld [vmem:[#allocation12 + $0xf4] ss:$28 sps:$4 sm:$0xff]  }
 0x48e   :  { %v7966_v14 = vld [vmem:[#allocation12 + $0xf0] ss:$28 sps:$4 sm:$0xff]  }
 0x490   :  { %5871 = vmatpush1.bf16.msra.mxu1 %v7904_v16  ;;  %6035 = vmatpush1.bf16.msra.mxu0 %v7907_v17  ;;  %v7970_v16 = vld [vmem:[#allocation12 + $0xf8] ss:$28 sps:$4 sm:$0xff]   ;;  %v7973_v17 = vld [vmem:[#allocation12 + $0x12c] ss:$28 sps:$4 sm:$0xff]  }
 0x491   :  { %5872 = vmatprep.subr.bf16.mxu1 %v7912_v18  ;;  %6036 = vmatprep.subr.bf16.mxu0 %v7915_v19  ;;  %v7974_v18 = vld [vmem:[#allocation12 + $0x2f0] ss:$28 sps:$4 sm:$0xff]   ;;  %v7971_v19 = vld [vmem:[#allocation12 + $0x128] ss:$28 sps:$4 sm:$0xff]  }
 0x494   :  { %5873 = vmatpush1.bf16.msra.mxu1 %v7910_v21  ;;  %6037 = vmatpush1.bf16.msra.mxu0 %v7913_v22  ;;  %v7975_v21 = vld [vmem:[#allocation12 + $0x130] ss:$28 sps:$4 sm:$0xff]   ;;  %v7978_v22 = vld [vmem:[#allocation12 + $0x164] ss:$28 sps:$4 sm:$0xff]  }
 0x495   :  { %5874 = vmatprep.subr.bf16.mxu1 %v7918_v49  ;;  %6038 = vmatprep.subr.bf16.mxu0 %v7921_v27  ;;  %v7979_v49 = vld [vmem:[#allocation12 + $0x328] ss:$28 sps:$4 sm:$0xff]   ;;  %v7976_v27 = vld [vmem:[#allocation12 + $0x160] ss:$28 sps:$4 sm:$0xff]  }
 0x498   :  { %5875 = vmatpush1.bf16.msra.mxu1 %v7916_v23  ;;  %6039 = vmatpush1.bf16.msra.mxu0 %v7919_v24  ;;  %v7980_v23 = vld [vmem:[#allocation12 + $0x168] ss:$28 sps:$4 sm:$0xff]   ;;  %v7983_v24 = vld [vmem:[#allocation12 + $0x19c] ss:$28 sps:$4 sm:$0xff]  }
 0x499   :  { %5876 = vmatprep.subr.bf16.mxu1 %v7924_v26  ;;  %6040 = vmatprep.subr.bf16.mxu0 %v7927_v28  ;;  %v7984_v26 = vld [vmem:[#allocation12 + $0x360] ss:$28 sps:$4 sm:$0xff]   ;;  %v7981_v28 = vld [vmem:[#allocation12 + $0x198] ss:$28 sps:$4 sm:$0xff]  }
 0x49c   :  { %5877 = vmatpush1.bf16.msra.mxu1 %v7922_v62  ;;  %6041 = vmatpush1.bf16.msra.mxu0 %v7925_v31  ;;  %v7985_v62 = vld [vmem:[#allocation12 + $0x1a0] ss:$28 sps:$4 sm:$0xff]   ;;  %v7988_v31 = vld [vmem:[#allocation12 + $0x1d4] ss:$28 sps:$4 sm:$0xff]  }
 0x49d   :  { %5878 = vmatprep.subr.bf16.mxu1 %v7930_v32  ;;  %6042 = vmatprep.subr.bf16.mxu0 %v7933_v35  ;;  %v7989_v32 = vld [vmem:[#allocation12 + $0x558] ss:$28 sps:$4 sm:$0xff]   ;;  %v7986_v35 = vld [vmem:[#allocation12 + $0x1d0] ss:$28 sps:$4 sm:$0xff]  }
 0x4a0   :  { %5879 = vmatpush1.bf16.msra.mxu1 %v7928_v39  ;;  %6043 = vmatpush1.bf16.msra.mxu0 %v7931_v5  ;;  %v7993_v39 = vld [vmem:[#allocation12 + $0x20c] ss:$28 sps:$4 sm:$0xff]  }
 0x4a1   :  { %5880 = vmatprep.subr.bf16.mxu1 %v7936_v41  ;;  %6044 = vmatprep.subr.bf16.mxu0 %v7939_v42  ;;  %v7994_v5 = vld [vmem:[#allocation12 + $0x590] ss:$28 sps:$4 sm:$0xff]   ;;  %v7991_v41 = vld [vmem:[#allocation12 + $0x208] ss:$28 sps:$4 sm:$0xff]  }
 0x4a2   :  { %v7995_v42 = vld [vmem:[#allocation12 + $0x3d0] ss:$28 sps:$4 sm:$0xff]  }
 0x4a4   :  { %5881 = vmatpush1.bf16.msra.mxu1 %v7934_v44  ;;  %6045 = vmatpush1.bf16.msra.mxu0 %v7937_v45  ;;  %v7999_v44 = vld [vmem:[#allocation12 + $0x5c8] ss:$28 sps:$4 sm:$0xff]   ;;  %v7996_v45 = vld [vmem:[#allocation12 + $0x240] ss:$28 sps:$4 sm:$0xff]  }
 0x4a5   :  { %5882 = vmatprep.subr.bf16.mxu1 %v7942_v46  ;;  %6046 = vmatprep.subr.bf16.mxu0 %v7945_v47  ;;  %v8000_v46 = vld [vmem:[#allocation12 + $0x408] ss:$28 sps:$4 sm:$0xff]   ;;  %v8003_v47 = vld [vmem:[#allocation12 + $0x27c] ss:$28 sps:$4 sm:$0xff]  }
 0x4a8   :  { %5883 = vmatpush1.bf16.msra.mxu1 %v7940_v15  ;;  %6047 = vmatpush1.bf16.msra.mxu0 %v7943_v20  ;;  %v8001_v15 = vld [vmem:[#allocation12 + $0x278] ss:$28 sps:$4 sm:$0xff]   ;;  %v8005_v20 = vld [vmem:[#allocation12 + $0x440] ss:$28 sps:$4 sm:$0xff]  }
 0x4a9   :  { %6057 = vmatprep.subr.bf16.mxu1 %v7948_v52  ;;  %7241 = vmatprep.subr.bf16.mxu0 %v7949_v53  ;;  %v8008_v52 = vld [vmem:[#allocation12 + $0x2b4] ss:$28 sps:$4 sm:$0xff]  }
 0x4aa   :  { %v8009_v53 = vld [vmem:[#allocation12 + $0x638] ss:$28 sps:$4 sm:$0xff]  }
 0x4ab   :  { %5885 = vmatmul.mubr.bf16.vlgmr.msra.gmra.mrb[12].mxu1 %v8701_v57  ;;  %6049 = vmatmul.mubr.bf16.vlgmr.msra.gmra.mrb[16].mxu0 %v8701_v57 }
 0x4ac   :  { %6058 = vmatpush1.bf16.msra.mxu1 %v7946_v9  ;;  %6089 = vmatprep.mubr.bf16.mxu1 %v8653_v37  ;;  %v8010_v9 = vld [vmem:[#allocation12 + $0x478] ss:$28 sps:$4 sm:$0xff]  }
 0x4ad   :  { %7242 = vmatpush3.bf16.msra.mxu0 %v7950_v56  ;;  %6253 = vmatprep.mubr.bf16.mxu0 %v8653_v37  ;;  %v7969_v37 = vld [vmem:[#allocation12 + $0x2b8] ss:$28 sps:$4 sm:$0xff]   ;;  %v8013_v56 = vld [vmem:[#allocation12 + $0x2ec] ss:$28 sps:$4 sm:$0xff]  }
 0x4ae   :  { %6059 = vmatprep.subr.bf16.mxu1 %v7953_v58  ;;  %7243 = vmatprep.subr.bf16.mxu0 %v7954_v59  ;;  %v8014_v58 = vld [vmem:[#allocation12 + $0x670] ss:$28 sps:$4 sm:$0xff]   ;;  %v8011_v59 = vld [vmem:[#allocation12 + $0x2e8] ss:$28 sps:$4 sm:$0xff]  }
 0x4b0   :  { %6060 = vmatpush1.bf16.msra.mxu1 %v7951_v2  ;;  %v8015_v2 = vld [vmem:[#allocation12 + $0x4b0] ss:$28 sps:$4 sm:$0xff]  }
 0x4b1   :  { %7244 = vmatpush3.bf16.msra.mxu0 %v7955_v3  ;;  %6061 = vmatprep.subr.bf16.mxu1 %v7958_v1  ;;  %v8018_v3 = vld [vmem:[#allocation12 + $0x324] ss:$28 sps:$4 sm:$0xff]  }
 0x4b2   :  { %7245 = vmatprep.subr.bf16.mxu0 %v7959_v4  ;;  %v8019_v1 = vld [vmem:[#allocation12 + $0x6a8] ss:$28 sps:$4 sm:$0xff]   ;;  %v8016_v4 = vld [vmem:[#allocation12 + $0x320] ss:$28 sps:$4 sm:$0xff]  }
 0x4b4   :  { %6062 = vmatpush1.bf16.msra.mxu1 %v7956_v7  ;;  %v8020_v7 = vld [vmem:[#allocation12 + $0x4e8] ss:$28 sps:$4 sm:$0xff]  }
 0x4b5   :  { %7246 = vmatpush3.bf16.msra.mxu0 %v7960_v8  ;;  %6063 = vmatprep.subr.bf16.mxu1 %v7963_v10  ;;  %v8023_v8 = vld [vmem:[#allocation12 + $0x35c] ss:$28 sps:$4 sm:$0xff]  }
 0x4b6   :  { %7247 = vmatprep.subr.bf16.mxu0 %v7964_v11  ;;  %v8024_v10 = vld [vmem:[#allocation12 + $0x6e0] ss:$28 sps:$4 sm:$0xff]   ;;  %v8021_v11 = vld [vmem:[#allocation12 + $0x358] ss:$28 sps:$4 sm:$0xff]  }
 0x4b8   :  { %6064 = vmatpush1.bf16.msra.mxu1 %v7961_v12  ;;  %v8025_v12 = vld [vmem:[#allocation12 + $0x520] ss:$28 sps:$4 sm:$0xff]  }
 0x4b9   :  { %7248 = vmatpush3.bf16.msra.mxu0 %v7965_v25  ;;  %6065 = vmatprep.subr.bf16.mxu1 %v7968_v13  ;;  %v8028_v25 = vld [vmem:[#allocation12 + $0x394] ss:$28 sps:$4 sm:$0xff]  }
 0x4ba   :  { %7249 = vmatprep.subr.bf16.mxu0 %v7969_v37  ;;  %v8029_v13 = vld [vmem:[#allocation12 + $0x8d8] ss:$28 sps:$4 sm:$0xff]   ;;  %v8026_v37 = vld [vmem:[#allocation12 + $0x390] ss:$28 sps:$4 sm:$0xff]  }
 0x4bc   :  { %6066 = vmatpush1.bf16.msra.mxu1 %v7966_v14  ;;  %v8030_v14 = vld [vmem:[#allocation12 + $0x718] ss:$28 sps:$4 sm:$0xff]  }
 0x4bd   :  { %7250 = vmatpush3.bf16.msra.mxu0 %v7970_v16  ;;  %6067 = vmatprep.subr.bf16.mxu1 %v7973_v17  ;;  %v8033_v16 = vld [vmem:[#allocation12 + $0x3cc] ss:$28 sps:$4 sm:$0xff]  }
 0x4be   :  { %7251 = vmatprep.subr.bf16.mxu0 %v7974_v18  ;;  %v8034_v17 = vld [vmem:[#allocation12 + $0x910] ss:$28 sps:$4 sm:$0xff]   ;;  %v8031_v18 = vld [vmem:[#allocation12 + $0x3c8] ss:$28 sps:$4 sm:$0xff]  }
 0x4c0   :  { %6068 = vmatpush1.bf16.msra.mxu1 %v7971_v19  ;;  %v8035_v19 = vld [vmem:[#allocation12 + $0x750] ss:$28 sps:$4 sm:$0xff]  }
 0x4c1   :  { %7252 = vmatpush3.bf16.msra.mxu0 %v7975_v21  ;;  %6069 = vmatprep.subr.bf16.mxu1 %v7978_v22  ;;  %v8038_v21 = vld [vmem:[#allocation12 + $0x404] ss:$28 sps:$4 sm:$0xff]  }
 0x4c2   :  { %7253 = vmatprep.subr.bf16.mxu0 %v7979_v49  ;;  %v8039_v22 = vld [vmem:[#allocation12 + $0x948] ss:$28 sps:$4 sm:$0xff]   ;;  %v8036_v49 = vld [vmem:[#allocation12 + $0x400] ss:$28 sps:$4 sm:$0xff]  }
 0x4c4   :  { %6070 = vmatpush1.bf16.msra.mxu1 %v7976_v27  ;;  %v8043_v27 = vld [vmem:[#allocation12 + $0x43c] ss:$28 sps:$4 sm:$0xff]  }
 0x4c5   :  { %7254 = vmatpush3.bf16.msra.mxu0 %v7980_v23  ;;  %6071 = vmatprep.subr.bf16.mxu1 %v7983_v24  ;;  %v8044_v23 = vld [vmem:[#allocation12 + $0x980] ss:$28 sps:$4 sm:$0xff]   ;;  %v8041_v24 = vld [vmem:[#allocation12 + $0x438] ss:$28 sps:$4 sm:$0xff]  }
 0x4c6   :  { %7255 = vmatprep.subr.bf16.mxu0 %v7984_v26  ;;  %v8048_v26 = vld [vmem:[#allocation12 + $0x474] ss:$28 sps:$4 sm:$0xff]  }
 0x4c8   :  { %6072 = vmatpush1.bf16.msra.mxu1 %v7981_v28  ;;  %v8049_v28 = vld [vmem:[#allocation12 + $0x9b8] ss:$28 sps:$4 sm:$0xff]  }
 0x4c9   :  { %7256 = vmatpush3.bf16.msra.mxu0 %v7985_v62  ;;  %6073 = vmatprep.subr.bf16.mxu1 %v7988_v31  ;;  %v8046_v62 = vld [vmem:[#allocation12 + $0x470] ss:$28 sps:$4 sm:$0xff]   ;;  %v8050_v31 = vld [vmem:[#allocation12 + $0x7f8] ss:$28 sps:$4 sm:$0xff]  }
 0x4ca   :  { %7263 = vmatprep.subr.bf16.mxu0 %v7989_v32  ;;  %v8053_v32 = vld [vmem:[#allocation12 + $0x4ac] ss:$28 sps:$4 sm:$0xff]  }
 0x4cc   :  { %6254 = vmatmul.mubr.bf16.vlgmr.msra.gmra.mrb[20].mxu0 %v8657_v38  ;;  %6074 = vmatpush1.bf16.msra.mxu1 %v7986_v35  ;;  %v8054_v35 = vld [vmem:[#allocation12 + $0x9f0] ss:$28 sps:$4 sm:$0xff]  }
 0x4cd   :  { %7264 = vmatpush3.bf16.msra.mxu0 %v7990_v36  ;;  %6293 = vmatprep.mubr.bf16.mxu0 %v8661_v40  ;;  %v8051_v36 = vld [vmem:[#allocation12 + $0x4a8] ss:$28 sps:$4 sm:$0xff]  }
 0x4ce   :  { %6075 = vmatprep.subr.bf16.mxu1 %v7993_v39  ;;  %7265 = vmatprep.subr.bf16.mxu0 %v7994_v5  ;;  %v8055_v39 = vld [vmem:[#allocation12 + $0x830] ss:$28 sps:$4 sm:$0xff]   ;;  %v8058_v5 = vld [vmem:[#allocation12 + $0x4e4] ss:$28 sps:$4 sm:$0xff]  }
 0x4d0   :  { %6076 = vmatpush1.bf16.msra.mxu1 %v7991_v41  ;;  %v8059_v41 = vld [vmem:[#allocation12 + $0xa28] ss:$28 sps:$4 sm:$0xff]  }
 0x4d1   :  { %7266 = vmatpush3.bf16.msra.mxu0 %v7995_v42  ;;  %6077 = vmatprep.subr.bf16.mxu1 %v7998_v43  ;;  %v8056_v42 = vld [vmem:[#allocation12 + $0x4e0] ss:$28 sps:$4 sm:$0xff]   ;;  %v8060_v43 = vld [vmem:[#allocation12 + $0x868] ss:$28 sps:$4 sm:$0xff]  }
 0x4d2   :  { %7267 = vmatprep.subr.bf16.mxu0 %v7999_v44  ;;  %v8063_v44 = vld [vmem:[#allocation12 + $0x51c] ss:$28 sps:$4 sm:$0xff]  }
 0x4d4   :  { %6078 = vmatpush1.bf16.msra.mxu1 %v7996_v45  ;;  %v8064_v45 = vld [vmem:[#allocation12 + $0xa60] ss:$28 sps:$4 sm:$0xff]  }
 0x4d5   :  { %7268 = vmatpush3.bf16.msra.mxu0 %v8000_v46  ;;  %6079 = vmatprep.subr.bf16.mxu1 %v8003_v47  ;;  %v8061_v46 = vld [vmem:[#allocation12 + $0x518] ss:$28 sps:$4 sm:$0xff]   ;;  %v8065_v47 = vld [vmem:[#allocation12 + $0x8a0] ss:$28 sps:$4 sm:$0xff]  }
 0x4d6   :  { %7269 = vmatprep.subr.bf16.mxu0 %v8004_v48  ;;  %v8068_v48 = vld [vmem:[#allocation12 + $0x554] ss:$28 sps:$4 sm:$0xff]  }
 0x4d8   :  { %6080 = vmatpush1.bf16.msra.mxu1 %v8001_v15  ;;  %v8069_v15 = vld [vmem:[#allocation12 + $0xc58] ss:$28 sps:$4 sm:$0xff]  }
 0x4d9   :  { %7270 = vmatpush3.bf16.msra.mxu0 %v8005_v20  ;;  %6081 = vmatprep.subr.bf16.mxu1 %v8008_v52  ;;  %v8066_v20 = vld [vmem:[#allocation12 + $0x550] ss:$28 sps:$4 sm:$0xff]   ;;  %v8070_v52 = vld [vmem:[#allocation12 + $0xa98] ss:$28 sps:$4 sm:$0xff]  }
 0x4da   :  { %7271 = vmatprep.subr.bf16.mxu0 %v8009_v53  ;;  %v8073_v53 = vld [vmem:[#allocation12 + $0x58c] ss:$28 sps:$4 sm:$0xff]  }
 0x4dc   :  { %6082 = vmatpush1.bf16.msra.mxu1 %v8006_v54  ;;  %v8074_v54 = vld [vmem:[#allocation12 + $0xc90] ss:$28 sps:$4 sm:$0xff]  }
 0x4dd   :  { %7272 = vmatpush3.bf16.msra.mxu0 %v8010_v9  ;;  %6083 = vmatprep.subr.bf16.mxu1 %v8013_v56  ;;  %v8071_v9 = vld [vmem:[#allocation12 + $0x588] ss:$28 sps:$4 sm:$0xff]   ;;  %v8075_v56 = vld [vmem:[#allocation12 + $0xad0] ss:$28 sps:$4 sm:$0xff]  }
 0x4de   :  { %7273 = vmatprep.subr.bf16.mxu0 %v8014_v58  ;;  %v8078_v58 = vld [vmem:[#allocation12 + $0x5c4] ss:$28 sps:$4 sm:$0xff]  }
 0x4e0   :  { %6084 = vmatpush1.bf16.msra.mxu1 %v8011_v59  ;;  %v8079_v59 = vld [vmem:[#allocation12 + $0xcc8] ss:$28 sps:$4 sm:$0xff]  }
 0x4e1   :  { %7274 = vmatpush3.bf16.msra.mxu0 %v8015_v2  ;;  %6085 = vmatprep.subr.bf16.mxu1 %v8018_v3  ;;  %v8076_v2 = vld [vmem:[#allocation12 + $0x5c0] ss:$28 sps:$4 sm:$0xff]   ;;  %v8080_v3 = vld [vmem:[#allocation12 + $0xb08] ss:$28 sps:$4 sm:$0xff]  }
 0x4e2   :  { %7275 = vmatprep.subr.bf16.mxu0 %v8019_v1  ;;  %v8083_v1 = vld [vmem:[#allocation12 + $0x5fc] ss:$28 sps:$4 sm:$0xff]  }
 0x4e4   :  { %6086 = vmatpush1.bf16.msra.mxu1 %v8016_v4  ;;  %v8084_v4 = vld [vmem:[#allocation12 + $0xd00] ss:$28 sps:$4 sm:$0xff]  }
 0x4e5   :  { %7276 = vmatpush3.bf16.msra.mxu0 %v8020_v7  ;;  %6087 = vmatprep.subr.bf16.mxu1 %v8023_v8  ;;  %v8081_v7 = vld [vmem:[#allocation12 + $0x5f8] ss:$28 sps:$4 sm:$0xff]   ;;  %v8085_v8 = vld [vmem:[#allocation12 + $0xb40] ss:$28 sps:$4 sm:$0xff]  }
 0x4e6   :  { %7277 = vmatprep.subr.bf16.mxu0 %v8024_v10  ;;  %v8088_v10 = vld [vmem:[#allocation12 + $0x634] ss:$28 sps:$4 sm:$0xff]  }
 0x4e8   :  { %6088 = vmatpush1.bf16.msra.mxu1 %v8021_v11  ;;  %v8089_v11 = vld [vmem:[#allocation12 + $0xd38] ss:$28 sps:$4 sm:$0xff]  }
 0x4e9   :  { %7278 = vmatpush3.bf16.msra.mxu0 %v8025_v12  ;;  %6098 = vmatprep.subr.bf16.mxu1 %v8028_v25  ;;  %v8086_v12 = vld [vmem:[#allocation12 + $0x630] ss:$28 sps:$4 sm:$0xff]   ;;  %v8090_v25 = vld [vmem:[#allocation12 + $0xb78] ss:$28 sps:$4 sm:$0xff]  }
 0x4ea   :  { %7285 = vmatprep.subr.bf16.mxu0 %v8029_v13  ;;  %v8093_v13 = vld [vmem:[#allocation12 + $0x66c] ss:$28 sps:$4 sm:$0xff]  }
 0x4eb   :  { %6090 = vmatmul.mubr.bf16.vlgmr.msra.gmra.mrb[16].mxu1 %v8657_v38  ;;  %v8040_v38 = vld [vmem:[#allocation12 + $0x788] ss:$28 sps:$4 sm:$0xff]  }
 0x4ec   :  { %6294 = vmatmul.mubr.bf16.vlgmr.msra.gmra.mrb[24].mxu0 %v8668_v55  ;;  %6099 = vmatpush1.bf16.msra.mxu1 %v8026_v37  ;;  %v8094_v37 = vld [vmem:[#allocation12 + $0xd70] ss:$28 sps:$4 sm:$0xff]  }
 0x4ed   :  { %6130 = vmatprep.mubr.bf16.mxu1 %v8661_v40  ;;  %7286 = vmatpush3.bf16.msra.mxu0 %v8030_v14  ;;  %v8045_v40 = vld [vmem:[#allocation12 + $0x7c0] ss:$28 sps:$4 sm:$0xff]   ;;  %v8091_v14 = vld [vmem:[#allocation12 + $0x668] ss:$28 sps:$4 sm:$0xff]  }
 0x4ee   :  { %6333 = vmatprep.mubr.bf16.mxu0 %v8684_v33  ;;  %6100 = vmatprep.subr.bf16.mxu1 %v8033_v16  ;;  %v8095_v16 = vld [vmem:[#allocation12 + $0xbb0] ss:$28 sps:$4 sm:$0xff]  }
 0x4ef   :  { %7287 = vmatprep.subr.bf16.mxu0 %v8034_v17  ;;  %v8098_v17 = vld [vmem:[#allocation12 + $0x6a4] ss:$28 sps:$4 sm:$0xff]  }
 0x4f0   :  { %6101 = vmatpush1.bf16.msra.mxu1 %v8031_v18  ;;  %v8099_v18 = vld [vmem:[#allocation12 + $0xda8] ss:$28 sps:$4 sm:$0xff]  }
 0x4f1   :  { %7288 = vmatpush3.bf16.msra.mxu0 %v8035_v19  ;;  %6102 = vmatprep.subr.bf16.mxu1 %v8038_v21  ;;  %v8096_v19 = vld [vmem:[#allocation12 + $0x6a0] ss:$28 sps:$4 sm:$0xff]   ;;  %v8100_v21 = vld [vmem:[#allocation12 + $0xbe8] ss:$28 sps:$4 sm:$0xff]  }
 0x4f2   :  { %7289 = vmatprep.subr.bf16.mxu0 %v8039_v22  ;;  %v8103_v22 = vld [vmem:[#allocation12 + $0x6dc] ss:$28 sps:$4 sm:$0xff]  }
 0x4f4   :  { %6103 = vmatpush1.bf16.msra.mxu1 %v8036_v49  ;;  %v8104_v49 = vld [vmem:[#allocation12 + $0xde0] ss:$28 sps:$4 sm:$0xff]  }
 0x4f5   :  { %7290 = vmatpush3.bf16.msra.mxu0 %v8040_v38  ;;  %6104 = vmatprep.subr.bf16.mxu1 %v8043_v27  ;;  %v8101_v38 = vld [vmem:[#allocation12 + $0x6d8] ss:$28 sps:$4 sm:$0xff]   ;;  %v8105_v27 = vld [vmem:[#allocation12 + $0xc20] ss:$28 sps:$4 sm:$0xff]  }
 0x4f6   :  { %7291 = vmatprep.subr.bf16.mxu0 %v8044_v23  ;;  %v8108_v23 = vld [vmem:[#allocation12 + $0x714] ss:$28 sps:$4 sm:$0xff]  }
 0x4f8   :  { %6105 = vmatpush1.bf16.msra.mxu1 %v8041_v24  ;;  %v8106_v24 = vld [vmem:[#allocation12 + $0x710] ss:$28 sps:$4 sm:$0xff]  }
 0x4f9   :  { %7292 = vmatpush3.bf16.msra.mxu0 %v8045_v40  ;;  %6106 = vmatprep.subr.bf16.mxu1 %v8048_v26  ;;  %v8111_v40 = vld [vmem:[#allocation12 + $0x74c] ss:$28 sps:$4 sm:$0xff]  }
 0x4fa   :  { %7293 = vmatprep.subr.bf16.mxu0 %v8049_v28  ;;  %v8109_v26 = vld [vmem:[#allocation12 + $0x748] ss:$28 sps:$4 sm:$0xff]  }
 0x4fb   :  { %v8114_v28 = vld [vmem:[#allocation12 + $0x784] ss:$28 sps:$4 sm:$0xff]  }
 0x4fc   :  { %6107 = vmatpush1.bf16.msra.mxu1 %v8046_v62  ;;  %v8112_v62 = vld [vmem:[#allocation12 + $0x780] ss:$28 sps:$4 sm:$0xff]  }
 0x4fd   :  { %7294 = vmatpush3.bf16.msra.mxu0 %v8050_v31  ;;  %6108 = vmatprep.subr.bf16.mxu1 %v8053_v32  ;;  %v8117_v31 = vld [vmem:[#allocation12 + $0x7bc] ss:$28 sps:$4 sm:$0xff]  }
 0x4fe   :  { %7295 = vmatprep.subr.bf16.mxu0 %v8054_v35  ;;  %v8115_v32 = vld [vmem:[#allocation12 + $0x7b8] ss:$28 sps:$4 sm:$0xff]  }
 0x4ff   :  { %v8120_v35 = vld [vmem:[#allocation12 + $0x7f4] ss:$28 sps:$4 sm:$0xff]  }
 0x500   :  { %6109 = vmatpush1.bf16.msra.mxu1 %v8051_v36  ;;  %v8118_v36 = vld [vmem:[#allocation12 + $0x7f0] ss:$28 sps:$4 sm:$0xff]  }
 0x501   :  { %7296 = vmatpush3.bf16.msra.mxu0 %v8055_v39  ;;  %6110 = vmatprep.subr.bf16.mxu1 %v8058_v5  ;;  %v8121_v39 = vld [vmem:[#allocation12 + $0x828] ss:$28 sps:$4 sm:$0xff]  }
 0x502   :  { %7297 = vmatprep.subr.bf16.mxu0 %v8059_v41  ;;  %v8126_v5 = vld [vmem:[#allocation12 + $0x864] ss:$28 sps:$4 sm:$0xff]   ;;  %v8129_v41 = vld [vmem:[#allocation12 + $0x89c] ss:$28 sps:$4 sm:$0xff]  }
 0x504   :  { %6111 = vmatpush1.bf16.msra.mxu1 %v8056_v42  ;;  %v8127_v42 = vld [vmem:[#allocation12 + $0x898] ss:$28 sps:$4 sm:$0xff]  }
 0x505   :  { %7298 = vmatpush3.bf16.msra.mxu0 %v8060_v43  ;;  %6112 = vmatprep.subr.bf16.mxu1 %v8063_v44  ;;  %v8132_v43 = vld [vmem:[#allocation12 + $0x8d4] ss:$28 sps:$4 sm:$0xff]  }
 0x506   :  { %7299 = vmatprep.subr.bf16.mxu0 %v8064_v45  ;;  %v8130_v44 = vld [vmem:[#allocation12 + $0x8d0] ss:$28 sps:$4 sm:$0xff]  }
 0x507   :  { %v8135_v45 = vld [vmem:[#allocation12 + $0x90c] ss:$28 sps:$4 sm:$0xff]  }
 0x508   :  { %6113 = vmatpush1.bf16.msra.mxu1 %v8061_v46  ;;  %v8133_v46 = vld [vmem:[#allocation12 + $0x908] ss:$28 sps:$4 sm:$0xff]  }
 0x509   :  { %7300 = vmatpush3.bf16.msra.mxu0 %v8065_v47  ;;  %6114 = vmatprep.subr.bf16.mxu1 %v8068_v48  ;;  %v8138_v47 = vld [vmem:[#allocation12 + $0x944] ss:$28 sps:$4 sm:$0xff]  }
 0x50a   :  { %7307 = vmatprep.subr.bf16.mxu0 %v8069_v15  ;;  %v8136_v48 = vld [vmem:[#allocation12 + $0x940] ss:$28 sps:$4 sm:$0xff]  }
 0x50b   :  { %v8141_v15 = vld [vmem:[#allocation12 + $0x97c] ss:$28 sps:$4 sm:$0xff]  }
 0x50c   :  { %6334 = vmatmul.mubr.bf16.vlgmr.msra.gmra.mrb[28].mxu0 %v8688_v30  ;;  %6115 = vmatpush1.bf16.msra.mxu1 %v8066_v20  ;;  %v8139_v20 = vld [vmem:[#allocation12 + $0x978] ss:$28 sps:$4 sm:$0xff]  }
 0x50d   :  { %7308 = vmatpush3.bf16.msra.mxu0 %v8070_v52  ;;  %6373 = vmatprep.mubr.bf16.mxu0 %v8692_v34  ;;  %v8144_v52 = vld [vmem:[#allocation12 + $0x9b4] ss:$28 sps:$4 sm:$0xff]  }
 0x50e   :  { %6116 = vmatprep.subr.bf16.mxu1 %v8073_v53  ;;  %7309 = vmatprep.subr.bf16.mxu0 %v8074_v54  ;;  %v8142_v53 = vld [vmem:[#allocation12 + $0x9b0] ss:$28 sps:$4 sm:$0xff]  }
 0x50f   :  { %v8147_v54 = vld [vmem:[#allocation12 + $0x9ec] ss:$28 sps:$4 sm:$0xff]  }
 0x510   :  { %6117 = vmatpush1.bf16.msra.mxu1 %v8071_v9  ;;  %v8145_v9 = vld [vmem:[#allocation12 + $0x9e8] ss:$28 sps:$4 sm:$0xff]  }
 0x511   :  { %7310 = vmatpush3.bf16.msra.mxu0 %v8075_v56  ;;  %6118 = vmatprep.subr.bf16.mxu1 %v8078_v58  ;;  %v8150_v56 = vld [vmem:[#allocation12 + $0xa24] ss:$28 sps:$4 sm:$0xff]  }
 0x512   :  { %7311 = vmatprep.subr.bf16.mxu0 %v8079_v59  ;;  %v8148_v58 = vld [vmem:[#allocation12 + $0xa20] ss:$28 sps:$4 sm:$0xff]  }
 0x513   :  { %v8153_v59 = vld [vmem:[#allocation12 + $0xa5c] ss:$28 sps:$4 sm:$0xff]  }
 0x514   :  { %6119 = vmatpush1.bf16.msra.mxu1 %v8076_v2  ;;  %v8151_v2 = vld [vmem:[#allocation12 + $0xa58] ss:$28 sps:$4 sm:$0xff]  }
 0x515   :  { %7312 = vmatpush3.bf16.msra.mxu0 %v8080_v3  ;;  %6120 = vmatprep.subr.bf16.mxu1 %v8083_v1  ;;  %v8156_v3 = vld [vmem:[#allocation12 + $0xa94] ss:$28 sps:$4 sm:$0xff]  }
 0x516   :  { %7313 = vmatprep.subr.bf16.mxu0 %v8084_v4  ;;  %v8154_v1 = vld [vmem:[#allocation12 + $0xa90] ss:$28 sps:$4 sm:$0xff]  }
 0x517   :  { %v8159_v4 = vld [vmem:[#allocation12 + $0xacc] ss:$28 sps:$4 sm:$0xff]  }
 0x518   :  { %6121 = vmatpush1.bf16.msra.mxu1 %v8081_v7  ;;  %v8157_v7 = vld [vmem:[#allocation12 + $0xac8] ss:$28 sps:$4 sm:$0xff]  }
 0x519   :  { %7314 = vmatpush3.bf16.msra.mxu0 %v8085_v8  ;;  %6122 = vmatprep.subr.bf16.mxu1 %v8088_v10  ;;  %v8162_v8 = vld [vmem:[#allocation12 + $0xb04] ss:$28 sps:$4 sm:$0xff]  }
 0x51a   :  { %7315 = vmatprep.subr.bf16.mxu0 %v8089_v11  ;;  %v8160_v10 = vld [vmem:[#allocation12 + $0xb00] ss:$28 sps:$4 sm:$0xff]  }
 0x51b   :  { %v8165_v11 = vld [vmem:[#allocation12 + $0xb3c] ss:$28 sps:$4 sm:$0xff]  }
 0x51c   :  { %6123 = vmatpush1.bf16.msra.mxu1 %v8086_v12  ;;  %v8163_v12 = vld [vmem:[#allocation12 + $0xb38] ss:$28 sps:$4 sm:$0xff]  }
 0x51d   :  { %7316 = vmatpush3.bf16.msra.mxu0 %v8090_v25  ;;  %6124 = vmatprep.subr.bf16.mxu1 %v8093_v13  ;;  %v8168_v25 = vld [vmem:[#allocation12 + $0xb74] ss:$28 sps:$4 sm:$0xff]  }
 0x51e   :  { %7317 = vmatprep.subr.bf16.mxu0 %v8094_v37  ;;  %v8166_v13 = vld [vmem:[#allocation12 + $0xb70] ss:$28 sps:$4 sm:$0xff]   ;;  %v8720_v37 = vld [vmem:[#allocation13] sm:$0xff] }
 0x520   :  { %6125 = vmatpush1.bf16.msra.mxu1 %v8091_v14  ;;  %v3401_v14 = vrot.slane %v8720_v37, %v8626_v6 }
 0x521   :  { %7318 = vmatpush3.bf16.msra.mxu0 %v8095_v16  ;;  %6126 = vmatprep.subr.bf16.mxu1 %v8098_v17  ;;  %v3397_v16 = vrot.slane %v8720_v37, %v8600_v63  ;;  %v3405_v17 = vrot.slane %v8720_v37, %v8603_v0  ;;  %v8177_v0 = vld [vmem:[#allocation12 + $0xc1c] ss:$28 sps:$4 sm:$0xff]  }
 0x522   :  { %7319 = vmatprep.subr.bf16.mxu0 %v8099_v18  ;;  %v8169_v18 = vld [vmem:[#allocation12 + $0xba8] ss:$28 sps:$4 sm:$0xff]  }
 0x524   :  { %6127 = vmatpush1.bf16.msra.mxu1 %v8096_v19  ;;  %v8174_v19 = vld [vmem:[#allocation12 + $0xbe4] ss:$28 sps:$4 sm:$0xff]  }
 0x525   :  { %7320 = vmatpush3.bf16.msra.mxu0 %v8100_v21  ;;  %6128 = vmatprep.subr.bf16.mxu1 %v8103_v22 }
 0x526   :  { %7321 = vmatprep.subr.bf16.mxu0 %v8104_v49 }
 0x528   :  { %6129 = vmatpush1.bf16.msra.mxu1 %v8101_v38 }
 0x529   :  { %7322 = vmatpush3.bf16.msra.mxu0 %v8105_v27  ;;  %6139 = vmatprep.subr.bf16.mxu1 %v8108_v23 }
 0x52b   :  { %6131 = vmatmul.mubr.bf16.vlgmr.msra.gmra.mrb[16].mxu1 %v8668_v55  ;;  %v8123_v55 = vld [vmem:[#allocation12 + $0x82c] ss:$28 sps:$4 sm:$0xff]  }
 0x52c   :  { %6374 = vmatmul.mubr.bf16.vlgmr.msra.gmra.mrb[32].mxu0 %v8701_v57  ;;  %6140 = vmatpush1.bf16.msra.mxu1 %v8106_v24 }
 0x52d   :  { %6171 = vmatprep.mubr.bf16.mxu1 %v8684_v33  ;;  %6141 = vmatprep.subr.bf16.mxu1 %v8111_v40  ;;  %v8124_v33 = vld [vmem:[#allocation12 + $0x860] ss:$28 sps:$4 sm:$0xff]  }
 0x530   :  { %6142 = vmatpush1.bf16.msra.mxu1 %v8109_v26  ;;  %v8172_v26 = vld [vmem:[#allocation12 + $0xbe0] ss:$28 sps:$4 sm:$0xff]  }
 0x531   :  { %6143 = vmatprep.subr.bf16.mxu1 %v8114_v28 }
 0x534   :  { %6144 = vmatpush1.bf16.msra.mxu1 %v8112_v62  ;;  %v8175_v62 = vld [vmem:[#allocation12 + $0xc18] ss:$28 sps:$4 sm:$0xff]  }
 0x535   :  { %6145 = vmatprep.subr.bf16.mxu1 %v8117_v31  ;;  %v8180_v31 = vld [vmem:[#allocation12 + $0xc54] ss:$28 sps:$4 sm:$0xff]  }
 0x538   :  { %6146 = vmatpush1.bf16.msra.mxu1 %v8115_v32  ;;  %v8178_v32 = vld [vmem:[#allocation12 + $0xc50] ss:$28 sps:$4 sm:$0xff]  }
 0x539   :  { %6147 = vmatprep.subr.bf16.mxu1 %v8120_v35  ;;  %v8183_v35 = vld [vmem:[#allocation12 + $0xc8c] ss:$28 sps:$4 sm:$0xff]  }
 0x53c   :  { %6148 = vmatpush1.bf16.msra.mxu1 %v8118_v36 }
 0x53d   :  { %6149 = vmatprep.subr.bf16.mxu1 %v8123_v55 }
 0x540   :  { %6150 = vmatpush1.bf16.msra.mxu1 %v8121_v39  ;;  %v8181_v39 = vld [vmem:[#allocation12 + $0xc88] ss:$28 sps:$4 sm:$0xff]  }
 0x541   :  { %6151 = vmatprep.subr.bf16.mxu1 %v8126_v5 }
 0x544   :  { %6152 = vmatpush1.bf16.msra.mxu1 %v8124_v33  ;;  %v8186_v33 = vld [vmem:[#allocation12 + $0xcc4] ss:$28 sps:$4 sm:$0xff]  }
 0x545   :  { %6153 = vmatprep.subr.bf16.mxu1 %v8129_v41 }
 0x548   :  { %6154 = vmatpush1.bf16.msra.mxu1 %v8127_v42 }
 0x549   :  { %6155 = vmatprep.subr.bf16.mxu1 %v8132_v43 }
 0x54c   :  { %6156 = vmatpush1.bf16.msra.mxu1 %v8130_v44  ;;  %v8184_v44 = vld [vmem:[#allocation12 + $0xcc0] ss:$28 sps:$4 sm:$0xff]  }
 0x54d   :  { %6157 = vmatprep.subr.bf16.mxu1 %v8135_v45  ;;  %v8189_v45 = vld [vmem:[#allocation12 + $0xcfc] ss:$28 sps:$4 sm:$0xff]  }
 0x550   :  { %6158 = vmatpush1.bf16.msra.mxu1 %v8133_v46  ;;  %v8187_v46 = vld [vmem:[#allocation12 + $0xcf8] ss:$28 sps:$4 sm:$0xff]  }
 0x551   :  { %6159 = vmatprep.subr.bf16.mxu1 %v8138_v47  ;;  %v8192_v47 = vld [vmem:[#allocation12 + $0xd34] ss:$28 sps:$4 sm:$0xff]  }
 0x554   :  { %6160 = vmatpush1.bf16.msra.mxu1 %v8136_v48  ;;  %v8190_v48 = vld [vmem:[#allocation12 + $0xd30] ss:$28 sps:$4 sm:$0xff]  }
 0x555   :  { %6161 = vmatprep.subr.bf16.mxu1 %v8141_v15  ;;  %v8195_v15 = vld [vmem:[#allocation12 + $0xd6c] ss:$28 sps:$4 sm:$0xff]  }
 0x558   :  { %6162 = vmatpush1.bf16.msra.mxu1 %v8139_v20  ;;  %v8193_v20 = vld [vmem:[#allocation12 + $0xd68] ss:$28 sps:$4 sm:$0xff]  }
 0x559   :  { %6163 = vmatprep.subr.bf16.mxu1 %v8144_v52  ;;  %v8198_v52 = vld [vmem:[#allocation12 + $0xda4] ss:$28 sps:$4 sm:$0xff]  }
 0x55c   :  { %6164 = vmatpush1.bf16.msra.mxu1 %v8142_v53 }
 0x55d   :  { %6165 = vmatprep.subr.bf16.mxu1 %v8147_v54 }
 0x560   :  { %6166 = vmatpush1.bf16.msra.mxu1 %v8145_v9  ;;  %v8196_v9 = vld [vmem:[#allocation12 + $0xda0] ss:$28 sps:$4 sm:$0xff]  }
 0x561   :  { %6167 = vmatprep.subr.bf16.mxu1 %v8150_v56 }
 0x564   :  { %6168 = vmatpush1.bf16.msra.mxu1 %v8148_v58 }
 0x565   :  { %6169 = vmatprep.subr.bf16.mxu1 %v8153_v59  ;;  %v8201_v59 = vld [vmem:[#allocation12 + $0xddc] ss:$28 sps:$4 sm:$0xff]  }
 0x568   :  { %6170 = vmatpush1.bf16.msra.mxu1 %v8151_v2 }
 0x569   :  { %6180 = vmatprep.subr.bf16.mxu1 %v8156_v3  ;;  %v8199_v3 = vld [vmem:[#allocation12 + $0xdd8] ss:$28 sps:$4 sm:$0xff]  }
 0x56b   :  { %6172 = vmatmul.mubr.bf16.vlgmr.msra.gmra.mrb[16].mxu1 %v8688_v30  ;;  %v8171_v30 = vld [vmem:[#allocation12 + $0xbac] ss:$28 sps:$4 sm:$0xff]  }
 0x56c   :  { %6181 = vmatpush1.bf16.msra.mxu1 %v8154_v1  ;;  %6212 = vmatprep.mubr.bf16.mxu1 %v8692_v34  ;;  %v3393_v34 = vrot.slane %v8720_v37, %v8595_v61  ;;  %v3417_v1 = vrot.slane %v8720_v37, %v1222_v29 }
 0x56d   :  { %6182 = vmatprep.subr.bf16.mxu1 %v8159_v4 }
 0x570   :  { %6183 = vmatpush1.bf16.msra.mxu1 %v8157_v7 }
 0x571   :  { %6184 = vmatprep.subr.bf16.mxu1 %v8162_v8 }
 0x574   :  { %6185 = vmatpush1.bf16.msra.mxu1 %v8160_v10 }
 0x575   :  { %6186 = vmatprep.subr.bf16.mxu1 %v8165_v11 }
 0x578   :  { %6187 = vmatpush1.bf16.msra.mxu1 %v8163_v12 }
 0x579   :  { %6188 = vmatprep.subr.bf16.mxu1 %v8168_v25 }
 0x57c   :  { %6189 = vmatpush1.bf16.msra.mxu1 %v8166_v13 }
 0x57d   :  { %6190 = vmatprep.subr.bf16.mxu1 %v8171_v30 }
 0x57e   :  { %v5886_v21 = vpop.f32.mrb[12].mxu1  ;;  %v6050_v22 = vpop.f32.mrb[16].mxu0 }
 0x57f   :  { %v7337_v49 = vadd.f32 %v5886_v21, %v3393_v34  ;;  %v7339_v38 = vadd.f32 %v6050_v22, %v3401_v14  ;;  %v5888_v27 = vpop.f32.mrb[13].mxu1  ;;  %v6052_v23 = vpop.f32.mrb[17].mxu0 }
 0x580   :  { %v7338_v61 = vadd.f32 %v5888_v27, %v3397_v16  ;;  %v7340_v24 = vadd.f32 %v6052_v23, %v3405_v17  ;;  %v5890_v40 = vpop.f32.mrb[14].mxu1  ;;  %v6054_v6 = vpop.f32.mrb[18].mxu0  ;;  %6191 = vmatpush1.bf16.msra.mxu1 %v8169_v18  ;;  %v3409_v27 = vrot.slane %v8720_v37, %v1214_v50  ;;  %v3413_v23 = vrot.slane %v8720_v37, %v1218_v51 }
 0x581   :  { %8202 = vtanh.f32 %v7337_v49  ;;  %v5891_v63 = vpop.f32.mrb[15].mxu1  ;;  %v6055_v28 = vpop.f32.mrb[19].mxu0  ;;  %6192 = vmatprep.subr.bf16.mxu1 %v8174_v19 }
 0x582   :  { %8204 = vtanh.f32 %v7339_v38 }
 0x583   :  { %8206 = vtanh.f32 %v7338_v61 }
 0x584   :  { %8208 = vtanh.f32 %v7340_v24  ;;  %6193 = vmatpush1.bf16.msra.mxu1 %v8172_v26 }
 0x585   :  { %6194 = vmatprep.subr.bf16.mxu1 %v8177_v0 }
 0x588   :  { %6195 = vmatpush1.bf16.msra.mxu1 %v8175_v62 }
 0x589   :  { %6196 = vmatprep.subr.bf16.mxu1 %v8180_v31 }
 0x58b   :  { %v8203_v36 = vpop.eup %8202 }
 0x58c   :  { %v8205_v55 = vpop.eup %8204  ;;  %6197 = vmatpush1.bf16.msra.mxu1 %v8178_v32 }
 0x58d   :  { %v8207_v5 = vpop.eup %8206  ;;  %6198 = vmatprep.subr.bf16.mxu1 %v8183_v35 }
 0x58e   :  { %v8209_v41 = vpop.eup %8208  ;;  %v7237_v42 = vpack.c.bf16 %v8207_v5, %v8203_v36 }
 0x58f   :  { %v7238_v43 = vpack.c.bf16 %v8209_v41, %v8205_v55 }
 0x590   :  { %6417 = vst [vmem:[%s8762_s10] sm:$0xff] %v7237_v42  ;;  %6199 = vmatpush1.bf16.msra.mxu1 %v8181_v39 }
 0x591   :  { %6418 = vst [vmem:[%s8762_s10 + $0x8] sm:$0xff] %v7238_v43  ;;  %6200 = vmatprep.subr.bf16.mxu1 %v8186_v33 }
 0x594   :  { %6201 = vmatpush1.bf16.msra.mxu1 %v8184_v44 }
 0x595   :  { %6202 = vmatprep.subr.bf16.mxu1 %v8189_v45 }
 0x598   :  { %6203 = vmatpush1.bf16.msra.mxu1 %v8187_v46 }
 0x599   :  { %6204 = vmatprep.subr.bf16.mxu1 %v8192_v47 }
 0x59c   :  { %6205 = vmatpush1.bf16.msra.mxu1 %v8190_v48 }
 0x59d   :  { %6206 = vmatprep.subr.bf16.mxu1 %v8195_v15 }
 0x59f   :  { %v7257_v53 = vpop.f32.mrb[20].mxu0 }
 0x5a0   :  { %v7258_v54 = vpop.f32.mrb[21].mxu0  ;;  %6207 = vmatpush1.bf16.msra.mxu1 %v8193_v20 }
 0x5a1   :  { %v7259_v56 = vadd.f32 %v7258_v54, %v7257_v53  ;;  %v7260_v58 = vpop.f32.mrb[22].mxu0  ;;  %6208 = vmatprep.subr.bf16.mxu1 %v8198_v52 }
 0x5a2   :  { %v7261_v2 = vpop.f32.mrb[23].mxu0 }
 0x5a3   :  { %v6256_v8 = vadd.f32 %v7259_v56, %v3417_v1 }
 0x5a4   :  { %6209 = vmatpush1.bf16.msra.mxu1 %v8196_v9 }
 0x5a5   :  { %6210 = vmatprep.subr.bf16.mxu1 %v8201_v59 }
 0x5a8   :  { %6211 = vmatpush1.bf16.msra.mxu1 %v8199_v3 }
 0x5ab   :  { %6213 = vmatmul.mubr.bf16.vlgmr.msra.gmra.mrb[16].mxu1 %v8701_v57 }
 0x5bf   :  { %v7279_v4 = vpop.f32.mrb[24].mxu0 }
 0x5c0   :  { %v7280_v7 = vpop.f32.mrb[25].mxu0 }
 0x5c1   :  { %v7281_v10 = vadd.f32 %v7280_v7, %v7279_v4  ;;  %v7282_v11 = vpop.f32.mrb[26].mxu0 }
 0x5c2   :  { %v7283_v12 = vpop.f32.mrb[27].mxu0 }
 0x5c3   :  { %v6296_v25 = vadd.f32 %v7281_v10, %v6256_v8 }
 0x5df   :  { %v7301_v13 = vpop.f32.mrb[28].mxu0 }
 0x5e0   :  { %v7302_v30 = vpop.f32.mrb[29].mxu0 }
 0x5e1   :  { %v7303_v34 = vadd.f32 %v7302_v30, %v7301_v13  ;;  %v7304_v14 = vpop.f32.mrb[30].mxu0 }
 0x5e2   :  { %v7305_v16 = vpop.f32.mrb[31].mxu0 }
 0x5e3   :  { %v6336_v17 = vadd.f32 %v7303_v34, %v6296_v25 }
 0x5ff   :  { %v7323_v18 = vpop.f32.mrb[32].mxu0 }
 0x600   :  { %v7324_v19 = vpop.f32.mrb[33].mxu0 }
 0x601   :  { %v7325_v57 = vadd.f32 %v7324_v19, %v7323_v18  ;;  %v7326_v21 = vpop.f32.mrb[34].mxu0 }
 0x602   :  { %v7327_v22 = vpop.f32.mrb[35].mxu0 }
 0x603   :  { %v6376_v49 = vadd.f32 %v7325_v57, %v6336_v17 }
 0x605   :  { %8210 = vtanh.f32 %v6376_v49 }
 0x60f   :  { %v8211_v29 = vpop.eup %8210 }
 0x610   :  { %v7240_v38 = vpack.c.bf16 %v8211_v29, %v8211_v29 }
 0x612   :  { %6420 = vst [vmem:[%s8762_s10 + $0x18] sm:$0xf] %v7240_v38 }
 0x67e   :  { %v6214_v61 = vpop.f32.mrb[16].mxu1 }
 0x67f   :  { %v7341_v24 = vadd.f32 %v6214_v61, %v3409_v27  ;;  %v6216_v40 = vpop.f32.mrb[17].mxu1 }
 0x680   :  { %v7342_v6 = vadd.f32 %v6216_v40, %v3413_v23  ;;  %v6218_v26 = vpop.f32.mrb[18].mxu1 }
 0x681   :  { %8212 = vtanh.f32 %v7341_v24  ;;  %v6219_v63 = vpop.f32.mrb[19].mxu1 }
 0x682   :  { %8214 = vtanh.f32 %v7342_v6 }
 0x68b   :  { %v8213_v28 = vpop.eup %8212 }
 0x68c   :  { %v8215_v0 = vpop.eup %8214 }
 0x68d   :  { %v7239_v62 = vpack.c.bf16 %v8215_v0, %v8213_v28 }
 0x68f   :  { %6419 = vst [vmem:[%s8762_s10 + $0x10] sm:$0xff] %v7239_v62 }
 0x690   :  { %6425 = vsyncpa [#allocation3], 1 }
 0x691   :  { %6426 = vsyncpa [#allocation5], 1 }
 0x692   :  { %6427 = vsyncpa [#allocation8], 1 }
 0x693   :  { %6428 = vsyncpa [#allocation11], 1 }
 0x694   :  { %6429 = vsyncpa [#allocation14], 1 }

// kernel: forward.1
= control target key start
LH: loop header
LB: loop body
LE: loop exit
PB: predicated region body
PF: predicated region fallthrough
CT: control target
= control target key end

     0   :  { %15 = vsyncpa [#allocation3], 0  ;;  %s8752_s0 = inlined_call_operand.vmem [shape: s32[8,1], index: 0, kind: input, shape index: {}]   ;;  %s8753_s1 = inlined_call_operand.vmem [shape: f32[8,128], index: 1, kind: input, shape index: {}]   ;;  %s8754_s2 = inlined_call_operand.hbm [shape: bf16[128,256], index: 2, kind: input, shape index: {}]   ;;  %s8755_s3 = inlined_call_operand.hbm [shape: bf16[128,256], index: 3, kind: input, shape index: {}]   ;;  %s8756_s4 = inlined_call_operand.hbm [shape: bf16[256,512], index: 4, kind: input, shape index: {}]   ;;  %s8757_s5 = inlined_call_operand.hbm [shape: f32[1,512], index: 5, kind: input, shape index: {}]   ;;  %s8758_s6 = inlined_call_operand.hbm [shape: bf16[512,1024], index: 6, kind: input, shape index: {}]   ;;  %s8759_s7 = inlined_call_operand.hbm [shape: f32[1,1024], index: 7, kind: input, shape index: {}]   ;;  %s8760_s8 = inlined_call_operand.hbm [shape: bf16[1024,896], index: 8, kind: input, shape index: {}]   ;;  %s8761_s9 = inlined_call_operand.hbm [shape: f32[1,896], index: 9, kind: input, shape index: {}]   ;;  %s8762_s10 = inlined_call_operand.vmem [shape: bf16[8,896], index: 10, kind: output, shape index: {}]  }
   0x1   :  { %16 = vsyncpa [#allocation5], 0 }
   0x2   :  { %17 = vsyncpa [#allocation8], 0 }
   0x3   :  { %18 = vsyncpa [#allocation11], 0 }
   0x4   :  { %19 = vsyncpa [#allocation14], 0  ;;  %s8402_s13 = smov [#allocation4]   ;;  %s8403_s15 = smov [#allocation7]  }
   0x5   :  { %s41_s14 = sshll.u32 %s8402_s13, 4  ;;  %s66_s16 = sshll.u32 %s8403_s15, 4  ;;  %s42_s14 = int_to_ptr.vmem [resolvable:$true] %s41_s14  ;;  %s67_s16 = int_to_ptr.vmem [resolvable:$true] %s66_s16 }
   0x6   :  { %s8216_s19 = scalar_lea.hbm %s8755_s3, 2048 }
   0x7   :  { %p8217_p0 = scmp.ne.s32.totalorder %s8755_s3, %s8216_s19  ;;  %p8220_p1 = scmp.lt.u32.totalorder %s8216_s19, %s8755_s3 }
   0x9   :  { %p8222_p2 = pnand %p8220_p1, %p8217_p0 }
   0xb   :  { %8225 = shalt.err (!%p8222_p2)
}
   0xc   :  { %s8226_s24 = scalar_lea.vmem %s42_s14, 2048  ;;  %p8231_p4 = scmp.lt.s32.totalorder %s42_s14, %s42_s14 }
   0xd   :  { %p8227_p3 = scmp.ne.s32.totalorder %s42_s14, %s8226_s24  ;;  %p8232_p5 = scmp.lt.s32.totalorder %s8226_s24, %s8226_s24 }
   0xf   :  { %p8233_p6 = por %p8232_p5, %p8231_p4 }
  0x11   :  { %p8234_p7 = pnand %p8233_p6, %p8227_p3 }
  0x13   :  { %8237 = shalt.err (!%p8234_p7)
}
  0x14   :  { %s8404_s25 = smov 128   ;;  %s8405_s26 = smov 8  }
  0x15   :  { %47 = dma.hbm_to_vmem [thread:$0]  %s8755_s3, 2048, %s42_s14, [#allocation5], %s8404_s25, %s8404_s25, %s8405_s26  }
  0x16   :  { %s8238_s11 = scalar_lea.hbm %s8757_s5, 64 }
  0x17   :  { %p8239_p8 = scmp.ne.s32.totalorder %s8757_s5, %s8238_s11  ;;  %p8242_p9 = scmp.lt.u32.totalorder %s8238_s11, %s8757_s5 }
  0x19   :  { %p8244_p10 = pnand %p8242_p9, %p8239_p8 }
  0x1b   :  { %8247 = shalt.err (!%p8244_p10)
}
  0x1c   :  { %s8248_s18 = scalar_lea.vmem %s67_s16, 64  ;;  %p8253_p12 = scmp.lt.s32.totalorder %s67_s16, %s67_s16 }
  0x1d   :  { %p8249_p11 = scmp.ne.s32.totalorder %s67_s16, %s8248_s18  ;;  %p8254_p13 = scmp.lt.s32.totalorder %s8248_s18, %s8248_s18 }
  0x1f   :  { %p8255_p0 = por %p8254_p13, %p8253_p12 }
  0x21   :  { %p8256_p1 = pnand %p8255_p0, %p8249_p11 }
  0x23   :  { %8259 = shalt.err (!%p8256_p1)
}
  0x24   :  { %69 = dma.hbm_to_vmem [thread:$0]  %s8757_s5, 64, %s67_s16, [#allocation8]  }
  0x25   :  { %s8406_s19 = smov [#allocation10]   ;;  %s8407_s21 = smov [#allocation2]  }
  0x26   :  { %s88_s20 = sshll.u32 %s8406_s19, 4  ;;  %s29_s22 = sshll.u32 %s8407_s21, 4  ;;  %s89_s20 = int_to_ptr.vmem [resolvable:$true] %s88_s20  ;;  %s8502_s22 = int_to_ptr.vmem [resolvable:$true] %s29_s22 }
  0x27   :  { %s8260_s27 = scalar_lea.hbm %s8759_s7, 128 }
  0x28   :  { %p8261_p2 = scmp.ne.s32.totalorder %s8759_s7, %s8260_s27  ;;  %p8264_p3 = scmp.lt.u32.totalorder %s8260_s27, %s8759_s7 }
  0x2a   :  { %p8266_p4 = pnand %p8264_p3, %p8261_p2 }
  0x2c   :  { %8269 = shalt.err (!%p8266_p4)
}
  0x2d   :  { %s8270_s5 = scalar_lea.vmem %s89_s20, 128  ;;  %p8275_p6 = scmp.lt.s32.totalorder %s89_s20, %s89_s20 }
  0x2e   :  { %p8271_p5 = scmp.ne.s32.totalorder %s89_s20, %s8270_s5  ;;  %p8276_p7 = scmp.lt.s32.totalorder %s8270_s5, %s8270_s5 }
  0x30   :  { %p8277_p8 = por %p8276_p7, %p8275_p6 }
  0x32   :  { %p8278_p9 = pnand %p8277_p8, %p8271_p5 }
  0x34   :  { %8281 = shalt.err (!%p8278_p9)
}
  0x35   :  { %91 = dma.hbm_to_vmem [thread:$0]  %s8759_s7, 128, %s89_s20, [#allocation11]  }
  0x36   :  { %s8282_s17 = scalar_lea.hbm %s8754_s2, 2048 }
  0x37   :  { %p8283_p10 = scmp.ne.s32.totalorder %s8754_s2, %s8282_s17  ;;  %p8286_p11 = scmp.lt.u32.totalorder %s8282_s17, %s8754_s2 }
  0x39   :  { %p8288_p12 = pnand %p8286_p11, %p8283_p10 }
  0x3b   :  { %8291 = shalt.err (!%p8288_p12)
}
  0x3c   :  { %s8292_s21 = scalar_lea.vmem %s8502_s22, 2048  ;;  %p8297_p0 = scmp.lt.s32.totalorder %s8502_s22, %s8502_s22 }
  0x3d   :  { %p8293_p13 = scmp.ne.s32.totalorder %s8502_s22, %s8292_s21  ;;  %p8298_p1 = scmp.lt.s32.totalorder %s8292_s21, %s8292_s21 }
  0x3f   :  { %p8299_p2 = por %p8298_p1, %p8297_p0 }
  0x41   :  { %p8300_p3 = pnand %p8299_p2, %p8293_p13 }
  0x43   :  { %8303 = shalt.err (!%p8300_p3)
}
  0x44   :  { %35 = dma.hbm_to_vmem [thread:$0]  %s8754_s2, 2048, %s8502_s22, [#allocation3], %s8404_s25, %s8404_s25, %s8405_s26  }
  0x45   :  { %s8408_s23 = smov [#allocation6]   ;;  %s8304_s29 = scalar_lea.hbm %s8756_s4, 8192 }
  0x46   :  { %s53_s24 = sshll.u32 %s8408_s23, 4  ;;  %p8305_p4 = scmp.ne.s32.totalorder %s8756_s4, %s8304_s29  ;;  %s54_s24 = int_to_ptr.vmem [resolvable:$true] %s53_s24 }
  0x47   :  { %p8308_p5 = scmp.lt.u32.totalorder %s8304_s29, %s8756_s4 }
  0x49   :  { %p8310_p6 = pnand %p8308_p5, %p8305_p4 }
  0x4b   :  { %8313 = shalt.err (!%p8310_p6)
}
  0x4c   :  { %s8314_s12 = scalar_lea.vmem %s54_s24, 8192  ;;  %p8319_p8 = scmp.lt.s32.totalorder %s54_s24, %s54_s24 }
  0x4d   :  { %p8315_p7 = scmp.ne.s32.totalorder %s54_s24, %s8314_s12  ;;  %p8320_p9 = scmp.lt.s32.totalorder %s8314_s12, %s8314_s12 }
  0x4f   :  { %p8321_p10 = por %p8320_p9, %p8319_p8 }
  0x51   :  { %p8322_p11 = pnand %p8321_p10, %p8315_p7 }
  0x53   :  { %8325 = shalt.err (!%p8322_p11)
}
  0x54   :  { %s8409_s2 = smov 256   ;;  %s8410_s25 = smov 16  }
  0x55   :  { %59 = dma.hbm_to_vmem [thread:$0]  %s8756_s4, 8192, %s54_s24, [#allocation5], %s8409_s2, %s8409_s2, %s8410_s25  }
  0x56   :  { %s8411_s13 = smov [#allocation9]   ;;  %s8326_s3 = scalar_lea.hbm %s8758_s6, 32768 }
  0x57   :  { %s75_s15 = sshll.u32 %s8411_s13, 4  ;;  %p8327_p12 = scmp.ne.s32.totalorder %s8758_s6, %s8326_s3  ;;  %s76_s15 = int_to_ptr.vmem [resolvable:$true] %s75_s15 }
  0x58   :  { %p8330_p13 = scmp.lt.u32.totalorder %s8326_s3, %s8758_s6 }
  0x5a   :  { %p8332_p0 = pnand %p8330_p13, %p8327_p12 }
  0x5c   :  { %8335 = shalt.err (!%p8332_p0)
}
  0x5d   :  { %s8336_s20 = scalar_lea.vmem %s76_s15, 32768  ;;  %p8341_p2 = scmp.lt.s32.totalorder %s76_s15, %s76_s15 }
  0x5e   :  { %p8337_p1 = scmp.ne.s32.totalorder %s76_s15, %s8336_s20  ;;  %p8342_p3 = scmp.lt.s32.totalorder %s8336_s20, %s8336_s20 }
  0x60   :  { %p8343_p4 = por %p8342_p3, %p8341_p2 }
  0x62   :  { %p8344_p5 = pnand %p8343_p4, %p8337_p1 }
  0x64   :  { %8347 = shalt.err (!%p8344_p5)
}
  0x65   :  { %s8412_s4 = smov 512   ;;  %s8413_s23 = smov 32  }
  0x66   :  { %81 = dma.hbm_to_vmem [thread:$0]  %s8758_s6, 32768, %s76_s15, [#allocation8], %s8412_s4, %s8412_s4, %s8413_s23  }
  0x67   :  { %s8414_s28 = smov [#allocation12]   ;;  %s8348_s5 = scalar_lea.hbm %s8760_s8, 57344 }
  0x68   :  { %s97_s29 = sshll.u32 %s8414_s28, 4  ;;  %p8349_p6 = scmp.ne.s32.totalorder %s8760_s8, %s8348_s5  ;;  %s98_s29 = int_to_ptr.vmem [resolvable:$true] %s97_s29 }
  0x69   :  { %p8352_p7 = scmp.lt.u32.totalorder %s8348_s5, %s8760_s8 }
  0x6b   :  { %p8354_p8 = pnand %p8352_p7, %p8349_p6 }
  0x6d   :  { %8357 = shalt.err (!%p8354_p8)
}
  0x6e   :  { %s8358_s26 = scalar_lea.vmem %s98_s29, 57344  ;;  %p8363_p10 = scmp.lt.s32.totalorder %s98_s29, %s98_s29 }
  0x6f   :  { %p8359_p9 = scmp.ne.s32.totalorder %s98_s29, %s8358_s26  ;;  %p8364_p11 = scmp.lt.s32.totalorder %s8358_s26, %s8358_s26 }
  0x71   :  { %p8365_p12 = por %p8364_p11, %p8363_p10 }
  0x73   :  { %p8366_p13 = pnand %p8365_p12, %p8359_p9 }
  0x75   :  { %8369 = shalt.err (!%p8366_p13)
}
  0x76   :  { %s8415_s6 = smov 448   ;;  %s8416_s22 = smov 28  }
  0x77   :  { %103 = dma.hbm_to_vmem [thread:$0]  %s8760_s8, 57344, %s98_s29, [#allocation11], %s8415_s6, %s8415_s6, %s8416_s22  }
  0x78   :  { %s8417_s17 = smov [#allocation13]   ;;  %s8370_s19 = scalar_lea.hbm %s8761_s9, 112 }
  0x79   :  { %s110_s18 = sshll.u32 %s8417_s17, 4  ;;  %p8371_p0 = scmp.ne.s32.totalorder %s8761_s9, %s8370_s19  ;;  %s111_s18 = int_to_ptr.vmem [resolvable:$true] %s110_s18 }
  0x7a   :  { %p8374_p1 = scmp.lt.u32.totalorder %s8370_s19, %s8761_s9 }
  0x7c   :  { %p8376_p2 = pnand %p8374_p1, %p8371_p0 }
  0x7e   :  { %8379 = shalt.err (!%p8376_p2)
}
  0x7f   :  { %s8380_s23 = scalar_lea.vmem %s111_s18, 112  ;;  %s8384_s8 = scalar_lea.vmem %s111_s18, 128 }
  0x80   :  { %p8381_p3 = scmp.ne.s32.totalorder %s111_s18, %s8380_s23  ;;  %p8385_p4 = scmp.lt.s32.totalorder %s111_s18, %s111_s18 }
  0x81   :  { %p8386_p5 = scmp.lt.s32.totalorder %s8384_s8, %s8380_s23 }
  0x83   :  { %p8387_p6 = por %p8386_p5, %p8385_p4 }
  0x85   :  { %p8388_p7 = pnand %p8387_p6, %p8381_p3 }
  0x87   :  { %8391 = shalt.err (!%p8388_p7)
}
  0x88   :  { %113 = dma.hbm_to_vmem [thread:$0]  %s8761_s9, 112, %s111_s18, [#allocation14]  }
  0x89   :  { %8392 = dma.done.wait [#allocation3], 2048  }
  0x8a   :  { %8393 = vsyncadd [#allocation3], 4294965248 }
  0x8b   :  { %8394 = dma.done.wait [#allocation5], 10240  }
  0x8c   :  { %8395 = vsyncadd [#allocation5], 4294957056 }
  0x8d   :  { %8396 = dma.done.wait [#allocation8], 32832  }
  0x8e   :  { %8397 = vsyncadd [#allocation8], 4294934464 }
  0x8f   :  { %8398 = dma.done.wait [#allocation11], 57472  }
  0x90   :  { %8399 = vsyncadd [#allocation11], 4294909824 }
  0x91   :  { %8400 = dma.done.wait [#allocation14], 112  }
  0x92   :  { %8401 = vsyncadd [#allocation14], 4294967184  ;;  %v8418_v0 = vmov 0   ;;  %v140_v1 = vld [vmem:[%s8752_s0] sm:$0xff]  ;;  %v7421_v4 = vld [vmem:[#allocation4 + $0x14] ss:$8 sps:$4 sm:$0xff]  }
  0x93   :  { %7417 = vset.pattern.permute.xlu0 %v8418_v0  ;;  %296 = vmatprep.mubr.bf16.mxu0 %v8418_v0  ;;  %v7418_v2 = vld [vmem:[#allocation4 + $0x4] ss:$8 sps:$4 sm:$0xff]   ;;  %v7420_v3 = vld [vmem:[#allocation4] ss:$8 sps:$4 sm:$0xff]   ;;  %v7423_v5 = vld [vmem:[#allocation4 + $0x10] ss:$8 sps:$4 sm:$0xff]  }
  0x94   :  { %144 = vperm.xlu0 %7417, %v140_v1   ;;  %264 = vmatprep.subr.bf16.mxu0 %v7418_v2  ;;  %v7424_v6 = vld [vmem:[#allocation4 + $0x24] ss:$8 sps:$4 sm:$0xff]   ;;  %v7426_v7 = vld [vmem:[#allocation4 + $0x20] ss:$8 sps:$4 sm:$0xff]   ;;  %v7427_v8 = vld [vmem:[#allocation4 + $0x34] ss:$8 sps:$4 sm:$0xff]   ;;  %v141_v1 = vlaneseq }
  0x95   :  { %265 = vmatpush1.bf16.msra.mxu0 %v7420_v3  ;;  %v7429_v9 = vld [vmem:[#allocation4 + $0x30] ss:$8 sps:$4 sm:$0xff]   ;;  %v7430_v10 = vld [vmem:[#allocation4 + $0x44] ss:$8 sps:$4 sm:$0xff]   ;;  %v7432_v11 = vld [vmem:[#allocation4 + $0x40] ss:$8 sps:$4 sm:$0xff]  }
  0x96   :  { %266 = vmatprep.subr.bf16.mxu0 %v7421_v4  ;;  %v7433_v12 = vld [vmem:[#allocation4 + $0x54] ss:$8 sps:$4 sm:$0xff]   ;;  %v7435_v13 = vld [vmem:[#allocation4 + $0x50] ss:$8 sps:$4 sm:$0xff]   ;;  %v7436_v14 = vld [vmem:[#allocation4 + $0x64] ss:$8 sps:$4 sm:$0xff]  }
  0x97   :  { %v7466_v15 = vld [vmem:[#allocation6 + $0x4] ss:$16 sps:$4 sm:$0xff]   ;;  %v7438_v16 = vld [vmem:[#allocation4 + $0x60] ss:$8 sps:$4 sm:$0xff]   ;;  %v7441_v20 = vld [vmem:[#allocation4 + $0x70] ss:$8 sps:$4 sm:$0xff]  }
  0x98   :  { %v7439_v17 = vld [vmem:[#allocation4 + $0x74] ss:$8 sps:$4 sm:$0xff]   ;;  %840 = vmatprep.subr.bf16.mxu1 %v7466_v15  ;;  %v7471_v18 = vld [vmem:[#allocation6] ss:$16 sps:$4 sm:$0xff]   ;;  %v7444_v24 = vld [vmem:[#allocation2 + $0x4] ss:$8 sps:$4 sm:$0xff]  }
  0x99   :  { %267 = vmatpush1.bf16.msra.mxu0 %v7423_v5  ;;  %v7472_v19 = vld [vmem:[#allocation6 + $0x24] ss:$16 sps:$4 sm:$0xff]   ;;  %841 = vmatpush1.bf16.msra.mxu1 %v7471_v18  ;;  %v7477_v22 = vld [vmem:[#allocation6 + $0x20] ss:$16 sps:$4 sm:$0xff]   ;;  %v7470_v56 = vld [vmem:[#allocation6 + $0xc] ss:$16 sps:$4 sm:$0xff]  }
  0x9a   :  { %268 = vmatprep.subr.bf16.mxu0 %v7424_v6  ;;  %v166_v21 = vld [vmem:[%s8753_s1] sm:$0xff]  ;;  %842 = vmatprep.subr.bf16.mxu1 %v7472_v19  ;;  %v7447_v29 = vld [vmem:[#allocation2 + $0x14] ss:$8 sps:$4 sm:$0xff]   ;;  %v7445_v32 = vld [vmem:[#allocation2 + $0x10] ss:$8 sps:$4 sm:$0xff]   ;;  %v142_v2 = vand.u32 127, %v141_v1 }
  0x9b   :  { %v7478_v23 = vld [vmem:[#allocation6 + $0x44] ss:$16 sps:$4 sm:$0xff]   ;;  %v7483_v25 = vld [vmem:[#allocation6 + $0x40] ss:$16 sps:$4 sm:$0xff]   ;;  %v167_v26 = vpack.c.bf16 %v166_v21, %v166_v21  ;;  %v7468_v3 = vld [vmem:[#allocation6 + $0x8] ss:$16 sps:$4 sm:$0xff]  }
  0x9c   :  { %v7484_v27 = vld [vmem:[#allocation6 + $0x64] ss:$16 sps:$4 sm:$0xff]   ;;  %v7442_v28 = vld [vmem:[#allocation2] ss:$8 sps:$4 sm:$0xff]   ;;  %v7451_v40 = vld [vmem:[#allocation2 + $0x30] ss:$8 sps:$4 sm:$0xff]  }
  0x9d   :  { %269 = vmatpush1.bf16.msra.mxu0 %v7426_v7  ;;  %843 = vmatpush1.bf16.msra.mxu1 %v7477_v22  ;;  %v7489_v30 = vld [vmem:[#allocation6 + $0x60] ss:$16 sps:$4 sm:$0xff]   ;;  %v7490_v31 = vld [vmem:[#allocation6 + $0x84] ss:$16 sps:$4 sm:$0xff]   ;;  %v7476_v4 = vld [vmem:[#allocation6 + $0x2c] ss:$16 sps:$4 sm:$0xff]  }
  0x9e   :  { %270 = vmatprep.subr.bf16.mxu0 %v7427_v8  ;;  %844 = vmatprep.subr.bf16.mxu1 %v7478_v23  ;;  %v7450_v33 = vld [vmem:[#allocation2 + $0x24] ss:$8 sps:$4 sm:$0xff]   ;;  %v7495_v34 = vld [vmem:[#allocation6 + $0x80] ss:$16 sps:$4 sm:$0xff]   ;;  %v7453_v37 = vld [vmem:[#allocation2 + $0x34] ss:$8 sps:$4 sm:$0xff]  }
  0x9f   :  { %v7496_v35 = vld [vmem:[#allocation6 + $0xa4] ss:$16 sps:$4 sm:$0xff]   ;;  %v7448_v36 = vld [vmem:[#allocation2 + $0x20] ss:$8 sps:$4 sm:$0xff]   ;;  %v7457_v48 = vld [vmem:[#allocation2 + $0x50] ss:$8 sps:$4 sm:$0xff]  }
  0xa0   :  { %v7501_v38 = vld [vmem:[#allocation6 + $0xa0] ss:$16 sps:$4 sm:$0xff]   ;;  %v7502_v39 = vld [vmem:[#allocation6 + $0xc4] ss:$16 sps:$4 sm:$0xff]   ;;  %v7474_v6 = vld [vmem:[#allocation6 + $0x28] ss:$16 sps:$4 sm:$0xff]  }
  0xa1   :  { %271 = vmatpush1.bf16.msra.mxu0 %v7429_v9  ;;  %845 = vmatpush1.bf16.msra.mxu1 %v7483_v25  ;;  %v7456_v41 = vld [vmem:[#allocation2 + $0x44] ss:$8 sps:$4 sm:$0xff]   ;;  %v7507_v42 = vld [vmem:[#allocation6 + $0xc0] ss:$16 sps:$4 sm:$0xff]   ;;  %v7459_v45 = vld [vmem:[#allocation2 + $0x54] ss:$8 sps:$4 sm:$0xff]  }
  0xa2   :  { %272 = vmatprep.subr.bf16.mxu0 %v7430_v10  ;;  %846 = vmatprep.subr.bf16.mxu1 %v7484_v27  ;;  %v7508_v43 = vld [vmem:[#allocation6 + $0xe4] ss:$16 sps:$4 sm:$0xff]   ;;  %v7454_v44 = vld [vmem:[#allocation2 + $0x40] ss:$8 sps:$4 sm:$0xff]   ;;  %v7463_v54 = vld [vmem:[#allocation2 + $0x70] ss:$8 sps:$4 sm:$0xff]  }
  0xa3   :  { %v7513_v46 = vld [vmem:[#allocation6 + $0xe0] ss:$16 sps:$4 sm:$0xff]   ;;  %v7514_v47 = vld [vmem:[#allocation6 + $0x104] ss:$16 sps:$4 sm:$0xff]   ;;  %v8419_v7 = vmov 1.0|1.0  }
  0xa4   :  { %v7462_v49 = vld [vmem:[#allocation2 + $0x64] ss:$8 sps:$4 sm:$0xff]   ;;  %v7519_v50 = vld [vmem:[#allocation6 + $0x100] ss:$16 sps:$4 sm:$0xff]   ;;  %v7465_v53 = vld [vmem:[#allocation2 + $0x74] ss:$8 sps:$4 sm:$0xff]  }
  0xa5   :  { %273 = vmatpush1.bf16.msra.mxu0 %v7432_v11  ;;  %847 = vmatpush1.bf16.msra.mxu1 %v7489_v30  ;;  %v7520_v51 = vld [vmem:[#allocation6 + $0x124] ss:$16 sps:$4 sm:$0xff]   ;;  %v7460_v52 = vld [vmem:[#allocation2 + $0x60] ss:$8 sps:$4 sm:$0xff]   ;;  %v7482_v8 = vld [vmem:[#allocation6 + $0x4c] ss:$16 sps:$4 sm:$0xff]  }
  0xa6   :  { %274 = vmatprep.subr.bf16.mxu0 %v7433_v12  ;;  %848 = vmatprep.subr.bf16.mxu1 %v7490_v31  ;;  %v7525_v55 = vld [vmem:[#allocation6 + $0x120] ss:$16 sps:$4 sm:$0xff]   ;;  %v7526_v57 = vld [vmem:[#allocation6 + $0x144] ss:$16 sps:$4 sm:$0xff]   ;;  %v7480_v9 = vld [vmem:[#allocation6 + $0x48] ss:$16 sps:$4 sm:$0xff]  }
  0xa7   :  { %v7531_v58 = vld [vmem:[#allocation6 + $0x140] ss:$16 sps:$4 sm:$0xff]   ;;  %v7532_v59 = vld [vmem:[#allocation6 + $0x164] ss:$16 sps:$4 sm:$0xff]   ;;  %v7488_v10 = vld [vmem:[#allocation6 + $0x6c] ss:$16 sps:$4 sm:$0xff]  }
  0xa8   :  { %v7537_v60 = vld [vmem:[#allocation6 + $0x160] ss:$16 sps:$4 sm:$0xff]   ;;  %v7538_v61 = vld [vmem:[#allocation6 + $0x184] ss:$16 sps:$4 sm:$0xff]   ;;  %v7486_v11 = vld [vmem:[#allocation6 + $0x68] ss:$16 sps:$4 sm:$0xff]  }
  0xa9   :  { %275 = vmatpush1.bf16.msra.mxu0 %v7435_v13  ;;  %849 = vmatpush1.bf16.msra.mxu1 %v7495_v34  ;;  %v7543_v62 = vld [vmem:[#allocation6 + $0x180] ss:$16 sps:$4 sm:$0xff]   ;;  %v7544_v63 = vld [vmem:[#allocation6 + $0x1a4] ss:$16 sps:$4 sm:$0xff]   ;;  %v7494_v12 = vld [vmem:[#allocation6 + $0x8c] ss:$16 sps:$4 sm:$0xff]  }
  0xaa   :  { %276 = vmatprep.subr.bf16.mxu0 %v7436_v14  ;;  %850 = vmatprep.subr.bf16.mxu1 %v7496_v35  ;;  %v7492_v13 = vld [vmem:[#allocation6 + $0x88] ss:$16 sps:$4 sm:$0xff]   ;;  %v7500_v14 = vld [vmem:[#allocation6 + $0xac] ss:$16 sps:$4 sm:$0xff]   ;;  %v7555_v35 = vld [vmem:[#allocation6 + $0x1c0] ss:$16 sps:$4 sm:$0xff]  }
  0xab   :  { %v7498_v15 = vld [vmem:[#allocation6 + $0xa8] ss:$16 sps:$4 sm:$0xff]   ;;  %v7512_v18 = vld [vmem:[#allocation6 + $0xec] ss:$16 sps:$4 sm:$0xff]  }
  0xac   :  { %v7510_v19 = vld [vmem:[#allocation6 + $0xe8] ss:$16 sps:$4 sm:$0xff]   ;;  %v7524_v22 = vld [vmem:[#allocation6 + $0x12c] ss:$16 sps:$4 sm:$0xff]  }
  0xad   :  { %277 = vmatpush1.bf16.msra.mxu0 %v7438_v16  ;;  %851 = vmatpush1.bf16.msra.mxu1 %v7501_v38  ;;  %v7506_v16 = vld [vmem:[#allocation6 + $0xcc] ss:$16 sps:$4 sm:$0xff]   ;;  %v7516_v21 = vld [vmem:[#allocation6 + $0x108] ss:$16 sps:$4 sm:$0xff]  }
  0xae   :  { %278 = vmatprep.subr.bf16.mxu0 %v7439_v17  ;;  %852 = vmatprep.subr.bf16.mxu1 %v7502_v39  ;;  %v7504_v17 = vld [vmem:[#allocation6 + $0xc8] ss:$16 sps:$4 sm:$0xff]   ;;  %v7548_v30 = vld [vmem:[#allocation6 + $0x1ac] ss:$16 sps:$4 sm:$0xff]   ;;  %v7561_v39 = vld [vmem:[#allocation6 + $0x1e0] ss:$16 sps:$4 sm:$0xff]  }
  0xaf   :  { %v7522_v23 = vld [vmem:[#allocation6 + $0x128] ss:$16 sps:$4 sm:$0xff]  }
  0xb0   :  { %v7528_v25 = vld [vmem:[#allocation6 + $0x148] ss:$16 sps:$4 sm:$0xff]  }
  0xb1   :  { %279 = vmatpush1.bf16.msra.mxu0 %v7441_v20  ;;  %853 = vmatpush1.bf16.msra.mxu1 %v7507_v42  ;;  %v7518_v20 = vld [vmem:[#allocation6 + $0x10c] ss:$16 sps:$4 sm:$0xff]   ;;  %v7534_v27 = vld [vmem:[#allocation6 + $0x168] ss:$16 sps:$4 sm:$0xff]  }
  0xb2   :  { %385 = vmatprep.subr.bf16.mxu0 %v7444_v24  ;;  %854 = vmatprep.subr.bf16.mxu1 %v7508_v43  ;;  %v7530_v24 = vld [vmem:[#allocation6 + $0x14c] ss:$16 sps:$4 sm:$0xff]   ;;  %v7546_v31 = vld [vmem:[#allocation6 + $0x1a8] ss:$16 sps:$4 sm:$0xff]  }
  0xb3   :  { %v7552_v34 = vld [vmem:[#allocation6 + $0x1c8] ss:$16 sps:$4 sm:$0xff]   ;;  %v939_v42 = vld [vmem:[#allocation9 + $0x8] sm:$0xff] }
  0xb4   :  { %297 = vmatmul.mubr.bf16.vlgmr.msra.gmra.mrb[0].mxu0 %v167_v26  ;;  %v7536_v26 = vld [vmem:[#allocation6 + $0x16c] ss:$16 sps:$4 sm:$0xff]   ;;  %v7558_v38 = vld [vmem:[#allocation6 + $0x1e8] ss:$16 sps:$4 sm:$0xff]  }
  0xb5   :  { %386 = vmatpush1.bf16.msra.mxu0 %v7442_v28  ;;  %417 = vmatprep.mubr.bf16.mxu0 %v8418_v0  ;;  %v7549_v0 = vld [vmem:[#allocation6 + $0x1a0] ss:$16 sps:$4 sm:$0xff]   ;;  %v7542_v28 = vld [vmem:[#allocation6 + $0x18c] ss:$16 sps:$4 sm:$0xff]  }
  0xb6   :  { %387 = vmatprep.subr.bf16.mxu0 %v7447_v29  ;;  %855 = vmatpush1.bf16.msra.mxu1 %v7513_v46  ;;  %v7540_v29 = vld [vmem:[#allocation6 + $0x188] ss:$16 sps:$4 sm:$0xff]  }
  0xb7   :  { %856 = vmatprep.subr.bf16.mxu1 %v7514_v47 }
  0xb9   :  { %388 = vmatpush1.bf16.msra.mxu0 %v7445_v32  ;;  %v7550_v32 = vld [vmem:[#allocation6 + $0x1c4] ss:$16 sps:$4 sm:$0xff]  }
  0xba   :  { %389 = vmatprep.subr.bf16.mxu0 %v7450_v33  ;;  %857 = vmatpush1.bf16.msra.mxu1 %v7519_v50  ;;  %v7554_v33 = vld [vmem:[#allocation6 + $0x1cc] ss:$16 sps:$4 sm:$0xff]  }
  0xbb   :  { %858 = vmatprep.subr.bf16.mxu1 %v7520_v51 }
  0xbd   :  { %390 = vmatpush1.bf16.msra.mxu0 %v7448_v36  ;;  %v7556_v36 = vld [vmem:[#allocation6 + $0x1e4] ss:$16 sps:$4 sm:$0xff]  }
  0xbe   :  { %391 = vmatprep.subr.bf16.mxu0 %v7453_v37  ;;  %859 = vmatpush1.bf16.msra.mxu1 %v7525_v55  ;;  %v7560_v37 = vld [vmem:[#allocation6 + $0x1ec] ss:$16 sps:$4 sm:$0xff]  }
  0xbf   :  { %860 = vmatprep.subr.bf16.mxu1 %v7526_v57  ;;  %v947_v57 = vld [vmem:[#allocation9 + $0x48] sm:$0xff] }
  0xc1   :  { %392 = vmatpush1.bf16.msra.mxu0 %v7451_v40  ;;  %v938_v40 = vld [vmem:[#allocation9] sm:$0xff] }
  0xc2   :  { %393 = vmatprep.subr.bf16.mxu0 %v7456_v41  ;;  %861 = vmatpush1.bf16.msra.mxu1 %v7531_v58  ;;  %v942_v41 = vld [vmem:[#allocation9 + $0x20] sm:$0xff]  ;;  %v951_v58 = vld [vmem:[#allocation9 + $0x68] sm:$0xff] }
  0xc3   :  { %862 = vmatprep.subr.bf16.mxu1 %v7532_v59  ;;  %v6529_v43 = vcombine.low %v938_v40, %v942_v41 }
  0xc5   :  { %394 = vmatpush1.bf16.msra.mxu0 %v7454_v44  ;;  %v6530_v44 = vcombine.high %v938_v40, %v942_v41  ;;  %v994_v41 = vld [vmem:[#allocation9 + $0x1c0] sm:$0xff] }
  0xc6   :  { %395 = vmatprep.subr.bf16.mxu0 %v7459_v45  ;;  %863 = vmatpush1.bf16.msra.mxu1 %v7537_v60  ;;  %v943_v45 = vld [vmem:[#allocation9 + $0x28] sm:$0xff] }
  0xc7   :  { %864 = vmatprep.subr.bf16.mxu1 %v7538_v61  ;;  %v6531_v46 = vcombine.low %v939_v42, %v943_v45  ;;  %v6532_v47 = vcombine.high %v939_v42, %v943_v45  ;;  %v998_v42 = vld [vmem:[#allocation9 + $0x1e0] sm:$0xff] }
  0xc9   :  { %396 = vmatpush1.bf16.msra.mxu0 %v7457_v48 }
  0xca   :  { %397 = vmatprep.subr.bf16.mxu0 %v7462_v49  ;;  %865 = vmatpush1.bf16.msra.mxu1 %v7543_v62  ;;  %v6540_v62 = vcombine.high %v947_v57, %v951_v58 }
  0xcb   :  { %866 = vmatprep.subr.bf16.mxu1 %v7544_v63  ;;  %v954_v63 = vld [vmem:[#allocation9 + $0x80] sm:$0xff] }
  0xcd   :  { %398 = vmatpush1.bf16.msra.mxu0 %v7460_v52 }
  0xce   :  { %399 = vmatprep.subr.bf16.mxu0 %v7465_v53  ;;  %867 = vmatpush1.bf16.msra.mxu1 %v7549_v0  ;;  %v946_v53 = vld [vmem:[#allocation9 + $0x40] sm:$0xff] }
  0xcf   :  { %868 = vmatprep.subr.bf16.mxu1 %v7550_v32 }
  0xd1   :  { %400 = vmatpush1.bf16.msra.mxu0 %v7463_v54 }
  0xd2   :  { %881 = vmatprep.subr.bf16.mxu0 %v7470_v56  ;;  %869 = vmatpush1.bf16.msra.mxu1 %v7555_v35  ;;  %v950_v56 = vld [vmem:[#allocation9 + $0x60] sm:$0xff]  ;;  %v987_v35 = vld [vmem:[#allocation9 + $0x188] sm:$0xff] }
  0xd3   :  { %870 = vmatprep.subr.bf16.mxu1 %v7556_v36  ;;  %v6538_v61 = vcombine.high %v946_v53, %v950_v56  ;;  %v991_v36 = vld [vmem:[#allocation9 + $0x1a8] sm:$0xff] }
  0xd4   :  { %v6580_v40 = vcombine.high %v987_v35, %v991_v36 }
  0xd6   :  { %871 = vmatpush1.bf16.msra.mxu1 %v7561_v39 }
  0xd7   :  { %2516 = vmatprep.subr.bf16.mxu1 %v6530_v44  ;;  %v999_v44 = vld [vmem:[#allocation9 + $0x1e8] sm:$0xff] }
 0x113   :  { %v145_v5 = vpop.permute.xlu0 %144 }
 0x114   :  { %vm146_vm0 = vcmp.eq.s32.totalorder %v145_v5, %v142_v2  ;;  %v958_v2 = vld [vmem:[#allocation9 + $0xa0] sm:$0xff]  ;;  %v6537_v5 = vcombine.low %v946_v53, %v950_v56  ;;  %v6585_v53 = vcombine.low %v994_v41, %v998_v42 }
 0x115   :  { %vm6463_vm1 = vmpackc.low %vm146_vm0, %vm146_vm0 }
 0x116   :  { %6464 = vmatmul.mubr.msk.bf16.vlgmr.msra.gmra.mrb[0].mxu0 %vm6463_vm1, %v8419_v7  ;;  %v6546_v7 = vcombine.high %v954_v63, %v958_v2 }
 0x117   :  { %882 = vmatpush1.bf16.msra.mxu0 %v7468_v3  ;;  %v955_v3 = vld [vmem:[#allocation9 + $0x88] sm:$0xff] }
 0x118   :  { %883 = vmatprep.subr.bf16.mxu0 %v7476_v4  ;;  %v959_v4 = vld [vmem:[#allocation9 + $0xa8] sm:$0xff] }
 0x11b   :  { %884 = vmatpush1.bf16.msra.mxu0 %v7474_v6  ;;  %v6539_v6 = vcombine.low %v947_v57, %v951_v58  ;;  %v1010_v57 = vld [vmem:[#allocation9 + $0x240] sm:$0xff] }
 0x11c   :  { %885 = vmatprep.subr.bf16.mxu0 %v7482_v8  ;;  %v6548_v8 = vcombine.high %v955_v3, %v959_v4  ;;  %v1014_v58 = vld [vmem:[#allocation9 + $0x260] sm:$0xff] }
 0x11f   :  { %886 = vmatpush1.bf16.msra.mxu0 %v7480_v9  ;;  %v962_v9 = vld [vmem:[#allocation9 + $0xc0] sm:$0xff] }
 0x120   :  { %887 = vmatprep.subr.bf16.mxu0 %v7488_v10  ;;  %v966_v10 = vld [vmem:[#allocation9 + $0xe0] sm:$0xff] }
 0x123   :  { %888 = vmatpush1.bf16.msra.mxu0 %v7486_v11  ;;  %v963_v11 = vld [vmem:[#allocation9 + $0xc8] sm:$0xff] }
 0x124   :  { %889 = vmatprep.subr.bf16.mxu0 %v7494_v12  ;;  %v967_v12 = vld [vmem:[#allocation9 + $0xe8] sm:$0xff] }
 0x127   :  { %890 = vmatpush1.bf16.msra.mxu0 %v7492_v13  ;;  %v6545_v13 = vcombine.low %v954_v63, %v958_v2  ;;  %v6602_v63 = vcombine.high %v1010_v57, %v1014_v58  ;;  %v1018_v2 = vld [vmem:[#allocation9 + $0x280] sm:$0xff] }
 0x128   :  { %891 = vmatprep.subr.bf16.mxu0 %v7500_v14  ;;  %v6547_v14 = vcombine.low %v955_v3, %v959_v4  ;;  %v1022_v3 = vld [vmem:[#allocation9 + $0x2a0] sm:$0xff]  ;;  %v1019_v4 = vld [vmem:[#allocation9 + $0x288] sm:$0xff] }
 0x12b   :  { %892 = vmatpush1.bf16.msra.mxu0 %v7498_v15  ;;  %v6554_v15 = vcombine.high %v962_v9, %v966_v10 }
 0x12c   :  { %893 = vmatprep.subr.bf16.mxu0 %v7506_v16  ;;  %v6556_v16 = vcombine.high %v963_v11, %v967_v12 }
 0x12f   :  { %894 = vmatpush1.bf16.msra.mxu0 %v7504_v17  ;;  %v970_v17 = vld [vmem:[#allocation9 + $0x100] sm:$0xff] }
 0x130   :  { %895 = vmatprep.subr.bf16.mxu0 %v7512_v18  ;;  %v974_v18 = vld [vmem:[#allocation9 + $0x120] sm:$0xff] }
 0x133   :  { %896 = vmatpush1.bf16.msra.mxu0 %v7510_v19  ;;  %v971_v19 = vld [vmem:[#allocation9 + $0x108] sm:$0xff] }
 0x134   :  { %897 = vmatprep.subr.bf16.mxu0 %v7518_v20  ;;  %v975_v20 = vld [vmem:[#allocation9 + $0x128] sm:$0xff] }
 0x137   :  { %898 = vmatpush1.bf16.msra.mxu0 %v7516_v21  ;;  %v6553_v21 = vcombine.low %v962_v9, %v966_v10  ;;  %v1026_v10 = vld [vmem:[#allocation9 + $0x2c0] sm:$0xff] }
 0x138   :  { %899 = vmatprep.subr.bf16.mxu0 %v7524_v22  ;;  %v6555_v22 = vcombine.low %v963_v11, %v967_v12  ;;  %v1030_v11 = vld [vmem:[#allocation9 + $0x2e0] sm:$0xff]  ;;  %v1027_v12 = vld [vmem:[#allocation9 + $0x2c8] sm:$0xff] }
 0x13b   :  { %900 = vmatpush1.bf16.msra.mxu0 %v7522_v23  ;;  %v6562_v23 = vcombine.high %v970_v17, %v974_v18 }
 0x13c   :  { %901 = vmatprep.subr.bf16.mxu0 %v7530_v24  ;;  %v6564_v24 = vcombine.high %v971_v19, %v975_v20 }
 0x13f   :  { %902 = vmatpush1.bf16.msra.mxu0 %v7528_v25  ;;  %v978_v25 = vld [vmem:[#allocation9 + $0x140] sm:$0xff] }
 0x140   :  { %903 = vmatprep.subr.bf16.mxu0 %v7536_v26  ;;  %v982_v26 = vld [vmem:[#allocation9 + $0x160] sm:$0xff] }
 0x143   :  { %904 = vmatpush1.bf16.msra.mxu0 %v7534_v27  ;;  %v979_v27 = vld [vmem:[#allocation9 + $0x148] sm:$0xff] }
 0x144   :  { %905 = vmatprep.subr.bf16.mxu0 %v7542_v28  ;;  %v983_v28 = vld [vmem:[#allocation9 + $0x168] sm:$0xff] }
 0x145   :  { %v6572_v32 = vcombine.high %v979_v27, %v983_v28 }
 0x147   :  { %906 = vmatpush1.bf16.msra.mxu0 %v7540_v29  ;;  %v6561_v29 = vcombine.low %v970_v17, %v974_v18  ;;  %v1034_v18 = vld [vmem:[#allocation9 + $0x300] sm:$0xff] }
 0x148   :  { %907 = vmatprep.subr.bf16.mxu0 %v7548_v30  ;;  %v6563_v30 = vcombine.low %v971_v19, %v975_v20  ;;  %v1038_v19 = vld [vmem:[#allocation9 + $0x320] sm:$0xff]  ;;  %v1035_v20 = vld [vmem:[#allocation9 + $0x308] sm:$0xff] }
 0x14b   :  { %908 = vmatpush1.bf16.msra.mxu0 %v7546_v31  ;;  %v6570_v31 = vcombine.high %v978_v25, %v982_v26 }
 0x14c   :  { %909 = vmatprep.subr.bf16.mxu0 %v7554_v33  ;;  %v986_v33 = vld [vmem:[#allocation9 + $0x180] sm:$0xff] }
 0x14f   :  { %910 = vmatpush1.bf16.msra.mxu0 %v7552_v34  ;;  %v990_v34 = vld [vmem:[#allocation9 + $0x1a0] sm:$0xff] }
 0x150   :  { %911 = vmatprep.subr.bf16.mxu0 %v7560_v37  ;;  %v6569_v37 = vcombine.low %v978_v25, %v982_v26  ;;  %v6578_v39 = vcombine.high %v986_v33, %v990_v34  ;;  %v6577_v45 = vcombine.low %v986_v33, %v990_v34  ;;  %v1042_v26 = vld [vmem:[#allocation9 + $0x340] sm:$0xff] }
 0x153   :  { %912 = vmatpush1.bf16.msra.mxu0 %v7558_v38  ;;  %v6571_v38 = vcombine.low %v979_v27, %v983_v28  ;;  %v1046_v27 = vld [vmem:[#allocation9 + $0x360] sm:$0xff]  ;;  %v1043_v28 = vld [vmem:[#allocation9 + $0x348] sm:$0xff] }
 0x154   :  { %2598 = vmatprep.subr.bf16.mxu0 %v6532_v47  ;;  %v6586_v47 = vcombine.high %v994_v41, %v998_v42  ;;  %v6633_v34 = vcombine.low %v1042_v26, %v1046_v27 }
 0x1e9   :  { %v419_v48 = vpop.f32.mrb[0].mxu0 }
 0x1ea   :  { %v426_v49 = vpack.c.bf16 %v419_v48, %v419_v48  ;;  %v421_v50 = vpop.f32.mrb[1].mxu0 }
 0x1eb   :  { %v427_v51 = vpack.c.bf16 %v421_v50, %v421_v50  ;;  %v423_v52 = vpop.f32.mrb[2].mxu0  ;;  %v1006_v50 = vld [vmem:[#allocation9 + $0x220] sm:$0xff] }
 0x1ec   :  { %v430_v54 = vmul.bf16 1045249613, %v426_v49  ;;  %v424_v55 = vpop.f32.mrb[3].mxu0  ;;  %vm428_vm3 = vcmp.gt.bf16.partialorder %v426_v49, 0  ;;  %v1007_v52 = vld [vmem:[#allocation9 + $0x228] sm:$0xff] }
 0x1ed   :  { %vm429_vm2 = vcmp.gt.bf16.partialorder %v427_v51, 0  ;;  %v431_v59 = vmul.bf16 1045249613, %v427_v51 }
 0x1ee   :  { %v432_v0 = vsel %vm428_vm3, %v426_v49, %v430_v54  ;;  %v1002_v49 = vld [vmem:[#allocation9 + $0x200] sm:$0xff] }
 0x1ef   :  { %v433_v60 = vsel %vm429_vm2, %v427_v51, %v431_v59  ;;  %v1003_v51 = vld [vmem:[#allocation9 + $0x208] sm:$0xff]  ;;  %v6594_v55 = vcombine.high %v1002_v49, %v1006_v50 }
 0x1f0   :  { %872 = vmatprep.mubr.bf16.mxu1 %v433_v60  ;;  %913 = vmatprep.mubr.bf16.mxu0 %v433_v60  ;;  %v6596_v56 = vcombine.high %v1003_v51, %v1007_v52  ;;  %v1011_v59 = vld [vmem:[#allocation9 + $0x248] sm:$0xff] }
 0x1f1   :  { %873 = vmatmul.mubr.bf16.vlgmr.msra.gmra.mrb[0].mxu1 %v432_v0  ;;  %914 = vmatmul.mubr.bf16.vlgmr.msra.gmra.mrb[4].mxu0 %v432_v0  ;;  %v1015_v60 = vld [vmem:[#allocation9 + $0x268] sm:$0xff] }
 0x1f2   :  { %2517 = vmatpush1.bf16.msra.mxu1 %v6529_v43  ;;  %2599 = vmatpush1.bf16.msra.mxu0 %v6531_v46  ;;  %v995_v43 = vld [vmem:[#allocation9 + $0x1c8] sm:$0xff]  ;;  %v6579_v46 = vcombine.low %v987_v35, %v991_v36  ;;  %v6604_v0 = vcombine.high %v1011_v59, %v1015_v60  ;;  %v1050_v36 = vld [vmem:[#allocation9 + $0x380] sm:$0xff] }
 0x1f3   :  { %2518 = vmatprep.subr.bf16.mxu1 %v6538_v61  ;;  %2600 = vmatprep.subr.bf16.mxu0 %v6540_v62  ;;  %v6588_v48 = vcombine.high %v995_v43, %v999_v44  ;;  %v6587_v54 = vcombine.low %v995_v43, %v999_v44  ;;  %v6593_v61 = vcombine.low %v1002_v49, %v1006_v50  ;;  %v1058_v44 = vld [vmem:[#allocation9 + $0x3c0] sm:$0xff] }
 0x1f4   :  { %v6595_v62 = vcombine.low %v1003_v51, %v1007_v52  ;;  %v1066_v52 = vld [vmem:[#allocation9 + $0x400] sm:$0xff] }
 0x1f6   :  { %2519 = vmatpush1.bf16.msra.mxu1 %v6537_v5  ;;  %2601 = vmatpush1.bf16.msra.mxu0 %v6539_v6  ;;  %v1023_v5 = vld [vmem:[#allocation9 + $0x2a8] sm:$0xff]  ;;  %v6601_v6 = vcombine.low %v1010_v57, %v1014_v58 }
 0x1f7   :  { %2520 = vmatprep.subr.bf16.mxu1 %v6546_v7  ;;  %2602 = vmatprep.subr.bf16.mxu0 %v6548_v8  ;;  %v6603_v7 = vcombine.low %v1011_v59, %v1015_v60  ;;  %v6610_v8 = vcombine.high %v1018_v2, %v1022_v3  ;;  %v6612_v9 = vcombine.high %v1019_v4, %v1023_v5  ;;  %v8592_v60 = vshrl.u32 %v141_v1, 7 }
 0x1fa   :  { %2521 = vmatpush1.bf16.msra.mxu1 %v6545_v13  ;;  %2603 = vmatpush1.bf16.msra.mxu0 %v6547_v14  ;;  %v1031_v13 = vld [vmem:[#allocation9 + $0x2e8] sm:$0xff]  ;;  %v6609_v14 = vcombine.low %v1018_v2, %v1022_v3 }
 0x1fb   :  { %2522 = vmatprep.subr.bf16.mxu1 %v6554_v15  ;;  %2604 = vmatprep.subr.bf16.mxu0 %v6556_v16  ;;  %v6611_v15 = vcombine.low %v1019_v4, %v1023_v5  ;;  %v6618_v16 = vcombine.high %v1026_v10, %v1030_v11  ;;  %v6620_v17 = vcombine.high %v1027_v12, %v1031_v13 }
 0x1fe   :  { %2523 = vmatpush1.bf16.msra.mxu1 %v6553_v21  ;;  %2605 = vmatpush1.bf16.msra.mxu0 %v6555_v22  ;;  %v1039_v21 = vld [vmem:[#allocation9 + $0x328] sm:$0xff]  ;;  %v6617_v22 = vcombine.low %v1026_v10, %v1030_v11 }
 0x1ff   :  { %2524 = vmatprep.subr.bf16.mxu1 %v6562_v23  ;;  %2606 = vmatprep.subr.bf16.mxu0 %v6564_v24  ;;  %v6619_v23 = vcombine.low %v1027_v12, %v1031_v13  ;;  %v6626_v24 = vcombine.high %v1034_v18, %v1038_v19  ;;  %v6628_v25 = vcombine.high %v1035_v20, %v1039_v21 }
 0x202   :  { %2525 = vmatpush1.bf16.msra.mxu1 %v6561_v29  ;;  %2607 = vmatpush1.bf16.msra.mxu0 %v6563_v30  ;;  %v1047_v29 = vld [vmem:[#allocation9 + $0x368] sm:$0xff]  ;;  %v6625_v30 = vcombine.low %v1034_v18, %v1038_v19  ;;  %v1074_v19 = vld [vmem:[#allocation9 + $0x440] sm:$0xff] }
 0x203   :  { %2526 = vmatprep.subr.bf16.mxu1 %v6570_v31  ;;  %2608 = vmatprep.subr.bf16.mxu0 %v6572_v32  ;;  %v6627_v31 = vcombine.low %v1035_v20, %v1039_v21  ;;  %v6634_v32 = vcombine.high %v1042_v26, %v1046_v27  ;;  %v6636_v33 = vcombine.high %v1043_v28, %v1047_v29  ;;  %v1078_v20 = vld [vmem:[#allocation9 + $0x460] sm:$0xff] }
 0x204   :  { %v6635_v35 = vcombine.low %v1043_v28, %v1047_v29  ;;  %v1082_v26 = vld [vmem:[#allocation9 + $0x480] sm:$0xff]  ;;  %v6666_v28 = vcombine.high %v1074_v19, %v1078_v20 }
 0x206   :  { %2527 = vmatpush1.bf16.msra.mxu1 %v6569_v37  ;;  %2609 = vmatpush1.bf16.msra.mxu0 %v6571_v38  ;;  %v1054_v37 = vld [vmem:[#allocation9 + $0x3a0] sm:$0xff]  ;;  %v1051_v38 = vld [vmem:[#allocation9 + $0x388] sm:$0xff] }
 0x207   :  { %2528 = vmatprep.subr.bf16.mxu1 %v6578_v39  ;;  %2610 = vmatprep.subr.bf16.mxu0 %v6580_v40  ;;  %v6642_v39 = vcombine.high %v1050_v36, %v1054_v37  ;;  %v1055_v40 = vld [vmem:[#allocation9 + $0x3a8] sm:$0xff]  ;;  %v6641_v41 = vcombine.low %v1050_v36, %v1054_v37 }
 0x208   :  { %v6643_v42 = vcombine.low %v1051_v38, %v1055_v40  ;;  %v6644_v43 = vcombine.high %v1051_v38, %v1055_v40  ;;  %v1090_v38 = vld [vmem:[#allocation9 + $0x4c0] sm:$0xff]  ;;  %v1091_v40 = vld [vmem:[#allocation9 + $0x4c8] sm:$0xff] }
 0x20a   :  { %2529 = vmatpush1.bf16.msra.mxu1 %v6577_v45  ;;  %2611 = vmatpush1.bf16.msra.mxu0 %v6579_v46  ;;  %v1062_v45 = vld [vmem:[#allocation9 + $0x3e0] sm:$0xff]  ;;  %v1059_v46 = vld [vmem:[#allocation9 + $0x3c8] sm:$0xff] }
 0x20b   :  { %2530 = vmatprep.subr.bf16.mxu1 %v6586_v47  ;;  %2612 = vmatprep.subr.bf16.mxu0 %v6588_v48  ;;  %v6650_v47 = vcombine.high %v1058_v44, %v1062_v45  ;;  %v1063_v48 = vld [vmem:[#allocation9 + $0x3e8] sm:$0xff]  ;;  %v6649_v49 = vcombine.low %v1058_v44, %v1062_v45 }
 0x20c   :  { %v6651_v50 = vcombine.low %v1059_v46, %v1063_v48  ;;  %v6652_v51 = vcombine.high %v1059_v46, %v1063_v48  ;;  %v1098_v46 = vld [vmem:[#allocation9 + $0x500] sm:$0xff]  ;;  %v1099_v48 = vld [vmem:[#allocation9 + $0x508] sm:$0xff] }
 0x20e   :  { %2531 = vmatpush1.bf16.msra.mxu1 %v6585_v53  ;;  %2613 = vmatpush1.bf16.msra.mxu0 %v6587_v54  ;;  %v1070_v53 = vld [vmem:[#allocation9 + $0x420] sm:$0xff]  ;;  %v1067_v54 = vld [vmem:[#allocation9 + $0x408] sm:$0xff] }
 0x20f   :  { %2532 = vmatprep.subr.bf16.mxu1 %v6594_v55  ;;  %2614 = vmatprep.subr.bf16.mxu0 %v6596_v56  ;;  %v6658_v55 = vcombine.high %v1066_v52, %v1070_v53  ;;  %v1071_v56 = vld [vmem:[#allocation9 + $0x428] sm:$0xff]  ;;  %v6657_v57 = vcombine.low %v1066_v52, %v1070_v53 }
 0x210   :  { %v6659_v58 = vcombine.low %v1067_v54, %v1071_v56  ;;  %v6660_v59 = vcombine.high %v1067_v54, %v1071_v56  ;;  %v1106_v54 = vld [vmem:[#allocation9 + $0x540] sm:$0xff]  ;;  %v1107_v56 = vld [vmem:[#allocation9 + $0x548] sm:$0xff] }
 0x212   :  { %2533 = vmatpush1.bf16.msra.mxu1 %v6593_v61  ;;  %2615 = vmatpush1.bf16.msra.mxu0 %v6595_v62  ;;  %v8595_v61 = vsub.s32 0, %v8592_v60  ;;  %v8597_v62 = vld [vmem:[#allocation7] sm:$0xf] }
 0x213   :  { %2534 = vmatprep.subr.bf16.mxu1 %v6602_v63  ;;  %2616 = vmatprep.subr.bf16.mxu0 %v6604_v0  ;;  %v8600_v63 = vsub.s32 1, %v8592_v60  ;;  %v8603_v0 = vsub.s32 3, %v8592_v60 }
 0x214   :  { %v503_v2 = vrot.slane %v8597_v62, %v8595_v61 }
 0x215   :  { %v507_v3 = vrot.slane %v8597_v62, %v8600_v63  ;;  %v515_v1 = vrot.slane %v8597_v62, %v8603_v0 }
 0x216   :  { %2535 = vmatpush1.bf16.msra.mxu1 %v6601_v6  ;;  %2617 = vmatpush1.bf16.msra.mxu0 %v6603_v7 }
 0x217   :  { %2536 = vmatprep.subr.bf16.mxu1 %v6610_v8  ;;  %2618 = vmatprep.subr.bf16.mxu0 %v6612_v9 }
 0x21a   :  { %2537 = vmatpush1.bf16.msra.mxu1 %v6609_v14  ;;  %2619 = vmatpush1.bf16.msra.mxu0 %v6611_v15 }
 0x21b   :  { %2538 = vmatprep.subr.bf16.mxu1 %v6618_v16  ;;  %2620 = vmatprep.subr.bf16.mxu0 %v6620_v17 }
 0x21e   :  { %2539 = vmatpush1.bf16.msra.mxu1 %v6617_v22  ;;  %2621 = vmatpush1.bf16.msra.mxu0 %v6619_v23  ;;  %v1075_v22 = vld [vmem:[#allocation9 + $0x448] sm:$0xff] }
 0x21f   :  { %2540 = vmatprep.subr.bf16.mxu1 %v6626_v24  ;;  %2622 = vmatprep.subr.bf16.mxu0 %v6628_v25  ;;  %v1079_v23 = vld [vmem:[#allocation9 + $0x468] sm:$0xff] }
 0x220   :  { %v6668_v29 = vcombine.high %v1075_v22, %v1079_v23 }
 0x222   :  { %2541 = vmatpush1.bf16.msra.mxu1 %v6625_v30  ;;  %2623 = vmatpush1.bf16.msra.mxu0 %v6627_v31  ;;  %v1086_v30 = vld [vmem:[#allocation9 + $0x4a0] sm:$0xff]  ;;  %v1083_v31 = vld [vmem:[#allocation9 + $0x488] sm:$0xff] }
 0x223   :  { %2542 = vmatprep.subr.bf16.mxu1 %v6634_v32  ;;  %2624 = vmatprep.subr.bf16.mxu0 %v6636_v33  ;;  %v1087_v32 = vld [vmem:[#allocation9 + $0x4a8] sm:$0xff]  ;;  %v6674_v36 = vcombine.high %v1082_v26, %v1086_v30 }
 0x224   :  { %v6676_v37 = vcombine.high %v1083_v31, %v1087_v32 }
 0x226   :  { %2543 = vmatpush1.bf16.msra.mxu1 %v6633_v34  ;;  %2625 = vmatpush1.bf16.msra.mxu0 %v6635_v35  ;;  %v6665_v34 = vcombine.low %v1074_v19, %v1078_v20  ;;  %v6667_v35 = vcombine.low %v1075_v22, %v1079_v23  ;;  %v1130_v20 = vld [vmem:[#allocation9 + $0x600] sm:$0xff]  ;;  %v1131_v22 = vld [vmem:[#allocation9 + $0x608] sm:$0xff] }
 0x227   :  { %2544 = vmatprep.subr.bf16.mxu1 %v6642_v39  ;;  %2626 = vmatprep.subr.bf16.mxu0 %v6644_v43  ;;  %v1094_v39 = vld [vmem:[#allocation9 + $0x4e0] sm:$0xff]  ;;  %v6675_v43 = vcombine.low %v1083_v31, %v1087_v32  ;;  %v1135_v23 = vld [vmem:[#allocation9 + $0x628] sm:$0xff] }
 0x228   :  { %v6682_v44 = vcombine.high %v1090_v38, %v1094_v39  ;;  %v1142_v31 = vld [vmem:[#allocation9 + $0x660] sm:$0xff]  ;;  %v1139_v32 = vld [vmem:[#allocation9 + $0x648] sm:$0xff] }
 0x22a   :  { %2545 = vmatpush1.bf16.msra.mxu1 %v6641_v41  ;;  %2627 = vmatpush1.bf16.msra.mxu0 %v6643_v42  ;;  %v1095_v41 = vld [vmem:[#allocation9 + $0x4e8] sm:$0xff]  ;;  %v6673_v42 = vcombine.low %v1082_v26, %v1086_v30  ;;  %v1138_v30 = vld [vmem:[#allocation9 + $0x640] sm:$0xff] }
 0x22b   :  { %2546 = vmatprep.subr.bf16.mxu1 %v6650_v47  ;;  %2628 = vmatprep.subr.bf16.mxu0 %v6652_v51  ;;  %v6684_v45 = vcombine.high %v1091_v40, %v1095_v41  ;;  %v1102_v47 = vld [vmem:[#allocation9 + $0x520] sm:$0xff]  ;;  %v6683_v51 = vcombine.low %v1091_v40, %v1095_v41  ;;  %v1147_v41 = vld [vmem:[#allocation9 + $0x688] sm:$0xff] }
 0x22c   :  { %v6690_v52 = vcombine.high %v1098_v46, %v1102_v47  ;;  %v1150_v40 = vld [vmem:[#allocation9 + $0x6a0] sm:$0xff] }
 0x22e   :  { %2547 = vmatpush1.bf16.msra.mxu1 %v6649_v49  ;;  %2629 = vmatpush1.bf16.msra.mxu0 %v6651_v50  ;;  %v1103_v49 = vld [vmem:[#allocation9 + $0x528] sm:$0xff]  ;;  %v6681_v50 = vcombine.low %v1090_v38, %v1094_v39  ;;  %v1146_v39 = vld [vmem:[#allocation9 + $0x680] sm:$0xff] }
 0x22f   :  { %2557 = vmatprep.subr.bf16.mxu1 %v6658_v55  ;;  %2639 = vmatprep.subr.bf16.mxu0 %v6660_v59  ;;  %v6692_v53 = vcombine.high %v1099_v48, %v1103_v49  ;;  %v1110_v55 = vld [vmem:[#allocation9 + $0x560] sm:$0xff]  ;;  %v6691_v59 = vcombine.low %v1099_v48, %v1103_v49  ;;  %v1155_v49 = vld [vmem:[#allocation9 + $0x6c8] sm:$0xff] }
 0x230   :  { %v1158_v48 = vld [vmem:[#allocation9 + $0x6e0] sm:$0xff] }
 0x2c4   :  { %v874_v4 = vpop.f32.mrb[0].mxu1  ;;  %v8611_v5 = vpop.f32.mrb[4].mxu0 }
 0x2c5   :  { %v875_v6 = vadd.f32 %v874_v4, %v503_v2  ;;  %v876_v7 = vpop.f32.mrb[1].mxu1  ;;  %v917_v8 = vpop.f32.mrb[5].mxu0  ;;  %v6698_v2 = vcombine.high %v1106_v54, %v1110_v55  ;;  %v1118_v4 = vld [vmem:[#allocation9 + $0x5a0] sm:$0xff] }
 0x2c6   :  { %v877_v9 = vadd.f32 %v876_v7, %v507_v3  ;;  %v918_v10 = vadd.f32 %v917_v8, %v515_v1  ;;  %v878_v11 = vpop.f32.mrb[2].mxu1  ;;  %v919_v12 = vpop.f32.mrb[6].mxu0  ;;  %v1114_v1 = vld [vmem:[#allocation9 + $0x580] sm:$0xff]  ;;  %v1119_v7 = vld [vmem:[#allocation9 + $0x5a8] sm:$0xff]  ;;  %v6697_v8 = vcombine.low %v1106_v54, %v1110_v55 }
 0x2c7   :  { %v922_v13 = vpack.c.bf16 %v875_v6, %v875_v6  ;;  %v879_v14 = vpop.f32.mrb[3].mxu1  ;;  %v920_v15 = vpop.f32.mrb[7].mxu0  ;;  %v1115_v6 = vld [vmem:[#allocation9 + $0x588] sm:$0xff]  ;;  %v1122_v12 = vld [vmem:[#allocation9 + $0x5c0] sm:$0xff] }
 0x2c8   :  { %v923_v16 = vpack.c.bf16 %v877_v9, %v877_v9  ;;  %v925_v17 = vpack.c.bf16 %v918_v10, %v918_v10  ;;  %v6706_v10 = vcombine.high %v1114_v1, %v1118_v4  ;;  %v6708_v11 = vcombine.high %v1115_v6, %v1119_v7  ;;  %v1123_v14 = vld [vmem:[#allocation9 + $0x5c8] sm:$0xff]  ;;  %v1162_v55 = vld [vmem:[#allocation9 + $0x700] sm:$0xff] }
 0x2c9   :  { %v930_v18 = vmul.bf16 1045249613, %v922_v13  ;;  %vm926_vm4 = vcmp.gt.bf16.partialorder %v922_v13, 0  ;;  %v1127_v15 = vld [vmem:[#allocation9 + $0x5e8] sm:$0xff] }
 0x2ca   :  { %vm927_vm5 = vcmp.gt.bf16.partialorder %v923_v16, 0  ;;  %v931_v21 = vmul.bf16 1045249613, %v923_v16  ;;  %v933_v24 = vmul.bf16 1045249613, %v925_v17  ;;  %vm929_vm6 = vcmp.gt.bf16.partialorder %v925_v17, 0 }
 0x2cb   :  { %v8617_v27 = vsel %vm926_vm4, %v922_v13, %v930_v18  ;;  %v1126_v13 = vld [vmem:[#allocation9 + $0x5e0] sm:$0xff]  ;;  %v6716_v19 = vcombine.high %v1123_v14, %v1127_v15  ;;  %v6715_v26 = vcombine.low %v1123_v14, %v1127_v15 }
 0x2cc   :  { %v8613_v25 = vsel %vm927_vm5, %v923_v16, %v931_v21  ;;  %v8621_v33 = vsel %vm929_vm6, %v925_v17, %v933_v24  ;;  %v6705_v16 = vcombine.low %v1114_v1, %v1118_v4  ;;  %v6707_v17 = vcombine.low %v1115_v6, %v1119_v7  ;;  %v1134_v21 = vld [vmem:[#allocation9 + $0x620] sm:$0xff] }
 0x2cd   :  { %2548 = vmatprep.mubr.bf16.mxu1 %v8613_v25  ;;  %2630 = vmatprep.mubr.bf16.mxu0 %v8613_v25  ;;  %v6714_v18 = vcombine.high %v1122_v12, %v1126_v13  ;;  %v6713_v24 = vcombine.low %v1122_v12, %v1126_v13  ;;  %v1170_v4 = vld [vmem:[#allocation9 + $0x740] sm:$0xff]  ;;  %v8626_v6 = vsub.s32 2, %v8592_v60 }
 0x2ce   :  { %2549 = vmatmul.mubr.bf16.vlgmr.msra.gmra.mrb[4].mxu1 %v8617_v27  ;;  %2631 = vmatmul.mubr.bf16.vlgmr.msra.gmra.mrb[8].mxu0 %v8617_v27  ;;  %v1174_v7 = vld [vmem:[#allocation9 + $0x760] sm:$0xff] }
 0x2cf   :  { %2558 = vmatpush1.bf16.msra.mxu1 %v6657_v57  ;;  %2640 = vmatpush1.bf16.msra.mxu0 %v6659_v58  ;;  %v1111_v57 = vld [vmem:[#allocation9 + $0x568] sm:$0xff]  ;;  %v6689_v58 = vcombine.low %v1098_v46, %v1102_v47  ;;  %v1154_v47 = vld [vmem:[#allocation9 + $0x6c0] sm:$0xff]  ;;  %v6762_v12 = vcombine.high %v1170_v4, %v1174_v7  ;;  %v511_v15 = vrot.slane %v8597_v62, %v8626_v6 }
 0x2d0   :  { %2589 = vmatprep.mubr.bf16.mxu1 %v8621_v33  ;;  %2671 = vmatprep.mubr.bf16.mxu0 %v8621_v33  ;;  %v6700_v3 = vcombine.high %v1107_v56, %v1111_v57  ;;  %v6699_v9 = vcombine.low %v1107_v56, %v1111_v57  ;;  %v1166_v56 = vld [vmem:[#allocation9 + $0x720] sm:$0xff]  ;;  %v1163_v57 = vld [vmem:[#allocation9 + $0x708] sm:$0xff] }
 0x2d1   :  { %2559 = vmatprep.subr.bf16.mxu1 %v6666_v28  ;;  %2641 = vmatprep.subr.bf16.mxu0 %v6668_v29  ;;  %v6722_v28 = vcombine.high %v1130_v20, %v1134_v21  ;;  %v6724_v29 = vcombine.high %v1131_v22, %v1135_v23  ;;  %v1178_v14 = vld [vmem:[#allocation9 + $0x780] sm:$0xff] }
 0x2d3   :  { %2560 = vmatpush1.bf16.msra.mxu1 %v6665_v34  ;;  %2642 = vmatpush1.bf16.msra.mxu0 %v6667_v35  ;;  %v1143_v34 = vld [vmem:[#allocation9 + $0x668] sm:$0xff]  ;;  %v6721_v35 = vcombine.low %v1130_v20, %v1134_v21 }
 0x2d4   :  { %2561 = vmatprep.subr.bf16.mxu1 %v6674_v36  ;;  %2643 = vmatprep.subr.bf16.mxu0 %v6676_v37  ;;  %v6723_v36 = vcombine.low %v1131_v22, %v1135_v23  ;;  %v6730_v37 = vcombine.high %v1138_v30, %v1142_v31  ;;  %v6732_v38 = vcombine.high %v1139_v32, %v1143_v34  ;;  %v1186_v23 = vld [vmem:[#allocation9 + $0x7c0] sm:$0xff] }
 0x2d7   :  { %2562 = vmatpush1.bf16.msra.mxu1 %v6673_v42  ;;  %2644 = vmatpush1.bf16.msra.mxu0 %v6675_v43  ;;  %v1151_v42 = vld [vmem:[#allocation9 + $0x6a8] sm:$0xff]  ;;  %v6729_v43 = vcombine.low %v1138_v30, %v1142_v31 }
 0x2d8   :  { %2563 = vmatprep.subr.bf16.mxu1 %v6682_v44  ;;  %2645 = vmatprep.subr.bf16.mxu0 %v6684_v45  ;;  %v6731_v44 = vcombine.low %v1139_v32, %v1143_v34  ;;  %v6738_v45 = vcombine.high %v1146_v39, %v1150_v40  ;;  %v6740_v46 = vcombine.high %v1147_v41, %v1151_v42  ;;  %v940_v34 = vld [vmem:[#allocation9 + $0x10] sm:$0xff] }
 0x2db   :  { %2564 = vmatpush1.bf16.msra.mxu1 %v6681_v50  ;;  %2646 = vmatpush1.bf16.msra.mxu0 %v6683_v51  ;;  %v1159_v50 = vld [vmem:[#allocation9 + $0x6e8] sm:$0xff]  ;;  %v6737_v51 = vcombine.low %v1146_v39, %v1150_v40 }
 0x2dc   :  { %2565 = vmatprep.subr.bf16.mxu1 %v6690_v52  ;;  %2647 = vmatprep.subr.bf16.mxu0 %v6692_v53  ;;  %v6739_v52 = vcombine.low %v1147_v41, %v1151_v42  ;;  %v6746_v53 = vcombine.high %v1154_v47, %v1158_v48  ;;  %v6748_v54 = vcombine.high %v1155_v49, %v1159_v50 }
 0x2df   :  { %2566 = vmatpush1.bf16.msra.mxu1 %v6689_v58  ;;  %2648 = vmatpush1.bf16.msra.mxu0 %v6691_v59  ;;  %v1167_v58 = vld [vmem:[#allocation9 + $0x728] sm:$0xff]  ;;  %v6745_v59 = vcombine.low %v1154_v47, %v1158_v48 }
 0x2e0   :  { %2567 = vmatprep.subr.bf16.mxu1 %v6698_v2  ;;  %2649 = vmatprep.subr.bf16.mxu0 %v6700_v3  ;;  %v6747_v2 = vcombine.low %v1155_v49, %v1159_v50  ;;  %v6754_v3 = vcombine.high %v1162_v55, %v1166_v56  ;;  %v6756_v1 = vcombine.high %v1163_v57, %v1167_v58 }
 0x2e3   :  { %2568 = vmatpush1.bf16.msra.mxu1 %v6697_v8  ;;  %2650 = vmatpush1.bf16.msra.mxu0 %v6699_v9  ;;  %v1171_v8 = vld [vmem:[#allocation9 + $0x748] sm:$0xff] }
 0x2e4   :  { %2569 = vmatprep.subr.bf16.mxu1 %v6706_v10  ;;  %2651 = vmatprep.subr.bf16.mxu0 %v6708_v11  ;;  %v1175_v9 = vld [vmem:[#allocation9 + $0x768] sm:$0xff]  ;;  %v6753_v10 = vcombine.low %v1162_v55, %v1166_v56  ;;  %v6755_v11 = vcombine.low %v1163_v57, %v1167_v58  ;;  %v961_v55 = vld [vmem:[#allocation9 + $0xb8] sm:$0xff] }
 0x2e5   :  { %v6764_v13 = vcombine.high %v1171_v8, %v1175_v9  ;;  %v6763_v20 = vcombine.low %v1171_v8, %v1175_v9 }
 0x2e7   :  { %2570 = vmatpush1.bf16.msra.mxu1 %v6705_v16  ;;  %2652 = vmatpush1.bf16.msra.mxu0 %v6707_v17  ;;  %v1182_v16 = vld [vmem:[#allocation9 + $0x7a0] sm:$0xff]  ;;  %v1179_v17 = vld [vmem:[#allocation9 + $0x788] sm:$0xff] }
 0x2e8   :  { %2571 = vmatprep.subr.bf16.mxu1 %v6714_v18  ;;  %2653 = vmatprep.subr.bf16.mxu0 %v6716_v19  ;;  %v1183_v18 = vld [vmem:[#allocation9 + $0x7a8] sm:$0xff]  ;;  %v6761_v19 = vcombine.low %v1170_v4, %v1174_v7  ;;  %v6770_v21 = vcombine.high %v1178_v14, %v1182_v16  ;;  %v6769_v62 = vcombine.low %v1178_v14, %v1182_v16  ;;  %v969_v4 = vld [vmem:[#allocation9 + $0xf8] sm:$0xff] }
 0x2e9   :  { %v6772_v22 = vcombine.high %v1179_v17, %v1183_v18  ;;  %v6771_v30 = vcombine.low %v1179_v17, %v1183_v18  ;;  %v980_v18 = vld [vmem:[#allocation9 + $0x150] sm:$0xff] }
 0x2eb   :  { %2572 = vmatpush1.bf16.msra.mxu1 %v6713_v24  ;;  %2654 = vmatpush1.bf16.msra.mxu0 %v6715_v26  ;;  %v916_v24 = vadd.f32 %v8611_v5, %v511_v15  ;;  %v1190_v26 = vld [vmem:[#allocation9 + $0x7e0] sm:$0xff] }
 0x2ec   :  { %2573 = vmatprep.subr.bf16.mxu1 %v6722_v28  ;;  %2655 = vmatprep.subr.bf16.mxu0 %v6724_v29  ;;  %v1187_v28 = vld [vmem:[#allocation9 + $0x7c8] sm:$0xff]  ;;  %v6778_v31 = vcombine.high %v1186_v23, %v1190_v26  ;;  %v6777_v39 = vcombine.low %v1186_v23, %v1190_v26 }
 0x2ed   :  { %v1191_v29 = vld [vmem:[#allocation9 + $0x7e8] sm:$0xff] }
 0x2ee   :  { %v6780_v32 = vcombine.high %v1187_v28, %v1191_v29  ;;  %v6779_v5 = vcombine.low %v1187_v28, %v1191_v29  ;;  %v988_v28 = vld [vmem:[#allocation9 + $0x190] sm:$0xff] }
 0x2ef   :  { %2574 = vmatpush1.bf16.msra.mxu1 %v6721_v35  ;;  %2656 = vmatpush1.bf16.msra.mxu0 %v6723_v36  ;;  %v924_v35 = vpack.c.bf16 %v916_v24, %v916_v24  ;;  %v944_v36 = vld [vmem:[#allocation9 + $0x30] sm:$0xff] }
 0x2f0   :  { %2575 = vmatprep.subr.bf16.mxu1 %v6730_v37  ;;  %2657 = vmatprep.subr.bf16.mxu0 %v6732_v38  ;;  %v941_v37 = vld [vmem:[#allocation9 + $0x18] sm:$0xff]  ;;  %v6534_v40 = vcombine.high %v940_v34, %v944_v36  ;;  %v6533_v47 = vcombine.low %v940_v34, %v944_v36  ;;  %v992_v29 = vld [vmem:[#allocation9 + $0x1b0] sm:$0xff] }
 0x2f1   :  { %v945_v38 = vld [vmem:[#allocation9 + $0x38] sm:$0xff]  ;;  %v932_v42 = vmul.bf16 1045249613, %v924_v35  ;;  %vm928_vm7 = vcmp.gt.bf16.partialorder %v924_v35, 0  ;;  %v6582_v34 = vcombine.high %v988_v28, %v992_v29  ;;  %v996_v36 = vld [vmem:[#allocation9 + $0x1d0] sm:$0xff] }
 0x2f2   :  { %v6536_v41 = vcombine.high %v941_v37, %v945_v38  ;;  %v6535_v48 = vcombine.low %v941_v37, %v945_v38  ;;  %v1000_v37 = vld [vmem:[#allocation9 + $0x1f0] sm:$0xff]  ;;  %v997_v38 = vld [vmem:[#allocation9 + $0x1d8] sm:$0xff] }
 0x2f3   :  { %2576 = vmatpush1.bf16.msra.mxu1 %v6729_v43  ;;  %2658 = vmatpush1.bf16.msra.mxu0 %v6731_v44  ;;  %v948_v43 = vld [vmem:[#allocation9 + $0x50] sm:$0xff]  ;;  %v8631_v49 = vsel %vm928_vm7, %v924_v35, %v932_v42 }
 0x2f4   :  { %2577 = vmatprep.subr.bf16.mxu1 %v6738_v45  ;;  %2659 = vmatprep.subr.bf16.mxu0 %v6740_v46  ;;  %v952_v44 = vld [vmem:[#allocation9 + $0x70] sm:$0xff]  ;;  %v949_v45 = vld [vmem:[#allocation9 + $0x58] sm:$0xff] }
 0x2f5   :  { %v953_v46 = vld [vmem:[#allocation9 + $0x78] sm:$0xff]  ;;  %v6542_v50 = vcombine.high %v948_v43, %v952_v44  ;;  %v6541_v56 = vcombine.low %v948_v43, %v952_v44  ;;  %v1004_v43 = vld [vmem:[#allocation9 + $0x210] sm:$0xff] }
 0x2f6   :  { %v6543_v57 = vcombine.low %v949_v45, %v953_v46  ;;  %v1008_v44 = vld [vmem:[#allocation9 + $0x230] sm:$0xff] }
 0x2f7   :  { %2578 = vmatpush1.bf16.msra.mxu1 %v6737_v51  ;;  %2660 = vmatpush1.bf16.msra.mxu0 %v6739_v52  ;;  %v6544_v51 = vcombine.high %v949_v45, %v953_v46  ;;  %v956_v52 = vld [vmem:[#allocation9 + $0x90] sm:$0xff]  ;;  %v1005_v45 = vld [vmem:[#allocation9 + $0x218] sm:$0xff] }
 0x2f8   :  { %2579 = vmatprep.subr.bf16.mxu1 %v6746_v53  ;;  %2661 = vmatprep.subr.bf16.mxu0 %v6748_v54  ;;  %v960_v53 = vld [vmem:[#allocation9 + $0xb0] sm:$0xff]  ;;  %v957_v54 = vld [vmem:[#allocation9 + $0x98] sm:$0xff] }
 0x2f9   :  { %v6550_v58 = vcombine.high %v956_v52, %v960_v53  ;;  %v6549_v7 = vcombine.low %v956_v52, %v960_v53  ;;  %v6551_v8 = vcombine.low %v957_v54, %v961_v55  ;;  %v1009_v46 = vld [vmem:[#allocation9 + $0x238] sm:$0xff]  ;;  %v1012_v52 = vld [vmem:[#allocation9 + $0x250] sm:$0xff] }
 0x2fa   :  { %v1016_v53 = vld [vmem:[#allocation9 + $0x270] sm:$0xff] }
 0x2fb   :  { %2580 = vmatpush1.bf16.msra.mxu1 %v6745_v59  ;;  %2662 = vmatpush1.bf16.msra.mxu0 %v6747_v2  ;;  %v6552_v59 = vcombine.high %v957_v54, %v961_v55  ;;  %v964_v2 = vld [vmem:[#allocation9 + $0xd0] sm:$0xff]  ;;  %v1013_v54 = vld [vmem:[#allocation9 + $0x258] sm:$0xff] }
 0x2fc   :  { %2581 = vmatprep.subr.bf16.mxu1 %v6754_v3  ;;  %2663 = vmatprep.subr.bf16.mxu0 %v6756_v1  ;;  %v968_v3 = vld [vmem:[#allocation9 + $0xf0] sm:$0xff]  ;;  %v965_v1 = vld [vmem:[#allocation9 + $0xd8] sm:$0xff] }
 0x2fd   :  { %v6558_v9 = vcombine.high %v964_v2, %v968_v3  ;;  %v6557_v14 = vcombine.low %v964_v2, %v968_v3  ;;  %v6559_v15 = vcombine.low %v965_v1, %v969_v4  ;;  %v1017_v55 = vld [vmem:[#allocation9 + $0x278] sm:$0xff]  ;;  %v1020_v2 = vld [vmem:[#allocation9 + $0x290] sm:$0xff] }
 0x2fe   :  { %v1024_v3 = vld [vmem:[#allocation9 + $0x2b0] sm:$0xff] }
 0x2ff   :  { %2582 = vmatpush1.bf16.msra.mxu1 %v6753_v10  ;;  %2664 = vmatpush1.bf16.msra.mxu0 %v6755_v11  ;;  %v6560_v10 = vcombine.high %v965_v1, %v969_v4  ;;  %v972_v11 = vld [vmem:[#allocation9 + $0x110] sm:$0xff]  ;;  %v1021_v1 = vld [vmem:[#allocation9 + $0x298] sm:$0xff] }
 0x300   :  { %2583 = vmatprep.subr.bf16.mxu1 %v6762_v12  ;;  %2665 = vmatprep.subr.bf16.mxu0 %v6764_v13  ;;  %v976_v12 = vld [vmem:[#allocation9 + $0x130] sm:$0xff]  ;;  %v977_v13 = vld [vmem:[#allocation9 + $0x138] sm:$0xff] }
 0x301   :  { %v6566_v16 = vcombine.high %v972_v11, %v976_v12  ;;  %v1025_v4 = vld [vmem:[#allocation9 + $0x2b8] sm:$0xff] }
 0x303   :  { %2584 = vmatpush1.bf16.msra.mxu1 %v6761_v19  ;;  %2666 = vmatpush1.bf16.msra.mxu0 %v6763_v20  ;;  %v984_v19 = vld [vmem:[#allocation9 + $0x170] sm:$0xff]  ;;  %v981_v20 = vld [vmem:[#allocation9 + $0x158] sm:$0xff] }
 0x304   :  { %2585 = vmatprep.subr.bf16.mxu1 %v6770_v21  ;;  %2667 = vmatprep.subr.bf16.mxu0 %v6772_v22  ;;  %v985_v21 = vld [vmem:[#allocation9 + $0x178] sm:$0xff]  ;;  %v6565_v22 = vcombine.low %v972_v11, %v976_v12  ;;  %v6574_v24 = vcombine.high %v980_v18, %v984_v19  ;;  %v1028_v11 = vld [vmem:[#allocation9 + $0x2d0] sm:$0xff] }
 0x305   :  { %v6576_v26 = vcombine.high %v981_v20, %v985_v21  ;;  %v1032_v12 = vld [vmem:[#allocation9 + $0x2f0] sm:$0xff] }
 0x307   :  { %2586 = vmatpush1.bf16.msra.mxu1 %v6769_v62  ;;  %2668 = vmatpush1.bf16.msra.mxu0 %v6771_v30  ;;  %v989_v62 = vld [vmem:[#allocation9 + $0x198] sm:$0xff] }
 0x308   :  { %2587 = vmatprep.subr.bf16.mxu1 %v6778_v31  ;;  %2669 = vmatprep.subr.bf16.mxu0 %v6780_v32  ;;  %v993_v30 = vld [vmem:[#allocation9 + $0x1b8] sm:$0xff]  ;;  %v6573_v31 = vcombine.low %v980_v18, %v984_v19  ;;  %v6575_v32 = vcombine.low %v981_v20, %v985_v21  ;;  %v1036_v18 = vld [vmem:[#allocation9 + $0x310] sm:$0xff] }
 0x309   :  { %v6584_v35 = vcombine.high %v989_v62, %v993_v30  ;;  %v1040_v19 = vld [vmem:[#allocation9 + $0x330] sm:$0xff]  ;;  %v1037_v20 = vld [vmem:[#allocation9 + $0x318] sm:$0xff] }
 0x30a   :  { %v1041_v21 = vld [vmem:[#allocation9 + $0x338] sm:$0xff] }
 0x30b   :  { %2588 = vmatpush1.bf16.msra.mxu1 %v6777_v39  ;;  %2670 = vmatpush1.bf16.msra.mxu0 %v6779_v5  ;;  %v1001_v39 = vld [vmem:[#allocation9 + $0x1f8] sm:$0xff]  ;;  %v6581_v5 = vcombine.low %v988_v28, %v992_v29  ;;  %v1044_v28 = vld [vmem:[#allocation9 + $0x350] sm:$0xff] }
 0x30c   :  { %2680 = vmatprep.subr.bf16.mxu1 %v6534_v40  ;;  %2762 = vmatprep.subr.bf16.mxu0 %v6536_v41  ;;  %v6583_v40 = vcombine.low %v989_v62, %v993_v30  ;;  %v6590_v41 = vcombine.high %v996_v36, %v1000_v37  ;;  %v6592_v42 = vcombine.high %v997_v38, %v1001_v39  ;;  %v1048_v29 = vld [vmem:[#allocation9 + $0x370] sm:$0xff]  ;;  %v1045_v62 = vld [vmem:[#allocation9 + $0x358] sm:$0xff] }
 0x30d   :  { %v1049_v30 = vld [vmem:[#allocation9 + $0x378] sm:$0xff] }
 0x30e   :  { %2590 = vmatmul.mubr.bf16.vlgmr.msra.gmra.mrb[4].mxu1 %v8631_v49  ;;  %2672 = vmatmul.mubr.bf16.vlgmr.msra.gmra.mrb[8].mxu0 %v8631_v49 }
 0x30f   :  { %2681 = vmatpush1.bf16.msra.mxu1 %v6533_v47  ;;  %2712 = vmatprep.mubr.bf16.mxu1 %v8613_v25  ;;  %v6589_v47 = vcombine.low %v996_v36, %v1000_v37  ;;  %v1052_v36 = vld [vmem:[#allocation9 + $0x390] sm:$0xff] }
 0x310   :  { %2763 = vmatpush1.bf16.msra.mxu0 %v6535_v48  ;;  %2794 = vmatprep.mubr.bf16.mxu0 %v8613_v25  ;;  %v973_v25 = vld [vmem:[#allocation9 + $0x118] sm:$0xff]  ;;  %v6591_v48 = vcombine.low %v997_v38, %v1001_v39  ;;  %v1056_v37 = vld [vmem:[#allocation9 + $0x3b0] sm:$0xff] }
 0x311   :  { %2682 = vmatprep.subr.bf16.mxu1 %v6542_v50  ;;  %2764 = vmatprep.subr.bf16.mxu0 %v6544_v51  ;;  %v6568_v17 = vcombine.high %v973_v25, %v977_v13  ;;  %v6567_v23 = vcombine.low %v973_v25, %v977_v13  ;;  %v6598_v50 = vcombine.high %v1004_v43, %v1008_v44  ;;  %v1029_v25 = vld [vmem:[#allocation9 + $0x2d8] sm:$0xff] }
 0x312   :  { %v6600_v51 = vcombine.high %v1005_v45, %v1009_v46  ;;  %v1033_v13 = vld [vmem:[#allocation9 + $0x2f8] sm:$0xff] }
 0x313   :  { %2683 = vmatpush1.bf16.msra.mxu1 %v6541_v56  ;;  %v6597_v56 = vcombine.low %v1004_v43, %v1008_v44  ;;  %v1053_v38 = vld [vmem:[#allocation9 + $0x398] sm:$0xff]  ;;  %v1060_v43 = vld [vmem:[#allocation9 + $0x3d0] sm:$0xff] }
 0x314   :  { %2765 = vmatpush1.bf16.msra.mxu0 %v6543_v57  ;;  %2684 = vmatprep.subr.bf16.mxu1 %v6550_v58  ;;  %v6599_v57 = vcombine.low %v1005_v45, %v1009_v46  ;;  %v6606_v58 = vcombine.high %v1012_v52, %v1016_v53  ;;  %v1057_v39 = vld [vmem:[#allocation9 + $0x3b8] sm:$0xff]  ;;  %v1064_v44 = vld [vmem:[#allocation9 + $0x3f0] sm:$0xff] }
 0x315   :  { %2766 = vmatprep.subr.bf16.mxu0 %v6552_v59  ;;  %v6608_v59 = vcombine.high %v1013_v54, %v1017_v55  ;;  %v1061_v45 = vld [vmem:[#allocation9 + $0x3d8] sm:$0xff] }
 0x316   :  { %v1065_v46 = vld [vmem:[#allocation9 + $0x3f8] sm:$0xff] }
 0x317   :  { %2685 = vmatpush1.bf16.msra.mxu1 %v6549_v7  ;;  %v6605_v7 = vcombine.low %v1012_v52, %v1016_v53  ;;  %v1068_v52 = vld [vmem:[#allocation9 + $0x410] sm:$0xff] }
 0x318   :  { %2767 = vmatpush1.bf16.msra.mxu0 %v6551_v8  ;;  %2686 = vmatprep.subr.bf16.mxu1 %v6558_v9  ;;  %v6607_v8 = vcombine.low %v1013_v54, %v1017_v55  ;;  %v6614_v9 = vcombine.high %v1020_v2, %v1024_v3  ;;  %v1072_v53 = vld [vmem:[#allocation9 + $0x430] sm:$0xff]  ;;  %v1069_v54 = vld [vmem:[#allocation9 + $0x418] sm:$0xff] }
 0x319   :  { %2768 = vmatprep.subr.bf16.mxu0 %v6560_v10  ;;  %v6616_v10 = vcombine.high %v1021_v1, %v1025_v4  ;;  %v1073_v55 = vld [vmem:[#allocation9 + $0x438] sm:$0xff] }
 0x31b   :  { %2687 = vmatpush1.bf16.msra.mxu1 %v6557_v14  ;;  %v6613_v14 = vcombine.low %v1020_v2, %v1024_v3  ;;  %v1076_v2 = vld [vmem:[#allocation9 + $0x450] sm:$0xff] }
 0x31c   :  { %2769 = vmatpush1.bf16.msra.mxu0 %v6559_v15  ;;  %2688 = vmatprep.subr.bf16.mxu1 %v6566_v16  ;;  %v6615_v15 = vcombine.low %v1021_v1, %v1025_v4  ;;  %v6622_v16 = vcombine.high %v1028_v11, %v1032_v12  ;;  %v1080_v3 = vld [vmem:[#allocation9 + $0x470] sm:$0xff]  ;;  %v6661_v1 = vcombine.low %v1068_v52, %v1072_v53  ;;  %v1077_v4 = vld [vmem:[#allocation9 + $0x458] sm:$0xff] }
 0x31d   :  { %2770 = vmatprep.subr.bf16.mxu0 %v6568_v17  ;;  %v6624_v17 = vcombine.high %v1029_v25, %v1033_v13 }
 0x31f   :  { %2689 = vmatpush1.bf16.msra.mxu1 %v6565_v22  ;;  %v6621_v22 = vcombine.low %v1028_v11, %v1032_v12  ;;  %v1088_v11 = vld [vmem:[#allocation9 + $0x4b0] sm:$0xff] }
 0x320   :  { %2771 = vmatpush1.bf16.msra.mxu0 %v6567_v23  ;;  %2690 = vmatprep.subr.bf16.mxu1 %v6574_v24  ;;  %v6623_v23 = vcombine.low %v1029_v25, %v1033_v13  ;;  %v6630_v24 = vcombine.high %v1036_v18, %v1040_v19  ;;  %v1085_v25 = vld [vmem:[#allocation9 + $0x498] sm:$0xff] }
 0x321   :  { %2772 = vmatprep.subr.bf16.mxu0 %v6576_v26  ;;  %v6632_v26 = vcombine.high %v1037_v20, %v1041_v21  ;;  %v1089_v13 = vld [vmem:[#allocation9 + $0x4b8] sm:$0xff] }
 0x323   :  { %2691 = vmatpush1.bf16.msra.mxu1 %v6573_v31  ;;  %v6629_v31 = vcombine.low %v1036_v18, %v1040_v19  ;;  %v1092_v18 = vld [vmem:[#allocation9 + $0x4d0] sm:$0xff] }
 0x324   :  { %2773 = vmatpush1.bf16.msra.mxu0 %v6575_v32  ;;  %2692 = vmatprep.subr.bf16.mxu1 %v6582_v34  ;;  %v6631_v32 = vcombine.low %v1037_v20, %v1041_v21  ;;  %v6638_v34 = vcombine.high %v1044_v28, %v1048_v29  ;;  %v1096_v19 = vld [vmem:[#allocation9 + $0x4f0] sm:$0xff]  ;;  %v1093_v20 = vld [vmem:[#allocation9 + $0x4d8] sm:$0xff] }
 0x325   :  { %2774 = vmatprep.subr.bf16.mxu0 %v6584_v35  ;;  %v6640_v35 = vcombine.high %v1045_v62, %v1049_v30  ;;  %v1097_v21 = vld [vmem:[#allocation9 + $0x4f8] sm:$0xff] }
 0x327   :  { %2693 = vmatpush1.bf16.msra.mxu1 %v6581_v5  ;;  %v6637_v5 = vcombine.low %v1044_v28, %v1048_v29  ;;  %v1104_v28 = vld [vmem:[#allocation9 + $0x530] sm:$0xff]  ;;  %v1101_v29 = vld [vmem:[#allocation9 + $0x518] sm:$0xff] }
 0x328   :  { %2775 = vmatpush1.bf16.msra.mxu0 %v6583_v40  ;;  %2694 = vmatprep.subr.bf16.mxu1 %v6590_v41  ;;  %v6639_v40 = vcombine.low %v1045_v62, %v1049_v30  ;;  %v6646_v41 = vcombine.high %v1052_v36, %v1056_v37  ;;  %v1105_v62 = vld [vmem:[#allocation9 + $0x538] sm:$0xff]  ;;  %v6687_v30 = vcombine.low %v1093_v20, %v1097_v21 }
 0x329   :  { %2776 = vmatprep.subr.bf16.mxu0 %v6592_v42  ;;  %v6648_v42 = vcombine.high %v1053_v38, %v1057_v39 }
 0x32b   :  { %2695 = vmatpush1.bf16.msra.mxu1 %v6589_v47  ;;  %v6645_v47 = vcombine.low %v1052_v36, %v1056_v37  ;;  %v1109_v36 = vld [vmem:[#allocation9 + $0x558] sm:$0xff] }
 0x32c   :  { %2777 = vmatpush1.bf16.msra.mxu0 %v6591_v48  ;;  %2696 = vmatprep.subr.bf16.mxu1 %v6598_v50  ;;  %v6647_v48 = vcombine.low %v1053_v38, %v1057_v39  ;;  %v6654_v50 = vcombine.high %v1060_v43, %v1064_v44  ;;  %v1113_v37 = vld [vmem:[#allocation9 + $0x578] sm:$0xff]  ;;  %v6695_v39 = vcombine.low %v1101_v29, %v1105_v62 }
 0x32d   :  { %2778 = vmatprep.subr.bf16.mxu0 %v6600_v51  ;;  %v6656_v51 = vcombine.high %v1061_v45, %v1065_v46 }
 0x32f   :  { %2697 = vmatpush1.bf16.msra.mxu1 %v6597_v56  ;;  %v6653_v56 = vcombine.low %v1060_v43, %v1064_v44  ;;  %v1117_v43 = vld [vmem:[#allocation9 + $0x598] sm:$0xff] }
 0x330   :  { %2779 = vmatpush1.bf16.msra.mxu0 %v6599_v57  ;;  %2698 = vmatprep.subr.bf16.mxu1 %v6606_v58  ;;  %v6655_v57 = vcombine.low %v1061_v45, %v1065_v46  ;;  %v6662_v58 = vcombine.high %v1068_v52, %v1072_v53  ;;  %v1121_v44 = vld [vmem:[#allocation9 + $0x5b8] sm:$0xff]  ;;  %v6703_v46 = vcombine.low %v1109_v36, %v1113_v37 }
 0x331   :  { %2780 = vmatprep.subr.bf16.mxu0 %v6608_v59  ;;  %v6664_v59 = vcombine.high %v1069_v54, %v1073_v55  ;;  %v1125_v52 = vld [vmem:[#allocation9 + $0x5d8] sm:$0xff] }
 0x332   :  { %v1129_v53 = vld [vmem:[#allocation9 + $0x5f8] sm:$0xff] }
 0x333   :  { %2699 = vmatpush1.bf16.msra.mxu1 %v6605_v7  ;;  %v1081_v7 = vld [vmem:[#allocation9 + $0x478] sm:$0xff] }
 0x334   :  { %2781 = vmatpush1.bf16.msra.mxu0 %v6607_v8  ;;  %2700 = vmatprep.subr.bf16.mxu1 %v6614_v9  ;;  %v6663_v8 = vcombine.low %v1069_v54, %v1073_v55  ;;  %v6670_v9 = vcombine.high %v1076_v2, %v1080_v3  ;;  %v6672_v12 = vcombine.high %v1077_v4, %v1081_v7 }
 0x335   :  { %2782 = vmatprep.subr.bf16.mxu0 %v6616_v10  ;;  %v1084_v10 = vld [vmem:[#allocation9 + $0x490] sm:$0xff]  ;;  %v6711_v55 = vcombine.low %v1117_v43, %v1121_v44 }
 0x337   :  { %2701 = vmatpush1.bf16.msra.mxu1 %v6613_v14  ;;  %v6669_v14 = vcombine.low %v1076_v2, %v1080_v3  ;;  %v1133_v2 = vld [vmem:[#allocation9 + $0x618] sm:$0xff] }
 0x338   :  { %2783 = vmatpush1.bf16.msra.mxu0 %v6615_v15  ;;  %2702 = vmatprep.subr.bf16.mxu1 %v6622_v16  ;;  %v6671_v15 = vcombine.low %v1077_v4, %v1081_v7  ;;  %v6678_v16 = vcombine.high %v1084_v10, %v1088_v11  ;;  %v1137_v3 = vld [vmem:[#allocation9 + $0x638] sm:$0xff]  ;;  %v6719_v4 = vcombine.low %v1125_v52, %v1129_v53 }
 0x339   :  { %2784 = vmatprep.subr.bf16.mxu0 %v6624_v17  ;;  %v6680_v17 = vcombine.high %v1085_v25, %v1089_v13 }
 0x33b   :  { %2703 = vmatpush1.bf16.msra.mxu1 %v6621_v22  ;;  %v6677_v22 = vcombine.low %v1084_v10, %v1088_v11  ;;  %v1144_v10 = vld [vmem:[#allocation9 + $0x670] sm:$0xff]  ;;  %v1141_v11 = vld [vmem:[#allocation9 + $0x658] sm:$0xff] }
 0x33c   :  { %2785 = vmatpush1.bf16.msra.mxu0 %v6623_v23  ;;  %2704 = vmatprep.subr.bf16.mxu1 %v6630_v24  ;;  %v6686_v23 = vcombine.high %v1092_v18, %v1096_v19  ;;  %v6688_v24 = vcombine.high %v1093_v20, %v1097_v21 }
 0x33d   :  { %2786 = vmatprep.subr.bf16.mxu0 %v6632_v26  ;;  %v1100_v26 = vld [vmem:[#allocation9 + $0x510] sm:$0xff] }
 0x33e   :  { %v6693_v38 = vcombine.low %v1100_v26, %v1104_v28 }
 0x33f   :  { %2705 = vmatpush1.bf16.msra.mxu1 %v6629_v31  ;;  %v6694_v31 = vcombine.high %v1100_v26, %v1104_v28  ;;  %v1157_v26 = vld [vmem:[#allocation9 + $0x6d8] sm:$0xff] }
 0x340   :  { %2787 = vmatpush1.bf16.msra.mxu0 %v6631_v32  ;;  %2706 = vmatprep.subr.bf16.mxu1 %v6638_v34  ;;  %v6696_v32 = vcombine.high %v1101_v29, %v1105_v62  ;;  %v1108_v34 = vld [vmem:[#allocation9 + $0x550] sm:$0xff]  ;;  %v1161_v28 = vld [vmem:[#allocation9 + $0x6f8] sm:$0xff] }
 0x341   :  { %2788 = vmatprep.subr.bf16.mxu0 %v6640_v35  ;;  %v1112_v35 = vld [vmem:[#allocation9 + $0x570] sm:$0xff] }
 0x342   :  { %v6701_v45 = vcombine.low %v1108_v34, %v1112_v35 }
 0x343   :  { %2707 = vmatpush1.bf16.msra.mxu1 %v6637_v5  ;;  %v6702_v5 = vcombine.high %v1108_v34, %v1112_v35  ;;  %v1165_v34 = vld [vmem:[#allocation9 + $0x718] sm:$0xff] }
 0x344   :  { %2789 = vmatpush1.bf16.msra.mxu0 %v6639_v40  ;;  %2708 = vmatprep.subr.bf16.mxu1 %v6646_v41  ;;  %v6704_v40 = vcombine.high %v1109_v36, %v1113_v37  ;;  %v1116_v41 = vld [vmem:[#allocation9 + $0x590] sm:$0xff]  ;;  %v1169_v35 = vld [vmem:[#allocation9 + $0x738] sm:$0xff]  ;;  %v6751_v37 = vcombine.low %v1157_v26, %v1161_v28 }
 0x345   :  { %2790 = vmatprep.subr.bf16.mxu0 %v6648_v42  ;;  %v1120_v42 = vld [vmem:[#allocation9 + $0x5b0] sm:$0xff] }
 0x346   :  { %v6709_v54 = vcombine.low %v1116_v41, %v1120_v42 }
 0x347   :  { %2709 = vmatpush1.bf16.msra.mxu1 %v6645_v47  ;;  %v6710_v47 = vcombine.high %v1116_v41, %v1120_v42  ;;  %v1173_v41 = vld [vmem:[#allocation9 + $0x758] sm:$0xff] }
 0x348   :  { %2791 = vmatpush1.bf16.msra.mxu0 %v6647_v48  ;;  %2710 = vmatprep.subr.bf16.mxu1 %v6654_v50  ;;  %v6712_v48 = vcombine.high %v1117_v43, %v1121_v44  ;;  %v1124_v50 = vld [vmem:[#allocation9 + $0x5d0] sm:$0xff]  ;;  %v1177_v42 = vld [vmem:[#allocation9 + $0x778] sm:$0xff]  ;;  %v6759_v44 = vcombine.low %v1165_v34, %v1169_v35 }
 0x349   :  { %2792 = vmatprep.subr.bf16.mxu0 %v6656_v51  ;;  %v1128_v51 = vld [vmem:[#allocation9 + $0x5f0] sm:$0xff] }
 0x34b   :  { %2711 = vmatpush1.bf16.msra.mxu1 %v6653_v56  ;;  %v6718_v56 = vcombine.high %v1124_v50, %v1128_v51 }
 0x34c   :  { %2793 = vmatpush1.bf16.msra.mxu0 %v6655_v57  ;;  %2721 = vmatprep.subr.bf16.mxu1 %v6662_v58  ;;  %v6720_v57 = vcombine.high %v1125_v52, %v1129_v53  ;;  %v1132_v58 = vld [vmem:[#allocation9 + $0x610] sm:$0xff]  ;;  %v6767_v53 = vcombine.low %v1173_v41, %v1177_v42 }
 0x34d   :  { %2803 = vmatprep.subr.bf16.mxu0 %v6664_v59  ;;  %v1136_v59 = vld [vmem:[#allocation9 + $0x630] sm:$0xff] }
 0x34e   :  { %2713 = vmatmul.mubr.bf16.vlgmr.msra.gmra.mrb[8].mxu1 %v8617_v27  ;;  %v6726_v7 = vcombine.high %v1132_v58, %v1136_v59 }
 0x34f   :  { %2795 = vmatmul.mubr.bf16.vlgmr.msra.gmra.mrb[12].mxu0 %v8617_v27  ;;  %2722 = vmatpush1.bf16.msra.mxu1 %v6661_v1  ;;  %v6679_v27 = vcombine.low %v1085_v25, %v1089_v13  ;;  %v6717_v1 = vcombine.low %v1124_v50, %v1128_v51  ;;  %v6725_v25 = vcombine.low %v1132_v58, %v1136_v59  ;;  %v1181_v50 = vld [vmem:[#allocation9 + $0x798] sm:$0xff] }
 0x350   :  { %2753 = vmatprep.mubr.bf16.mxu1 %v8621_v33  ;;  %2804 = vmatpush1.bf16.msra.mxu0 %v6663_v8  ;;  %v6728_v8 = vcombine.high %v1133_v2, %v1137_v3  ;;  %v6727_v13 = vcombine.low %v1133_v2, %v1137_v3  ;;  %v1185_v51 = vld [vmem:[#allocation9 + $0x7b8] sm:$0xff] }
 0x351   :  { %2835 = vmatprep.mubr.bf16.mxu0 %v8621_v33  ;;  %2723 = vmatprep.subr.bf16.mxu1 %v6670_v9  ;;  %v6685_v33 = vcombine.low %v1092_v18, %v1096_v19  ;;  %v1140_v9 = vld [vmem:[#allocation9 + $0x650] sm:$0xff]  ;;  %v1149_v18 = vld [vmem:[#allocation9 + $0x698] sm:$0xff]  ;;  %v6775_v3 = vcombine.low %v1181_v50, %v1185_v51 }
 0x352   :  { %2805 = vmatprep.subr.bf16.mxu0 %v6672_v12  ;;  %v1145_v12 = vld [vmem:[#allocation9 + $0x678] sm:$0xff]  ;;  %v6733_v20 = vcombine.low %v1140_v9, %v1144_v10 }
 0x353   :  { %2724 = vmatpush1.bf16.msra.mxu1 %v6669_v14  ;;  %v6734_v14 = vcombine.high %v1140_v9, %v1144_v10  ;;  %v1153_v19 = vld [vmem:[#allocation9 + $0x6b8] sm:$0xff]  ;;  %v6735_v21 = vcombine.low %v1141_v11, %v1145_v12  ;;  %v7564_v9 = vld [vmem:[#allocation12 + $0x4] ss:$28 sps:$4 sm:$0xff]   ;;  %v7567_v10 = vld [vmem:[#allocation12 + $0xc] ss:$28 sps:$4 sm:$0xff]  }
 0x354   :  { %2806 = vmatpush1.bf16.msra.mxu0 %v6671_v15  ;;  %2725 = vmatprep.subr.bf16.mxu1 %v6678_v16  ;;  %v6736_v15 = vcombine.high %v1141_v11, %v1145_v12  ;;  %v1148_v16 = vld [vmem:[#allocation9 + $0x690] sm:$0xff]  ;;  %v6743_v62 = vcombine.low %v1149_v18, %v1153_v19  ;;  %v1189_v58 = vld [vmem:[#allocation9 + $0x7d8] sm:$0xff]  ;;  %v7562_v11 = vld [vmem:[#allocation12] ss:$28 sps:$4 sm:$0xff]  }
 0x355   :  { %2807 = vmatprep.subr.bf16.mxu0 %v6680_v17  ;;  %v1152_v17 = vld [vmem:[#allocation9 + $0x6b0] sm:$0xff]  ;;  %v1193_v59 = vld [vmem:[#allocation9 + $0x7f8] sm:$0xff] }
 0x356   :  { %v6741_v29 = vcombine.low %v1148_v16, %v1152_v17  ;;  %v7565_v12 = vld [vmem:[#allocation12 + $0x8] ss:$28 sps:$4 sm:$0xff]  }
 0x357   :  { %2726 = vmatpush1.bf16.msra.mxu1 %v6677_v22  ;;  %v6742_v22 = vcombine.high %v1148_v16, %v1152_v17  ;;  %v7576_v16 = vld [vmem:[#allocation12 + $0x74] ss:$28 sps:$4 sm:$0xff]   ;;  %v7579_v17 = vld [vmem:[#allocation12 + $0x7c] ss:$28 sps:$4 sm:$0xff]  }
 0x358   :  { %2808 = vmatpush1.bf16.msra.mxu0 %v6679_v27  ;;  %2727 = vmatprep.subr.bf16.mxu1 %v6686_v23  ;;  %v6744_v27 = vcombine.high %v1149_v18, %v1153_v19  ;;  %v1156_v23 = vld [vmem:[#allocation9 + $0x6d0] sm:$0xff]  ;;  %v7577_v19 = vld [vmem:[#allocation12 + $0x78] ss:$28 sps:$4 sm:$0xff]  }
 0x359   :  { %2809 = vmatprep.subr.bf16.mxu0 %v6688_v24  ;;  %v1160_v24 = vld [vmem:[#allocation9 + $0x6f0] sm:$0xff] }
 0x35a   :  { %v6749_v36 = vcombine.low %v1156_v23, %v1160_v24  ;;  %v7574_v18 = vld [vmem:[#allocation12 + $0x70] ss:$28 sps:$4 sm:$0xff]  }
 0x35b   :  { %2728 = vmatpush1.bf16.msra.mxu1 %v6685_v33  ;;  %v6750_v33 = vcombine.high %v1156_v23, %v1160_v24  ;;  %v7591_v23 = vld [vmem:[#allocation12 + $0xec] ss:$28 sps:$4 sm:$0xff]   ;;  %v7586_v24 = vld [vmem:[#allocation12 + $0xe0] ss:$28 sps:$4 sm:$0xff]  }
 0x35c   :  { %2810 = vmatpush1.bf16.msra.mxu0 %v6687_v30  ;;  %2729 = vmatprep.subr.bf16.mxu1 %v6694_v31  ;;  %v6752_v30 = vcombine.high %v1157_v26, %v1161_v28  ;;  %v1164_v31 = vld [vmem:[#allocation9 + $0x710] sm:$0xff]  ;;  %v7594_v28 = vld [vmem:[#allocation12 + $0x11c] ss:$28 sps:$4 sm:$0xff]  }
 0x35d   :  { %2811 = vmatprep.subr.bf16.mxu0 %v6696_v32  ;;  %v1168_v32 = vld [vmem:[#allocation9 + $0x730] sm:$0xff] }
 0x35e   :  { %v6757_v43 = vcombine.low %v1164_v31, %v1168_v32  ;;  %v7589_v26 = vld [vmem:[#allocation12 + $0xe8] ss:$28 sps:$4 sm:$0xff]  }
 0x35f   :  { %2730 = vmatpush1.bf16.msra.mxu1 %v6693_v38  ;;  %v6758_v38 = vcombine.high %v1164_v31, %v1168_v32  ;;  %v7603_v31 = vld [vmem:[#allocation12 + $0x15c] ss:$28 sps:$4 sm:$0xff]   ;;  %v7598_v32 = vld [vmem:[#allocation12 + $0x150] ss:$28 sps:$4 sm:$0xff]  }
 0x360   :  { %2812 = vmatpush1.bf16.msra.mxu0 %v6695_v39  ;;  %2731 = vmatprep.subr.bf16.mxu1 %v6702_v5  ;;  %v6760_v39 = vcombine.high %v1165_v34, %v1169_v35  ;;  %v1172_v5 = vld [vmem:[#allocation9 + $0x750] sm:$0xff]  ;;  %v7601_v34 = vld [vmem:[#allocation12 + $0x158] ss:$28 sps:$4 sm:$0xff]  }
 0x361   :  { %2813 = vmatprep.subr.bf16.mxu0 %v6704_v40  ;;  %v1176_v40 = vld [vmem:[#allocation9 + $0x770] sm:$0xff] }
 0x362   :  { %v6765_v52 = vcombine.low %v1172_v5, %v1176_v40  ;;  %v7606_v35 = vld [vmem:[#allocation12 + $0x18c] ss:$28 sps:$4 sm:$0xff]  }
 0x363   :  { %2732 = vmatpush1.bf16.msra.mxu1 %v6701_v45  ;;  %v6766_v45 = vcombine.high %v1172_v5, %v1176_v40  ;;  %v7615_v5 = vld [vmem:[#allocation12 + $0x1cc] ss:$28 sps:$4 sm:$0xff]   ;;  %v7610_v40 = vld [vmem:[#allocation12 + $0x1c0] ss:$28 sps:$4 sm:$0xff]  }
 0x364   :  { %2814 = vmatpush1.bf16.msra.mxu0 %v6703_v46  ;;  %2733 = vmatprep.subr.bf16.mxu1 %v6710_v47  ;;  %v6768_v46 = vcombine.high %v1173_v41, %v1177_v42  ;;  %v1180_v47 = vld [vmem:[#allocation9 + $0x790] sm:$0xff]  ;;  %v7618_v42 = vld [vmem:[#allocation12 + $0x1fc] ss:$28 sps:$4 sm:$0xff]  }
 0x365   :  { %2815 = vmatprep.subr.bf16.mxu0 %v6712_v48  ;;  %v1184_v48 = vld [vmem:[#allocation9 + $0x7b0] sm:$0xff] }
 0x366   :  { %v6773_v2 = vcombine.low %v1180_v47, %v1184_v48  ;;  %v7613_v41 = vld [vmem:[#allocation12 + $0x1c8] ss:$28 sps:$4 sm:$0xff]  }
 0x367   :  { %2734 = vmatpush1.bf16.msra.mxu1 %v6709_v54  ;;  %v6774_v54 = vcombine.high %v1180_v47, %v1184_v48  ;;  %v7627_v47 = vld [vmem:[#allocation12 + $0x23c] ss:$28 sps:$4 sm:$0xff]   ;;  %v7622_v48 = vld [vmem:[#allocation12 + $0x230] ss:$28 sps:$4 sm:$0xff]  }
 0x368   :  { %2816 = vmatpush1.bf16.msra.mxu0 %v6711_v55  ;;  %2735 = vmatprep.subr.bf16.mxu1 %v6718_v56  ;;  %v6776_v55 = vcombine.high %v1181_v50, %v1185_v51  ;;  %v1188_v56 = vld [vmem:[#allocation9 + $0x7d0] sm:$0xff]  ;;  %v7625_v50 = vld [vmem:[#allocation12 + $0x238] ss:$28 sps:$4 sm:$0xff]  }
 0x369   :  { %2817 = vmatprep.subr.bf16.mxu0 %v6720_v57  ;;  %v1192_v57 = vld [vmem:[#allocation9 + $0x7f0] sm:$0xff] }
 0x36a   :  { %v7630_v51 = vld [vmem:[#allocation12 + $0x26c] ss:$28 sps:$4 sm:$0xff]  }
 0x36b   :  { %2736 = vmatpush1.bf16.msra.mxu1 %v6717_v1  ;;  %v6782_v1 = vcombine.high %v1188_v56, %v1192_v57 }
 0x36c   :  { %2818 = vmatpush1.bf16.msra.mxu0 %v6719_v4  ;;  %2737 = vmatprep.subr.bf16.mxu1 %v6726_v7  ;;  %v6784_v4 = vcombine.high %v1189_v58, %v1193_v59  ;;  %v6781_v7 = vcombine.low %v1188_v56, %v1192_v57  ;;  %v7639_v56 = vld [vmem:[#allocation12 + $0x2ac] ss:$28 sps:$4 sm:$0xff]   ;;  %v7634_v57 = vld [vmem:[#allocation12 + $0x2a0] ss:$28 sps:$4 sm:$0xff]  }
 0x36d   :  { %2819 = vmatprep.subr.bf16.mxu0 %v6728_v8  ;;  %v6783_v8 = vcombine.low %v1189_v58, %v1193_v59  ;;  %v7637_v58 = vld [vmem:[#allocation12 + $0x2a8] ss:$28 sps:$4 sm:$0xff]   ;;  %v7642_v59 = vld [vmem:[#allocation12 + $0x2dc] ss:$28 sps:$4 sm:$0xff]  }
 0x36f   :  { %2738 = vmatpush1.bf16.msra.mxu1 %v6725_v25  ;;  %v7570_v25 = vld [vmem:[#allocation12 + $0x3c] ss:$28 sps:$4 sm:$0xff]  }
 0x370   :  { %2820 = vmatpush1.bf16.msra.mxu0 %v6727_v13  ;;  %2739 = vmatprep.subr.bf16.mxu1 %v6734_v14  ;;  %v7573_v13 = vld [vmem:[#allocation12 + $0x44] ss:$28 sps:$4 sm:$0xff]   ;;  %v7568_v14 = vld [vmem:[#allocation12 + $0x38] ss:$28 sps:$4 sm:$0xff]  }
 0x371   :  { %2821 = vmatprep.subr.bf16.mxu0 %v6736_v15  ;;  %v7571_v15 = vld [vmem:[#allocation12 + $0x40] ss:$28 sps:$4 sm:$0xff]  }
 0x373   :  { %2740 = vmatpush1.bf16.msra.mxu1 %v6733_v20  ;;  %v7582_v20 = vld [vmem:[#allocation12 + $0xac] ss:$28 sps:$4 sm:$0xff]  }
 0x374   :  { %2822 = vmatpush1.bf16.msra.mxu0 %v6735_v21  ;;  %2741 = vmatprep.subr.bf16.mxu1 %v6742_v22  ;;  %v7585_v21 = vld [vmem:[#allocation12 + $0xb4] ss:$28 sps:$4 sm:$0xff]   ;;  %v7580_v22 = vld [vmem:[#allocation12 + $0xa8] ss:$28 sps:$4 sm:$0xff]  }
 0x375   :  { %2823 = vmatprep.subr.bf16.mxu0 %v6744_v27  ;;  %v7588_v27 = vld [vmem:[#allocation12 + $0xe4] ss:$28 sps:$4 sm:$0xff]  }
 0x377   :  { %2742 = vmatpush1.bf16.msra.mxu1 %v6741_v29  ;;  %v7597_v29 = vld [vmem:[#allocation12 + $0x124] ss:$28 sps:$4 sm:$0xff]  }
 0x378   :  { %2824 = vmatpush1.bf16.msra.mxu0 %v6743_v62  ;;  %2743 = vmatprep.subr.bf16.mxu1 %v6750_v33  ;;  %v7592_v62 = vld [vmem:[#allocation12 + $0x118] ss:$28 sps:$4 sm:$0xff]   ;;  %v7595_v33 = vld [vmem:[#allocation12 + $0x120] ss:$28 sps:$4 sm:$0xff]  }
 0x379   :  { %2825 = vmatprep.subr.bf16.mxu0 %v6752_v30  ;;  %v7600_v30 = vld [vmem:[#allocation12 + $0x154] ss:$28 sps:$4 sm:$0xff]  }
 0x37b   :  { %2744 = vmatpush1.bf16.msra.mxu1 %v6749_v36  ;;  %v7609_v36 = vld [vmem:[#allocation12 + $0x194] ss:$28 sps:$4 sm:$0xff]  }
 0x37c   :  { %2826 = vmatpush1.bf16.msra.mxu0 %v6751_v37  ;;  %2745 = vmatprep.subr.bf16.mxu1 %v6758_v38  ;;  %v7604_v37 = vld [vmem:[#allocation12 + $0x188] ss:$28 sps:$4 sm:$0xff]   ;;  %v7607_v38 = vld [vmem:[#allocation12 + $0x190] ss:$28 sps:$4 sm:$0xff]  }
 0x37d   :  { %2827 = vmatprep.subr.bf16.mxu0 %v6760_v39  ;;  %v7612_v39 = vld [vmem:[#allocation12 + $0x1c4] ss:$28 sps:$4 sm:$0xff]  }
 0x37f   :  { %2746 = vmatpush1.bf16.msra.mxu1 %v6757_v43  ;;  %v7621_v43 = vld [vmem:[#allocation12 + $0x204] ss:$28 sps:$4 sm:$0xff]  }
 0x380   :  { %2828 = vmatpush1.bf16.msra.mxu0 %v6759_v44  ;;  %2747 = vmatprep.subr.bf16.mxu1 %v6766_v45  ;;  %v7616_v44 = vld [vmem:[#allocation12 + $0x1f8] ss:$28 sps:$4 sm:$0xff]   ;;  %v7619_v45 = vld [vmem:[#allocation12 + $0x200] ss:$28 sps:$4 sm:$0xff]  }
 0x381   :  { %2829 = vmatprep.subr.bf16.mxu0 %v6768_v46  ;;  %v7624_v46 = vld [vmem:[#allocation12 + $0x234] ss:$28 sps:$4 sm:$0xff]  }
 0x383   :  { %2748 = vmatpush1.bf16.msra.mxu1 %v6765_v52  ;;  %v7633_v52 = vld [vmem:[#allocation12 + $0x274] ss:$28 sps:$4 sm:$0xff]  }
 0x384   :  { %2830 = vmatpush1.bf16.msra.mxu0 %v6767_v53  ;;  %2749 = vmatprep.subr.bf16.mxu1 %v6774_v54  ;;  %v7628_v53 = vld [vmem:[#allocation12 + $0x268] ss:$28 sps:$4 sm:$0xff]   ;;  %v7631_v54 = vld [vmem:[#allocation12 + $0x270] ss:$28 sps:$4 sm:$0xff]  }
 0x385   :  { %2831 = vmatprep.subr.bf16.mxu0 %v6776_v55  ;;  %v7636_v55 = vld [vmem:[#allocation12 + $0x2a4] ss:$28 sps:$4 sm:$0xff]  }
 0x387   :  { %2750 = vmatpush1.bf16.msra.mxu1 %v6773_v2  ;;  %v7645_v2 = vld [vmem:[#allocation12 + $0x2e4] ss:$28 sps:$4 sm:$0xff]  }
 0x388   :  { %2832 = vmatpush1.bf16.msra.mxu0 %v6775_v3  ;;  %2751 = vmatprep.subr.bf16.mxu1 %v6782_v1  ;;  %v7640_v3 = vld [vmem:[#allocation12 + $0x2d8] ss:$28 sps:$4 sm:$0xff]   ;;  %v7643_v1 = vld [vmem:[#allocation12 + $0x2e0] ss:$28 sps:$4 sm:$0xff]  }
 0x389   :  { %2833 = vmatprep.subr.bf16.mxu0 %v6784_v4  ;;  %v7648_v4 = vld [vmem:[#allocation12 + $0x314] ss:$28 sps:$4 sm:$0xff]  }
 0x38b   :  { %2752 = vmatpush1.bf16.msra.mxu1 %v6781_v7  ;;  %v7651_v7 = vld [vmem:[#allocation12 + $0x31c] ss:$28 sps:$4 sm:$0xff]  }
 0x38c   :  { %2834 = vmatpush1.bf16.msra.mxu0 %v6783_v8  ;;  %5729 = vmatprep.subr.bf16.mxu1 %v7564_v9  ;;  %v7646_v8 = vld [vmem:[#allocation12 + $0x310] ss:$28 sps:$4 sm:$0xff]   ;;  %v7649_v9 = vld [vmem:[#allocation12 + $0x318] ss:$28 sps:$4 sm:$0xff]  }
 0x38d   :  { %5893 = vmatprep.subr.bf16.mxu0 %v7567_v10  ;;  %v7654_v10 = vld [vmem:[#allocation12 + $0x34c] ss:$28 sps:$4 sm:$0xff]  }
 0x38e   :  { %2754 = vmatmul.mubr.bf16.vlgmr.msra.gmra.mrb[8].mxu1 %v8631_v49 }
 0x38f   :  { %2836 = vmatmul.mubr.bf16.vlgmr.msra.gmra.mrb[12].mxu0 %v8631_v49  ;;  %5730 = vmatpush1.bf16.msra.mxu1 %v7562_v11  ;;  %v7583_v49 = vld [vmem:[#allocation12 + $0xb0] ss:$28 sps:$4 sm:$0xff]  }
 0x390   :  { %5894 = vmatpush1.bf16.msra.mxu0 %v7565_v12  ;;  %5731 = vmatprep.subr.bf16.mxu1 %v7570_v25  ;;  %v7657_v11 = vld [vmem:[#allocation12 + $0x354] ss:$28 sps:$4 sm:$0xff]   ;;  %v7652_v12 = vld [vmem:[#allocation12 + $0x348] ss:$28 sps:$4 sm:$0xff]  }
 0x391   :  { %5895 = vmatprep.subr.bf16.mxu0 %v7573_v13  ;;  %v7655_v25 = vld [vmem:[#allocation12 + $0x350] ss:$28 sps:$4 sm:$0xff]   ;;  %v7660_v13 = vld [vmem:[#allocation12 + $0x384] ss:$28 sps:$4 sm:$0xff]  }
 0x393   :  { %5732 = vmatpush1.bf16.msra.mxu1 %v7568_v14  ;;  %v7663_v14 = vld [vmem:[#allocation12 + $0x38c] ss:$28 sps:$4 sm:$0xff]  }
 0x394   :  { %5896 = vmatpush1.bf16.msra.mxu0 %v7571_v15  ;;  %5733 = vmatprep.subr.bf16.mxu1 %v7576_v16  ;;  %v8643_v15 = vld [vmem:[#allocation10] sm:$0xff] }
 0x395   :  { %5897 = vmatprep.subr.bf16.mxu0 %v7579_v17  ;;  %v1199_v16 = vrot.slane %v8643_v15, %v8595_v61  ;;  %v1203_v17 = vrot.slane %v8643_v15, %v8600_v63 }
 0x397   :  { %5734 = vmatpush1.bf16.msra.mxu1 %v7574_v18  ;;  %v1211_v18 = vrot.slane %v8643_v15, %v8603_v0 }
 0x398   :  { %5898 = vmatpush1.bf16.msra.mxu0 %v7577_v19  ;;  %5735 = vmatprep.subr.bf16.mxu1 %v7582_v20 }
 0x399   :  { %5899 = vmatprep.subr.bf16.mxu0 %v7585_v21 }
 0x39b   :  { %5736 = vmatpush1.bf16.msra.mxu1 %v7580_v22 }
 0x39c   :  { %5900 = vmatpush1.bf16.msra.mxu0 %v7583_v49  ;;  %5737 = vmatprep.subr.bf16.mxu1 %v7588_v27 }
 0x39d   :  { %5901 = vmatprep.subr.bf16.mxu0 %v7591_v23 }
 0x39f   :  { %5738 = vmatpush1.bf16.msra.mxu1 %v7586_v24 }
 0x3a0   :  { %5902 = vmatpush1.bf16.msra.mxu0 %v7589_v26  ;;  %5739 = vmatprep.subr.bf16.mxu1 %v7594_v28 }
 0x3a1   :  { %5903 = vmatprep.subr.bf16.mxu0 %v7597_v29 }
 0x3a3   :  { %5740 = vmatpush1.bf16.msra.mxu1 %v7592_v62 }
 0x3a4   :  { %5904 = vmatpush1.bf16.msra.mxu0 %v7595_v33  ;;  %5741 = vmatprep.subr.bf16.mxu1 %v7600_v30 }
 0x3a5   :  { %5905 = vmatprep.subr.bf16.mxu0 %v7603_v31 }
 0x3a7   :  { %5742 = vmatpush1.bf16.msra.mxu1 %v7598_v32 }
 0x3a8   :  { %5906 = vmatpush1.bf16.msra.mxu0 %v7601_v34  ;;  %5743 = vmatprep.subr.bf16.mxu1 %v7606_v35  ;;  %v7658_v35 = vld [vmem:[#allocation12 + $0x380] ss:$28 sps:$4 sm:$0xff]  }
 0x3a9   :  { %5907 = vmatprep.subr.bf16.mxu0 %v7609_v36  ;;  %v7661_v36 = vld [vmem:[#allocation12 + $0x388] ss:$28 sps:$4 sm:$0xff]  }
 0x3ab   :  { %5744 = vmatpush1.bf16.msra.mxu1 %v7604_v37 }
 0x3ac   :  { %5908 = vmatpush1.bf16.msra.mxu0 %v7607_v38  ;;  %5745 = vmatprep.subr.bf16.mxu1 %v7612_v39  ;;  %v7666_v39 = vld [vmem:[#allocation12 + $0x3bc] ss:$28 sps:$4 sm:$0xff]  }
 0x3ad   :  { %5909 = vmatprep.subr.bf16.mxu0 %v7615_v5  ;;  %v7669_v5 = vld [vmem:[#allocation12 + $0x3c4] ss:$28 sps:$4 sm:$0xff]  }
 0x3af   :  { %5746 = vmatpush1.bf16.msra.mxu1 %v7610_v40 }
 0x3b0   :  { %5910 = vmatpush1.bf16.msra.mxu0 %v7613_v41  ;;  %5747 = vmatprep.subr.bf16.mxu1 %v7618_v42  ;;  %v7664_v41 = vld [vmem:[#allocation12 + $0x3b8] ss:$28 sps:$4 sm:$0xff]   ;;  %v7667_v42 = vld [vmem:[#allocation12 + $0x3c0] ss:$28 sps:$4 sm:$0xff]  }
 0x3b1   :  { %5911 = vmatprep.subr.bf16.mxu0 %v7621_v43  ;;  %v7672_v43 = vld [vmem:[#allocation12 + $0x3f4] ss:$28 sps:$4 sm:$0xff]  }
 0x3b3   :  { %5748 = vmatpush1.bf16.msra.mxu1 %v7616_v44  ;;  %v7675_v44 = vld [vmem:[#allocation12 + $0x3fc] ss:$28 sps:$4 sm:$0xff]  }
 0x3b4   :  { %5912 = vmatpush1.bf16.msra.mxu0 %v7619_v45  ;;  %5749 = vmatprep.subr.bf16.mxu1 %v7624_v46  ;;  %v7670_v45 = vld [vmem:[#allocation12 + $0x3f0] ss:$28 sps:$4 sm:$0xff]   ;;  %v7673_v46 = vld [vmem:[#allocation12 + $0x3f8] ss:$28 sps:$4 sm:$0xff]  }
 0x3b5   :  { %5913 = vmatprep.subr.bf16.mxu0 %v7627_v47  ;;  %v7678_v47 = vld [vmem:[#allocation12 + $0x42c] ss:$28 sps:$4 sm:$0xff]  }
 0x3b7   :  { %5750 = vmatpush1.bf16.msra.mxu1 %v7622_v48  ;;  %v7681_v48 = vld [vmem:[#allocation12 + $0x434] ss:$28 sps:$4 sm:$0xff]  }
 0x3b8   :  { %5914 = vmatpush1.bf16.msra.mxu0 %v7625_v50  ;;  %5751 = vmatprep.subr.bf16.mxu1 %v7630_v51  ;;  %v7676_v50 = vld [vmem:[#allocation12 + $0x428] ss:$28 sps:$4 sm:$0xff]   ;;  %v7679_v51 = vld [vmem:[#allocation12 + $0x430] ss:$28 sps:$4 sm:$0xff]  }
 0x3b9   :  { %5915 = vmatprep.subr.bf16.mxu0 %v7633_v52  ;;  %v7684_v52 = vld [vmem:[#allocation12 + $0x464] ss:$28 sps:$4 sm:$0xff]  }
 0x3bb   :  { %5752 = vmatpush1.bf16.msra.mxu1 %v7628_v53  ;;  %v7687_v53 = vld [vmem:[#allocation12 + $0x46c] ss:$28 sps:$4 sm:$0xff]  }
 0x3bc   :  { %5916 = vmatpush1.bf16.msra.mxu0 %v7631_v54  ;;  %5753 = vmatprep.subr.bf16.mxu1 %v7636_v55  ;;  %v7682_v54 = vld [vmem:[#allocation12 + $0x460] ss:$28 sps:$4 sm:$0xff]   ;;  %v7685_v55 = vld [vmem:[#allocation12 + $0x468] ss:$28 sps:$4 sm:$0xff]  }
 0x3bd   :  { %5917 = vmatprep.subr.bf16.mxu0 %v7639_v56  ;;  %v7690_v56 = vld [vmem:[#allocation12 + $0x49c] ss:$28 sps:$4 sm:$0xff]  }
 0x3bf   :  { %5754 = vmatpush1.bf16.msra.mxu1 %v7634_v57  ;;  %v7693_v57 = vld [vmem:[#allocation12 + $0x4a4] ss:$28 sps:$4 sm:$0xff]  }
 0x3c0   :  { %5918 = vmatpush1.bf16.msra.mxu0 %v7637_v58  ;;  %5755 = vmatprep.subr.bf16.mxu1 %v7642_v59  ;;  %v7688_v58 = vld [vmem:[#allocation12 + $0x498] ss:$28 sps:$4 sm:$0xff]   ;;  %v7691_v59 = vld [vmem:[#allocation12 + $0x4a0] ss:$28 sps:$4 sm:$0xff]  }
 0x3c1   :  { %5919 = vmatprep.subr.bf16.mxu0 %v7645_v2  ;;  %v7696_v2 = vld [vmem:[#allocation12 + $0x4d4] ss:$28 sps:$4 sm:$0xff]  }
 0x3c3   :  { %5756 = vmatpush1.bf16.msra.mxu1 %v7640_v3  ;;  %v7699_v3 = vld [vmem:[#allocation12 + $0x4dc] ss:$28 sps:$4 sm:$0xff]  }
 0x3c4   :  { %5920 = vmatpush1.bf16.msra.mxu0 %v7643_v1  ;;  %5757 = vmatprep.subr.bf16.mxu1 %v7648_v4  ;;  %v7694_v1 = vld [vmem:[#allocation12 + $0x4d0] ss:$28 sps:$4 sm:$0xff]   ;;  %v7697_v4 = vld [vmem:[#allocation12 + $0x4d8] ss:$28 sps:$4 sm:$0xff]  }
 0x3c5   :  { %5921 = vmatprep.subr.bf16.mxu0 %v7651_v7  ;;  %v7702_v7 = vld [vmem:[#allocation12 + $0x50c] ss:$28 sps:$4 sm:$0xff]  }
 0x3c7   :  { %5758 = vmatpush1.bf16.msra.mxu1 %v7646_v8  ;;  %v7705_v8 = vld [vmem:[#allocation12 + $0x514] ss:$28 sps:$4 sm:$0xff]  }
 0x3c8   :  { %5922 = vmatpush1.bf16.msra.mxu0 %v7649_v9  ;;  %5759 = vmatprep.subr.bf16.mxu1 %v7654_v10  ;;  %v7700_v9 = vld [vmem:[#allocation12 + $0x508] ss:$28 sps:$4 sm:$0xff]   ;;  %v7703_v10 = vld [vmem:[#allocation12 + $0x510] ss:$28 sps:$4 sm:$0xff]  }
 0x3c9   :  { %5923 = vmatprep.subr.bf16.mxu0 %v7657_v11  ;;  %v7708_v11 = vld [vmem:[#allocation12 + $0x544] ss:$28 sps:$4 sm:$0xff]  }
 0x3cb   :  { %5760 = vmatpush1.bf16.msra.mxu1 %v7652_v12  ;;  %v7711_v12 = vld [vmem:[#allocation12 + $0x54c] ss:$28 sps:$4 sm:$0xff]  }
 0x3cc   :  { %5924 = vmatpush1.bf16.msra.mxu0 %v7655_v25  ;;  %5770 = vmatprep.subr.bf16.mxu1 %v7660_v13  ;;  %v7706_v25 = vld [vmem:[#allocation12 + $0x540] ss:$28 sps:$4 sm:$0xff]   ;;  %v7709_v13 = vld [vmem:[#allocation12 + $0x548] ss:$28 sps:$4 sm:$0xff]  }
 0x3cd   :  { %5934 = vmatprep.subr.bf16.mxu0 %v7663_v14  ;;  %v7714_v14 = vld [vmem:[#allocation12 + $0x57c] ss:$28 sps:$4 sm:$0xff]  }
 0x3e1   :  { %v2591_v19 = vpop.f32.mrb[4].mxu1  ;;  %v8651_v20 = vpop.f32.mrb[8].mxu0 }
 0x3e2   :  { %v7329_v21 = vadd.f32 %v2591_v19, %v1199_v16  ;;  %v2593_v22 = vpop.f32.mrb[5].mxu1  ;;  %v2675_v49 = vpop.f32.mrb[9].mxu0  ;;  %v7717_v16 = vld [vmem:[#allocation12 + $0x584] ss:$28 sps:$4 sm:$0xff]   ;;  %v7720_v19 = vld [vmem:[#allocation12 + $0x5b4] ss:$28 sps:$4 sm:$0xff]  }
 0x3e3   :  { %v7330_v27 = vadd.f32 %v2593_v22, %v1203_v17  ;;  %v7332_v23 = vadd.f32 %v2675_v49, %v1211_v18  ;;  %v2595_v24 = vpop.f32.mrb[6].mxu1  ;;  %v2677_v26 = vpop.f32.mrb[10].mxu0  ;;  %v7712_v17 = vld [vmem:[#allocation12 + $0x578] ss:$28 sps:$4 sm:$0xff]   ;;  %v7715_v18 = vld [vmem:[#allocation12 + $0x580] ss:$28 sps:$4 sm:$0xff]  }
 0x3e4   :  { %v2844_v28 = vpack.c.bf16 %v7329_v21, %v7329_v21  ;;  %v2596_v29 = vpop.f32.mrb[7].mxu1  ;;  %v2678_v62 = vpop.f32.mrb[11].mxu0  ;;  %v7723_v21 = vld [vmem:[#allocation12 + $0x5bc] ss:$28 sps:$4 sm:$0xff]   ;;  %v7718_v22 = vld [vmem:[#allocation12 + $0x5b0] ss:$28 sps:$4 sm:$0xff]  }
 0x3e5   :  { %v2845_v33 = vpack.c.bf16 %v7330_v27, %v7330_v27  ;;  %v2847_v30 = vpack.c.bf16 %v7332_v23, %v7332_v23  ;;  %v7721_v49 = vld [vmem:[#allocation12 + $0x5b8] ss:$28 sps:$4 sm:$0xff]   ;;  %v7726_v27 = vld [vmem:[#allocation12 + $0x5ec] ss:$28 sps:$4 sm:$0xff]   ;;  %v7730_v62 = vld [vmem:[#allocation12 + $0x620] ss:$28 sps:$4 sm:$0xff]  }
 0x3e6   :  { %v2860_v31 = vmul.bf16 1045249613, %v2844_v28  ;;  %vm2852_vm8 = vcmp.gt.bf16.partialorder %v2844_v28, 0  ;;  %v7729_v23 = vld [vmem:[#allocation12 + $0x5f4] ss:$28 sps:$4 sm:$0xff]  }
 0x3e7   :  { %vm2853_vm9 = vcmp.gt.bf16.partialorder %v2845_v33, 0  ;;  %v2861_v32 = vmul.bf16 1045249613, %v2845_v33  ;;  %v2863_v34 = vmul.bf16 1045249613, %v2847_v30  ;;  %vm2855_vm10 = vcmp.gt.bf16.partialorder %v2847_v30, 0 }
 0x3e8   :  { %v8657_v38 = vsel %vm2852_vm8, %v2844_v28, %v2860_v31  ;;  %v7724_v24 = vld [vmem:[#allocation12 + $0x5e8] ss:$28 sps:$4 sm:$0xff]   ;;  %v7727_v26 = vld [vmem:[#allocation12 + $0x5f0] ss:$28 sps:$4 sm:$0xff]  }
 0x3e9   :  { %v8653_v37 = vsel %vm2853_vm9, %v2845_v33, %v2861_v32  ;;  %v8661_v40 = vsel %vm2855_vm10, %v2847_v30, %v2863_v34  ;;  %v7732_v28 = vld [vmem:[#allocation12 + $0x624] ss:$28 sps:$4 sm:$0xff]   ;;  %v7735_v29 = vld [vmem:[#allocation12 + $0x62c] ss:$28 sps:$4 sm:$0xff]   ;;  %v7738_v30 = vld [vmem:[#allocation12 + $0x65c] ss:$28 sps:$4 sm:$0xff]   ;;  %v1207_v32 = vrot.slane %v8643_v15, %v8626_v6 }
 0x3ea   :  { %5761 = vmatprep.mubr.bf16.mxu1 %v8653_v37  ;;  %5925 = vmatprep.mubr.bf16.mxu0 %v8653_v37  ;;  %v7733_v33 = vld [vmem:[#allocation12 + $0x628] ss:$28 sps:$4 sm:$0xff]   ;;  %v7736_v34 = vld [vmem:[#allocation12 + $0x658] ss:$28 sps:$4 sm:$0xff]  }
 0x3eb   :  { %5762 = vmatmul.mubr.bf16.vlgmr.msra.gmra.mrb[12].mxu1 %v8657_v38  ;;  %5926 = vmatmul.mubr.bf16.vlgmr.msra.gmra.mrb[16].mxu0 %v8657_v38  ;;  %v7741_v31 = vld [vmem:[#allocation12 + $0x664] ss:$28 sps:$4 sm:$0xff]  }
 0x3ec   :  { %5771 = vmatpush1.bf16.msra.mxu1 %v7658_v35  ;;  %5935 = vmatpush1.bf16.msra.mxu0 %v7661_v36  ;;  %v7739_v35 = vld [vmem:[#allocation12 + $0x660] ss:$28 sps:$4 sm:$0xff]   ;;  %v7744_v36 = vld [vmem:[#allocation12 + $0x694] ss:$28 sps:$4 sm:$0xff]  }
 0x3ed   :  { %5802 = vmatprep.mubr.bf16.mxu1 %v8661_v40  ;;  %5966 = vmatprep.mubr.bf16.mxu0 %v8661_v40 }
 0x3ee   :  { %5772 = vmatprep.subr.bf16.mxu1 %v7666_v39  ;;  %5936 = vmatprep.subr.bf16.mxu0 %v7669_v5  ;;  %v7747_v39 = vld [vmem:[#allocation12 + $0x69c] ss:$28 sps:$4 sm:$0xff]   ;;  %v7331_v5 = vadd.f32 %v8651_v20, %v1207_v32  ;;  %v7816_v32 = vld [vmem:[#allocation12 + $0x934] ss:$28 sps:$4 sm:$0xff]  }
 0x3ef   :  { %v7754_v20 = vld [vmem:[#allocation12 + $0x700] ss:$28 sps:$4 sm:$0xff]  }
 0x3f0   :  { %5773 = vmatpush1.bf16.msra.mxu1 %v7664_v41  ;;  %5937 = vmatpush1.bf16.msra.mxu0 %v7667_v42  ;;  %v7742_v41 = vld [vmem:[#allocation12 + $0x690] ss:$28 sps:$4 sm:$0xff]   ;;  %v7745_v42 = vld [vmem:[#allocation12 + $0x698] ss:$28 sps:$4 sm:$0xff]  }
 0x3f1   :  { %5774 = vmatprep.subr.bf16.mxu1 %v7672_v43  ;;  %5938 = vmatprep.subr.bf16.mxu0 %v7675_v44  ;;  %v7750_v43 = vld [vmem:[#allocation12 + $0x6cc] ss:$28 sps:$4 sm:$0xff]   ;;  %v7753_v44 = vld [vmem:[#allocation12 + $0x6d4] ss:$28 sps:$4 sm:$0xff]  }
 0x3f4   :  { %5775 = vmatpush1.bf16.msra.mxu1 %v7670_v45  ;;  %5939 = vmatpush1.bf16.msra.mxu0 %v7673_v46  ;;  %v2846_v45 = vpack.c.bf16 %v7331_v5, %v7331_v5  ;;  %v7748_v46 = vld [vmem:[#allocation12 + $0x6c8] ss:$28 sps:$4 sm:$0xff]   ;;  %v7825_v5 = vld [vmem:[#allocation12 + $0x974] ss:$28 sps:$4 sm:$0xff]  }
 0x3f5   :  { %5776 = vmatprep.subr.bf16.mxu1 %v7678_v47  ;;  %5940 = vmatprep.subr.bf16.mxu0 %v7681_v48  ;;  %v7751_v47 = vld [vmem:[#allocation12 + $0x6d0] ss:$28 sps:$4 sm:$0xff]   ;;  %v7756_v48 = vld [vmem:[#allocation12 + $0x704] ss:$28 sps:$4 sm:$0xff]  }
 0x3f6   :  { %vm2854_vm11 = vcmp.gt.bf16.partialorder %v2846_v45, 0 }
 0x3f8   :  { %5777 = vmatpush1.bf16.msra.mxu1 %v7676_v50  ;;  %5941 = vmatpush1.bf16.msra.mxu0 %v7679_v51  ;;  %v7759_v50 = vld [vmem:[#allocation12 + $0x70c] ss:$28 sps:$4 sm:$0xff]   ;;  %v2862_v51 = vmul.bf16 1045249613, %v2846_v45 }
 0x3f9   :  { %5778 = vmatprep.subr.bf16.mxu1 %v7684_v52  ;;  %5942 = vmatprep.subr.bf16.mxu0 %v7687_v53  ;;  %v7757_v52 = vld [vmem:[#allocation12 + $0x708] ss:$28 sps:$4 sm:$0xff]   ;;  %v7762_v53 = vld [vmem:[#allocation12 + $0x73c] ss:$28 sps:$4 sm:$0xff]  }
 0x3fc   :  { %5779 = vmatpush1.bf16.msra.mxu1 %v7682_v54  ;;  %5943 = vmatpush1.bf16.msra.mxu0 %v7685_v55  ;;  %v7765_v54 = vld [vmem:[#allocation12 + $0x744] ss:$28 sps:$4 sm:$0xff]   ;;  %v8668_v55 = vsel %vm2854_vm11, %v2846_v45, %v2862_v51  ;;  %v1218_v51 = vsub.s32 5, %v8592_v60 }
 0x3fd   :  { %5780 = vmatprep.subr.bf16.mxu1 %v7690_v56  ;;  %5944 = vmatprep.subr.bf16.mxu0 %v7693_v57  ;;  %v7760_v56 = vld [vmem:[#allocation12 + $0x738] ss:$28 sps:$4 sm:$0xff]   ;;  %v7763_v57 = vld [vmem:[#allocation12 + $0x740] ss:$28 sps:$4 sm:$0xff]  }
 0x3fe   :  { %v7826_v45 = vld [vmem:[#allocation12 + $0x9a0] ss:$28 sps:$4 sm:$0xff]  }
 0x400   :  { %5781 = vmatpush1.bf16.msra.mxu1 %v7688_v58  ;;  %5945 = vmatpush1.bf16.msra.mxu0 %v7691_v59  ;;  %v7768_v58 = vld [vmem:[#allocation12 + $0x774] ss:$28 sps:$4 sm:$0xff]   ;;  %v7771_v59 = vld [vmem:[#allocation12 + $0x77c] ss:$28 sps:$4 sm:$0xff]  }
 0x401   :  { %5782 = vmatprep.subr.bf16.mxu1 %v7696_v2  ;;  %5946 = vmatprep.subr.bf16.mxu0 %v7699_v3  ;;  %v7766_v2 = vld [vmem:[#allocation12 + $0x770] ss:$28 sps:$4 sm:$0xff]   ;;  %v7769_v3 = vld [vmem:[#allocation12 + $0x778] ss:$28 sps:$4 sm:$0xff]  }
 0x404   :  { %5783 = vmatpush1.bf16.msra.mxu1 %v7694_v1  ;;  %5947 = vmatpush1.bf16.msra.mxu0 %v7697_v4  ;;  %v7774_v1 = vld [vmem:[#allocation12 + $0x7ac] ss:$28 sps:$4 sm:$0xff]   ;;  %v7777_v4 = vld [vmem:[#allocation12 + $0x7b4] ss:$28 sps:$4 sm:$0xff]  }
 0x405   :  { %5784 = vmatprep.subr.bf16.mxu1 %v7702_v7  ;;  %5948 = vmatprep.subr.bf16.mxu0 %v7705_v8  ;;  %v7772_v7 = vld [vmem:[#allocation12 + $0x7a8] ss:$28 sps:$4 sm:$0xff]   ;;  %v7775_v8 = vld [vmem:[#allocation12 + $0x7b0] ss:$28 sps:$4 sm:$0xff]  }
 0x408   :  { %5785 = vmatpush1.bf16.msra.mxu1 %v7700_v9  ;;  %5949 = vmatpush1.bf16.msra.mxu0 %v7703_v10  ;;  %v7780_v9 = vld [vmem:[#allocation12 + $0x7e4] ss:$28 sps:$4 sm:$0xff]   ;;  %v7783_v10 = vld [vmem:[#allocation12 + $0x7ec] ss:$28 sps:$4 sm:$0xff]  }
 0x409   :  { %5786 = vmatprep.subr.bf16.mxu1 %v7708_v11  ;;  %5950 = vmatprep.subr.bf16.mxu0 %v7711_v12  ;;  %v7778_v11 = vld [vmem:[#allocation12 + $0x7e0] ss:$28 sps:$4 sm:$0xff]   ;;  %v7781_v12 = vld [vmem:[#allocation12 + $0x7e8] ss:$28 sps:$4 sm:$0xff]  }
 0x40c   :  { %5787 = vmatpush1.bf16.msra.mxu1 %v7706_v25  ;;  %5951 = vmatpush1.bf16.msra.mxu0 %v7709_v13  ;;  %v7786_v25 = vld [vmem:[#allocation12 + $0x81c] ss:$28 sps:$4 sm:$0xff]   ;;  %v7789_v13 = vld [vmem:[#allocation12 + $0x824] ss:$28 sps:$4 sm:$0xff]  }
 0x40d   :  { %5788 = vmatprep.subr.bf16.mxu1 %v7714_v14  ;;  %5952 = vmatprep.subr.bf16.mxu0 %v7717_v16  ;;  %v7784_v14 = vld [vmem:[#allocation12 + $0x818] ss:$28 sps:$4 sm:$0xff]   ;;  %v7787_v16 = vld [vmem:[#allocation12 + $0x820] ss:$28 sps:$4 sm:$0xff]  }
 0x410   :  { %5789 = vmatpush1.bf16.msra.mxu1 %v7712_v17  ;;  %5953 = vmatpush1.bf16.msra.mxu0 %v7715_v18  ;;  %v7792_v17 = vld [vmem:[#allocation12 + $0x854] ss:$28 sps:$4 sm:$0xff]   ;;  %v7795_v18 = vld [vmem:[#allocation12 + $0x85c] ss:$28 sps:$4 sm:$0xff]  }
 0x411   :  { %5790 = vmatprep.subr.bf16.mxu1 %v7720_v19  ;;  %5954 = vmatprep.subr.bf16.mxu0 %v7723_v21  ;;  %v7790_v19 = vld [vmem:[#allocation12 + $0x850] ss:$28 sps:$4 sm:$0xff]   ;;  %v7793_v21 = vld [vmem:[#allocation12 + $0x858] ss:$28 sps:$4 sm:$0xff]  }
 0x414   :  { %5791 = vmatpush1.bf16.msra.mxu1 %v7718_v22  ;;  %5955 = vmatpush1.bf16.msra.mxu0 %v7721_v49  ;;  %v7798_v22 = vld [vmem:[#allocation12 + $0x88c] ss:$28 sps:$4 sm:$0xff]   ;;  %v7801_v49 = vld [vmem:[#allocation12 + $0x894] ss:$28 sps:$4 sm:$0xff]  }
 0x415   :  { %5792 = vmatprep.subr.bf16.mxu1 %v7726_v27  ;;  %5956 = vmatprep.subr.bf16.mxu0 %v7729_v23  ;;  %v7796_v27 = vld [vmem:[#allocation12 + $0x888] ss:$28 sps:$4 sm:$0xff]   ;;  %v7799_v23 = vld [vmem:[#allocation12 + $0x890] ss:$28 sps:$4 sm:$0xff]  }
 0x418   :  { %5793 = vmatpush1.bf16.msra.mxu1 %v7724_v24  ;;  %5957 = vmatpush1.bf16.msra.mxu0 %v7727_v26  ;;  %v7804_v24 = vld [vmem:[#allocation12 + $0x8c4] ss:$28 sps:$4 sm:$0xff]   ;;  %v7807_v26 = vld [vmem:[#allocation12 + $0x8cc] ss:$28 sps:$4 sm:$0xff]  }
 0x419   :  { %5794 = vmatprep.subr.bf16.mxu1 %v7732_v28  ;;  %5958 = vmatprep.subr.bf16.mxu0 %v7735_v29  ;;  %v7802_v28 = vld [vmem:[#allocation12 + $0x8c0] ss:$28 sps:$4 sm:$0xff]   ;;  %v7805_v29 = vld [vmem:[#allocation12 + $0x8c8] ss:$28 sps:$4 sm:$0xff]  }
 0x41c   :  { %5795 = vmatpush1.bf16.msra.mxu1 %v7730_v62  ;;  %5959 = vmatpush1.bf16.msra.mxu0 %v7733_v33  ;;  %v7810_v62 = vld [vmem:[#allocation12 + $0x8fc] ss:$28 sps:$4 sm:$0xff]   ;;  %v7813_v33 = vld [vmem:[#allocation12 + $0x904] ss:$28 sps:$4 sm:$0xff]  }
 0x41d   :  { %5796 = vmatprep.subr.bf16.mxu1 %v7738_v30  ;;  %5960 = vmatprep.subr.bf16.mxu0 %v7741_v31  ;;  %v7808_v30 = vld [vmem:[#allocation12 + $0x8f8] ss:$28 sps:$4 sm:$0xff]   ;;  %v7811_v31 = vld [vmem:[#allocation12 + $0x900] ss:$28 sps:$4 sm:$0xff]  }
 0x420   :  { %5797 = vmatpush1.bf16.msra.mxu1 %v7736_v34  ;;  %5961 = vmatpush1.bf16.msra.mxu0 %v7739_v35  ;;  %v7819_v34 = vld [vmem:[#allocation12 + $0x93c] ss:$28 sps:$4 sm:$0xff]   ;;  %v7814_v35 = vld [vmem:[#allocation12 + $0x930] ss:$28 sps:$4 sm:$0xff]  }
 0x421   :  { %5798 = vmatprep.subr.bf16.mxu1 %v7744_v36  ;;  %5962 = vmatprep.subr.bf16.mxu0 %v7747_v39  ;;  %v7817_v36 = vld [vmem:[#allocation12 + $0x938] ss:$28 sps:$4 sm:$0xff]   ;;  %v7822_v39 = vld [vmem:[#allocation12 + $0x96c] ss:$28 sps:$4 sm:$0xff]  }
 0x424   :  { %5799 = vmatpush1.bf16.msra.mxu1 %v7742_v41  ;;  %5963 = vmatpush1.bf16.msra.mxu0 %v7745_v42  ;;  %v7820_v41 = vld [vmem:[#allocation12 + $0x968] ss:$28 sps:$4 sm:$0xff]   ;;  %v7823_v42 = vld [vmem:[#allocation12 + $0x970] ss:$28 sps:$4 sm:$0xff]  }
 0x425   :  { %5800 = vmatprep.subr.bf16.mxu1 %v7750_v43  ;;  %5964 = vmatprep.subr.bf16.mxu0 %v7753_v44  ;;  %v7828_v43 = vld [vmem:[#allocation12 + $0x9a4] ss:$28 sps:$4 sm:$0xff]   ;;  %v7831_v44 = vld [vmem:[#allocation12 + $0x9ac] ss:$28 sps:$4 sm:$0xff]  }
 0x428   :  { %5801 = vmatpush1.bf16.msra.mxu1 %v7748_v46  ;;  %5965 = vmatpush1.bf16.msra.mxu0 %v7751_v47  ;;  %v7829_v46 = vld [vmem:[#allocation12 + $0x9a8] ss:$28 sps:$4 sm:$0xff]   ;;  %v7834_v47 = vld [vmem:[#allocation12 + $0x9dc] ss:$28 sps:$4 sm:$0xff]  }
 0x429   :  { %5811 = vmatprep.subr.bf16.mxu1 %v7756_v48  ;;  %5975 = vmatprep.subr.bf16.mxu0 %v7759_v50  ;;  %v7837_v48 = vld [vmem:[#allocation12 + $0x9e4] ss:$28 sps:$4 sm:$0xff]   ;;  %v1214_v50 = vsub.s32 4, %v8592_v60 }
 0x42b   :  { %5803 = vmatmul.mubr.bf16.vlgmr.msra.gmra.mrb[12].mxu1 %v8668_v55  ;;  %5967 = vmatmul.mubr.bf16.vlgmr.msra.gmra.mrb[16].mxu0 %v8668_v55 }
 0x42c   :  { %5812 = vmatpush1.bf16.msra.mxu1 %v7754_v20  ;;  %5976 = vmatpush1.bf16.msra.mxu0 %v7757_v52  ;;  %v7832_v20 = vld [vmem:[#allocation12 + $0x9d8] ss:$28 sps:$4 sm:$0xff]   ;;  %v7835_v52 = vld [vmem:[#allocation12 + $0x9e0] ss:$28 sps:$4 sm:$0xff]  }
 0x42d   :  { %5813 = vmatprep.subr.bf16.mxu1 %v7762_v53  ;;  %5977 = vmatprep.subr.bf16.mxu0 %v7765_v54  ;;  %v1226_v53 = vsub.s32 7, %v8592_v60  ;;  %v7840_v54 = vld [vmem:[#allocation12 + $0xa14] ss:$28 sps:$4 sm:$0xff]  }
 0x430   :  { %5814 = vmatpush1.bf16.msra.mxu1 %v7760_v56  ;;  %5978 = vmatpush1.bf16.msra.mxu0 %v7763_v57  ;;  %v7843_v56 = vld [vmem:[#allocation12 + $0xa1c] ss:$28 sps:$4 sm:$0xff]   ;;  %v1215_v57 = vrot.slane %v8643_v15, %v1214_v50 }
 0x431   :  { %5815 = vmatprep.subr.bf16.mxu1 %v7768_v58  ;;  %5979 = vmatprep.subr.bf16.mxu0 %v7771_v59  ;;  %v1219_v58 = vrot.slane %v8643_v15, %v1218_v51  ;;  %v1227_v59 = vrot.slane %v8643_v15, %v1226_v53  ;;  %v7882_v53 = vld [vmem:[#allocation12 + $0xb9c] ss:$28 sps:$4 sm:$0xff]  }
 0x434   :  { %5816 = vmatpush1.bf16.msra.mxu1 %v7766_v2  ;;  %5980 = vmatpush1.bf16.msra.mxu0 %v7769_v3  ;;  %v7838_v2 = vld [vmem:[#allocation12 + $0xa10] ss:$28 sps:$4 sm:$0xff]   ;;  %v7841_v3 = vld [vmem:[#allocation12 + $0xa18] ss:$28 sps:$4 sm:$0xff]  }
 0x435   :  { %5817 = vmatprep.subr.bf16.mxu1 %v7774_v1  ;;  %5981 = vmatprep.subr.bf16.mxu0 %v7777_v4  ;;  %v7846_v4 = vld [vmem:[#allocation12 + $0xa4c] ss:$28 sps:$4 sm:$0xff]  }
 0x438   :  { %5818 = vmatpush1.bf16.msra.mxu1 %v7772_v7  ;;  %5982 = vmatpush1.bf16.msra.mxu0 %v7775_v8  ;;  %v7849_v7 = vld [vmem:[#allocation12 + $0xa54] ss:$28 sps:$4 sm:$0xff]  }
 0x439   :  { %5819 = vmatprep.subr.bf16.mxu1 %v7780_v9  ;;  %5983 = vmatprep.subr.bf16.mxu0 %v7783_v10 }
 0x43c   :  { %5820 = vmatpush1.bf16.msra.mxu1 %v7778_v11  ;;  %5984 = vmatpush1.bf16.msra.mxu0 %v7781_v12 }
 0x43d   :  { %5821 = vmatprep.subr.bf16.mxu1 %v7786_v25  ;;  %5985 = vmatprep.subr.bf16.mxu0 %v7789_v13 }
 0x440   :  { %5822 = vmatpush1.bf16.msra.mxu1 %v7784_v14  ;;  %5986 = vmatpush1.bf16.msra.mxu0 %v7787_v16 }
 0x441   :  { %5823 = vmatprep.subr.bf16.mxu1 %v7792_v17  ;;  %5987 = vmatprep.subr.bf16.mxu0 %v7795_v18  ;;  %v7844_v18 = vld [vmem:[#allocation12 + $0xa48] ss:$28 sps:$4 sm:$0xff]  }
 0x444   :  { %5824 = vmatpush1.bf16.msra.mxu1 %v7790_v19  ;;  %5988 = vmatpush1.bf16.msra.mxu0 %v7793_v21  ;;  %v7847_v19 = vld [vmem:[#allocation12 + $0xa50] ss:$28 sps:$4 sm:$0xff]  }
 0x445   :  { %5825 = vmatprep.subr.bf16.mxu1 %v7798_v22  ;;  %5989 = vmatprep.subr.bf16.mxu0 %v7801_v49  ;;  %v7852_v49 = vld [vmem:[#allocation12 + $0xa84] ss:$28 sps:$4 sm:$0xff]  }
 0x448   :  { %5826 = vmatpush1.bf16.msra.mxu1 %v7796_v27  ;;  %5990 = vmatpush1.bf16.msra.mxu0 %v7799_v23  ;;  %v7855_v27 = vld [vmem:[#allocation12 + $0xa8c] ss:$28 sps:$4 sm:$0xff]  }
 0x449   :  { %5827 = vmatprep.subr.bf16.mxu1 %v7804_v24  ;;  %5991 = vmatprep.subr.bf16.mxu0 %v7807_v26 }
 0x44c   :  { %5828 = vmatpush1.bf16.msra.mxu1 %v7802_v28  ;;  %5992 = vmatpush1.bf16.msra.mxu0 %v7805_v29  ;;  %v7850_v29 = vld [vmem:[#allocation12 + $0xa80] ss:$28 sps:$4 sm:$0xff]  }
 0x44d   :  { %5829 = vmatprep.subr.bf16.mxu1 %v7810_v62  ;;  %5993 = vmatprep.subr.bf16.mxu0 %v7813_v33  ;;  %v7853_v62 = vld [vmem:[#allocation12 + $0xa88] ss:$28 sps:$4 sm:$0xff]  }
 0x450   :  { %5830 = vmatpush1.bf16.msra.mxu1 %v7808_v30  ;;  %5994 = vmatpush1.bf16.msra.mxu0 %v7811_v31  ;;  %v7858_v31 = vld [vmem:[#allocation12 + $0xabc] ss:$28 sps:$4 sm:$0xff]  }
 0x451   :  { %5831 = vmatprep.subr.bf16.mxu1 %v7816_v32  ;;  %5995 = vmatprep.subr.bf16.mxu0 %v7819_v34  ;;  %v7861_v32 = vld [vmem:[#allocation12 + $0xac4] ss:$28 sps:$4 sm:$0xff]  }
 0x454   :  { %5832 = vmatpush1.bf16.msra.mxu1 %v7814_v35  ;;  %5996 = vmatpush1.bf16.msra.mxu0 %v7817_v36  ;;  %v7856_v35 = vld [vmem:[#allocation12 + $0xab8] ss:$28 sps:$4 sm:$0xff]   ;;  %v7859_v36 = vld [vmem:[#allocation12 + $0xac0] ss:$28 sps:$4 sm:$0xff]  }
 0x455   :  { %5833 = vmatprep.subr.bf16.mxu1 %v7822_v39  ;;  %5997 = vmatprep.subr.bf16.mxu0 %v7825_v5  ;;  %v7864_v39 = vld [vmem:[#allocation12 + $0xaf4] ss:$28 sps:$4 sm:$0xff]   ;;  %v7867_v5 = vld [vmem:[#allocation12 + $0xafc] ss:$28 sps:$4 sm:$0xff]  }
 0x458   :  { %5834 = vmatpush1.bf16.msra.mxu1 %v7820_v41  ;;  %5998 = vmatpush1.bf16.msra.mxu0 %v7823_v42  ;;  %v7862_v41 = vld [vmem:[#allocation12 + $0xaf0] ss:$28 sps:$4 sm:$0xff]   ;;  %v7865_v42 = vld [vmem:[#allocation12 + $0xaf8] ss:$28 sps:$4 sm:$0xff]  }
 0x459   :  { %5835 = vmatprep.subr.bf16.mxu1 %v7828_v43  ;;  %5999 = vmatprep.subr.bf16.mxu0 %v7831_v44  ;;  %v7870_v43 = vld [vmem:[#allocation12 + $0xb2c] ss:$28 sps:$4 sm:$0xff]   ;;  %v7873_v44 = vld [vmem:[#allocation12 + $0xb34] ss:$28 sps:$4 sm:$0xff]  }
 0x45c   :  { %5836 = vmatpush1.bf16.msra.mxu1 %v7826_v45  ;;  %6000 = vmatpush1.bf16.msra.mxu0 %v7829_v46  ;;  %v7868_v45 = vld [vmem:[#allocation12 + $0xb28] ss:$28 sps:$4 sm:$0xff]   ;;  %v7871_v46 = vld [vmem:[#allocation12 + $0xb30] ss:$28 sps:$4 sm:$0xff]  }
 0x45d   :  { %5837 = vmatprep.subr.bf16.mxu1 %v7834_v47  ;;  %6001 = vmatprep.subr.bf16.mxu0 %v7837_v48  ;;  %v7876_v47 = vld [vmem:[#allocation12 + $0xb64] ss:$28 sps:$4 sm:$0xff]   ;;  %v7879_v48 = vld [vmem:[#allocation12 + $0xb6c] ss:$28 sps:$4 sm:$0xff]  }
 0x460   :  { %5838 = vmatpush1.bf16.msra.mxu1 %v7832_v20  ;;  %6002 = vmatpush1.bf16.msra.mxu0 %v7835_v52  ;;  %v7874_v20 = vld [vmem:[#allocation12 + $0xb60] ss:$28 sps:$4 sm:$0xff]   ;;  %v7877_v52 = vld [vmem:[#allocation12 + $0xb68] ss:$28 sps:$4 sm:$0xff]  }
 0x461   :  { %v2755_v1 = vpop.f32.mrb[8].mxu1  ;;  %5839 = vmatprep.subr.bf16.mxu1 %v7840_v54  ;;  %6003 = vmatprep.subr.bf16.mxu0 %v7843_v56  ;;  %v7885_v54 = vld [vmem:[#allocation12 + $0xba4] ss:$28 sps:$4 sm:$0xff]   ;;  %v7880_v56 = vld [vmem:[#allocation12 + $0xb98] ss:$28 sps:$4 sm:$0xff]  }
 0x462   :  { %v7333_v8 = vadd.f32 %v2755_v1, %v1215_v57  ;;  %v8682_v9 = vpop.f32.mrb[12].mxu0  ;;  %v2757_v10 = vpop.f32.mrb[9].mxu1  ;;  %v7883_v57 = vld [vmem:[#allocation12 + $0xba0] ss:$28 sps:$4 sm:$0xff]   ;;  %v7894_v1 = vld [vmem:[#allocation12 + $0xc0c] ss:$28 sps:$4 sm:$0xff]  }
 0x463   :  { %v7334_v11 = vadd.f32 %v2757_v10, %v1219_v58  ;;  %v2839_v12 = vpop.f32.mrb[13].mxu0  ;;  %v2759_v25 = vpop.f32.mrb[10].mxu1  ;;  %v7888_v58 = vld [vmem:[#allocation12 + $0xbd4] ss:$28 sps:$4 sm:$0xff]   ;;  %v7900_v10 = vld [vmem:[#allocation12 + $0xc44] ss:$28 sps:$4 sm:$0xff]  }
 0x464   :  { %v2848_v13 = vpack.c.bf16 %v7333_v8, %v7333_v8  ;;  %v7336_v14 = vadd.f32 %v2839_v12, %v1227_v59  ;;  %v2841_v16 = vpop.f32.mrb[14].mxu0  ;;  %5840 = vmatpush1.bf16.msra.mxu1 %v7838_v2  ;;  %6004 = vmatpush1.bf16.msra.mxu0 %v7841_v3  ;;  %v2760_v17 = vpop.f32.mrb[11].mxu1  ;;  %v7891_v59 = vld [vmem:[#allocation12 + $0xbdc] ss:$28 sps:$4 sm:$0xff]   ;;  %v7886_v2 = vld [vmem:[#allocation12 + $0xbd0] ss:$28 sps:$4 sm:$0xff]  }
 0x465   :  { %v2849_v21 = vpack.c.bf16 %v7334_v11, %v7334_v11  ;;  %v2842_v22 = vpop.f32.mrb[15].mxu0  ;;  %5841 = vmatprep.subr.bf16.mxu1 %v7846_v4  ;;  %6005 = vmatprep.subr.bf16.mxu0 %v7849_v7  ;;  %v7889_v3 = vld [vmem:[#allocation12 + $0xbd8] ss:$28 sps:$4 sm:$0xff]   ;;  %v7892_v7 = vld [vmem:[#allocation12 + $0xc08] ss:$28 sps:$4 sm:$0xff]  }
 0x466   :  { %v2864_v23 = vmul.bf16 1045249613, %v2848_v13  ;;  %v2851_v24 = vpack.c.bf16 %v7336_v14, %v7336_v14  ;;  %vm2856_vm12 = vcmp.gt.bf16.partialorder %v2848_v13, 0  ;;  %v7897_v4 = vld [vmem:[#allocation12 + $0xc14] ss:$28 sps:$4 sm:$0xff]  }
 0x467   :  { %vm2857_vm13 = vcmp.gt.bf16.partialorder %v2849_v21, 0  ;;  %v2865_v26 = vmul.bf16 1045249613, %v2849_v21  ;;  %v7895_v8 = vld [vmem:[#allocation12 + $0xc10] ss:$28 sps:$4 sm:$0xff]  }
 0x468   :  { %v2867_v28 = vmul.bf16 1045249613, %v2851_v24  ;;  %5842 = vmatpush1.bf16.msra.mxu1 %v7844_v18  ;;  %6006 = vmatpush1.bf16.msra.mxu0 %v7847_v19  ;;  %vm2859_vm14 = vcmp.gt.bf16.partialorder %v2851_v24, 0  ;;  %v8688_v30 = vsel %vm2856_vm12, %v2848_v13, %v2864_v23  ;;  %v7903_v11 = vld [vmem:[#allocation12 + $0xc4c] ss:$28 sps:$4 sm:$0xff]  }
 0x469   :  { %v8684_v33 = vsel %vm2857_vm13, %v2849_v21, %v2865_v26  ;;  %5852 = vmatprep.subr.bf16.mxu1 %v7852_v49  ;;  %6016 = vmatprep.subr.bf16.mxu0 %v7855_v27  ;;  %v7898_v12 = vld [vmem:[#allocation12 + $0xc40] ss:$28 sps:$4 sm:$0xff]   ;;  %v7901_v25 = vld [vmem:[#allocation12 + $0xc48] ss:$28 sps:$4 sm:$0xff]   ;;  %v7904_v16 = vld [vmem:[#allocation12 + $0xc78] ss:$28 sps:$4 sm:$0xff]  }
 0x46a   :  { %5843 = vmatprep.mubr.bf16.mxu1 %v8684_v33  ;;  %6007 = vmatprep.mubr.bf16.mxu0 %v8684_v33  ;;  %v8692_v34 = vsel %vm2859_vm14, %v2851_v24, %v2867_v28  ;;  %v7906_v13 = vld [vmem:[#allocation12 + $0xc7c] ss:$28 sps:$4 sm:$0xff]   ;;  %v7909_v14 = vld [vmem:[#allocation12 + $0xc84] ss:$28 sps:$4 sm:$0xff]   ;;  %v7912_v18 = vld [vmem:[#allocation12 + $0xcb4] ss:$28 sps:$4 sm:$0xff]  }
 0x46b   :  { %5844 = vmatmul.mubr.bf16.vlgmr.msra.gmra.mrb[12].mxu1 %v8688_v30  ;;  %6008 = vmatmul.mubr.bf16.vlgmr.msra.gmra.mrb[16].mxu0 %v8688_v30  ;;  %v7907_v17 = vld [vmem:[#allocation12 + $0xc80] ss:$28 sps:$4 sm:$0xff]   ;;  %v7910_v21 = vld [vmem:[#allocation12 + $0xcb0] ss:$28 sps:$4 sm:$0xff]   ;;  %v7913_v22 = vld [vmem:[#allocation12 + $0xcb8] ss:$28 sps:$4 sm:$0xff]  }
 0x46c   :  { %5853 = vmatpush1.bf16.msra.mxu1 %v7850_v29  ;;  %6017 = vmatpush1.bf16.msra.mxu0 %v7853_v62  ;;  %v7915_v19 = vld [vmem:[#allocation12 + $0xcbc] ss:$28 sps:$4 sm:$0xff]   ;;  %v7918_v49 = vld [vmem:[#allocation12 + $0xcec] ss:$28 sps:$4 sm:$0xff]   ;;  %v7921_v27 = vld [vmem:[#allocation12 + $0xcf4] ss:$28 sps:$4 sm:$0xff]  }
 0x46d   :  { %5884 = vmatprep.mubr.bf16.mxu1 %v8692_v34  ;;  %6048 = vmatprep.mubr.bf16.mxu0 %v8692_v34  ;;  %v7916_v23 = vld [vmem:[#allocation12 + $0xce8] ss:$28 sps:$4 sm:$0xff]   ;;  %v7919_v24 = vld [vmem:[#allocation12 + $0xcf0] ss:$28 sps:$4 sm:$0xff]   ;;  %v1222_v29 = vsub.s32 6, %v8592_v60 }
 0x46e   :  { %5854 = vmatprep.subr.bf16.mxu1 %v7858_v31  ;;  %6018 = vmatprep.subr.bf16.mxu0 %v7861_v32  ;;  %v7924_v26 = vld [vmem:[#allocation12 + $0xd24] ss:$28 sps:$4 sm:$0xff]   ;;  %v7927_v28 = vld [vmem:[#allocation12 + $0xd2c] ss:$28 sps:$4 sm:$0xff]   ;;  %v7930_v32 = vld [vmem:[#allocation12 + $0xd5c] ss:$28 sps:$4 sm:$0xff]  }
 0x46f   :  { %v7922_v62 = vld [vmem:[#allocation12 + $0xd20] ss:$28 sps:$4 sm:$0xff]   ;;  %v7925_v31 = vld [vmem:[#allocation12 + $0xd28] ss:$28 sps:$4 sm:$0xff]  }
 0x470   :  { %5855 = vmatpush1.bf16.msra.mxu1 %v7856_v35  ;;  %6019 = vmatpush1.bf16.msra.mxu0 %v7859_v36  ;;  %v7933_v35 = vld [vmem:[#allocation12 + $0xd64] ss:$28 sps:$4 sm:$0xff]   ;;  %v1223_v36 = vrot.slane %v8643_v15, %v1222_v29 }
 0x471   :  { %5856 = vmatprep.subr.bf16.mxu1 %v7864_v39  ;;  %6020 = vmatprep.subr.bf16.mxu0 %v7867_v5  ;;  %v7928_v39 = vld [vmem:[#allocation12 + $0xd58] ss:$28 sps:$4 sm:$0xff]   ;;  %v7931_v5 = vld [vmem:[#allocation12 + $0xd60] ss:$28 sps:$4 sm:$0xff]   ;;  %v7940_v15 = vld [vmem:[#allocation12 + $0xdc8] ss:$28 sps:$4 sm:$0xff]  }
 0x474   :  { %5857 = vmatpush1.bf16.msra.mxu1 %v7862_v41  ;;  %6021 = vmatpush1.bf16.msra.mxu0 %v7865_v42  ;;  %v7936_v41 = vld [vmem:[#allocation12 + $0xd94] ss:$28 sps:$4 sm:$0xff]   ;;  %v7939_v42 = vld [vmem:[#allocation12 + $0xd9c] ss:$28 sps:$4 sm:$0xff]  }
 0x475   :  { %5858 = vmatprep.subr.bf16.mxu1 %v7870_v43  ;;  %6022 = vmatprep.subr.bf16.mxu0 %v7873_v44  ;;  %v7335_v43 = vadd.f32 %v8682_v9, %v1223_v36  ;;  %v7934_v44 = vld [vmem:[#allocation12 + $0xd90] ss:$28 sps:$4 sm:$0xff]   ;;  %v7990_v36 = vld [vmem:[#allocation12 + $0x398] ss:$28 sps:$4 sm:$0xff]  }
 0x476   :  { %v7946_v9 = vld [vmem:[#allocation12 + $0x10] ss:$28 sps:$4 sm:$0xff]  }
 0x478   :  { %5859 = vmatpush1.bf16.msra.mxu1 %v7868_v45  ;;  %6023 = vmatpush1.bf16.msra.mxu0 %v7871_v46  ;;  %v7937_v45 = vld [vmem:[#allocation12 + $0xd98] ss:$28 sps:$4 sm:$0xff]   ;;  %v7942_v46 = vld [vmem:[#allocation12 + $0xdcc] ss:$28 sps:$4 sm:$0xff]  }
 0x479   :  { %5860 = vmatprep.subr.bf16.mxu1 %v7876_v47  ;;  %6024 = vmatprep.subr.bf16.mxu0 %v7879_v48  ;;  %v7945_v47 = vld [vmem:[#allocation12 + $0xdd4] ss:$28 sps:$4 sm:$0xff]   ;;  %v2850_v48 = vpack.c.bf16 %v7335_v43, %v7335_v43  ;;  %v7998_v43 = vld [vmem:[#allocation12 + $0x244] ss:$28 sps:$4 sm:$0xff]  }
 0x47b   :  { %vm2858_vm15 = vcmp.gt.bf16.partialorder %v2850_v48, 0 }
 0x47c   :  { %5861 = vmatpush1.bf16.msra.mxu1 %v7874_v20  ;;  %6025 = vmatpush1.bf16.msra.mxu0 %v7877_v52  ;;  %v7943_v20 = vld [vmem:[#allocation12 + $0xdd0] ss:$28 sps:$4 sm:$0xff]  }
 0x47d   :  { %5862 = vmatprep.subr.bf16.mxu1 %v7882_v53  ;;  %6026 = vmatprep.subr.bf16.mxu0 %v7885_v54  ;;  %v7948_v52 = vld [vmem:[#allocation12 + $0x14] ss:$28 sps:$4 sm:$0xff]   ;;  %v2866_v54 = vmul.bf16 1045249613, %v2850_v48 }
 0x47e   :  { %v7949_v53 = vld [vmem:[#allocation12 + $0x1d8] ss:$28 sps:$4 sm:$0xff]  }
 0x480   :  { %5863 = vmatpush1.bf16.msra.mxu1 %v7880_v56  ;;  %6027 = vmatpush1.bf16.msra.mxu0 %v7883_v57  ;;  %v7950_v56 = vld [vmem:[#allocation12 + $0x18] ss:$28 sps:$4 sm:$0xff]   ;;  %v8701_v57 = vsel %vm2858_vm15, %v2850_v48, %v2866_v54  ;;  %v8004_v48 = vld [vmem:[#allocation12 + $0x600] ss:$28 sps:$4 sm:$0xff]   ;;  %v8006_v54 = vld [vmem:[#allocation12 + $0x2b0] ss:$28 sps:$4 sm:$0xff]  }
 0x481   :  { %5864 = vmatprep.subr.bf16.mxu1 %v7888_v58  ;;  %6028 = vmatprep.subr.bf16.mxu0 %v7891_v59  ;;  %v7953_v58 = vld [vmem:[#allocation12 + $0x4c] ss:$28 sps:$4 sm:$0xff]  }
 0x482   :  { %v7954_v59 = vld [vmem:[#allocation12 + $0x210] ss:$28 sps:$4 sm:$0xff]  }
 0x484   :  { %5865 = vmatpush1.bf16.msra.mxu1 %v7886_v2  ;;  %6029 = vmatpush1.bf16.msra.mxu0 %v7889_v3  ;;  %v7951_v2 = vld [vmem:[#allocation12 + $0x48] ss:$28 sps:$4 sm:$0xff]   ;;  %v7955_v3 = vld [vmem:[#allocation12 + $0x50] ss:$28 sps:$4 sm:$0xff]  }
 0x485   :  { %5866 = vmatprep.subr.bf16.mxu1 %v7894_v1  ;;  %6030 = vmatprep.subr.bf16.mxu0 %v7897_v4  ;;  %v7958_v1 = vld [vmem:[#allocation12 + $0x84] ss:$28 sps:$4 sm:$0xff]  }
 0x486   :  { %v7959_v4 = vld [vmem:[#allocation12 + $0x248] ss:$28 sps:$4 sm:$0xff]  }
 0x488   :  { %5867 = vmatpush1.bf16.msra.mxu1 %v7892_v7  ;;  %6031 = vmatpush1.bf16.msra.mxu0 %v7895_v8  ;;  %v7956_v7 = vld [vmem:[#allocation12 + $0x80] ss:$28 sps:$4 sm:$0xff]   ;;  %v7960_v8 = vld [vmem:[#allocation12 + $0x88] ss:$28 sps:$4 sm:$0xff]  }
 0x489   :  { %5868 = vmatprep.subr.bf16.mxu1 %v7900_v10  ;;  %6032 = vmatprep.subr.bf16.mxu0 %v7903_v11  ;;  %v7963_v10 = vld [vmem:[#allocation12 + $0xbc] ss:$28 sps:$4 sm:$0xff]  }
 0x48a   :  { %v7964_v11 = vld [vmem:[#allocation12 + $0x280] ss:$28 sps:$4 sm:$0xff]  }
 0x48c   :  { %5869 = vmatpush1.bf16.msra.mxu1 %v7898_v12  ;;  %6033 = vmatpush1.bf16.msra.mxu0 %v7901_v25  ;;  %v7961_v12 = vld [vmem:[#allocation12 + $0xb8] ss:$28 sps:$4 sm:$0xff]   ;;  %v7965_v25 = vld [vmem:[#allocation12 + $0xc0] ss:$28 sps:$4 sm:$0xff]  }
 0x48d   :  { %5870 = vmatprep.subr.bf16.mxu1 %v7906_v13  ;;  %6034 = vmatprep.subr.bf16.mxu0 %v7909_v14  ;;  %v7968_v13 = vld [vmem:[#allocation12 + $0xf4] ss:$28 sps:$4 sm:$0xff]  }
 0x48e   :  { %v7966_v14 = vld [vmem:[#allocation12 + $0xf0] ss:$28 sps:$4 sm:$0xff]  }
 0x490   :  { %5871 = vmatpush1.bf16.msra.mxu1 %v7904_v16  ;;  %6035 = vmatpush1.bf16.msra.mxu0 %v7907_v17  ;;  %v7970_v16 = vld [vmem:[#allocation12 + $0xf8] ss:$28 sps:$4 sm:$0xff]   ;;  %v7973_v17 = vld [vmem:[#allocation12 + $0x12c] ss:$28 sps:$4 sm:$0xff]  }
 0x491   :  { %5872 = vmatprep.subr.bf16.mxu1 %v7912_v18  ;;  %6036 = vmatprep.subr.bf16.mxu0 %v7915_v19  ;;  %v7974_v18 = vld [vmem:[#allocation12 + $0x2f0] ss:$28 sps:$4 sm:$0xff]   ;;  %v7971_v19 = vld [vmem:[#allocation12 + $0x128] ss:$28 sps:$4 sm:$0xff]  }
 0x494   :  { %5873 = vmatpush1.bf16.msra.mxu1 %v7910_v21  ;;  %6037 = vmatpush1.bf16.msra.mxu0 %v7913_v22  ;;  %v7975_v21 = vld [vmem:[#allocation12 + $0x130] ss:$28 sps:$4 sm:$0xff]   ;;  %v7978_v22 = vld [vmem:[#allocation12 + $0x164] ss:$28 sps:$4 sm:$0xff]  }
 0x495   :  { %5874 = vmatprep.subr.bf16.mxu1 %v7918_v49  ;;  %6038 = vmatprep.subr.bf16.mxu0 %v7921_v27  ;;  %v7979_v49 = vld [vmem:[#allocation12 + $0x328] ss:$28 sps:$4 sm:$0xff]   ;;  %v7976_v27 = vld [vmem:[#allocation12 + $0x160] ss:$28 sps:$4 sm:$0xff]  }
 0x498   :  { %5875 = vmatpush1.bf16.msra.mxu1 %v7916_v23  ;;  %6039 = vmatpush1.bf16.msra.mxu0 %v7919_v24  ;;  %v7980_v23 = vld [vmem:[#allocation12 + $0x168] ss:$28 sps:$4 sm:$0xff]   ;;  %v7983_v24 = vld [vmem:[#allocation12 + $0x19c] ss:$28 sps:$4 sm:$0xff]  }
 0x499   :  { %5876 = vmatprep.subr.bf16.mxu1 %v7924_v26  ;;  %6040 = vmatprep.subr.bf16.mxu0 %v7927_v28  ;;  %v7984_v26 = vld [vmem:[#allocation12 + $0x360] ss:$28 sps:$4 sm:$0xff]   ;;  %v7981_v28 = vld [vmem:[#allocation12 + $0x198] ss:$28 sps:$4 sm:$0xff]  }
 0x49c   :  { %5877 = vmatpush1.bf16.msra.mxu1 %v7922_v62  ;;  %6041 = vmatpush1.bf16.msra.mxu0 %v7925_v31  ;;  %v7985_v62 = vld [vmem:[#allocation12 + $0x1a0] ss:$28 sps:$4 sm:$0xff]   ;;  %v7988_v31 = vld [vmem:[#allocation12 + $0x1d4] ss:$28 sps:$4 sm:$0xff]  }
 0x49d   :  { %5878 = vmatprep.subr.bf16.mxu1 %v7930_v32  ;;  %6042 = vmatprep.subr.bf16.mxu0 %v7933_v35  ;;  %v7989_v32 = vld [vmem:[#allocation12 + $0x558] ss:$28 sps:$4 sm:$0xff]   ;;  %v7986_v35 = vld [vmem:[#allocation12 + $0x1d0] ss:$28 sps:$4 sm:$0xff]  }
 0x4a0   :  { %5879 = vmatpush1.bf16.msra.mxu1 %v7928_v39  ;;  %6043 = vmatpush1.bf16.msra.mxu0 %v7931_v5  ;;  %v7993_v39 = vld [vmem:[#allocation12 + $0x20c] ss:$28 sps:$4 sm:$0xff]  }
 0x4a1   :  { %5880 = vmatprep.subr.bf16.mxu1 %v7936_v41  ;;  %6044 = vmatprep.subr.bf16.mxu0 %v7939_v42  ;;  %v7994_v5 = vld [vmem:[#allocation12 + $0x590] ss:$28 sps:$4 sm:$0xff]   ;;  %v7991_v41 = vld [vmem:[#allocation12 + $0x208] ss:$28 sps:$4 sm:$0xff]  }
 0x4a2   :  { %v7995_v42 = vld [vmem:[#allocation12 + $0x3d0] ss:$28 sps:$4 sm:$0xff]  }
 0x4a4   :  { %5881 = vmatpush1.bf16.msra.mxu1 %v7934_v44  ;;  %6045 = vmatpush1.bf16.msra.mxu0 %v7937_v45  ;;  %v7999_v44 = vld [vmem:[#allocation12 + $0x5c8] ss:$28 sps:$4 sm:$0xff]   ;;  %v7996_v45 = vld [vmem:[#allocation12 + $0x240] ss:$28 sps:$4 sm:$0xff]  }
 0x4a5   :  { %5882 = vmatprep.subr.bf16.mxu1 %v7942_v46  ;;  %6046 = vmatprep.subr.bf16.mxu0 %v7945_v47  ;;  %v8000_v46 = vld [vmem:[#allocation12 + $0x408] ss:$28 sps:$4 sm:$0xff]   ;;  %v8003_v47 = vld [vmem:[#allocation12 + $0x27c] ss:$28 sps:$4 sm:$0xff]  }
 0x4a8   :  { %5883 = vmatpush1.bf16.msra.mxu1 %v7940_v15  ;;  %6047 = vmatpush1.bf16.msra.mxu0 %v7943_v20  ;;  %v8001_v15 = vld [vmem:[#allocation12 + $0x278] ss:$28 sps:$4 sm:$0xff]   ;;  %v8005_v20 = vld [vmem:[#allocation12 + $0x440] ss:$28 sps:$4 sm:$0xff]  }
 0x4a9   :  { %6057 = vmatprep.subr.bf16.mxu1 %v7948_v52  ;;  %7241 = vmatprep.subr.bf16.mxu0 %v7949_v53  ;;  %v8008_v52 = vld [vmem:[#allocation12 + $0x2b4] ss:$28 sps:$4 sm:$0xff]  }
 0x4aa   :  { %v8009_v53 = vld [vmem:[#allocation12 + $0x638] ss:$28 sps:$4 sm:$0xff]  }
 0x4ab   :  { %5885 = vmatmul.mubr.bf16.vlgmr.msra.gmra.mrb[12].mxu1 %v8701_v57  ;;  %6049 = vmatmul.mubr.bf16.vlgmr.msra.gmra.mrb[16].mxu0 %v8701_v57 }
 0x4ac   :  { %6058 = vmatpush1.bf16.msra.mxu1 %v7946_v9  ;;  %6089 = vmatprep.mubr.bf16.mxu1 %v8653_v37  ;;  %v8010_v9 = vld [vmem:[#allocation12 + $0x478] ss:$28 sps:$4 sm:$0xff]  }
 0x4ad   :  { %7242 = vmatpush3.bf16.msra.mxu0 %v7950_v56  ;;  %6253 = vmatprep.mubr.bf16.mxu0 %v8653_v37  ;;  %v7969_v37 = vld [vmem:[#allocation12 + $0x2b8] ss:$28 sps:$4 sm:$0xff]   ;;  %v8013_v56 = vld [vmem:[#allocation12 + $0x2ec] ss:$28 sps:$4 sm:$0xff]  }
 0x4ae   :  { %6059 = vmatprep.subr.bf16.mxu1 %v7953_v58  ;;  %7243 = vmatprep.subr.bf16.mxu0 %v7954_v59  ;;  %v8014_v58 = vld [vmem:[#allocation12 + $0x670] ss:$28 sps:$4 sm:$0xff]   ;;  %v8011_v59 = vld [vmem:[#allocation12 + $0x2e8] ss:$28 sps:$4 sm:$0xff]  }
 0x4b0   :  { %6060 = vmatpush1.bf16.msra.mxu1 %v7951_v2  ;;  %v8015_v2 = vld [vmem:[#allocation12 + $0x4b0] ss:$28 sps:$4 sm:$0xff]  }
 0x4b1   :  { %7244 = vmatpush3.bf16.msra.mxu0 %v7955_v3  ;;  %6061 = vmatprep.subr.bf16.mxu1 %v7958_v1  ;;  %v8018_v3 = vld [vmem:[#allocation12 + $0x324] ss:$28 sps:$4 sm:$0xff]  }
 0x4b2   :  { %7245 = vmatprep.subr.bf16.mxu0 %v7959_v4  ;;  %v8019_v1 = vld [vmem:[#allocation12 + $0x6a8] ss:$28 sps:$4 sm:$0xff]   ;;  %v8016_v4 = vld [vmem:[#allocation12 + $0x320] ss:$28 sps:$4 sm:$0xff]  }
 0x4b4   :  { %6062 = vmatpush1.bf16.msra.mxu1 %v7956_v7  ;;  %v8020_v7 = vld [vmem:[#allocation12 + $0x4e8] ss:$28 sps:$4 sm:$0xff]  }
 0x4b5   :  { %7246 = vmatpush3.bf16.msra.mxu0 %v7960_v8  ;;  %6063 = vmatprep.subr.bf16.mxu1 %v7963_v10  ;;  %v8023_v8 = vld [vmem:[#allocation12 + $0x35c] ss:$28 sps:$4 sm:$0xff]  }
 0x4b6   :  { %7247 = vmatprep.subr.bf16.mxu0 %v7964_v11  ;;  %v8024_v10 = vld [vmem:[#allocation12 + $0x6e0] ss:$28 sps:$4 sm:$0xff]   ;;  %v8021_v11 = vld [vmem:[#allocation12 + $0x358] ss:$28 sps:$4 sm:$0xff]  }
 0x4b8   :  { %6064 = vmatpush1.bf16.msra.mxu1 %v7961_v12  ;;  %v8025_v12 = vld [vmem:[#allocation12 + $0x520] ss:$28 sps:$4 sm:$0xff]  }
 0x4b9   :  { %7248 = vmatpush3.bf16.msra.mxu0 %v7965_v25  ;;  %6065 = vmatprep.subr.bf16.mxu1 %v7968_v13  ;;  %v8028_v25 = vld [vmem:[#allocation12 + $0x394] ss:$28 sps:$4 sm:$0xff]  }
 0x4ba   :  { %7249 = vmatprep.subr.bf16.mxu0 %v7969_v37  ;;  %v8029_v13 = vld [vmem:[#allocation12 + $0x8d8] ss:$28 sps:$4 sm:$0xff]   ;;  %v8026_v37 = vld [vmem:[#allocation12 + $0x390] ss:$28 sps:$4 sm:$0xff]  }
 0x4bc   :  { %6066 = vmatpush1.bf16.msra.mxu1 %v7966_v14  ;;  %v8030_v14 = vld [vmem:[#allocation12 + $0x718] ss:$28 sps:$4 sm:$0xff]  }
 0x4bd   :  { %7250 = vmatpush3.bf16.msra.mxu0 %v7970_v16  ;;  %6067 = vmatprep.subr.bf16.mxu1 %v7973_v17  ;;  %v8033_v16 = vld [vmem:[#allocation12 + $0x3cc] ss:$28 sps:$4 sm:$0xff]  }
 0x4be   :  { %7251 = vmatprep.subr.bf16.mxu0 %v7974_v18  ;;  %v8034_v17 = vld [vmem:[#allocation12 + $0x910] ss:$28 sps:$4 sm:$0xff]   ;;  %v8031_v18 = vld [vmem:[#allocation12 + $0x3c8] ss:$28 sps:$4 sm:$0xff]  }
 0x4c0   :  { %6068 = vmatpush1.bf16.msra.mxu1 %v7971_v19  ;;  %v8035_v19 = vld [vmem:[#allocation12 + $0x750] ss:$28 sps:$4 sm:$0xff]  }
 0x4c1   :  { %7252 = vmatpush3.bf16.msra.mxu0 %v7975_v21  ;;  %6069 = vmatprep.subr.bf16.mxu1 %v7978_v22  ;;  %v8038_v21 = vld [vmem:[#allocation12 + $0x404] ss:$28 sps:$4 sm:$0xff]  }
 0x4c2   :  { %7253 = vmatprep.subr.bf16.mxu0 %v7979_v49  ;;  %v8039_v22 = vld [vmem:[#allocation12 + $0x948] ss:$28 sps:$4 sm:$0xff]   ;;  %v8036_v49 = vld [vmem:[#allocation12 + $0x400] ss:$28 sps:$4 sm:$0xff]  }
 0x4c4   :  { %6070 = vmatpush1.bf16.msra.mxu1 %v7976_v27  ;;  %v8043_v27 = vld [vmem:[#allocation12 + $0x43c] ss:$28 sps:$4 sm:$0xff]  }
 0x4c5   :  { %7254 = vmatpush3.bf16.msra.mxu0 %v7980_v23  ;;  %6071 = vmatprep.subr.bf16.mxu1 %v7983_v24  ;;  %v8044_v23 = vld [vmem:[#allocation12 + $0x980] ss:$28 sps:$4 sm:$0xff]   ;;  %v8041_v24 = vld [vmem:[#allocation12 + $0x438] ss:$28 sps:$4 sm:$0xff]  }
 0x4c6   :  { %7255 = vmatprep.subr.bf16.mxu0 %v7984_v26  ;;  %v8048_v26 = vld [vmem:[#allocation12 + $0x474] ss:$28 sps:$4 sm:$0xff]  }
 0x4c8   :  { %6072 = vmatpush1.bf16.msra.mxu1 %v7981_v28  ;;  %v8049_v28 = vld [vmem:[#allocation12 + $0x9b8] ss:$28 sps:$4 sm:$0xff]  }
 0x4c9   :  { %7256 = vmatpush3.bf16.msra.mxu0 %v7985_v62  ;;  %6073 = vmatprep.subr.bf16.mxu1 %v7988_v31  ;;  %v8046_v62 = vld [vmem:[#allocation12 + $0x470] ss:$28 sps:$4 sm:$0xff]   ;;  %v8050_v31 = vld [vmem:[#allocation12 + $0x7f8] ss:$28 sps:$4 sm:$0xff]  }
 0x4ca   :  { %7263 = vmatprep.subr.bf16.mxu0 %v7989_v32  ;;  %v8053_v32 = vld [vmem:[#allocation12 + $0x4ac] ss:$28 sps:$4 sm:$0xff]  }
 0x4cc   :  { %6254 = vmatmul.mubr.bf16.vlgmr.msra.gmra.mrb[20].mxu0 %v8657_v38  ;;  %6074 = vmatpush1.bf16.msra.mxu1 %v7986_v35  ;;  %v8054_v35 = vld [vmem:[#allocation12 + $0x9f0] ss:$28 sps:$4 sm:$0xff]  }
 0x4cd   :  { %7264 = vmatpush3.bf16.msra.mxu0 %v7990_v36  ;;  %6293 = vmatprep.mubr.bf16.mxu0 %v8661_v40  ;;  %v8051_v36 = vld [vmem:[#allocation12 + $0x4a8] ss:$28 sps:$4 sm:$0xff]  }
 0x4ce   :  { %6075 = vmatprep.subr.bf16.mxu1 %v7993_v39  ;;  %7265 = vmatprep.subr.bf16.mxu0 %v7994_v5  ;;  %v8055_v39 = vld [vmem:[#allocation12 + $0x830] ss:$28 sps:$4 sm:$0xff]   ;;  %v8058_v5 = vld [vmem:[#allocation12 + $0x4e4] ss:$28 sps:$4 sm:$0xff]  }
 0x4d0   :  { %6076 = vmatpush1.bf16.msra.mxu1 %v7991_v41  ;;  %v8059_v41 = vld [vmem:[#allocation12 + $0xa28] ss:$28 sps:$4 sm:$0xff]  }
 0x4d1   :  { %7266 = vmatpush3.bf16.msra.mxu0 %v7995_v42  ;;  %6077 = vmatprep.subr.bf16.mxu1 %v7998_v43  ;;  %v8056_v42 = vld [vmem:[#allocation12 + $0x4e0] ss:$28 sps:$4 sm:$0xff]   ;;  %v8060_v43 = vld [vmem:[#allocation12 + $0x868] ss:$28 sps:$4 sm:$0xff]  }
 0x4d2   :  { %7267 = vmatprep.subr.bf16.mxu0 %v7999_v44  ;;  %v8063_v44 = vld [vmem:[#allocation12 + $0x51c] ss:$28 sps:$4 sm:$0xff]  }
 0x4d4   :  { %6078 = vmatpush1.bf16.msra.mxu1 %v7996_v45  ;;  %v8064_v45 = vld [vmem:[#allocation12 + $0xa60] ss:$28 sps:$4 sm:$0xff]  }
 0x4d5   :  { %7268 = vmatpush3.bf16.msra.mxu0 %v8000_v46  ;;  %6079 = vmatprep.subr.bf16.mxu1 %v8003_v47  ;;  %v8061_v46 = vld [vmem:[#allocation12 + $0x518] ss:$28 sps:$4 sm:$0xff]   ;;  %v8065_v47 = vld [vmem:[#allocation12 + $0x8a0] ss:$28 sps:$4 sm:$0xff]  }
 0x4d6   :  { %7269 = vmatprep.subr.bf16.mxu0 %v8004_v48  ;;  %v8068_v48 = vld [vmem:[#allocation12 + $0x554] ss:$28 sps:$4 sm:$0xff]  }
 0x4d8   :  { %6080 = vmatpush1.bf16.msra.mxu1 %v8001_v15  ;;  %v8069_v15 = vld [vmem:[#allocation12 + $0xc58] ss:$28 sps:$4 sm:$0xff]  }
 0x4d9   :  { %7270 = vmatpush3.bf16.msra.mxu0 %v8005_v20  ;;  %6081 = vmatprep.subr.bf16.mxu1 %v8008_v52  ;;  %v8066_v20 = vld [vmem:[#allocation12 + $0x550] ss:$28 sps:$4 sm:$0xff]   ;;  %v8070_v52 = vld [vmem:[#allocation12 + $0xa98] ss:$28 sps:$4 sm:$0xff]  }
 0x4da   :  { %7271 = vmatprep.subr.bf16.mxu0 %v8009_v53  ;;  %v8073_v53 = vld [vmem:[#allocation12 + $0x58c] ss:$28 sps:$4 sm:$0xff]  }
 0x4dc   :  { %6082 = vmatpush1.bf16.msra.mxu1 %v8006_v54  ;;  %v8074_v54 = vld [vmem:[#allocation12 + $0xc90] ss:$28 sps:$4 sm:$0xff]  }
 0x4dd   :  { %7272 = vmatpush3.bf16.msra.mxu0 %v8010_v9  ;;  %6083 = vmatprep.subr.bf16.mxu1 %v8013_v56  ;;  %v8071_v9 = vld [vmem:[#allocation12 + $0x588] ss:$28 sps:$4 sm:$0xff]   ;;  %v8075_v56 = vld [vmem:[#allocation12 + $0xad0] ss:$28 sps:$4 sm:$0xff]  }
 0x4de   :  { %7273 = vmatprep.subr.bf16.mxu0 %v8014_v58  ;;  %v8078_v58 = vld [vmem:[#allocation12 + $0x5c4] ss:$28 sps:$4 sm:$0xff]  }
 0x4e0   :  { %6084 = vmatpush1.bf16.msra.mxu1 %v8011_v59  ;;  %v8079_v59 = vld [vmem:[#allocation12 + $0xcc8] ss:$28 sps:$4 sm:$0xff]  }
 0x4e1   :  { %7274 = vmatpush3.bf16.msra.mxu0 %v8015_v2  ;;  %6085 = vmatprep.subr.bf16.mxu1 %v8018_v3  ;;  %v8076_v2 = vld [vmem:[#allocation12 + $0x5c0] ss:$28 sps:$4 sm:$0xff]   ;;  %v8080_v3 = vld [vmem:[#allocation12 + $0xb08] ss:$28 sps:$4 sm:$0xff]  }
 0x4e2   :  { %7275 = vmatprep.subr.bf16.mxu0 %v8019_v1  ;;  %v8083_v1 = vld [vmem:[#allocation12 + $0x5fc] ss:$28 sps:$4 sm:$0xff]  }
 0x4e4   :  { %6086 = vmatpush1.bf16.msra.mxu1 %v8016_v4  ;;  %v8084_v4 = vld [vmem:[#allocation12 + $0xd00] ss:$28 sps:$4 sm:$0xff]  }
 0x4e5   :  { %7276 = vmatpush3.bf16.msra.mxu0 %v8020_v7  ;;  %6087 = vmatprep.subr.bf16.mxu1 %v8023_v8  ;;  %v8081_v7 = vld [vmem:[#allocation12 + $0x5f8] ss:$28 sps:$4 sm:$0xff]   ;;  %v8085_v8 = vld [vmem:[#allocation12 + $0xb40] ss:$28 sps:$4 sm:$0xff]  }
 0x4e6   :  { %7277 = vmatprep.subr.bf16.mxu0 %v8024_v10  ;;  %v8088_v10 = vld [vmem:[#allocation12 + $0x634] ss:$28 sps:$4 sm:$0xff]  }
 0x4e8   :  { %6088 = vmatpush1.bf16.msra.mxu1 %v8021_v11  ;;  %v8089_v11 = vld [vmem:[#allocation12 + $0xd38] ss:$28 sps:$4 sm:$0xff]  }
 0x4e9   :  { %7278 = vmatpush3.bf16.msra.mxu0 %v8025_v12  ;;  %6098 = vmatprep.subr.bf16.mxu1 %v8028_v25  ;;  %v8086_v12 = vld [vmem:[#allocation12 + $0x630] ss:$28 sps:$4 sm:$0xff]   ;;  %v8090_v25 = vld [vmem:[#allocation12 + $0xb78] ss:$28 sps:$4 sm:$0xff]  }
 0x4ea   :  { %7285 = vmatprep.subr.bf16.mxu0 %v8029_v13  ;;  %v8093_v13 = vld [vmem:[#allocation12 + $0x66c] ss:$28 sps:$4 sm:$0xff]  }
 0x4eb   :  { %6090 = vmatmul.mubr.bf16.vlgmr.msra.gmra.mrb[16].mxu1 %v8657_v38  ;;  %v8040_v38 = vld [vmem:[#allocation12 + $0x788] ss:$28 sps:$4 sm:$0xff]  }
 0x4ec   :  { %6294 = vmatmul.mubr.bf16.vlgmr.msra.gmra.mrb[24].mxu0 %v8668_v55  ;;  %6099 = vmatpush1.bf16.msra.mxu1 %v8026_v37  ;;  %v8094_v37 = vld [vmem:[#allocation12 + $0xd70] ss:$28 sps:$4 sm:$0xff]  }
 0x4ed   :  { %6130 = vmatprep.mubr.bf16.mxu1 %v8661_v40  ;;  %7286 = vmatpush3.bf16.msra.mxu0 %v8030_v14  ;;  %v8045_v40 = vld [vmem:[#allocation12 + $0x7c0] ss:$28 sps:$4 sm:$0xff]   ;;  %v8091_v14 = vld [vmem:[#allocation12 + $0x668] ss:$28 sps:$4 sm:$0xff]  }
 0x4ee   :  { %6333 = vmatprep.mubr.bf16.mxu0 %v8684_v33  ;;  %6100 = vmatprep.subr.bf16.mxu1 %v8033_v16  ;;  %v8095_v16 = vld [vmem:[#allocation12 + $0xbb0] ss:$28 sps:$4 sm:$0xff]  }
 0x4ef   :  { %7287 = vmatprep.subr.bf16.mxu0 %v8034_v17  ;;  %v8098_v17 = vld [vmem:[#allocation12 + $0x6a4] ss:$28 sps:$4 sm:$0xff]  }
 0x4f0   :  { %6101 = vmatpush1.bf16.msra.mxu1 %v8031_v18  ;;  %v8099_v18 = vld [vmem:[#allocation12 + $0xda8] ss:$28 sps:$4 sm:$0xff]  }
 0x4f1   :  { %7288 = vmatpush3.bf16.msra.mxu0 %v8035_v19  ;;  %6102 = vmatprep.subr.bf16.mxu1 %v8038_v21  ;;  %v8096_v19 = vld [vmem:[#allocation12 + $0x6a0] ss:$28 sps:$4 sm:$0xff]   ;;  %v8100_v21 = vld [vmem:[#allocation12 + $0xbe8] ss:$28 sps:$4 sm:$0xff]  }
 0x4f2   :  { %7289 = vmatprep.subr.bf16.mxu0 %v8039_v22  ;;  %v8103_v22 = vld [vmem:[#allocation12 + $0x6dc] ss:$28 sps:$4 sm:$0xff]  }
 0x4f4   :  { %6103 = vmatpush1.bf16.msra.mxu1 %v8036_v49  ;;  %v8104_v49 = vld [vmem:[#allocation12 + $0xde0] ss:$28 sps:$4 sm:$0xff]  }
 0x4f5   :  { %7290 = vmatpush3.bf16.msra.mxu0 %v8040_v38  ;;  %6104 = vmatprep.subr.bf16.mxu1 %v8043_v27  ;;  %v8101_v38 = vld [vmem:[#allocation12 + $0x6d8] ss:$28 sps:$4 sm:$0xff]   ;;  %v8105_v27 = vld [vmem:[#allocation12 + $0xc20] ss:$28 sps:$4 sm:$0xff]  }
 0x4f6   :  { %7291 = vmatprep.subr.bf16.mxu0 %v8044_v23  ;;  %v8108_v23 = vld [vmem:[#allocation12 + $0x714] ss:$28 sps:$4 sm:$0xff]  }
 0x4f8   :  { %6105 = vmatpush1.bf16.msra.mxu1 %v8041_v24  ;;  %v8106_v24 = vld [vmem:[#allocation12 + $0x710] ss:$28 sps:$4 sm:$0xff]  }
 0x4f9   :  { %7292 = vmatpush3.bf16.msra.mxu0 %v8045_v40  ;;  %6106 = vmatprep.subr.bf16.mxu1 %v8048_v26  ;;  %v8111_v40 = vld [vmem:[#allocation12 + $0x74c] ss:$28 sps:$4 sm:$0xff]  }
 0x4fa   :  { %7293 = vmatprep.subr.bf16.mxu0 %v8049_v28  ;;  %v8109_v26 = vld [vmem:[#allocation12 + $0x748] ss:$28 sps:$4 sm:$0xff]  }
 0x4fb   :  { %v8114_v28 = vld [vmem:[#allocation12 + $0x784] ss:$28 sps:$4 sm:$0xff]  }
 0x4fc   :  { %6107 = vmatpush1.bf16.msra.mxu1 %v8046_v62  ;;  %v8112_v62 = vld [vmem:[#allocation12 + $0x780] ss:$28 sps:$4 sm:$0xff]  }
 0x4fd   :  { %7294 = vmatpush3.bf16.msra.mxu0 %v8050_v31  ;;  %6108 = vmatprep.subr.bf16.mxu1 %v8053_v32  ;;  %v8117_v31 = vld [vmem:[#allocation12 + $0x7bc] ss:$28 sps:$4 sm:$0xff]  }
 0x4fe   :  { %7295 = vmatprep.subr.bf16.mxu0 %v8054_v35  ;;  %v8115_v32 = vld [vmem:[#allocation12 + $0x7b8] ss:$28 sps:$4 sm:$0xff]  }
 0x4ff   :  { %v8120_v35 = vld [vmem:[#allocation12 + $0x7f4] ss:$28 sps:$4 sm:$0xff]  }
 0x500   :  { %6109 = vmatpush1.bf16.msra.mxu1 %v8051_v36  ;;  %v8118_v36 = vld [vmem:[#allocation12 + $0x7f0] ss:$28 sps:$4 sm:$0xff]  }
 0x501   :  { %7296 = vmatpush3.bf16.msra.mxu0 %v8055_v39  ;;  %6110 = vmatprep.subr.bf16.mxu1 %v8058_v5  ;;  %v8121_v39 = vld [vmem:[#allocation12 + $0x828] ss:$28 sps:$4 sm:$0xff]  }
 0x502   :  { %7297 = vmatprep.subr.bf16.mxu0 %v8059_v41  ;;  %v8126_v5 = vld [vmem:[#allocation12 + $0x864] ss:$28 sps:$4 sm:$0xff]   ;;  %v8129_v41 = vld [vmem:[#allocation12 + $0x89c] ss:$28 sps:$4 sm:$0xff]  }
 0x504   :  { %6111 = vmatpush1.bf16.msra.mxu1 %v8056_v42  ;;  %v8127_v42 = vld [vmem:[#allocation12 + $0x898] ss:$28 sps:$4 sm:$0xff]  }
 0x505   :  { %7298 = vmatpush3.bf16.msra.mxu0 %v8060_v43  ;;  %6112 = vmatprep.subr.bf16.mxu1 %v8063_v44  ;;  %v8132_v43 = vld [vmem:[#allocation12 + $0x8d4] ss:$28 sps:$4 sm:$0xff]  }
 0x506   :  { %7299 = vmatprep.subr.bf16.mxu0 %v8064_v45  ;;  %v8130_v44 = vld [vmem:[#allocation12 + $0x8d0] ss:$28 sps:$4 sm:$0xff]  }
 0x507   :  { %v8135_v45 = vld [vmem:[#allocation12 + $0x90c] ss:$28 sps:$4 sm:$0xff]  }
 0x508   :  { %6113 = vmatpush1.bf16.msra.mxu1 %v8061_v46  ;;  %v8133_v46 = vld [vmem:[#allocation12 + $0x908] ss:$28 sps:$4 sm:$0xff]  }
 0x509   :  { %7300 = vmatpush3.bf16.msra.mxu0 %v8065_v47  ;;  %6114 = vmatprep.subr.bf16.mxu1 %v8068_v48  ;;  %v8138_v47 = vld [vmem:[#allocation12 + $0x944] ss:$28 sps:$4 sm:$0xff]  }
 0x50a   :  { %7307 = vmatprep.subr.bf16.mxu0 %v8069_v15  ;;  %v8136_v48 = vld [vmem:[#allocation12 + $0x940] ss:$28 sps:$4 sm:$0xff]  }
 0x50b   :  { %v8141_v15 = vld [vmem:[#allocation12 + $0x97c] ss:$28 sps:$4 sm:$0xff]  }
 0x50c   :  { %6334 = vmatmul.mubr.bf16.vlgmr.msra.gmra.mrb[28].mxu0 %v8688_v30  ;;  %6115 = vmatpush1.bf16.msra.mxu1 %v8066_v20  ;;  %v8139_v20 = vld [vmem:[#allocation12 + $0x978] ss:$28 sps:$4 sm:$0xff]  }
 0x50d   :  { %7308 = vmatpush3.bf16.msra.mxu0 %v8070_v52  ;;  %6373 = vmatprep.mubr.bf16.mxu0 %v8692_v34  ;;  %v8144_v52 = vld [vmem:[#allocation12 + $0x9b4] ss:$28 sps:$4 sm:$0xff]  }
 0x50e   :  { %6116 = vmatprep.subr.bf16.mxu1 %v8073_v53  ;;  %7309 = vmatprep.subr.bf16.mxu0 %v8074_v54  ;;  %v8142_v53 = vld [vmem:[#allocation12 + $0x9b0] ss:$28 sps:$4 sm:$0xff]  }
 0x50f   :  { %v8147_v54 = vld [vmem:[#allocation12 + $0x9ec] ss:$28 sps:$4 sm:$0xff]  }
 0x510   :  { %6117 = vmatpush1.bf16.msra.mxu1 %v8071_v9  ;;  %v8145_v9 = vld [vmem:[#allocation12 + $0x9e8] ss:$28 sps:$4 sm:$0xff]  }
 0x511   :  { %7310 = vmatpush3.bf16.msra.mxu0 %v8075_v56  ;;  %6118 = vmatprep.subr.bf16.mxu1 %v8078_v58  ;;  %v8150_v56 = vld [vmem:[#allocation12 + $0xa24] ss:$28 sps:$4 sm:$0xff]  }
 0x512   :  { %7311 = vmatprep.subr.bf16.mxu0 %v8079_v59  ;;  %v8148_v58 = vld [vmem:[#allocation12 + $0xa20] ss:$28 sps:$4 sm:$0xff]  }
 0x513   :  { %v8153_v59 = vld [vmem:[#allocation12 + $0xa5c] ss:$28 sps:$4 sm:$0xff]  }
 0x514   :  { %6119 = vmatpush1.bf16.msra.mxu1 %v8076_v2  ;;  %v8151_v2 = vld [vmem:[#allocation12 + $0xa58] ss:$28 sps:$4 sm:$0xff]  }
 0x515   :  { %7312 = vmatpush3.bf16.msra.mxu0 %v8080_v3  ;;  %6120 = vmatprep.subr.bf16.mxu1 %v8083_v1  ;;  %v8156_v3 = vld [vmem:[#allocation12 + $0xa94] ss:$28 sps:$4 sm:$0xff]  }
 0x516   :  { %7313 = vmatprep.subr.bf16.mxu0 %v8084_v4  ;;  %v8154_v1 = vld [vmem:[#allocation12 + $0xa90] ss:$28 sps:$4 sm:$0xff]  }
 0x517   :  { %v8159_v4 = vld [vmem:[#allocation12 + $0xacc] ss:$28 sps:$4 sm:$0xff]  }
 0x518   :  { %6121 = vmatpush1.bf16.msra.mxu1 %v8081_v7  ;;  %v8157_v7 = vld [vmem:[#allocation12 + $0xac8] ss:$28 sps:$4 sm:$0xff]  }
 0x519   :  { %7314 = vmatpush3.bf16.msra.mxu0 %v8085_v8  ;;  %6122 = vmatprep.subr.bf16.mxu1 %v8088_v10  ;;  %v8162_v8 = vld [vmem:[#allocation12 + $0xb04] ss:$28 sps:$4 sm:$0xff]  }
 0x51a   :  { %7315 = vmatprep.subr.bf16.mxu0 %v8089_v11  ;;  %v8160_v10 = vld [vmem:[#allocation12 + $0xb00] ss:$28 sps:$4 sm:$0xff]  }
 0x51b   :  { %v8165_v11 = vld [vmem:[#allocation12 + $0xb3c] ss:$28 sps:$4 sm:$0xff]  }
 0x51c   :  { %6123 = vmatpush1.bf16.msra.mxu1 %v8086_v12  ;;  %v8163_v12 = vld [vmem:[#allocation12 + $0xb38] ss:$28 sps:$4 sm:$0xff]  }
 0x51d   :  { %7316 = vmatpush3.bf16.msra.mxu0 %v8090_v25  ;;  %6124 = vmatprep.subr.bf16.mxu1 %v8093_v13  ;;  %v8168_v25 = vld [vmem:[#allocation12 + $0xb74] ss:$28 sps:$4 sm:$0xff]  }
 0x51e   :  { %7317 = vmatprep.subr.bf16.mxu0 %v8094_v37  ;;  %v8166_v13 = vld [vmem:[#allocation12 + $0xb70] ss:$28 sps:$4 sm:$0xff]   ;;  %v8720_v37 = vld [vmem:[#allocation13] sm:$0xff] }
 0x520   :  { %6125 = vmatpush1.bf16.msra.mxu1 %v8091_v14  ;;  %v3401_v14 = vrot.slane %v8720_v37, %v8626_v6 }
 0x521   :  { %7318 = vmatpush3.bf16.msra.mxu0 %v8095_v16  ;;  %6126 = vmatprep.subr.bf16.mxu1 %v8098_v17  ;;  %v3397_v16 = vrot.slane %v8720_v37, %v8600_v63  ;;  %v3405_v17 = vrot.slane %v8720_v37, %v8603_v0  ;;  %v8177_v0 = vld [vmem:[#allocation12 + $0xc1c] ss:$28 sps:$4 sm:$0xff]  }
 0x522   :  { %7319 = vmatprep.subr.bf16.mxu0 %v8099_v18  ;;  %v8169_v18 = vld [vmem:[#allocation12 + $0xba8] ss:$28 sps:$4 sm:$0xff]  }
 0x524   :  { %6127 = vmatpush1.bf16.msra.mxu1 %v8096_v19  ;;  %v8174_v19 = vld [vmem:[#allocation12 + $0xbe4] ss:$28 sps:$4 sm:$0xff]  }
 0x525   :  { %7320 = vmatpush3.bf16.msra.mxu0 %v8100_v21  ;;  %6128 = vmatprep.subr.bf16.mxu1 %v8103_v22 }
 0x526   :  { %7321 = vmatprep.subr.bf16.mxu0 %v8104_v49 }
 0x528   :  { %6129 = vmatpush1.bf16.msra.mxu1 %v8101_v38 }
 0x529   :  { %7322 = vmatpush3.bf16.msra.mxu0 %v8105_v27  ;;  %6139 = vmatprep.subr.bf16.mxu1 %v8108_v23 }
 0x52b   :  { %6131 = vmatmul.mubr.bf16.vlgmr.msra.gmra.mrb[16].mxu1 %v8668_v55  ;;  %v8123_v55 = vld [vmem:[#allocation12 + $0x82c] ss:$28 sps:$4 sm:$0xff]  }
 0x52c   :  { %6374 = vmatmul.mubr.bf16.vlgmr.msra.gmra.mrb[32].mxu0 %v8701_v57  ;;  %6140 = vmatpush1.bf16.msra.mxu1 %v8106_v24 }
 0x52d   :  { %6171 = vmatprep.mubr.bf16.mxu1 %v8684_v33  ;;  %6141 = vmatprep.subr.bf16.mxu1 %v8111_v40  ;;  %v8124_v33 = vld [vmem:[#allocation12 + $0x860] ss:$28 sps:$4 sm:$0xff]  }
 0x530   :  { %6142 = vmatpush1.bf16.msra.mxu1 %v8109_v26  ;;  %v8172_v26 = vld [vmem:[#allocation12 + $0xbe0] ss:$28 sps:$4 sm:$0xff]  }
 0x531   :  { %6143 = vmatprep.subr.bf16.mxu1 %v8114_v28 }
 0x534   :  { %6144 = vmatpush1.bf16.msra.mxu1 %v8112_v62  ;;  %v8175_v62 = vld [vmem:[#allocation12 + $0xc18] ss:$28 sps:$4 sm:$0xff]  }
 0x535   :  { %6145 = vmatprep.subr.bf16.mxu1 %v8117_v31  ;;  %v8180_v31 = vld [vmem:[#allocation12 + $0xc54] ss:$28 sps:$4 sm:$0xff]  }
 0x538   :  { %6146 = vmatpush1.bf16.msra.mxu1 %v8115_v32  ;;  %v8178_v32 = vld [vmem:[#allocation12 + $0xc50] ss:$28 sps:$4 sm:$0xff]  }
 0x539   :  { %6147 = vmatprep.subr.bf16.mxu1 %v8120_v35  ;;  %v8183_v35 = vld [vmem:[#allocation12 + $0xc8c] ss:$28 sps:$4 sm:$0xff]  }
 0x53c   :  { %6148 = vmatpush1.bf16.msra.mxu1 %v8118_v36 }
 0x53d   :  { %6149 = vmatprep.subr.bf16.mxu1 %v8123_v55 }
 0x540   :  { %6150 = vmatpush1.bf16.msra.mxu1 %v8121_v39  ;;  %v8181_v39 = vld [vmem:[#allocation12 + $0xc88] ss:$28 sps:$4 sm:$0xff]  }
 0x541   :  { %6151 = vmatprep.subr.bf16.mxu1 %v8126_v5 }
 0x544   :  { %6152 = vmatpush1.bf16.msra.mxu1 %v8124_v33  ;;  %v8186_v33 = vld [vmem:[#allocation12 + $0xcc4] ss:$28 sps:$4 sm:$0xff]  }
 0x545   :  { %6153 = vmatprep.subr.bf16.mxu1 %v8129_v41 }
 0x548   :  { %6154 = vmatpush1.bf16.msra.mxu1 %v8127_v42 }
 0x549   :  { %6155 = vmatprep.subr.bf16.mxu1 %v8132_v43 }
 0x54c   :  { %6156 = vmatpush1.bf16.msra.mxu1 %v8130_v44  ;;  %v8184_v44 = vld [vmem:[#allocation12 + $0xcc0] ss:$28 sps:$4 sm:$0xff]  }
 0x54d   :  { %6157 = vmatprep.subr.bf16.mxu1 %v8135_v45  ;;  %v8189_v45 = vld [vmem:[#allocation12 + $0xcfc] ss:$28 sps:$4 sm:$0xff]  }
 0x550   :  { %6158 = vmatpush1.bf16.msra.mxu1 %v8133_v46  ;;  %v8187_v46 = vld [vmem:[#allocation12 + $0xcf8] ss:$28 sps:$4 sm:$0xff]  }
 0x551   :  { %6159 = vmatprep.subr.bf16.mxu1 %v8138_v47  ;;  %v8192_v47 = vld [vmem:[#allocation12 + $0xd34] ss:$28 sps:$4 sm:$0xff]  }
 0x554   :  { %6160 = vmatpush1.bf16.msra.mxu1 %v8136_v48  ;;  %v8190_v48 = vld [vmem:[#allocation12 + $0xd30] ss:$28 sps:$4 sm:$0xff]  }
 0x555   :  { %6161 = vmatprep.subr.bf16.mxu1 %v8141_v15  ;;  %v8195_v15 = vld [vmem:[#allocation12 + $0xd6c] ss:$28 sps:$4 sm:$0xff]  }
 0x558   :  { %6162 = vmatpush1.bf16.msra.mxu1 %v8139_v20  ;;  %v8193_v20 = vld [vmem:[#allocation12 + $0xd68] ss:$28 sps:$4 sm:$0xff]  }
 0x559   :  { %6163 = vmatprep.subr.bf16.mxu1 %v8144_v52  ;;  %v8198_v52 = vld [vmem:[#allocation12 + $0xda4] ss:$28 sps:$4 sm:$0xff]  }
 0x55c   :  { %6164 = vmatpush1.bf16.msra.mxu1 %v8142_v53 }
 0x55d   :  { %6165 = vmatprep.subr.bf16.mxu1 %v8147_v54 }
 0x560   :  { %6166 = vmatpush1.bf16.msra.mxu1 %v8145_v9  ;;  %v8196_v9 = vld [vmem:[#allocation12 + $0xda0] ss:$28 sps:$4 sm:$0xff]  }
 0x561   :  { %6167 = vmatprep.subr.bf16.mxu1 %v8150_v56 }
 0x564   :  { %6168 = vmatpush1.bf16.msra.mxu1 %v8148_v58 }
 0x565   :  { %6169 = vmatprep.subr.bf16.mxu1 %v8153_v59  ;;  %v8201_v59 = vld [vmem:[#allocation12 + $0xddc] ss:$28 sps:$4 sm:$0xff]  }
 0x568   :  { %6170 = vmatpush1.bf16.msra.mxu1 %v8151_v2 }
 0x569   :  { %6180 = vmatprep.subr.bf16.mxu1 %v8156_v3  ;;  %v8199_v3 = vld [vmem:[#allocation12 + $0xdd8] ss:$28 sps:$4 sm:$0xff]  }
 0x56b   :  { %6172 = vmatmul.mubr.bf16.vlgmr.msra.gmra.mrb[16].mxu1 %v8688_v30  ;;  %v8171_v30 = vld [vmem:[#allocation12 + $0xbac] ss:$28 sps:$4 sm:$0xff]  }
 0x56c   :  { %6181 = vmatpush1.bf16.msra.mxu1 %v8154_v1  ;;  %6212 = vmatprep.mubr.bf16.mxu1 %v8692_v34  ;;  %v3393_v34 = vrot.slane %v8720_v37, %v8595_v61  ;;  %v3417_v1 = vrot.slane %v8720_v37, %v1222_v29 }
 0x56d   :  { %6182 = vmatprep.subr.bf16.mxu1 %v8159_v4 }
 0x570   :  { %6183 = vmatpush1.bf16.msra.mxu1 %v8157_v7 }
 0x571   :  { %6184 = vmatprep.subr.bf16.mxu1 %v8162_v8 }
 0x574   :  { %6185 = vmatpush1.bf16.msra.mxu1 %v8160_v10 }
 0x575   :  { %6186 = vmatprep.subr.bf16.mxu1 %v8165_v11 }
 0x578   :  { %6187 = vmatpush1.bf16.msra.mxu1 %v8163_v12 }
 0x579   :  { %6188 = vmatprep.subr.bf16.mxu1 %v8168_v25 }
 0x57c   :  { %6189 = vmatpush1.bf16.msra.mxu1 %v8166_v13 }
 0x57d   :  { %6190 = vmatprep.subr.bf16.mxu1 %v8171_v30 }
 0x57e   :  { %v5886_v21 = vpop.f32.mrb[12].mxu1  ;;  %v6050_v22 = vpop.f32.mrb[16].mxu0 }
 0x57f   :  { %v7337_v49 = vadd.f32 %v5886_v21, %v3393_v34  ;;  %v7339_v38 = vadd.f32 %v6050_v22, %v3401_v14  ;;  %v5888_v27 = vpop.f32.mrb[13].mxu1  ;;  %v6052_v23 = vpop.f32.mrb[17].mxu0 }
 0x580   :  { %v7338_v61 = vadd.f32 %v5888_v27, %v3397_v16  ;;  %v7340_v24 = vadd.f32 %v6052_v23, %v3405_v17  ;;  %v5890_v40 = vpop.f32.mrb[14].mxu1  ;;  %v6054_v6 = vpop.f32.mrb[18].mxu0  ;;  %6191 = vmatpush1.bf16.msra.mxu1 %v8169_v18  ;;  %v3409_v27 = vrot.slane %v8720_v37, %v1214_v50  ;;  %v3413_v23 = vrot.slane %v8720_v37, %v1218_v51 }
 0x581   :  { %8202 = vtanh.f32 %v7337_v49  ;;  %v5891_v63 = vpop.f32.mrb[15].mxu1  ;;  %v6055_v28 = vpop.f32.mrb[19].mxu0  ;;  %6192 = vmatprep.subr.bf16.mxu1 %v8174_v19 }
 0x582   :  { %8204 = vtanh.f32 %v7339_v38 }
 0x583   :  { %8206 = vtanh.f32 %v7338_v61 }
 0x584   :  { %8208 = vtanh.f32 %v7340_v24  ;;  %6193 = vmatpush1.bf16.msra.mxu1 %v8172_v26 }
 0x585   :  { %6194 = vmatprep.subr.bf16.mxu1 %v8177_v0 }
 0x588   :  { %6195 = vmatpush1.bf16.msra.mxu1 %v8175_v62 }
 0x589   :  { %6196 = vmatprep.subr.bf16.mxu1 %v8180_v31 }
 0x58b   :  { %v8203_v36 = vpop.eup %8202 }
 0x58c   :  { %v8205_v55 = vpop.eup %8204  ;;  %6197 = vmatpush1.bf16.msra.mxu1 %v8178_v32 }
 0x58d   :  { %v8207_v5 = vpop.eup %8206  ;;  %6198 = vmatprep.subr.bf16.mxu1 %v8183_v35 }
 0x58e   :  { %v8209_v41 = vpop.eup %8208  ;;  %v7237_v42 = vpack.c.bf16 %v8207_v5, %v8203_v36 }
 0x58f   :  { %v7238_v43 = vpack.c.bf16 %v8209_v41, %v8205_v55 }
 0x590   :  { %6417 = vst [vmem:[%s8762_s10] sm:$0xff] %v7237_v42  ;;  %6199 = vmatpush1.bf16.msra.mxu1 %v8181_v39 }
 0x591   :  { %6418 = vst [vmem:[%s8762_s10 + $0x8] sm:$0xff] %v7238_v43  ;;  %6200 = vmatprep.subr.bf16.mxu1 %v8186_v33 }
 0x594   :  { %6201 = vmatpush1.bf16.msra.mxu1 %v8184_v44 }
 0x595   :  { %6202 = vmatprep.subr.bf16.mxu1 %v8189_v45 }
 0x598   :  { %6203 = vmatpush1.bf16.msra.mxu1 %v8187_v46 }
 0x599   :  { %6204 = vmatprep.subr.bf16.mxu1 %v8192_v47 }
 0x59c   :  { %6205 = vmatpush1.bf16.msra.mxu1 %v8190_v48 }
 0x59d   :  { %6206 = vmatprep.subr.bf16.mxu1 %v8195_v15 }
 0x59f   :  { %v7257_v53 = vpop.f32.mrb[20].mxu0 }
 0x5a0   :  { %v7258_v54 = vpop.f32.mrb[21].mxu0  ;;  %6207 = vmatpush1.bf16.msra.mxu1 %v8193_v20 }
 0x5a1   :  { %v7259_v56 = vadd.f32 %v7258_v54, %v7257_v53  ;;  %v7260_v58 = vpop.f32.mrb[22].mxu0  ;;  %6208 = vmatprep.subr.bf16.mxu1 %v8198_v52 }
 0x5a2   :  { %v7261_v2 = vpop.f32.mrb[23].mxu0 }
 0x5a3   :  { %v6256_v8 = vadd.f32 %v7259_v56, %v3417_v1 }
 0x5a4   :  { %6209 = vmatpush1.bf16.msra.mxu1 %v8196_v9 }
 0x5a5   :  { %6210 = vmatprep.subr.bf16.mxu1 %v8201_v59 }
 0x5a8   :  { %6211 = vmatpush1.bf16.msra.mxu1 %v8199_v3 }
 0x5ab   :  { %6213 = vmatmul.mubr.bf16.vlgmr.msra.gmra.mrb[16].mxu1 %v8701_v57 }
 0x5bf   :  { %v7279_v4 = vpop.f32.mrb[24].mxu0 }
 0x5c0   :  { %v7280_v7 = vpop.f32.mrb[25].mxu0 }
 0x5c1   :  { %v7281_v10 = vadd.f32 %v7280_v7, %v7279_v4  ;;  %v7282_v11 = vpop.f32.mrb[26].mxu0 }
 0x5c2   :  { %v7283_v12 = vpop.f32.mrb[27].mxu0 }
 0x5c3   :  { %v6296_v25 = vadd.f32 %v7281_v10, %v6256_v8 }
 0x5df   :  { %v7301_v13 = vpop.f32.mrb[28].mxu0 }
 0x5e0   :  { %v7302_v30 = vpop.f32.mrb[29].mxu0 }
 0x5e1   :  { %v7303_v34 = vadd.f32 %v7302_v30, %v7301_v13  ;;  %v7304_v14 = vpop.f32.mrb[30].mxu0 }
 0x5e2   :  { %v7305_v16 = vpop.f32.mrb[31].mxu0 }
 0x5e3   :  { %v6336_v17 = vadd.f32 %v7303_v34, %v6296_v25 }
 0x5ff   :  { %v7323_v18 = vpop.f32.mrb[32].mxu0 }
 0x600   :  { %v7324_v19 = vpop.f32.mrb[33].mxu0 }
 0x601   :  { %v7325_v57 = vadd.f32 %v7324_v19, %v7323_v18  ;;  %v7326_v21 = vpop.f32.mrb[34].mxu0 }
 0x602   :  { %v7327_v22 = vpop.f32.mrb[35].mxu0 }
 0x603   :  { %v6376_v49 = vadd.f32 %v7325_v57, %v6336_v17 }
 0x605   :  { %8210 = vtanh.f32 %v6376_v49 }
 0x60f   :  { %v8211_v29 = vpop.eup %8210 }
 0x610   :  { %v7240_v38 = vpack.c.bf16 %v8211_v29, %v8211_v29 }
 0x612   :  { %6420 = vst [vmem:[%s8762_s10 + $0x18] sm:$0xf] %v7240_v38 }
 0x67e   :  { %v6214_v61 = vpop.f32.mrb[16].mxu1 }
 0x67f   :  { %v7341_v24 = vadd.f32 %v6214_v61, %v3409_v27  ;;  %v6216_v40 = vpop.f32.mrb[17].mxu1 }
 0x680   :  { %v7342_v6 = vadd.f32 %v6216_v40, %v3413_v23  ;;  %v6218_v26 = vpop.f32.mrb[18].mxu1 }
 0x681   :  { %8212 = vtanh.f32 %v7341_v24  ;;  %v6219_v63 = vpop.f32.mrb[19].mxu1 }
 0x682   :  { %8214 = vtanh.f32 %v7342_v6 }
 0x68b   :  { %v8213_v28 = vpop.eup %8212 }
 0x68c   :  { %v8215_v0 = vpop.eup %8214 }
 0x68d   :  { %v7239_v62 = vpack.c.bf16 %v8215_v0, %v8213_v28 }
 0x68f   :  { %6419 = vst [vmem:[%s8762_s10 + $0x10] sm:$0xff] %v7239_v62 }
 0x690   :  { %6425 = vsyncpa [#allocation3], 1 }
 0x691   :  { %6426 = vsyncpa [#allocation5], 1 }
 0x692   :  { %6427 = vsyncpa [#allocation8], 1 }
 0x693   :  { %6428 = vsyncpa [#allocation11], 1 }
 0x694   :  { %6429 = vsyncpa [#allocation14], 1 }

</bundles_post_ra>
